<compile_context>
chip_gen: v7x
topology: tpu7x:2x2x1
jax: 0.10.0
libtpu: 0.0.40
codegen_flags: <defaults>
</compile_context>

<pallas_src>
import math

import jax
import jax.numpy as jnp
from jax import lax
from jax.experimental import pallas as pl
from jax.experimental.pallas import tpu as pltpu

RATES = (6, 12, 18)
PAD = max(RATES)
BN_EPS = 1e-5


def _aspp_kernel(x_ref, w1_ref, w2_ref, w3_ref, b_ref, wo_ref, bo_ref,
                 out_ref, xpad_ref):
    """One grid step processes one image.

    x_ref   : (1, H, W, C_in)     unpadded NHWC image block
    w*_ref  : (9*C_in, C_out)     dilated 3x3 conv weights in im2col layout
    b_ref   : (3, C_out)          per-branch conv bias
    wo_ref  : (3*C_out, C_out)    1x1 output conv weights (BN folded in)
    bo_ref  : (1, C_out)          1x1 output conv bias    (BN folded in)
    out_ref : (1, H*W, C_out)
    xpad_ref: (H+2P, W+2P, C_in)  VMEM scratch: zero-padded image
    """
    _, H, W, C_in = x_ref.shape
    C_out = out_ref.shape[-1]
    P = PAD

    # Build the zero halo in VMEM (re-zeroed every step so correctness does not
    # depend on how the "parallel" grid axis is split across TensorCores).
    xpad_ref[...] = jnp.zeros_like(xpad_ref)
    xpad_ref[P:P + H, P:P + W, :] = x_ref[0]

    def branch(w_ref, rate, idx):
        # im2col: 9 shifted windows stacked along channels -> one K=9*C_in matmul.
        taps = []
        for i in range(3):
            for j in range(3):
                oh = P + (i - 1) * rate
                ow = P + (j - 1) * rate
                taps.append(xpad_ref[oh:oh + H, ow:ow + W, :])
        patch = jnp.concatenate(taps, axis=-1).reshape(H * W, 9 * C_in)
        y = jnp.dot(patch, w_ref[...], preferred_element_type=jnp.float32)
        y = y + b_ref[idx][None, :]          # conv bias
        return jnp.maximum(y, 0.0)           # ReLU (BN affine folded into wo/bo)

    # Final 1x1 conv as accumulated partial matmuls (no concatenate, branch
    # outputs are folded in immediately and never simultaneously live).
    out = jnp.broadcast_to(bo_ref[...], (H * W, C_out)).astype(jnp.float32)
    for idx, (w_ref, rate) in enumerate(zip((w1_ref, w2_ref, w3_ref), RATES)):
        y = branch(w_ref, rate, idx)
        out = out + jnp.dot(y, wo_ref[idx * C_out:(idx + 1) * C_out, :],
                            preferred_element_type=jnp.float32)
    out_ref[0] = out


def aspp_forward(x_nchw, params):
    """x_nchw: (N, C_in, H, W) float32 -> (N, C_out, H, W) float32."""
    N, C_in, H, W = x_nchw.shape
    C_out = params["b"].shape[-1]
    P = PAD

    x_nhwc = jnp.transpose(x_nchw, (0, 2, 3, 1))     # channels-last (lane = C)

    # Fold eval-mode BatchNorm (post-ReLU affine s,t) into the 1x1 output conv:
    #   (y * s + t) @ Wo_b  ==  y @ (s[:, None] * Wo_b)  +  t @ Wo_b
    wo3 = params["wo"].reshape(3, C_out, C_out)
    wo_folded = (params["bn_scale"][:, :, None] * wo3).reshape(3 * C_out, C_out)
    bo_folded = params["bo"] + jnp.einsum(
        "bc,bcd->d", params["bn_shift"], wo3)[None, :]

    # (3, 3, C_in, C_out) -> (9*C_in, C_out); row order (i, j, c_in) matches the
    # kernel's im2col tap order.
    w1 = params["w1"].reshape(9 * C_in, C_out)
    w2 = params["w2"].reshape(9 * C_in, C_out)
    w3 = params["w3"].reshape(9 * C_in, C_out)

    grid_spec = pltpu.PrefetchScalarGridSpec(
        num_scalar_prefetch=0,
        grid=(N,),
        in_specs=[
            pl.BlockSpec((1, H, W, C_in), lambda n: (n, 0, 0, 0)),
            pl.BlockSpec((9 * C_in, C_out), lambda n: (0, 0)),
            pl.BlockSpec((9 * C_in, C_out), lambda n: (0, 0)),
            pl.BlockSpec((9 * C_in, C_out), lambda n: (0, 0)),
            pl.BlockSpec((3, C_out), lambda n: (0, 0)),
            pl.BlockSpec((3 * C_out, C_out), lambda n: (0, 0)),
            pl.BlockSpec((1, C_out), lambda n: (0, 0)),
        ],
        out_specs=pl.BlockSpec((1, H * W, C_out), lambda n: (n, 0, 0)),
        scratch_shapes=[pltpu.VMEM((H + 2 * P, W + 2 * P, C_in), jnp.float32)],
    )

    out_flat = pl.pallas_call(
        _aspp_kernel,
        out_shape=jax.ShapeDtypeStruct((N, H * W, C_out), jnp.float32),
        grid_spec=grid_spec,
        compiler_params=pltpu.CompilerParams(
            dimension_semantics=("parallel",),
            vmem_limit_bytes=32 * 1024 * 1024),
    )(x_nhwc, w1, w2, w3, params["b"], wo_folded, bo_folded)

    out_nhwc = out_flat.reshape(N, H, W, C_out)
    return jnp.transpose(out_nhwc, (0, 3, 1, 2))


def init_params(key, in_dims, out_dims):
    """Deterministic synthetic init mirroring ASPP._init_weights shapes."""
    ks = jax.random.split(key, 6)
    fan3 = in_dims * 3 * 3
    std3 = math.sqrt(2.0 / fan3)                 # kaiming_normal_ (fan_in, relu)
    w1 = std3 * jax.random.normal(ks[0], (3, 3, in_dims, out_dims), jnp.float32)
    w2 = std3 * jax.random.normal(ks[1], (3, 3, in_dims, out_dims), jnp.float32)
    w3 = std3 * jax.random.normal(ks[2], (3, 3, in_dims, out_dims), jnp.float32)
    bb = 1.0 / math.sqrt(fan3)                   # torch default conv-bias init
    b = jax.random.uniform(ks[3], (3, out_dims), jnp.float32, -bb, bb)

    # BatchNorm2d: weight=1, bias=0, running_mean=0, running_var=1 (eval mode)
    bn_scale = jnp.full((3, out_dims), 1.0 / math.sqrt(1.0 + BN_EPS), jnp.float32)
    bn_shift = jnp.zeros((3, out_dims), jnp.float32)

    fan1 = 3 * out_dims
    std1 = math.sqrt(2.0 / fan1)
    wo = std1 * jax.random.normal(ks[4], (3 * out_dims, out_dims), jnp.float32)
    bob = 1.0 / math.sqrt(fan1)
    bo = jax.random.uniform(ks[5], (1, out_dims), jnp.float32, -bob, bob)

    return dict(w1=w1, w2=w2, w3=w3, b=b, bn_scale=bn_scale, bn_shift=bn_shift,
                wo=wo, bo=bo)


def aspp_reference(x_nchw, params):
    """Pure-JAX reference (lax dilated conv, unfolded BN) for correctness."""
    x = jnp.transpose(x_nchw, (0, 2, 3, 1))
    outs = []
    for idx, (w, r) in enumerate(
            zip((params["w1"], params["w2"], params["w3"]), RATES)):
        y = lax.conv_general_dilated(
            x, w, window_strides=(1, 1), padding=[(r, r), (r, r)],
            rhs_dilation=(r, r), dimension_numbers=("NHWC", "HWIO", "NHWC"))
        y = y + params["b"][idx][None, None, None, :]
        y = jnp.maximum(y, 0.0)
        y = y * params["bn_scale"][idx] + params["bn_shift"][idx]
        outs.append(y)
    cat = jnp.concatenate(outs, axis=-1)
    out = jnp.einsum("nhwc,cd->nhwd", cat, params["wo"]) + params["bo"][0]
    return jnp.transpose(out, (0, 3, 1, 2))


if __name__ == "__main__":
    key = jax.random.PRNGKey(0)
    k_x, k_p = jax.random.split(key)

    N, C_in, C_out, H, W = 2, 4, 8, 16, 16
    x = jax.random.normal(k_x, (N, C_in, H, W), jnp.float32)
    params = init_params(k_p, C_in, C_out)

    out = jax.block_until_ready(aspp_forward(x, params))
    ref = jax.block_until_ready(aspp_reference(x, params))

    assert out.shape == (N, C_out, H, W), out.shape
    assert jnp.allclose(out, ref, atol=1e-4, rtol=1e-4), \
        float(jnp.max(jnp.abs(out - ref)))
    print("KERNEL_OK")
</pallas_src>

<mosaic_0001>
module attributes {stable_mosaic.version = 11 : i64} {
  func.func @_aspp_kernel(%arg0: i32, %arg1: memref<1x16x16x4xf32, #tpu.memory_space<vmem>>, %arg2: memref<36x8xf32, #tpu.memory_space<vmem>>, %arg3: memref<36x8xf32, #tpu.memory_space<vmem>>, %arg4: memref<36x8xf32, #tpu.memory_space<vmem>>, %arg5: memref<3x8xf32, #tpu.memory_space<vmem>>, %arg6: memref<24x8xf32, #tpu.memory_space<vmem>>, %arg7: memref<1x8xf32, #tpu.memory_space<vmem>>, %arg8: memref<1x256x8xf32, #tpu.memory_space<vmem>>, %arg9: memref<52x52x4xf32, #tpu.memory_space<vmem>>) attributes {dimension_semantics = [#tpu.dimension_semantics<parallel>], iteration_bounds = array<i64: 2>, scalar_prefetch = 0 : i64, scratch_operands = 1 : i64, tpu.core_type = #tpu.core_type<tc>, window_params = [{transform_indices = @transform_0, window_bounds = array<i64: 1, 16, 16, 4>}, {pipeline_mode = #tpu.pipeline_mode<synchronous>, transform_indices = @transform_1, window_bounds = array<i64: 36, 8>}, {pipeline_mode = #tpu.pipeline_mode<synchronous>, transform_indices = @transform_2, window_bounds = array<i64: 36, 8>}, {pipeline_mode = #tpu.pipeline_mode<synchronous>, transform_indices = @transform_3, window_bounds = array<i64: 36, 8>}, {pipeline_mode = #tpu.pipeline_mode<synchronous>, transform_indices = @transform_4, window_bounds = array<i64: 3, 8>}, {pipeline_mode = #tpu.pipeline_mode<synchronous>, transform_indices = @transform_5, window_bounds = array<i64: 24, 8>}, {pipeline_mode = #tpu.pipeline_mode<synchronous>, transform_indices = @transform_6, window_bounds = array<i64: 1, 8>}, {transform_indices = @transform_7, window_bounds = array<i64: 1, 256, 8>}]} {
    %cst = arith.constant 0.000000e+00 : f32
    %0 = vector.broadcast %cst : f32 to vector<52x52x4xf32>
    %c0 = arith.constant 0 : index
    %c0_0 = arith.constant 0 : index
    %c0_1 = arith.constant 0 : index
    %1 = vector.load %arg9[%c0, %c0_0, %c0_1] : memref<52x52x4xf32, #tpu.memory_space<vmem>>, vector<52x52x4xf32>
    tpu.vector_store %arg9[%c0, %c0_0, %c0_1], %0 {strides = array<i32>} : memref<52x52x4xf32, #tpu.memory_space<vmem>>, vector<52x52x4xf32>,
    %c0_2 = arith.constant 0 : index
    %c0_3 = arith.constant 0 : index
    %c0_4 = arith.constant 0 : index
    %c0_5 = arith.constant 0 : index
    %2 = vector.load %arg1[%c0_2, %c0_3, %c0_4, %c0_5] : memref<1x16x16x4xf32, #tpu.memory_space<vmem>>, vector<1x16x16x4xf32>
    %3 = vector.shape_cast %2 : vector<1x16x16x4xf32> to vector<16x16x4xf32>
    %c18 = arith.constant 18 : index
    %c18_6 = arith.constant 18 : index
    %c0_7 = arith.constant 0 : index
    %4 = vector.load %arg9[%c18, %c18_6, %c0_7] : memref<52x52x4xf32, #tpu.memory_space<vmem>>, vector<16x16x4xf32>
    tpu.vector_store %arg9[%c18, %c18_6, %c0_7], %3 {strides = array<i32>} : memref<52x52x4xf32, #tpu.memory_space<vmem>>, vector<16x16x4xf32>,
    %c0_8 = arith.constant 0 : index
    %c0_9 = arith.constant 0 : index
    %5 = vector.load %arg7[%c0_8, %c0_9] : memref<1x8xf32, #tpu.memory_space<vmem>>, vector<1x8xf32>
    %6 = vector.shape_cast %5 : vector<1x8xf32> to vector<1x8xf32>
    %7 = vector.broadcast %6 : vector<1x8xf32> to vector<256x8xf32>
    %c12 = arith.constant 12 : index
    %c12_10 = arith.constant 12 : index
    %c0_11 = arith.constant 0 : index
    %8 = vector.load %arg9[%c12, %c12_10, %c0_11] : memref<52x52x4xf32, #tpu.memory_space<vmem>>, vector<16x16x4xf32>
    %c12_12 = arith.constant 12 : index
    %c18_13 = arith.constant 18 : index
    %c0_14 = arith.constant 0 : index
    %9 = vector.load %arg9[%c12_12, %c18_13, %c0_14] : memref<52x52x4xf32, #tpu.memory_space<vmem>>, vector<16x16x4xf32>
    %c12_15 = arith.constant 12 : index
    %c24 = arith.constant 24 : index
    %c0_16 = arith.constant 0 : index
    %10 = vector.load %arg9[%c12_15, %c24, %c0_16] : memref<52x52x4xf32, #tpu.memory_space<vmem>>, vector<16x16x4xf32>
    %c18_17 = arith.constant 18 : index
    %c12_18 = arith.constant 12 : index
    %c0_19 = arith.constant 0 : index
    %11 = vector.load %arg9[%c18_17, %c12_18, %c0_19] : memref<52x52x4xf32, #tpu.memory_space<vmem>>, vector<16x16x4xf32>
    %c18_20 = arith.constant 18 : index
    %c18_21 = arith.constant 18 : index
    %c0_22 = arith.constant 0 : index
    %12 = vector.load %arg9[%c18_20, %c18_21, %c0_22] : memref<52x52x4xf32, #tpu.memory_space<vmem>>, vector<16x16x4xf32>
    %c18_23 = arith.constant 18 : index
    %c24_24 = arith.constant 24 : index
    %c0_25 = arith.constant 0 : index
    %13 = vector.load %arg9[%c18_23, %c24_24, %c0_25] : memref<52x52x4xf32, #tpu.memory_space<vmem>>, vector<16x16x4xf32>
    %c24_26 = arith.constant 24 : index
    %c12_27 = arith.constant 12 : index
    %c0_28 = arith.constant 0 : index
    %14 = vector.load %arg9[%c24_26, %c12_27, %c0_28] : memref<52x52x4xf32, #tpu.memory_space<vmem>>, vector<16x16x4xf32>
    %c24_29 = arith.constant 24 : index
    %c18_30 = arith.constant 18 : index
    %c0_31 = arith.constant 0 : index
    %15 = vector.load %arg9[%c24_29, %c18_30, %c0_31] : memref<52x52x4xf32, #tpu.memory_space<vmem>>, vector<16x16x4xf32>
    %c24_32 = arith.constant 24 : index
    %c24_33 = arith.constant 24 : index
    %c0_34 = arith.constant 0 : index
    %16 = vector.load %arg9[%c24_32, %c24_33, %c0_34] : memref<52x52x4xf32, #tpu.memory_space<vmem>>, vector<16x16x4xf32>
    %17 = tpu.concatenate %8, %9, %10, %11, %12, %13, %14, %15, %16 in 2 : vector<16x16x4xf32>, vector<16x16x4xf32>, vector<16x16x4xf32>, vector<16x16x4xf32>, vector<16x16x4xf32>, vector<16x16x4xf32>, vector<16x16x4xf32>, vector<16x16x4xf32>, vector<16x16x4xf32> -> vector<16x16x36xf32>
    %18 = vector.shape_cast %17 : vector<16x16x36xf32> to vector<256x36xf32>
    %c0_35 = arith.constant 0 : index
    %c0_36 = arith.constant 0 : index
    %19 = vector.load %arg2[%c0_35, %c0_36] : memref<36x8xf32, #tpu.memory_space<vmem>>, vector<36x8xf32>
    %cst_37 = arith.constant dense<0.000000e+00> : vector<256x8xf32>
    %20 = tpu.matmul %18, %19, %cst_37 {dimension_numbers = #tpu.dot_dimension_numbers<[1], [0], [0], [1], [0, 0, 1, 1], [], []>} : vector<256x36xf32>, vector<36x8xf32>, vector<256x8xf32> -> vector<256x8xf32>
    %c0_38 = arith.constant 0 : index
    %c0_39 = arith.constant 0 : index
    %21 = vector.load %arg5[%c0_38, %c0_39] : memref<3x8xf32, #tpu.memory_space<vmem>>, vector<1x8xf32>
    %22 = vector.shape_cast %21 : vector<1x8xf32> to vector<8xf32>
    %23 = vector.shape_cast %22 : vector<8xf32> to vector<1x8xf32>
    %24 = vector.broadcast %23 : vector<1x8xf32> to vector<256x8xf32>
    %25 = arith.addf %20, %24 : vector<256x8xf32>
    %cst_40 = arith.constant 0.000000e+00 : f32
    %26 = vector.broadcast %cst_40 : f32 to vector<256x8xf32>
    %27 = arith.maximumf %25, %26 : vector<256x8xf32>
    %c0_41 = arith.constant 0 : index
    %c0_42 = arith.constant 0 : index
    %28 = vector.load %arg6[%c0_41, %c0_42] : memref<24x8xf32, #tpu.memory_space<vmem>>, vector<8x8xf32>
    %cst_43 = arith.constant dense<0.000000e+00> : vector<256x8xf32>
    %29 = tpu.matmul %27, %28, %cst_43 {dimension_numbers = #tpu.dot_dimension_numbers<[1], [0], [0], [1], [0, 0, 1, 1], [], []>} : vector<256x8xf32>, vector<8x8xf32>, vector<256x8xf32> -> vector<256x8xf32>
    %30 = arith.addf %7, %29 : vector<256x8xf32>
    %c6 = arith.constant 6 : index
    %c6_44 = arith.constant 6 : index
    %c0_45 = arith.constant 0 : index
    %31 = vector.load %arg9[%c6, %c6_44, %c0_45] : memref<52x52x4xf32, #tpu.memory_space<vmem>>, vector<16x16x4xf32>
    %c6_46 = arith.constant 6 : index
    %c18_47 = arith.constant 18 : index
    %c0_48 = arith.constant 0 : index
    %32 = vector.load %arg9[%c6_46, %c18_47, %c0_48] : memref<52x52x4xf32, #tpu.memory_space<vmem>>, vector<16x16x4xf32>
    %c6_49 = arith.constant 6 : index
    %c30 = arith.constant 30 : index
    %c0_50 = arith.constant 0 : index
    %33 = vector.load %arg9[%c6_49, %c30, %c0_50] : memref<52x52x4xf32, #tpu.memory_space<vmem>>, vector<16x16x4xf32>
    %c18_51 = arith.constant 18 : index
    %c6_52 = arith.constant 6 : index
    %c0_53 = arith.constant 0 : index
    %34 = vector.load %arg9[%c18_51, %c6_52, %c0_53] : memref<52x52x4xf32, #tpu.memory_space<vmem>>, vector<16x16x4xf32>
    %c18_54 = arith.constant 18 : index
    %c18_55 = arith.constant 18 : index
    %c0_56 = arith.constant 0 : index
    %35 = vector.load %arg9[%c18_54, %c18_55, %c0_56] : memref<52x52x4xf32, #tpu.memory_space<vmem>>, vector<16x16x4xf32>
    %c18_57 = arith.constant 18 : index
    %c30_58 = arith.constant 30 : index
    %c0_59 = arith.constant 0 : index
    %36 = vector.load %arg9[%c18_57, %c30_58, %c0_59] : memref<52x52x4xf32, #tpu.memory_space<vmem>>, vector<16x16x4xf32>
    %c30_60 = arith.constant 30 : index
    %c6_61 = arith.constant 6 : index
    %c0_62 = arith.constant 0 : index
    %37 = vector.load %arg9[%c30_60, %c6_61, %c0_62] : memref<52x52x4xf32, #tpu.memory_space<vmem>>, vector<16x16x4xf32>
    %c30_63 = arith.constant 30 : index
    %c18_64 = arith.constant 18 : index
    %c0_65 = arith.constant 0 : index
    %38 = vector.load %arg9[%c30_63, %c18_64, %c0_65] : memref<52x52x4xf32, #tpu.memory_space<vmem>>, vector<16x16x4xf32>
    %c30_66 = arith.constant 30 : index
    %c30_67 = arith.constant 30 : index
    %c0_68 = arith.constant 0 : index
    %39 = vector.load %arg9[%c30_66, %c30_67, %c0_68] : memref<52x52x4xf32, #tpu.memory_space<vmem>>, vector<16x16x4xf32>
    %40 = tpu.concatenate %31, %32, %33, %34, %35, %36, %37, %38, %39 in 2 : vector<16x16x4xf32>, vector<16x16x4xf32>, vector<16x16x4xf32>, vector<16x16x4xf32>, vector<16x16x4xf32>, vector<16x16x4xf32>, vector<16x16x4xf32>, vector<16x16x4xf32>, vector<16x16x4xf32> -> vector<16x16x36xf32>
    %41 = vector.shape_cast %40 : vector<16x16x36xf32> to vector<256x36xf32>
    %c0_69 = arith.constant 0 : index
    %c0_70 = arith.constant 0 : index
    %42 = vector.load %arg3[%c0_69, %c0_70] : memref<36x8xf32, #tpu.memory_space<vmem>>, vector<36x8xf32>
    %cst_71 = arith.constant dense<0.000000e+00> : vector<256x8xf32>
    %43 = tpu.matmul %41, %42, %cst_71 {dimension_numbers = #tpu.dot_dimension_numbers<[1], [0], [0], [1], [0, 0, 1, 1], [], []>} : vector<256x36xf32>, vector<36x8xf32>, vector<256x8xf32> -> vector<256x8xf32>
    %c1 = arith.constant 1 : index
    %c0_72 = arith.constant 0 : index
    %44 = vector.load %arg5[%c1, %c0_72] : memref<3x8xf32, #tpu.memory_space<vmem>>, vector<1x8xf32>
    %45 = vector.shape_cast %44 : vector<1x8xf32> to vector<8xf32>
    %46 = vector.shape_cast %45 : vector<8xf32> to vector<1x8xf32>
    %47 = vector.broadcast %46 : vector<1x8xf32> to vector<256x8xf32>
    %48 = arith.addf %43, %47 : vector<256x8xf32>
    %cst_73 = arith.constant 0.000000e+00 : f32
    %49 = vector.broadcast %cst_73 : f32 to vector<256x8xf32>
    %50 = arith.maximumf %48, %49 : vector<256x8xf32>
    %c8 = arith.constant 8 : index
    %c0_74 = arith.constant 0 : index
    %51 = vector.load %arg6[%c8, %c0_74] : memref<24x8xf32, #tpu.memory_space<vmem>>, vector<8x8xf32>
    %cst_75 = arith.constant dense<0.000000e+00> : vector<256x8xf32>
    %52 = tpu.matmul %50, %51, %cst_75 {dimension_numbers = #tpu.dot_dimension_numbers<[1], [0], [0], [1], [0, 0, 1, 1], [], []>} : vector<256x8xf32>, vector<8x8xf32>, vector<256x8xf32> -> vector<256x8xf32>
    %53 = arith.addf %30, %52 : vector<256x8xf32>
    %c0_76 = arith.constant 0 : index
    %c0_77 = arith.constant 0 : index
    %c0_78 = arith.constant 0 : index
    %54 = vector.load %arg9[%c0_76, %c0_77, %c0_78] : memref<52x52x4xf32, #tpu.memory_space<vmem>>, vector<16x16x4xf32>
    %c0_79 = arith.constant 0 : index
    %c18_80 = arith.constant 18 : index
    %c0_81 = arith.constant 0 : index
    %55 = vector.load %arg9[%c0_79, %c18_80, %c0_81] : memref<52x52x4xf32, #tpu.memory_space<vmem>>, vector<16x16x4xf32>
    %c0_82 = arith.constant 0 : index
    %c36 = arith.constant 36 : index
    %c0_83 = arith.constant 0 : index
    %56 = vector.load %arg9[%c0_82, %c36, %c0_83] : memref<52x52x4xf32, #tpu.memory_space<vmem>>, vector<16x16x4xf32>
    %c18_84 = arith.constant 18 : index
    %c0_85 = arith.constant 0 : index
    %c0_86 = arith.constant 0 : index
    %57 = vector.load %arg9[%c18_84, %c0_85, %c0_86] : memref<52x52x4xf32, #tpu.memory_space<vmem>>, vector<16x16x4xf32>
    %c18_87 = arith.constant 18 : index
    %c18_88 = arith.constant 18 : index
    %c0_89 = arith.constant 0 : index
    %58 = vector.load %arg9[%c18_87, %c18_88, %c0_89] : memref<52x52x4xf32, #tpu.memory_space<vmem>>, vector<16x16x4xf32>
    %c18_90 = arith.constant 18 : index
    %c36_91 = arith.constant 36 : index
    %c0_92 = arith.constant 0 : index
    %59 = vector.load %arg9[%c18_90, %c36_91, %c0_92] : memref<52x52x4xf32, #tpu.memory_space<vmem>>, vector<16x16x4xf32>
    %c36_93 = arith.constant 36 : index
    %c0_94 = arith.constant 0 : index
    %c0_95 = arith.constant 0 : index
    %60 = vector.load %arg9[%c36_93, %c0_94, %c0_95] : memref<52x52x4xf32, #tpu.memory_space<vmem>>, vector<16x16x4xf32>
    %c36_96 = arith.constant 36 : index
    %c18_97 = arith.constant 18 : index
    %c0_98 = arith.constant 0 : index
    %61 = vector.load %arg9[%c36_96, %c18_97, %c0_98] : memref<52x52x4xf32, #tpu.memory_space<vmem>>, vector<16x16x4xf32>
    %c36_99 = arith.constant 36 : index
    %c36_100 = arith.constant 36 : index
    %c0_101 = arith.constant 0 : index
    %62 = vector.load %arg9[%c36_99, %c36_100, %c0_101] : memref<52x52x4xf32, #tpu.memory_space<vmem>>, vector<16x16x4xf32>
    %63 = tpu.concatenate %54, %55, %56, %57, %58, %59, %60, %61, %62 in 2 : vector<16x16x4xf32>, vector<16x16x4xf32>, vector<16x16x4xf32>, vector<16x16x4xf32>, vector<16x16x4xf32>, vector<16x16x4xf32>, vector<16x16x4xf32>, vector<16x16x4xf32>, vector<16x16x4xf32> -> vector<16x16x36xf32>
    %64 = vector.shape_cast %63 : vector<16x16x36xf32> to vector<256x36xf32>
    %c0_102 = arith.constant 0 : index
    %c0_103 = arith.constant 0 : index
    %65 = vector.load %arg4[%c0_102, %c0_103] : memref<36x8xf32, #tpu.memory_space<vmem>>, vector<36x8xf32>
    %cst_104 = arith.constant dense<0.000000e+00> : vector<256x8xf32>
    %66 = tpu.matmul %64, %65, %cst_104 {dimension_numbers = #tpu.dot_dimension_numbers<[1], [0], [0], [1], [0, 0, 1, 1], [], []>} : vector<256x36xf32>, vector<36x8xf32>, vector<256x8xf32> -> vector<256x8xf32>
    %c2 = arith.constant 2 : index
    %c0_105 = arith.constant 0 : index
    %67 = vector.load %arg5[%c2, %c0_105] : memref<3x8xf32, #tpu.memory_space<vmem>>, vector<1x8xf32>
    %68 = vector.shape_cast %67 : vector<1x8xf32> to vector<8xf32>
    %69 = vector.shape_cast %68 : vector<8xf32> to vector<1x8xf32>
    %70 = vector.broadcast %69 : vector<1x8xf32> to vector<256x8xf32>
    %71 = arith.addf %66, %70 : vector<256x8xf32>
    %cst_106 = arith.constant 0.000000e+00 : f32
    %72 = vector.broadcast %cst_106 : f32 to vector<256x8xf32>
    %73 = arith.maximumf %71, %72 : vector<256x8xf32>
    %c16 = arith.constant 16 : index
    %c0_107 = arith.constant 0 : index
    %74 = vector.load %arg6[%c16, %c0_107] : memref<24x8xf32, #tpu.memory_space<vmem>>, vector<8x8xf32>
    %cst_108 = arith.constant dense<0.000000e+00> : vector<256x8xf32>
    %75 = tpu.matmul %73, %74, %cst_108 {dimension_numbers = #tpu.dot_dimension_numbers<[1], [0], [0], [1], [0, 0, 1, 1], [], []>} : vector<256x8xf32>, vector<8x8xf32>, vector<256x8xf32> -> vector<256x8xf32>
    %76 = arith.addf %53, %75 : vector<256x8xf32>
    %c0_109 = arith.constant 0 : index
    %c0_110 = arith.constant 0 : index
    %c0_111 = arith.constant 0 : index
    %77 = vector.load %arg8[%c0_109, %c0_110, %c0_111] : memref<1x256x8xf32, #tpu.memory_space<vmem>>, vector<1x256x8xf32>
    %78 = vector.shape_cast %77 : vector<1x256x8xf32> to vector<256x8xf32>
    %79 = vector.shape_cast %76 : vector<256x8xf32> to vector<1x256x8xf32>
    tpu.vector_store %arg8[%c0_109, %c0_110, %c0_111], %79 {strides = array<i32>} : memref<1x256x8xf32, #tpu.memory_space<vmem>>, vector<1x256x8xf32>,
    return
  }
  func.func @transform_0(%arg0: i32) -> (i32, i32, i32, i32) {
    %c0_i32 = arith.constant 0 : i32
    %c0_i32_0 = arith.constant 0 : i32
    %c0_i32_1 = arith.constant 0 : i32
    %c0_i32_2 = arith.constant 0 : i32
    return %arg0, %c0_i32, %c0_i32_0, %c0_i32_1 : i32, i32, i32, i32
  }
  func.func @transform_1(%arg0: i32) -> (i32, i32) {
    %c0_i32 = arith.constant 0 : i32
    %c0_i32_0 = arith.constant 0 : i32
    %c0_i32_1 = arith.constant 0 : i32
    return %c0_i32, %c0_i32_0 : i32, i32
  }
  func.func @transform_2(%arg0: i32) -> (i32, i32) {
    %c0_i32 = arith.constant 0 : i32
    %c0_i32_0 = arith.constant 0 : i32
    %c0_i32_1 = arith.constant 0 : i32
    return %c0_i32, %c0_i32_0 : i32, i32
  }
  func.func @transform_3(%arg0: i32) -> (i32, i32) {
    %c0_i32 = arith.constant 0 : i32
    %c0_i32_0 = arith.constant 0 : i32
    %c0_i32_1 = arith.constant 0 : i32
    return %c0_i32, %c0_i32_0 : i32, i32
  }
  func.func @transform_4(%arg0: i32) -> (i32, i32) {
    %c0_i32 = arith.constant 0 : i32
    %c0_i32_0 = arith.constant 0 : i32
    %c0_i32_1 = arith.constant 0 : i32
    return %c0_i32, %c0_i32_0 : i32, i32
  }
  func.func @transform_5(%arg0: i32) -> (i32, i32) {
    %c0_i32 = arith.constant 0 : i32
    %c0_i32_0 = arith.constant 0 : i32
    %c0_i32_1 = arith.constant 0 : i32
    return %c0_i32, %c0_i32_0 : i32, i32
  }
  func.func @transform_6(%arg0: i32) -> (i32, i32) {
    %c0_i32 = arith.constant 0 : i32
    %c0_i32_0 = arith.constant 0 : i32
    %c0_i32_1 = arith.constant 0 : i32
    return %c0_i32, %c0_i32_0 : i32, i32
  }
  func.func @transform_7(%arg0: i32) -> (i32, i32, i32) {
    %c0_i32 = arith.constant 0 : i32
    %c0_i32_0 = arith.constant 0 : i32
    %c0_i32_1 = arith.constant 0 : i32
    return %arg0, %c0_i32, %c0_i32_0 : i32, i32, i32
  }
}

</mosaic_0001>

<bundles_post_ra>
// kernel: tpu_custom_call.1
= control target key start
LH: loop header
LB: loop body
LE: loop exit
PB: predicated region body
PF: predicated region fallthrough
CT: control target
= control target key end

     0   :  { %s8340_s24 = smov 0   ;;  %s13005_s0 = inlined_call_operand.vmem [shape: f32[2,16,16,4], index: 0, kind: input, shape index: {}]   ;;  %s13006_s1 = inlined_call_operand.vmem [shape: f32[36,8], index: 1, kind: input, shape index: {}]   ;;  %s13007_s2 = inlined_call_operand.vmem [shape: f32[36,8], index: 2, kind: input, shape index: {}]   ;;  %s13008_s3 = inlined_call_operand.vmem [shape: f32[36,8], index: 3, kind: input, shape index: {}]   ;;  %s13009_s4 = inlined_call_operand.vmem [shape: f32[3,8], index: 4, kind: input, shape index: {}]   ;;  %s13010_s5 = inlined_call_operand.vmem [shape: f32[24,8], index: 5, kind: input, shape index: {}]   ;;  %s13011_s6 = inlined_call_operand.vmem [shape: f32[1,8], index: 6, kind: input, shape index: {}]   ;;  %s13012_s7 = inlined_call_operand.vmem [shape: f32[2,256,8], index: 7, kind: output, shape index: {}]  }
   0x1 LB: > { %s7362_s25 = sadd.s32 4294967295, %s8289_s24   ;;  %p7366_p0 = scmp.ge.s32.totalorder %s8289_s24, 1  ;;  %s8289_s24 = sphi %s8340_s24, %s17_s24  }
   0x2   : > { %p237_p1 = scmp.lt.s32.totalorder %s8289_s24, 3 }
   0x4   : > { %p238_p2 = pnand %p7366_p0, %p237_p1 }
   0x6   : > { %241 = sbr.rel (%p238_p2) target bundleno = 2129 (0x851), region = 48 }
   0xd   : > { %vm279_vm0 = vcmask 31744   ;;  %p8350_p3 = scmp.lt.s32.totalorder %s7362_s25, 1  ;;  %v13013_v0 = vmov 0.0   ;;  %s8292_s8 = smov 4   ;;  %vm2401_vm1 = vcmask 1043456   ;;  %vm2063_vm2 = vcmask 64512  }
   0xe   : > { %374 = vst.msk [vmem:[#allocation2 + $0x2e8] sm:$0xff] %vm279_vm0, %v13013_v0  ;;  %375 = vst.msk [vmem:[#allocation2 + $0x2f0] sm:$0xff] %vm279_vm0, %v13013_v0  ;;  %s8293_s9 = smov 8   ;;  %s8294_s10 = smov 12   ;;  %vm2096_vm3 = vcmask 97280   ;;  %vm2129_vm4 = vcmask 130048  }
   0xf   : > { %280 = vst.msk [vmem:[#allocation2] sm:$0xff] %vm279_vm0, %v13013_v0  ;;  %281 = vst.msk [vmem:[#allocation2 + $0x8] sm:$0xff] %vm279_vm0, %v13013_v0  ;;  %s13636_s25 = smov (!%p8350_p3, %s7362_s25), 1  ;;  %s8295_s11 = smov 16   ;;  %vm2162_vm5 = vcmask 162816   ;;  %vm2195_vm6 = vcmask 195584  }
  0x10   : > { %282 = vst.msk [vmem:[#allocation2 + $0x10] sm:$0xff] %vm279_vm0, %v13013_v0  ;;  %283 = vst.msk [vmem:[#allocation2 + $0x18] sm:$0xff] %vm279_vm0, %v13013_v0  ;;  %s7572_s27 = sshll.u32 %s13636_s25, 8  ;;  %s8296_s12 = smov 20   ;;  %vm2228_vm7 = vcmask 228352   ;;  %vm2261_vm8 = vcmask 261120  }
  0x11   : > { %284 = vst.msk [vmem:[#allocation2 + $0x20] sm:$0xff] %vm279_vm0, %v13013_v0  ;;  %285 = vst.msk [vmem:[#allocation2 + $0x28] sm:$0xff] %vm279_vm0, %v13013_v0  ;;  %s8990_s30 = scalar_lea.vmem %s13005_s0, %s7572_s27  ;;  %s8297_s13 = smov 24   ;;  %vm2304_vm9 = vcmask 293888   ;;  %vm286_vm10 = vcmask 27648  }
  0x12   : > { %288 = vst.msk [vmem:[#allocation2 + $0x38] sm:$0xff] %vm279_vm0, %v13013_v0  ;;  %289 = vst.msk [vmem:[#allocation2 + $0x40] sm:$0xff] %vm279_vm0, %v13013_v0  ;;  %v646_v1 = vld [vmem:[%s8990_s30 + $0x8] sm:$0xff]  ;;  %v645_v2 = vld [vmem:[%s8990_s30] sm:$0xff]  ;;  %s8298_s14 = smov 28   ;;  %s8299_s28 = smov 32  }
  0x13   : > { %290 = vst.msk [vmem:[#allocation2 + $0x48] sm:$0xff] %vm279_vm0, %v13013_v0  ;;  %291 = vst.msk [vmem:[#allocation2 + $0x50] sm:$0xff] %vm279_vm0, %v13013_v0  ;;  %v648_v3 = vld [vmem:[%s8990_s30 + $0x18] sm:$0xff]  ;;  %v647_v4 = vld [vmem:[%s8990_s30 + $0x10] sm:$0xff] }
  0x14   : > { %292 = vst.msk [vmem:[#allocation2 + $0x58] sm:$0xff] %vm279_vm0, %v13013_v0  ;;  %293 = vst.msk [vmem:[#allocation2 + $0x60] sm:$0xff] %vm279_vm0, %v13013_v0  ;;  %v650_v5 = vld [vmem:[%s8990_s30 + $0x28] sm:$0xff]  ;;  %v649_v6 = vld [vmem:[%s8990_s30 + $0x20] sm:$0xff] }
  0x15   : > { %295 = vst.msk [vmem:[#allocation2 + $0x70] sm:$0xff] %vm279_vm0, %v13013_v0  ;;  %296 = vst.msk [vmem:[#allocation2 + $0x78] sm:$0xff] %vm279_vm0, %v13013_v0  ;;  %v752_v7 = vld [vmem:[#allocation2 + $0x2ea] sm:$0xff]  ;;  %v652_v11 = vld [vmem:[%s8990_s30 + $0x38] sm:$0xff] }
  0x16   : > { %297 = vst.msk [vmem:[#allocation2 + $0x80] sm:$0xff] %vm279_vm0, %v13013_v0  ;;  %298 = vst.msk [vmem:[#allocation2 + $0x88] sm:$0xff] %vm279_vm0, %v13013_v0  ;;  %1043 = vrot.lane.b32.xlu1 %v752_v7, %s8292_s8  ;;  %v651_v12 = vld [vmem:[%s8990_s30 + $0x30] sm:$0xff]  ;;  %v654_v13 = vld [vmem:[%s8990_s30 + $0x48] sm:$0xff] }
  0x17   : > { %299 = vst.msk [vmem:[#allocation2 + $0x90] sm:$0xff] %vm279_vm0, %v13013_v0  ;;  %300 = vst.msk [vmem:[#allocation2 + $0x98] sm:$0xff] %vm279_vm0, %v13013_v0  ;;  %v653_v14 = vld [vmem:[%s8990_s30 + $0x40] sm:$0xff]  ;;  %v656_v15 = vld [vmem:[%s8990_s30 + $0x58] sm:$0xff] }
  0x18   : > { %302 = vst.msk [vmem:[#allocation2 + $0xa8] sm:$0xff] %vm279_vm0, %v13013_v0  ;;  %303 = vst.msk [vmem:[#allocation2 + $0xb0] sm:$0xff] %vm279_vm0, %v13013_v0  ;;  %v655_v19 = vld [vmem:[%s8990_s30 + $0x50] sm:$0xff]  ;;  %v658_v20 = vld [vmem:[%s8990_s30 + $0x68] sm:$0xff] }
  0x19   : > { %304 = vst.msk [vmem:[#allocation2 + $0xb8] sm:$0xff] %vm279_vm0, %v13013_v0  ;;  %305 = vst.msk [vmem:[#allocation2 + $0xc0] sm:$0xff] %vm279_vm0, %v13013_v0  ;;  %v657_v21 = vld [vmem:[%s8990_s30 + $0x60] sm:$0xff]  ;;  %v660_v23 = vld [vmem:[%s8990_s30 + $0x78] sm:$0xff] }
  0x1a   : > { %306 = vst.msk [vmem:[#allocation2 + $0xc8] sm:$0xff] %vm279_vm0, %v13013_v0  ;;  %307 = vst.msk [vmem:[#allocation2 + $0xd0] sm:$0xff] %vm279_vm0, %v13013_v0  ;;  %v659_v24 = vld [vmem:[%s8990_s30 + $0x70] sm:$0xff]  ;;  %v662_v25 = vld [vmem:[%s8990_s30 + $0x88] sm:$0xff] }
  0x1b   : > { %309 = vst.msk [vmem:[#allocation2 + $0xe0] sm:$0xff] %vm279_vm0, %v13013_v0  ;;  %310 = vst.msk [vmem:[#allocation2 + $0xe8] sm:$0xff] %vm279_vm0, %v13013_v0  ;;  %v661_v26 = vld [vmem:[%s8990_s30 + $0x80] sm:$0xff]  ;;  %v664_v27 = vld [vmem:[%s8990_s30 + $0x98] sm:$0xff] }
  0x1c   : > { %311 = vst.msk [vmem:[#allocation2 + $0xf0] sm:$0xff] %vm279_vm0, %v13013_v0  ;;  %312 = vst.msk [vmem:[#allocation2 + $0xf8] sm:$0xff] %vm279_vm0, %v13013_v0  ;;  %v663_v28 = vld [vmem:[%s8990_s30 + $0x90] sm:$0xff]  ;;  %v665_v41 = vld [vmem:[%s8990_s30 + $0xa0] sm:$0xff] }
  0x1d   : > { %313 = vst.msk [vmem:[#allocation2 + $0x100] sm:$0xff] %vm279_vm0, %v13013_v0  ;;  %314 = vst.msk [vmem:[#allocation2 + $0x108] sm:$0xff] %vm279_vm0, %v13013_v0  ;;  %v666_v42 = vld [vmem:[%s8990_s30 + $0xa8] sm:$0xff]  ;;  %v667_v43 = vld [vmem:[%s8990_s30 + $0xb0] sm:$0xff] }
  0x1e   : > { %316 = vst.msk [vmem:[#allocation2 + $0x118] sm:$0xff] %vm279_vm0, %v13013_v0  ;;  %317 = vst.msk [vmem:[#allocation2 + $0x120] sm:$0xff] %vm279_vm0, %v13013_v0  ;;  %v668_v46 = vld [vmem:[%s8990_s30 + $0xb8] sm:$0xff]  ;;  %v669_v47 = vld [vmem:[%s8990_s30 + $0xc0] sm:$0xff] }
  0x1f   : > { %318 = vst.msk [vmem:[#allocation2 + $0x128] sm:$0xff] %vm279_vm0, %v13013_v0  ;;  %319 = vst.msk [vmem:[#allocation2 + $0x130] sm:$0xff] %vm279_vm0, %v13013_v0  ;;  %v670_v48 = vld [vmem:[%s8990_s30 + $0xc8] sm:$0xff]  ;;  %v671_v51 = vld [vmem:[%s8990_s30 + $0xd0] sm:$0xff] }
  0x20   : > { %320 = vst.msk [vmem:[#allocation2 + $0x138] sm:$0xff] %vm279_vm0, %v13013_v0  ;;  %321 = vst.msk [vmem:[#allocation2 + $0x140] sm:$0xff] %vm279_vm0, %v13013_v0  ;;  %v672_v52 = vld [vmem:[%s8990_s30 + $0xd8] sm:$0xff]  ;;  %v673_v55 = vld [vmem:[%s8990_s30 + $0xe0] sm:$0xff] }
  0x21   : > { %323 = vst.msk [vmem:[#allocation2 + $0x150] sm:$0xff] %vm279_vm0, %v13013_v0  ;;  %324 = vst.msk [vmem:[#allocation2 + $0x158] sm:$0xff] %vm279_vm0, %v13013_v0  ;;  %v674_v56 = vld [vmem:[%s8990_s30 + $0xe8] sm:$0xff]  ;;  %v675_v59 = vld [vmem:[%s8990_s30 + $0xf0] sm:$0xff] }
  0x22   : > { %325 = vst.msk [vmem:[#allocation2 + $0x160] sm:$0xff] %vm279_vm0, %v13013_v0  ;;  %326 = vst.msk [vmem:[#allocation2 + $0x168] sm:$0xff] %vm279_vm0, %v13013_v0  ;;  %v676_v60 = vld [vmem:[%s8990_s30 + $0xf8] sm:$0xff] }
  0x23   : > { %327 = vst.msk [vmem:[#allocation2 + $0x170] sm:$0xff] %vm279_vm0, %v13013_v0  ;;  %328 = vst.msk [vmem:[#allocation2 + $0x178] sm:$0xff] %vm279_vm0, %v13013_v0 }
  0x24   : > { %330 = vst.msk [vmem:[#allocation2 + $0x188] sm:$0xff] %vm279_vm0, %v13013_v0  ;;  %331 = vst.msk [vmem:[#allocation2 + $0x190] sm:$0xff] %vm279_vm0, %v13013_v0 }
  0x25   : > { %332 = vst.msk [vmem:[#allocation2 + $0x198] sm:$0xff] %vm279_vm0, %v13013_v0  ;;  %333 = vst.msk [vmem:[#allocation2 + $0x1a0] sm:$0xff] %vm279_vm0, %v13013_v0 }
  0x26   : > { %334 = vst.msk [vmem:[#allocation2 + $0x1a8] sm:$0xff] %vm279_vm0, %v13013_v0  ;;  %335 = vst.msk [vmem:[#allocation2 + $0x1b0] sm:$0xff] %vm279_vm0, %v13013_v0 }
  0x27   : > { %337 = vst.msk [vmem:[#allocation2 + $0x1c0] sm:$0xff] %vm279_vm0, %v13013_v0  ;;  %338 = vst.msk [vmem:[#allocation2 + $0x1c8] sm:$0xff] %vm279_vm0, %v13013_v0 }
  0x28   : > { %339 = vst.msk [vmem:[#allocation2 + $0x1d0] sm:$0xff] %vm279_vm0, %v13013_v0  ;;  %340 = vst.msk [vmem:[#allocation2 + $0x1d8] sm:$0xff] %vm279_vm0, %v13013_v0 }
  0x29   : > { %341 = vst.msk [vmem:[#allocation2 + $0x1e0] sm:$0xff] %vm279_vm0, %v13013_v0  ;;  %342 = vst.msk [vmem:[#allocation2 + $0x1e8] sm:$0xff] %vm279_vm0, %v13013_v0 }
  0x2a   : > { %344 = vst.msk [vmem:[#allocation2 + $0x1f8] sm:$0xff] %vm279_vm0, %v13013_v0  ;;  %345 = vst.msk [vmem:[#allocation2 + $0x200] sm:$0xff] %vm279_vm0, %v13013_v0 }
  0x2b   : > { %346 = vst.msk [vmem:[#allocation2 + $0x208] sm:$0xff] %vm279_vm0, %v13013_v0  ;;  %347 = vst.msk [vmem:[#allocation2 + $0x210] sm:$0xff] %vm279_vm0, %v13013_v0 }
  0x2c   : > { %348 = vst.msk [vmem:[#allocation2 + $0x218] sm:$0xff] %vm279_vm0, %v13013_v0  ;;  %349 = vst.msk [vmem:[#allocation2 + $0x220] sm:$0xff] %vm279_vm0, %v13013_v0 }
  0x2d   : > { %351 = vst.msk [vmem:[#allocation2 + $0x230] sm:$0xff] %vm279_vm0, %v13013_v0  ;;  %352 = vst.msk [vmem:[#allocation2 + $0x238] sm:$0xff] %vm279_vm0, %v13013_v0 }
  0x2e   : > { %353 = vst.msk [vmem:[#allocation2 + $0x240] sm:$0xff] %vm279_vm0, %v13013_v0  ;;  %354 = vst.msk [vmem:[#allocation2 + $0x248] sm:$0xff] %vm279_vm0, %v13013_v0 }
  0x2f   : > { %355 = vst.msk [vmem:[#allocation2 + $0x250] sm:$0xff] %vm279_vm0, %v13013_v0  ;;  %356 = vst.msk [vmem:[#allocation2 + $0x258] sm:$0xff] %vm279_vm0, %v13013_v0 }
  0x30   : > { %358 = vst.msk [vmem:[#allocation2 + $0x268] sm:$0xff] %vm279_vm0, %v13013_v0  ;;  %359 = vst.msk [vmem:[#allocation2 + $0x270] sm:$0xff] %vm279_vm0, %v13013_v0 }
  0x31   : > { %360 = vst.msk [vmem:[#allocation2 + $0x278] sm:$0xff] %vm279_vm0, %v13013_v0  ;;  %361 = vst.msk [vmem:[#allocation2 + $0x280] sm:$0xff] %vm279_vm0, %v13013_v0 }
  0x32   : > { %362 = vst.msk [vmem:[#allocation2 + $0x288] sm:$0xff] %vm279_vm0, %v13013_v0  ;;  %363 = vst.msk [vmem:[#allocation2 + $0x290] sm:$0xff] %vm279_vm0, %v13013_v0 }
  0x33   : > { %365 = vst.msk [vmem:[#allocation2 + $0x2a0] sm:$0xff] %vm279_vm0, %v13013_v0  ;;  %366 = vst.msk [vmem:[#allocation2 + $0x2a8] sm:$0xff] %vm279_vm0, %v13013_v0 }
  0x34   : > { %367 = vst.msk [vmem:[#allocation2 + $0x2b0] sm:$0xff] %vm279_vm0, %v13013_v0  ;;  %368 = vst.msk [vmem:[#allocation2 + $0x2b8] sm:$0xff] %vm279_vm0, %v13013_v0 }
  0x35   : > { %369 = vst.msk [vmem:[#allocation2 + $0x2c0] sm:$0xff] %vm279_vm0, %v13013_v0  ;;  %370 = vst.msk [vmem:[#allocation2 + $0x2c8] sm:$0xff] %vm279_vm0, %v13013_v0 }
  0x36   : > { %372 = vst.msk [vmem:[#allocation2 + $0x2d8] sm:$0xff] %vm279_vm0, %v13013_v0  ;;  %373 = vst.msk [vmem:[#allocation2 + $0x2e0] sm:$0xff] %vm279_vm0, %v13013_v0 }
  0x37   : > { %376 = vst.msk [vmem:[#allocation2 + $0x2f8] sm:$0xff] %vm279_vm0, %v13013_v0  ;;  %377 = vst.msk [vmem:[#allocation2 + $0x300] sm:$0xff] %vm279_vm0, %v13013_v0 }
  0x38   : > { %379 = vst.msk [vmem:[#allocation2 + $0x310] sm:$0xff] %vm279_vm0, %v13013_v0  ;;  %380 = vst.msk [vmem:[#allocation2 + $0x318] sm:$0xff] %vm279_vm0, %v13013_v0 }
  0x39   : > { %381 = vst.msk [vmem:[#allocation2 + $0x320] sm:$0xff] %vm279_vm0, %v13013_v0  ;;  %382 = vst.msk [vmem:[#allocation2 + $0x328] sm:$0xff] %vm279_vm0, %v13013_v0 }
  0x3a   : > { %383 = vst.msk [vmem:[#allocation2 + $0x330] sm:$0xff] %vm279_vm0, %v13013_v0  ;;  %384 = vst.msk [vmem:[#allocation2 + $0x338] sm:$0xff] %vm279_vm0, %v13013_v0 }
  0x3b   : > { %386 = vst.msk [vmem:[#allocation2 + $0x348] sm:$0xff] %vm279_vm0, %v13013_v0  ;;  %387 = vst.msk [vmem:[#allocation2 + $0x350] sm:$0xff] %vm279_vm0, %v13013_v0  ;;  %v750_v8 = vld [vmem:[#allocation2 + $0x2b2] sm:$0xff] }
  0x3c   : > { %388 = vst.msk [vmem:[#allocation2 + $0x358] sm:$0xff] %vm279_vm0, %v13013_v0  ;;  %389 = vst.msk [vmem:[#allocation2 + $0x360] sm:$0xff] %vm279_vm0, %v13013_v0  ;;  %1039 = vrot.lane.b32.xlu0 %v750_v8, %s8292_s8  ;;  %v751_v10 = vld [vmem:[#allocation2 + $0x2ba] sm:$0xff] }
  0x3d   : > { %390 = vst.msk [vmem:[#allocation2 + $0x368] sm:$0xff] %vm279_vm0, %v13013_v0  ;;  %391 = vst.msk [vmem:[#allocation2 + $0x370] sm:$0xff] %vm279_vm0, %v13013_v0 }
  0x3e   : > { %393 = vst.msk [vmem:[#allocation2 + $0x380] sm:$0xff] %vm279_vm0, %v13013_v0  ;;  %394 = vst.msk [vmem:[#allocation2 + $0x388] sm:$0xff] %vm279_vm0, %v13013_v0  ;;  %v753_v9 = vld [vmem:[#allocation2 + $0x2f2] sm:$0xff] }
  0x3f   : > { %395 = vst.msk [vmem:[#allocation2 + $0x390] sm:$0xff] %vm279_vm0, %v13013_v0  ;;  %396 = vst.msk [vmem:[#allocation2 + $0x398] sm:$0xff] %vm279_vm0, %v13013_v0  ;;  %1045 = vrot.lane.b32.xlu1 %v753_v9, %s8292_s8 }
  0x40   : > { %397 = vst.msk [vmem:[#allocation2 + $0x3a0] sm:$0xff] %vm279_vm0, %v13013_v0  ;;  %398 = vst.msk [vmem:[#allocation2 + $0x3a8] sm:$0xff] %vm279_vm0, %v13013_v0  ;;  %1041 = vrot.lane.b32.xlu0 %v751_v10, %s8292_s8  ;;  %v754_v17 = vld [vmem:[#allocation2 + $0x322] sm:$0xff] }
  0x41   : > { %400 = vst.msk [vmem:[#allocation2 + $0x3b8] sm:$0xff] %vm279_vm0, %v13013_v0  ;;  %401 = vst.msk [vmem:[#allocation2 + $0x3c0] sm:$0xff] %vm279_vm0, %v13013_v0  ;;  %v755_v16 = vld [vmem:[#allocation2 + $0x32a] sm:$0xff] }
  0x42   : > { %402 = vst.msk [vmem:[#allocation2 + $0x3c8] sm:$0xff] %vm279_vm0, %v13013_v0  ;;  %403 = vst.msk [vmem:[#allocation2 + $0x3d0] sm:$0xff] %vm279_vm0, %v13013_v0  ;;  %v786_v7 = vld [vmem:[#allocation2 + $0x328] sm:$0xff] }
  0x43   : > { %404 = vst.msk [vmem:[#allocation2 + $0x3d8] sm:$0xff] %vm279_vm0, %v13013_v0  ;;  %405 = vst.msk [vmem:[#allocation2 + $0x3e0] sm:$0xff] %vm279_vm0, %v13013_v0  ;;  %1049 = vrot.lane.b32.xlu1 %v755_v16, %s8292_s8  ;;  %v756_v22 = vld [vmem:[#allocation2 + $0x35a] sm:$0xff] }
  0x44   : > { %407 = vst.msk [vmem:[#allocation2 + $0x3f0] sm:$0xff] %vm279_vm0, %v13013_v0  ;;  %408 = vst.msk [vmem:[#allocation2 + $0x3f8] sm:$0xff] %vm279_vm0, %v13013_v0  ;;  %v757_v18 = vld [vmem:[#allocation2 + $0x362] sm:$0xff]  ;;  %1047 = vrot.lane.b32.xlu0 %v754_v17, %s8292_s8 }
  0x45   : > { %409 = vst.msk [vmem:[#allocation2 + $0x400] sm:$0xff] %vm279_vm0, %v13013_v0  ;;  %410 = vst.msk [vmem:[#allocation2 + $0x408] sm:$0xff] %vm279_vm0, %v13013_v0  ;;  %v789_v8 = vld [vmem:[#allocation2 + $0x368] sm:$0xff]  ;;  %v788_v9 = vld [vmem:[#allocation2 + $0x360] sm:$0xff] }
  0x46   : > { %411 = vst.msk [vmem:[#allocation2 + $0x410] sm:$0xff] %vm279_vm0, %v13013_v0  ;;  %412 = vst.msk [vmem:[#allocation2 + $0x418] sm:$0xff] %vm279_vm0, %v13013_v0  ;;  %v758_v30 = vld [vmem:[#allocation2 + $0x392] sm:$0xff] }
  0x47   : > { %414 = vst.msk [vmem:[#allocation2 + $0x428] sm:$0xff] %vm279_vm0, %v13013_v0  ;;  %415 = vst.msk [vmem:[#allocation2 + $0x430] sm:$0xff] %vm279_vm0, %v13013_v0  ;;  %1053 = vrot.lane.b32.xlu1 %v757_v18, %s8292_s8  ;;  %v759_v29 = vld [vmem:[#allocation2 + $0x39a] sm:$0xff] }
  0x48   : > { %416 = vst.msk [vmem:[#allocation2 + $0x438] sm:$0xff] %vm279_vm0, %v13013_v0  ;;  %417 = vst.msk [vmem:[#allocation2 + $0x440] sm:$0xff] %vm279_vm0, %v13013_v0  ;;  %1051 = vrot.lane.b32.xlu0 %v756_v22, %s8292_s8  ;;  %v791_v10 = vld [vmem:[#allocation2 + $0x3a0] sm:$0xff] }
  0x49   : > { %418 = vst.msk [vmem:[#allocation2 + $0x448] sm:$0xff] %vm279_vm0, %v13013_v0  ;;  %419 = vst.msk [vmem:[#allocation2 + $0x450] sm:$0xff] %vm279_vm0, %v13013_v0  ;;  %v760_v32 = vld [vmem:[#allocation2 + $0x3ca] sm:$0xff] }
  0x4a   : > { %421 = vst.msk [vmem:[#allocation2 + $0x460] sm:$0xff] %vm279_vm0, %v13013_v0  ;;  %422 = vst.msk [vmem:[#allocation2 + $0x468] sm:$0xff] %vm279_vm0, %v13013_v0  ;;  %v761_v31 = vld [vmem:[#allocation2 + $0x3d2] sm:$0xff] }
  0x4b   : > { %423 = vst.msk [vmem:[#allocation2 + $0x470] sm:$0xff] %vm279_vm0, %v13013_v0  ;;  %424 = vst.msk [vmem:[#allocation2 + $0x478] sm:$0xff] %vm279_vm0, %v13013_v0  ;;  %1057 = vrot.lane.b32.xlu1 %v759_v29, %s8292_s8 }
  0x4c   : > { %425 = vst.msk [vmem:[#allocation2 + $0x480] sm:$0xff] %vm279_vm0, %v13013_v0  ;;  %426 = vst.msk [vmem:[#allocation2 + $0x488] sm:$0xff] %vm279_vm0, %v13013_v0  ;;  %1055 = vrot.lane.b32.xlu0 %v758_v30, %s8292_s8 }
  0x4d   : > { %428 = vst.msk [vmem:[#allocation2 + $0x498] sm:$0xff] %vm279_vm0, %v13013_v0  ;;  %429 = vst.msk [vmem:[#allocation2 + $0x4a0] sm:$0xff] %vm279_vm0, %v13013_v0 }
  0x4e   : > { %430 = vst.msk [vmem:[#allocation2 + $0x4a8] sm:$0xff] %vm279_vm0, %v13013_v0  ;;  %431 = vst.msk [vmem:[#allocation2 + $0x4b0] sm:$0xff] %vm279_vm0, %v13013_v0 }
  0x4f   : > { %432 = vst.msk [vmem:[#allocation2 + $0x4b8] sm:$0xff] %vm279_vm0, %v13013_v0  ;;  %433 = vst.msk [vmem:[#allocation2 + $0x4c0] sm:$0xff] %vm279_vm0, %v13013_v0  ;;  %1061 = vrot.lane.b32.xlu1 %v761_v31, %s8292_s8 }
  0x50   : > { %435 = vst.msk [vmem:[#allocation2 + $0x4d0] sm:$0xff] %vm279_vm0, %v13013_v0  ;;  %436 = vst.msk [vmem:[#allocation2 + $0x4d8] sm:$0xff] %vm279_vm0, %v13013_v0  ;;  %1059 = vrot.lane.b32.xlu0 %v760_v32, %s8292_s8 }
  0x51   : > { %437 = vst.msk [vmem:[#allocation2 + $0x4e0] sm:$0xff] %vm279_vm0, %v13013_v0  ;;  %438 = vst.msk [vmem:[#allocation2 + $0x4e8] sm:$0xff] %vm279_vm0, %v13013_v0 }
  0x52   : > { %439 = vst.msk [vmem:[#allocation2 + $0x4f0] sm:$0xff] %vm279_vm0, %v13013_v0  ;;  %440 = vst.msk [vmem:[#allocation2 + $0x4f8] sm:$0xff] %vm279_vm0, %v13013_v0 }
  0x53   : > { %442 = vst.msk [vmem:[#allocation2 + $0x508] sm:$0xff] %vm279_vm0, %v13013_v0  ;;  %443 = vst.msk [vmem:[#allocation2 + $0x510] sm:$0xff] %vm279_vm0, %v13013_v0 }
  0x54   : > { %444 = vst.msk [vmem:[#allocation2 + $0x518] sm:$0xff] %vm279_vm0, %v13013_v0  ;;  %445 = vst.msk [vmem:[#allocation2 + $0x520] sm:$0xff] %vm279_vm0, %v13013_v0 }
  0x55   : > { %446 = vst.msk [vmem:[#allocation2 + $0x528] sm:$0xff] %vm279_vm0, %v13013_v0  ;;  %447 = vst.msk [vmem:[#allocation2 + $0x530] sm:$0xff] %vm279_vm0, %v13013_v0 }
  0x56   : > { %449 = vst.msk [vmem:[#allocation2 + $0x540] sm:$0xff] %vm279_vm0, %v13013_v0  ;;  %450 = vst.msk [vmem:[#allocation2 + $0x548] sm:$0xff] %vm279_vm0, %v13013_v0 }
  0x57   : > { %451 = vst.msk [vmem:[#allocation2 + $0x550] sm:$0xff] %vm279_vm0, %v13013_v0  ;;  %452 = vst.msk [vmem:[#allocation2 + $0x558] sm:$0xff] %vm279_vm0, %v13013_v0 }
  0x58   : > { %453 = vst.msk [vmem:[#allocation2 + $0x560] sm:$0xff] %vm279_vm0, %v13013_v0  ;;  %454 = vst.msk [vmem:[#allocation2 + $0x568] sm:$0xff] %vm279_vm0, %v13013_v0 }
  0x59   : > { %456 = vst.msk [vmem:[#allocation2 + $0x578] sm:$0xff] %vm279_vm0, %v13013_v0  ;;  %457 = vst.msk [vmem:[#allocation2 + $0x580] sm:$0xff] %vm279_vm0, %v13013_v0 }
  0x5a   : > { %458 = vst.msk [vmem:[#allocation2 + $0x588] sm:$0xff] %vm279_vm0, %v13013_v0  ;;  %459 = vst.msk [vmem:[#allocation2 + $0x590] sm:$0xff] %vm279_vm0, %v13013_v0 }
  0x5b   : > { %460 = vst.msk [vmem:[#allocation2 + $0x598] sm:$0xff] %vm279_vm0, %v13013_v0  ;;  %461 = vst.msk [vmem:[#allocation2 + $0x5a0] sm:$0xff] %vm279_vm0, %v13013_v0 }
  0x5c   : > { %463 = vst.msk [vmem:[#allocation2 + $0x5b0] sm:$0xff] %vm279_vm0, %v13013_v0  ;;  %464 = vst.msk [vmem:[#allocation2 + $0x5b8] sm:$0xff] %vm279_vm0, %v13013_v0 }
  0x5d   : > { %465 = vst.msk [vmem:[#allocation2 + $0x5c0] sm:$0xff] %vm279_vm0, %v13013_v0  ;;  %466 = vst.msk [vmem:[#allocation2 + $0x5c8] sm:$0xff] %vm279_vm0, %v13013_v0 }
  0x5e   : > { %467 = vst.msk [vmem:[#allocation2 + $0x5d0] sm:$0xff] %vm279_vm0, %v13013_v0  ;;  %468 = vst.msk [vmem:[#allocation2 + $0x5d8] sm:$0xff] %vm279_vm0, %v13013_v0 }
  0x5f   : > { %470 = vst.msk [vmem:[#allocation2 + $0x5e8] sm:$0xff] %vm279_vm0, %v13013_v0  ;;  %471 = vst.msk [vmem:[#allocation2 + $0x5f0] sm:$0xff] %vm279_vm0, %v13013_v0 }
  0x60   : > { %472 = vst.msk [vmem:[#allocation2 + $0x5f8] sm:$0xff] %vm279_vm0, %v13013_v0  ;;  %473 = vst.msk [vmem:[#allocation2 + $0x600] sm:$0xff] %vm279_vm0, %v13013_v0 }
  0x61   : > { %474 = vst.msk [vmem:[#allocation2 + $0x608] sm:$0xff] %vm279_vm0, %v13013_v0  ;;  %475 = vst.msk [vmem:[#allocation2 + $0x610] sm:$0xff] %vm279_vm0, %v13013_v0 }
  0x62   : > { %477 = vst.msk [vmem:[#allocation2 + $0x620] sm:$0xff] %vm279_vm0, %v13013_v0  ;;  %478 = vst.msk [vmem:[#allocation2 + $0x628] sm:$0xff] %vm279_vm0, %v13013_v0 }
  0x63   : > { %479 = vst.msk [vmem:[#allocation2 + $0x630] sm:$0xff] %vm279_vm0, %v13013_v0  ;;  %480 = vst.msk [vmem:[#allocation2 + $0x638] sm:$0xff] %vm279_vm0, %v13013_v0 }
  0x64   : > { %481 = vst.msk [vmem:[#allocation2 + $0x640] sm:$0xff] %vm279_vm0, %v13013_v0  ;;  %482 = vst.msk [vmem:[#allocation2 + $0x648] sm:$0xff] %vm279_vm0, %v13013_v0 }
  0x65   : > { %484 = vst.msk [vmem:[#allocation2 + $0x658] sm:$0xff] %vm279_vm0, %v13013_v0  ;;  %485 = vst.msk [vmem:[#allocation2 + $0x660] sm:$0xff] %vm279_vm0, %v13013_v0 }
  0x66   : > { %486 = vst.msk [vmem:[#allocation2 + $0x668] sm:$0xff] %vm279_vm0, %v13013_v0  ;;  %487 = vst.msk [vmem:[#allocation2 + $0x670] sm:$0xff] %vm279_vm0, %v13013_v0 }
  0x67   : > { %488 = vst.msk [vmem:[#allocation2 + $0x678] sm:$0xff] %vm279_vm0, %v13013_v0  ;;  %489 = vst.msk [vmem:[#allocation2 + $0x680] sm:$0xff] %vm279_vm0, %v13013_v0 }
  0x68   : > { %491 = vst.msk [vmem:[#allocation2 + $0x690] sm:$0xff] %vm279_vm0, %v13013_v0  ;;  %492 = vst.msk [vmem:[#allocation2 + $0x698] sm:$0xff] %vm279_vm0, %v13013_v0 }
  0x69   : > { %493 = vst.msk [vmem:[#allocation2 + $0x6a0] sm:$0xff] %vm279_vm0, %v13013_v0  ;;  %494 = vst.msk [vmem:[#allocation2 + $0x6a8] sm:$0xff] %vm279_vm0, %v13013_v0 }
  0x6a   : > { %495 = vst.msk [vmem:[#allocation2 + $0x6b0] sm:$0xff] %vm279_vm0, %v13013_v0  ;;  %496 = vst.msk [vmem:[#allocation2 + $0x6b8] sm:$0xff] %vm279_vm0, %v13013_v0 }
  0x6b   : > { %498 = vst.msk [vmem:[#allocation2 + $0x6c8] sm:$0xff] %vm279_vm0, %v13013_v0  ;;  %499 = vst.msk [vmem:[#allocation2 + $0x6d0] sm:$0xff] %vm279_vm0, %v13013_v0 }
  0x6c   : > { %500 = vst.msk [vmem:[#allocation2 + $0x6d8] sm:$0xff] %vm279_vm0, %v13013_v0  ;;  %501 = vst.msk [vmem:[#allocation2 + $0x6e0] sm:$0xff] %vm279_vm0, %v13013_v0 }
  0x6d   : > { %502 = vst.msk [vmem:[#allocation2 + $0x6e8] sm:$0xff] %vm279_vm0, %v13013_v0  ;;  %503 = vst.msk [vmem:[#allocation2 + $0x6f0] sm:$0xff] %vm279_vm0, %v13013_v0 }
  0x6e   : > { %505 = vst.msk [vmem:[#allocation2 + $0x700] sm:$0xff] %vm279_vm0, %v13013_v0  ;;  %506 = vst.msk [vmem:[#allocation2 + $0x708] sm:$0xff] %vm279_vm0, %v13013_v0 }
  0x6f   : > { %507 = vst.msk [vmem:[#allocation2 + $0x710] sm:$0xff] %vm279_vm0, %v13013_v0  ;;  %508 = vst.msk [vmem:[#allocation2 + $0x718] sm:$0xff] %vm279_vm0, %v13013_v0 }
  0x70   : > { %509 = vst.msk [vmem:[#allocation2 + $0x720] sm:$0xff] %vm279_vm0, %v13013_v0  ;;  %510 = vst.msk [vmem:[#allocation2 + $0x728] sm:$0xff] %vm279_vm0, %v13013_v0 }
  0x71   : > { %512 = vst.msk [vmem:[#allocation2 + $0x738] sm:$0xff] %vm279_vm0, %v13013_v0  ;;  %513 = vst.msk [vmem:[#allocation2 + $0x740] sm:$0xff] %vm279_vm0, %v13013_v0 }
  0x72   : > { %514 = vst.msk [vmem:[#allocation2 + $0x748] sm:$0xff] %vm279_vm0, %v13013_v0  ;;  %515 = vst.msk [vmem:[#allocation2 + $0x750] sm:$0xff] %vm279_vm0, %v13013_v0 }
  0x73   : > { %516 = vst.msk [vmem:[#allocation2 + $0x758] sm:$0xff] %vm279_vm0, %v13013_v0  ;;  %517 = vst.msk [vmem:[#allocation2 + $0x760] sm:$0xff] %vm279_vm0, %v13013_v0 }
  0x74   : > { %519 = vst.msk [vmem:[#allocation2 + $0x770] sm:$0xff] %vm279_vm0, %v13013_v0  ;;  %520 = vst.msk [vmem:[#allocation2 + $0x778] sm:$0xff] %vm279_vm0, %v13013_v0 }
  0x75   : > { %521 = vst.msk [vmem:[#allocation2 + $0x780] sm:$0xff] %vm279_vm0, %v13013_v0  ;;  %522 = vst.msk [vmem:[#allocation2 + $0x788] sm:$0xff] %vm279_vm0, %v13013_v0 }
  0x76   : > { %523 = vst.msk [vmem:[#allocation2 + $0x790] sm:$0xff] %vm279_vm0, %v13013_v0  ;;  %524 = vst.msk [vmem:[#allocation2 + $0x798] sm:$0xff] %vm279_vm0, %v13013_v0 }
  0x77   : > { %526 = vst.msk [vmem:[#allocation2 + $0x7a8] sm:$0xff] %vm279_vm0, %v13013_v0  ;;  %527 = vst.msk [vmem:[#allocation2 + $0x7b0] sm:$0xff] %vm279_vm0, %v13013_v0 }
  0x78   : > { %528 = vst.msk [vmem:[#allocation2 + $0x7b8] sm:$0xff] %vm279_vm0, %v13013_v0  ;;  %529 = vst.msk [vmem:[#allocation2 + $0x7c0] sm:$0xff] %vm279_vm0, %v13013_v0 }
  0x79   : > { %530 = vst.msk [vmem:[#allocation2 + $0x7c8] sm:$0xff] %vm279_vm0, %v13013_v0  ;;  %531 = vst.msk [vmem:[#allocation2 + $0x7d0] sm:$0xff] %vm279_vm0, %v13013_v0 }
  0x7a   : > { %533 = vst.msk [vmem:[#allocation2 + $0x7e0] sm:$0xff] %vm279_vm0, %v13013_v0  ;;  %534 = vst.msk [vmem:[#allocation2 + $0x7e8] sm:$0xff] %vm279_vm0, %v13013_v0 }
  0x7b   : > { %535 = vst.msk [vmem:[#allocation2 + $0x7f0] sm:$0xff] %vm279_vm0, %v13013_v0  ;;  %536 = vst.msk [vmem:[#allocation2 + $0x7f8] sm:$0xff] %vm279_vm0, %v13013_v0 }
  0x7c   : > { %537 = vst.msk [vmem:[#allocation2 + $0x800] sm:$0xff] %vm279_vm0, %v13013_v0  ;;  %538 = vst.msk [vmem:[#allocation2 + $0x808] sm:$0xff] %vm279_vm0, %v13013_v0 }
  0x7d   : > { %540 = vst.msk [vmem:[#allocation2 + $0x818] sm:$0xff] %vm279_vm0, %v13013_v0  ;;  %541 = vst.msk [vmem:[#allocation2 + $0x820] sm:$0xff] %vm279_vm0, %v13013_v0 }
  0x7e   : > { %542 = vst.msk [vmem:[#allocation2 + $0x828] sm:$0xff] %vm279_vm0, %v13013_v0  ;;  %543 = vst.msk [vmem:[#allocation2 + $0x830] sm:$0xff] %vm279_vm0, %v13013_v0 }
  0x7f   : > { %544 = vst.msk [vmem:[#allocation2 + $0x838] sm:$0xff] %vm279_vm0, %v13013_v0  ;;  %545 = vst.msk [vmem:[#allocation2 + $0x840] sm:$0xff] %vm279_vm0, %v13013_v0 }
  0x80   : > { %547 = vst.msk [vmem:[#allocation2 + $0x850] sm:$0xff] %vm279_vm0, %v13013_v0  ;;  %548 = vst.msk [vmem:[#allocation2 + $0x858] sm:$0xff] %vm279_vm0, %v13013_v0 }
  0x81   : > { %549 = vst.msk [vmem:[#allocation2 + $0x860] sm:$0xff] %vm279_vm0, %v13013_v0  ;;  %550 = vst.msk [vmem:[#allocation2 + $0x868] sm:$0xff] %vm279_vm0, %v13013_v0 }
  0x82   : > { %551 = vst.msk [vmem:[#allocation2 + $0x870] sm:$0xff] %vm279_vm0, %v13013_v0  ;;  %552 = vst.msk [vmem:[#allocation2 + $0x878] sm:$0xff] %vm279_vm0, %v13013_v0 }
  0x83   : > { %554 = vst.msk [vmem:[#allocation2 + $0x888] sm:$0xff] %vm279_vm0, %v13013_v0  ;;  %555 = vst.msk [vmem:[#allocation2 + $0x890] sm:$0xff] %vm279_vm0, %v13013_v0 }
  0x84   : > { %556 = vst.msk [vmem:[#allocation2 + $0x898] sm:$0xff] %vm279_vm0, %v13013_v0  ;;  %557 = vst.msk [vmem:[#allocation2 + $0x8a0] sm:$0xff] %vm279_vm0, %v13013_v0 }
  0x85   : > { %558 = vst.msk [vmem:[#allocation2 + $0x8a8] sm:$0xff] %vm279_vm0, %v13013_v0  ;;  %559 = vst.msk [vmem:[#allocation2 + $0x8b0] sm:$0xff] %vm279_vm0, %v13013_v0 }
  0x86   : > { %561 = vst.msk [vmem:[#allocation2 + $0x8c0] sm:$0xff] %vm279_vm0, %v13013_v0  ;;  %562 = vst.msk [vmem:[#allocation2 + $0x8c8] sm:$0xff] %vm279_vm0, %v13013_v0 }
  0x87   : > { %563 = vst.msk [vmem:[#allocation2 + $0x8d0] sm:$0xff] %vm279_vm0, %v13013_v0  ;;  %564 = vst.msk [vmem:[#allocation2 + $0x8d8] sm:$0xff] %vm279_vm0, %v13013_v0 }
  0x88   : > { %565 = vst.msk [vmem:[#allocation2 + $0x8e0] sm:$0xff] %vm279_vm0, %v13013_v0  ;;  %566 = vst.msk [vmem:[#allocation2 + $0x8e8] sm:$0xff] %vm279_vm0, %v13013_v0  ;;  %v9220_v30 = vpop.permute.xlu1 %1043 }
  0x89   : > { %568 = vst.msk [vmem:[#allocation2 + $0x8f8] sm:$0xff] %vm279_vm0, %v13013_v0  ;;  %569 = vst.msk [vmem:[#allocation2 + $0x900] sm:$0xff] %vm279_vm0, %v13013_v0 }
  0x8a   : > { %570 = vst.msk [vmem:[#allocation2 + $0x908] sm:$0xff] %vm279_vm0, %v13013_v0  ;;  %571 = vst.msk [vmem:[#allocation2 + $0x910] sm:$0xff] %vm279_vm0, %v13013_v0 }
  0x8b   : > { %572 = vst.msk [vmem:[#allocation2 + $0x918] sm:$0xff] %vm279_vm0, %v13013_v0  ;;  %573 = vst.msk [vmem:[#allocation2 + $0x920] sm:$0xff] %vm279_vm0, %v13013_v0 }
  0x8c   : > { %575 = vst.msk [vmem:[#allocation2 + $0x930] sm:$0xff] %vm279_vm0, %v13013_v0  ;;  %576 = vst.msk [vmem:[#allocation2 + $0x938] sm:$0xff] %vm279_vm0, %v13013_v0 }
  0x8d   : > { %577 = vst.msk [vmem:[#allocation2 + $0x940] sm:$0xff] %vm279_vm0, %v13013_v0  ;;  %578 = vst.msk [vmem:[#allocation2 + $0x948] sm:$0xff] %vm279_vm0, %v13013_v0 }
  0x8e   : > { %579 = vst.msk [vmem:[#allocation2 + $0x950] sm:$0xff] %vm279_vm0, %v13013_v0  ;;  %580 = vst.msk [vmem:[#allocation2 + $0x958] sm:$0xff] %vm279_vm0, %v13013_v0 }
  0x8f   : > { %582 = vst.msk [vmem:[#allocation2 + $0x968] sm:$0xff] %vm279_vm0, %v13013_v0  ;;  %583 = vst.msk [vmem:[#allocation2 + $0x970] sm:$0xff] %vm279_vm0, %v13013_v0 }
  0x90   : > { %584 = vst.msk [vmem:[#allocation2 + $0x978] sm:$0xff] %vm279_vm0, %v13013_v0  ;;  %585 = vst.msk [vmem:[#allocation2 + $0x980] sm:$0xff] %vm279_vm0, %v13013_v0 }
  0x91   : > { %586 = vst.msk [vmem:[#allocation2 + $0x988] sm:$0xff] %vm279_vm0, %v13013_v0  ;;  %587 = vst.msk [vmem:[#allocation2 + $0x990] sm:$0xff] %vm279_vm0, %v13013_v0 }
  0x92   : > { %589 = vst.msk [vmem:[#allocation2 + $0x9a0] sm:$0xff] %vm279_vm0, %v13013_v0  ;;  %590 = vst.msk [vmem:[#allocation2 + $0x9a8] sm:$0xff] %vm279_vm0, %v13013_v0 }
  0x93   : > { %591 = vst.msk [vmem:[#allocation2 + $0x9b0] sm:$0xff] %vm279_vm0, %v13013_v0  ;;  %592 = vst.msk [vmem:[#allocation2 + $0x9b8] sm:$0xff] %vm279_vm0, %v13013_v0 }
  0x94   : > { %593 = vst.msk [vmem:[#allocation2 + $0x9c0] sm:$0xff] %vm279_vm0, %v13013_v0  ;;  %594 = vst.msk [vmem:[#allocation2 + $0x9c8] sm:$0xff] %vm279_vm0, %v13013_v0 }
  0x95   : > { %596 = vst.msk [vmem:[#allocation2 + $0x9d8] sm:$0xff] %vm279_vm0, %v13013_v0  ;;  %597 = vst.msk [vmem:[#allocation2 + $0x9e0] sm:$0xff] %vm279_vm0, %v13013_v0 }
  0x96   : > { %598 = vst.msk [vmem:[#allocation2 + $0x9e8] sm:$0xff] %vm279_vm0, %v13013_v0  ;;  %599 = vst.msk [vmem:[#allocation2 + $0x9f0] sm:$0xff] %vm279_vm0, %v13013_v0 }
  0x97   : > { %600 = vst.msk [vmem:[#allocation2 + $0x9f8] sm:$0xff] %vm279_vm0, %v13013_v0  ;;  %601 = vst.msk [vmem:[#allocation2 + $0xa00] sm:$0xff] %vm279_vm0, %v13013_v0 }
  0x98   : > { %603 = vst.msk [vmem:[#allocation2 + $0xa10] sm:$0xff] %vm279_vm0, %v13013_v0  ;;  %604 = vst.msk [vmem:[#allocation2 + $0xa18] sm:$0xff] %vm279_vm0, %v13013_v0 }
  0x99   : > { %605 = vst.msk [vmem:[#allocation2 + $0xa20] sm:$0xff] %vm279_vm0, %v13013_v0  ;;  %606 = vst.msk [vmem:[#allocation2 + $0xa28] sm:$0xff] %vm279_vm0, %v13013_v0 }
  0x9a   : > { %607 = vst.msk [vmem:[#allocation2 + $0xa30] sm:$0xff] %vm279_vm0, %v13013_v0  ;;  %608 = vst.msk [vmem:[#allocation2 + $0xa38] sm:$0xff] %vm279_vm0, %v13013_v0 }
  0x9b   : > { %610 = vst.msk [vmem:[#allocation2 + $0xa48] sm:$0xff] %vm279_vm0, %v13013_v0  ;;  %611 = vst.msk [vmem:[#allocation2 + $0xa50] sm:$0xff] %vm279_vm0, %v13013_v0 }
  0x9c   : > { %612 = vst.msk [vmem:[#allocation2 + $0xa58] sm:$0xff] %vm279_vm0, %v13013_v0  ;;  %613 = vst.msk [vmem:[#allocation2 + $0xa60] sm:$0xff] %vm279_vm0, %v13013_v0 }
  0x9d   : > { %614 = vst.msk [vmem:[#allocation2 + $0xa68] sm:$0xff] %vm279_vm0, %v13013_v0  ;;  %615 = vst.msk [vmem:[#allocation2 + $0xa70] sm:$0xff] %vm279_vm0, %v13013_v0 }
  0x9e   : > { %617 = vst.msk [vmem:[#allocation2 + $0xa80] sm:$0xff] %vm279_vm0, %v13013_v0  ;;  %618 = vst.msk [vmem:[#allocation2 + $0xa88] sm:$0xff] %vm279_vm0, %v13013_v0 }
  0x9f   : > { %619 = vst.msk [vmem:[#allocation2 + $0xa90] sm:$0xff] %vm279_vm0, %v13013_v0  ;;  %620 = vst.msk [vmem:[#allocation2 + $0xa98] sm:$0xff] %vm279_vm0, %v13013_v0 }
  0xa0   : > { %621 = vst.msk [vmem:[#allocation2 + $0xaa0] sm:$0xff] %vm279_vm0, %v13013_v0  ;;  %622 = vst.msk [vmem:[#allocation2 + $0xaa8] sm:$0xff] %vm279_vm0, %v13013_v0 }
  0xa1   : > { %624 = vst.msk [vmem:[#allocation2 + $0xab8] sm:$0xff] %vm279_vm0, %v13013_v0  ;;  %625 = vst.msk [vmem:[#allocation2 + $0xac0] sm:$0xff] %vm279_vm0, %v13013_v0 }
  0xa2   : > { %626 = vst.msk [vmem:[#allocation2 + $0xac8] sm:$0xff] %vm279_vm0, %v13013_v0  ;;  %627 = vst.msk [vmem:[#allocation2 + $0xad0] sm:$0xff] %vm279_vm0, %v13013_v0 }
  0xa3   : > { %628 = vst.msk [vmem:[#allocation2 + $0xad8] sm:$0xff] %vm279_vm0, %v13013_v0  ;;  %629 = vst.msk [vmem:[#allocation2 + $0xae0] sm:$0xff] %vm279_vm0, %v13013_v0 }
  0xa4   : > { %631 = vst.msk [vmem:[#allocation2 + $0xaf0] sm:$0xff] %vm279_vm0, %v13013_v0  ;;  %632 = vst.msk [vmem:[#allocation2 + $0xaf8] sm:$0xff] %vm279_vm0, %v13013_v0 }
  0xa5   : > { %633 = vst.msk [vmem:[#allocation2 + $0xb00] sm:$0xff] %vm279_vm0, %v13013_v0  ;;  %634 = vst.msk [vmem:[#allocation2 + $0xb08] sm:$0xff] %vm279_vm0, %v13013_v0 }
  0xa6   : > { %635 = vst.msk [vmem:[#allocation2 + $0xb10] sm:$0xff] %vm279_vm0, %v13013_v0  ;;  %636 = vst.msk [vmem:[#allocation2 + $0xb18] sm:$0xff] %vm279_vm0, %v13013_v0 }
  0xa7   : > { %638 = vst.msk [vmem:[#allocation2 + $0xb28] sm:$0xff] %vm279_vm0, %v13013_v0  ;;  %639 = vst.msk [vmem:[#allocation2 + $0xb30] sm:$0xff] %vm279_vm0, %v13013_v0 }
  0xa8   : > { %640 = vst.msk [vmem:[#allocation2 + $0xb38] sm:$0xff] %vm279_vm0, %v13013_v0  ;;  %641 = vst.msk [vmem:[#allocation2 + $0xb40] sm:$0xff] %vm279_vm0, %v13013_v0 }
  0xa9   : > { %642 = vst.msk [vmem:[#allocation2 + $0xb48] sm:$0xff] %vm279_vm0, %v13013_v0  ;;  %643 = vst.msk [vmem:[#allocation2 + $0xb50] sm:$0xff] %vm279_vm0, %v13013_v0 }
  0xaa   : > { %679 = vst.msk [vmem:[#allocation2 + $0x40a] sm:$0xff] %vm279_vm0, %v646_v1  ;;  %678 = vst.msk [vmem:[#allocation2 + $0x402] sm:$0xff] %vm279_vm0, %v645_v2  ;;  %v783_v2 = vld [vmem:[#allocation2 + $0x2c0] sm:$0xff] }
  0xab   : > { %681 = vst.msk [vmem:[#allocation2 + $0x442] sm:$0xff] %vm279_vm0, %v648_v3  ;;  %680 = vst.msk [vmem:[#allocation2 + $0x43a] sm:$0xff] %vm279_vm0, %v647_v4  ;;  %v782_v3 = vld [vmem:[#allocation2 + $0x2b8] sm:$0xff] }
  0xac   : > { %683 = vst.msk [vmem:[#allocation2 + $0x47a] sm:$0xff] %vm279_vm0, %v650_v5  ;;  %682 = vst.msk [vmem:[#allocation2 + $0x472] sm:$0xff] %vm279_vm0, %v649_v6  ;;  %v785_v4 = vld [vmem:[#allocation2 + $0x2f8] sm:$0xff]  ;;  %v784_v5 = vld [vmem:[#allocation2 + $0x2f0] sm:$0xff] }
  0xad   : > { %685 = vst.msk [vmem:[#allocation2 + $0x4b2] sm:$0xff] %vm279_vm0, %v652_v11  ;;  %684 = vst.msk [vmem:[#allocation2 + $0x4aa] sm:$0xff] %vm279_vm0, %v651_v12  ;;  %v787_v6 = vld [vmem:[#allocation2 + $0x330] sm:$0xff]  ;;  %v790_v11 = vld [vmem:[#allocation2 + $0x398] sm:$0xff] }
  0xae   : > { %687 = vst.msk [vmem:[#allocation2 + $0x4ea] sm:$0xff] %vm279_vm0, %v654_v13  ;;  %686 = vst.msk [vmem:[#allocation2 + $0x4e2] sm:$0xff] %vm279_vm0, %v653_v14  ;;  %v793_v12 = vld [vmem:[#allocation2 + $0x3d8] sm:$0xff]  ;;  %v792_v13 = vld [vmem:[#allocation2 + $0x3d0] sm:$0xff]  ;;  %v9222_v31 = vpop.permute.xlu0 %1039 }
  0xaf   : > { %689 = vst.msk [vmem:[#allocation2 + $0x522] sm:$0xff] %vm279_vm0, %v656_v15  ;;  %688 = vst.msk [vmem:[#allocation2 + $0x51a] sm:$0xff] %vm279_vm0, %v655_v19 }
  0xb0   : > { %691 = vst.msk [vmem:[#allocation2 + $0x55a] sm:$0xff] %vm279_vm0, %v658_v20  ;;  %690 = vst.msk [vmem:[#allocation2 + $0x552] sm:$0xff] %vm279_vm0, %v657_v21 }
  0xb1   : > { %693 = vst.msk [vmem:[#allocation2 + $0x592] sm:$0xff] %vm279_vm0, %v660_v23  ;;  %692 = vst.msk [vmem:[#allocation2 + $0x58a] sm:$0xff] %vm279_vm0, %v659_v24  ;;  %v9044_v33 = vld [vmem:[#allocation2 + $0x40a] sm:$0xff]  ;;  %v9046_v34 = vld [vmem:[#allocation2 + $0x402] sm:$0xff] }
  0xb2   : > { %695 = vst.msk [vmem:[#allocation2 + $0x5ca] sm:$0xff] %vm279_vm0, %v662_v25  ;;  %694 = vst.msk [vmem:[#allocation2 + $0x5c2] sm:$0xff] %vm279_vm0, %v661_v26  ;;  %1065 = vrot.lane.b32.xlu1 %v9044_v33, %s8292_s8  ;;  %1063 = vrot.lane.b32.xlu0 %v9046_v34, %s8292_s8  ;;  %v9052_v35 = vld [vmem:[#allocation2 + $0x442] sm:$0xff]  ;;  %v9054_v36 = vld [vmem:[#allocation2 + $0x43a] sm:$0xff] }
  0xb3   : > { %697 = vst.msk [vmem:[#allocation2 + $0x602] sm:$0xff] %vm279_vm0, %v664_v27  ;;  %696 = vst.msk [vmem:[#allocation2 + $0x5fa] sm:$0xff] %vm279_vm0, %v663_v28  ;;  %v9060_v37 = vld [vmem:[#allocation2 + $0x47a] sm:$0xff]  ;;  %v9062_v38 = vld [vmem:[#allocation2 + $0x472] sm:$0xff] }
  0xb4   : > { %v9068_v39 = vld [vmem:[#allocation2 + $0x4b2] sm:$0xff]  ;;  %v9070_v40 = vld [vmem:[#allocation2 + $0x4aa] sm:$0xff]  ;;  %698 = vst.msk [vmem:[#allocation2 + $0x632] sm:$0xff] %vm279_vm0, %v665_v41  ;;  %699 = vst.msk [vmem:[#allocation2 + $0x63a] sm:$0xff] %vm279_vm0, %v666_v42  ;;  %v9232_v42 = vpop.permute.xlu1 %1045 }
  0xb5   : > { %v9080_v44 = vld [vmem:[#allocation2 + $0x4ea] sm:$0xff]  ;;  %v9082_v45 = vld [vmem:[#allocation2 + $0x4e2] sm:$0xff]  ;;  %700 = vst.msk [vmem:[#allocation2 + $0x66a] sm:$0xff] %vm279_vm0, %v667_v43  ;;  %701 = vst.msk [vmem:[#allocation2 + $0x672] sm:$0xff] %vm279_vm0, %v668_v46  ;;  %v9234_v43 = vpop.permute.xlu0 %1041 }
  0xb6   : > { %1069 = vrot.lane.b32.xlu1 %v9052_v35, %s8292_s8  ;;  %1067 = vrot.lane.b32.xlu0 %v9054_v36, %s8292_s8  ;;  %702 = vst.msk [vmem:[#allocation2 + $0x6a2] sm:$0xff] %vm279_vm0, %v669_v47  ;;  %703 = vst.msk [vmem:[#allocation2 + $0x6aa] sm:$0xff] %vm279_vm0, %v670_v48  ;;  %v9096_v49 = vld [vmem:[#allocation2 + $0x522] sm:$0xff]  ;;  %v9098_v50 = vld [vmem:[#allocation2 + $0x51a] sm:$0xff] }
  0xb7   : > { %704 = vst.msk [vmem:[#allocation2 + $0x6da] sm:$0xff] %vm279_vm0, %v671_v51  ;;  %705 = vst.msk [vmem:[#allocation2 + $0x6e2] sm:$0xff] %vm279_vm0, %v672_v52  ;;  %v9108_v53 = vld [vmem:[#allocation2 + $0x55a] sm:$0xff]  ;;  %v9110_v54 = vld [vmem:[#allocation2 + $0x552] sm:$0xff] }
  0xb8   : > { %706 = vst.msk [vmem:[#allocation2 + $0x712] sm:$0xff] %vm279_vm0, %v673_v55  ;;  %v9119_v57 = vld [vmem:[#allocation2 + $0x592] sm:$0xff]  ;;  %v9121_v58 = vld [vmem:[#allocation2 + $0x58a] sm:$0xff]  ;;  %707 = vst.msk [vmem:[#allocation2 + $0x71a] sm:$0xff] %vm279_vm0, %v674_v56  ;;  %v9244_v48 = vpop.permute.xlu1 %1049 }
  0xb9   : > { %708 = vst.msk [vmem:[#allocation2 + $0x74a] sm:$0xff] %vm279_vm0, %v675_v59  ;;  %v9131_v61 = vld [vmem:[#allocation2 + $0x5ca] sm:$0xff]  ;;  %v9133_v62 = vld [vmem:[#allocation2 + $0x5c2] sm:$0xff]  ;;  %709 = vst.msk [vmem:[#allocation2 + $0x752] sm:$0xff] %vm279_vm0, %v676_v60  ;;  %v9246_v51 = vpop.permute.xlu0 %1047 }
  0xba   : > { %1073 = vrot.lane.b32.xlu1 %v9060_v37, %s8292_s8  ;;  %1071 = vrot.lane.b32.xlu0 %v9062_v38, %s8292_s8  ;;  %v9140_v63 = vld [vmem:[#allocation2 + $0x602] sm:$0xff]  ;;  %v9142_v1 = vld [vmem:[#allocation2 + $0x5fa] sm:$0xff]  ;;  %v9160_v14 = vld [vmem:[#allocation2 + $0x410] sm:$0xff]  ;;  %13044 = vst [vmem:[#allocation3_spill] sm:$0xff] %v9220_v30 }
  0xbb   : > { %v9162_v15 = vld [vmem:[#allocation2 + $0x408] sm:$0xff]  ;;  %v9170_v17 = vld [vmem:[#allocation2 + $0x440] sm:$0xff]  ;;  %v9178_v19 = vld [vmem:[#allocation2 + $0x478] sm:$0xff]  ;;  %13045 = vst [vmem:[#allocation4_spill] sm:$0xff] %v9222_v31 }
  0xbc   : > { %v9168_v16 = vld [vmem:[#allocation2 + $0x448] sm:$0xff]  ;;  %v9176_v18 = vld [vmem:[#allocation2 + $0x480] sm:$0xff]  ;;  %v9184_v20 = vld [vmem:[#allocation2 + $0x4b8] sm:$0xff]  ;;  %13046 = vst [vmem:[#allocation5_spill] sm:$0xff] %v9232_v42  ;;  %v9252_v56 = vpop.permute.xlu1 %1053 }
  0xbd   : > { %v9186_v21 = vld [vmem:[#allocation2 + $0x4b0] sm:$0xff]  ;;  %v9194_v23 = vld [vmem:[#allocation2 + $0x4e8] sm:$0xff]  ;;  %v9202_v25 = vld [vmem:[#allocation2 + $0x520] sm:$0xff]  ;;  %13047 = vst [vmem:[#allocation6_spill] sm:$0xff] %v9234_v43  ;;  %v9254_v59 = vpop.permute.xlu0 %1051 }
  0xbe   : > { %1077 = vrot.lane.b32.xlu1 %v9068_v39, %s8292_s8  ;;  %1075 = vrot.lane.b32.xlu0 %v9070_v40, %s8292_s8  ;;  %v9192_v22 = vld [vmem:[#allocation2 + $0x4f0] sm:$0xff]  ;;  %v9200_v24 = vld [vmem:[#allocation2 + $0x528] sm:$0xff]  ;;  %v9208_v26 = vld [vmem:[#allocation2 + $0x560] sm:$0xff]  ;;  %13048 = vst [vmem:[#allocation7_spill] sm:$0xff] %v9244_v48 }
  0xbf   : > { %v9210_v27 = vld [vmem:[#allocation2 + $0x558] sm:$0xff]  ;;  %v9218_v29 = vld [vmem:[#allocation2 + $0x590] sm:$0xff]  ;;  %v9230_v41 = vld [vmem:[#allocation2 + $0x5c8] sm:$0xff]  ;;  %13049 = vst [vmem:[#allocation8_spill] sm:$0xff] %v9246_v51 }
  0xc0   : > { %v9216_v28 = vld [vmem:[#allocation2 + $0x598] sm:$0xff]  ;;  %v9228_v32 = vld [vmem:[#allocation2 + $0x5d0] sm:$0xff]  ;;  %v9240_v46 = vld [vmem:[#allocation2 + $0x608] sm:$0xff]  ;;  %13050 = vst [vmem:[#allocation9_spill] sm:$0xff] %v9252_v56 }
  0xc1   : > { %v9242_v47 = vld [vmem:[#allocation2 + $0x600] sm:$0xff]  ;;  %13051 = vst [vmem:[#allocation10_spill] sm:$0xff] %v9254_v59 }
  0xc2   : > { %1081 = vrot.lane.b32.xlu1 %v9080_v44, %s8292_s8  ;;  %1079 = vrot.lane.b32.xlu0 %v9082_v45, %s8292_s8  ;;  %v815_v52 = vld [vmem:[#allocation2 + $0x404] sm:$0xff]  ;;  %v814_v55 = vld [vmem:[#allocation2 + $0x3fc] sm:$0xff] }
  0xc3   : > { %v817_v60 = vld [vmem:[#allocation2 + $0x43c] sm:$0xff] }
  0xc6   : > { %1085 = vrot.lane.b32.xlu1 %v9096_v49, %s8292_s8  ;;  %1083 = vrot.lane.b32.xlu0 %v9098_v50, %s8292_s8 }
  0xca   : > { %1089 = vrot.lane.b32.xlu1 %v9108_v53, %s8292_s8  ;;  %1087 = vrot.lane.b32.xlu0 %v9110_v54, %s8292_s8 }
  0xce   : > { %1093 = vrot.lane.b32.xlu1 %v9119_v57, %s8292_s8  ;;  %1091 = vrot.lane.b32.xlu0 %v9121_v58, %s8292_s8 }
  0xd2   : > { %1097 = vrot.lane.b32.xlu1 %v9131_v61, %s8292_s8  ;;  %1095 = vrot.lane.b32.xlu0 %v9133_v62, %s8292_s8 }
  0xd6   : > { %1101 = vrot.lane.b32.xlu1 %v9140_v63, %s8292_s8  ;;  %1099 = vrot.lane.b32.xlu0 %v9142_v1, %s8292_s8 }
  0xda   : > { %1169 = vrot.lane.b32.xlu1 %v783_v2, %s8293_s9  ;;  %1167 = vrot.lane.b32.xlu0 %v782_v3, %s8293_s9  ;;  %v816_v2 = vld [vmem:[#allocation2 + $0x434] sm:$0xff]  ;;  %v9258_v3 = vpop.permute.xlu1 %1057 }
  0xdb   : > { %13052 = vst [vmem:[#allocation11_spill] sm:$0xff] %v9258_v3 }
  0xde   : > { %1173 = vrot.lane.b32.xlu1 %v785_v4, %s8293_s9  ;;  %1171 = vrot.lane.b32.xlu0 %v784_v5, %s8293_s9  ;;  %v9260_v4 = vpop.permute.xlu0 %1055  ;;  %v819_v5 = vld [vmem:[#allocation2 + $0x474] sm:$0xff] }
  0xdf   : > { %13053 = vst [vmem:[#allocation12_spill] sm:$0xff] %v9260_v4 }
  0xe2   : > { %1177 = vrot.lane.b32.xlu1 %v787_v6, %s8293_s9  ;;  %1175 = vrot.lane.b32.xlu0 %v786_v7, %s8293_s9  ;;  %v818_v6 = vld [vmem:[#allocation2 + $0x46c] sm:$0xff]  ;;  %v9264_v7 = vpop.permute.xlu1 %1061 }
  0xe3   : > { %13054 = vst [vmem:[#allocation13_spill] sm:$0xff] %v9264_v7 }
  0xe6   : > { %1181 = vrot.lane.b32.xlu1 %v789_v8, %s8293_s9  ;;  %1179 = vrot.lane.b32.xlu0 %v788_v9, %s8293_s9  ;;  %v9266_v8 = vpop.permute.xlu0 %1059  ;;  %v821_v9 = vld [vmem:[#allocation2 + $0x4ac] sm:$0xff] }
  0xe7   : > { %13055 = vst [vmem:[#allocation14_spill] sm:$0xff] %v9266_v8 }
  0xea   : > { %1185 = vrot.lane.b32.xlu1 %v791_v10, %s8293_s9  ;;  %1183 = vrot.lane.b32.xlu0 %v790_v11, %s8293_s9  ;;  %v820_v10 = vld [vmem:[#allocation2 + $0x4a4] sm:$0xff] }
  0xee   : > { %1189 = vrot.lane.b32.xlu1 %v793_v12, %s8293_s9  ;;  %1187 = vrot.lane.b32.xlu0 %v792_v13, %s8293_s9  ;;  %v823_v13 = vld [vmem:[#allocation2 + $0x4e4] sm:$0xff] }
  0xf2   : > { %1193 = vrot.lane.b32.xlu1 %v9160_v14, %s8293_s9  ;;  %1191 = vrot.lane.b32.xlu0 %v9162_v15, %s8293_s9 }
  0xf6   : > { %1197 = vrot.lane.b32.xlu1 %v9168_v16, %s8293_s9  ;;  %1195 = vrot.lane.b32.xlu0 %v9170_v17, %s8293_s9 }
  0xfa   : > { %1201 = vrot.lane.b32.xlu1 %v9176_v18, %s8293_s9  ;;  %1199 = vrot.lane.b32.xlu0 %v9178_v19, %s8293_s9 }
  0xfe   : > { %1205 = vrot.lane.b32.xlu1 %v9184_v20, %s8293_s9  ;;  %1203 = vrot.lane.b32.xlu0 %v9186_v21, %s8293_s9 }
 0x102   : > { %1209 = vrot.lane.b32.xlu1 %v9192_v22, %s8293_s9  ;;  %1207 = vrot.lane.b32.xlu0 %v9194_v23, %s8293_s9 }
 0x106   : > { %1213 = vrot.lane.b32.xlu1 %v9200_v24, %s8293_s9  ;;  %1211 = vrot.lane.b32.xlu0 %v9202_v25, %s8293_s9 }
 0x10a   : > { %1217 = vrot.lane.b32.xlu1 %v9208_v26, %s8293_s9  ;;  %1215 = vrot.lane.b32.xlu0 %v9210_v27, %s8293_s9 }
 0x10e   : > { %1221 = vrot.lane.b32.xlu1 %v9216_v28, %s8293_s9  ;;  %1219 = vrot.lane.b32.xlu0 %v9218_v29, %s8293_s9 }
 0x112   : > { %1225 = vrot.lane.b32.xlu1 %v9228_v32, %s8293_s9  ;;  %1223 = vrot.lane.b32.xlu0 %v9230_v41, %s8293_s9 }
 0x116   : > { %1229 = vrot.lane.b32.xlu1 %v9240_v46, %s8293_s9  ;;  %1227 = vrot.lane.b32.xlu0 %v9242_v47, %s8293_s9 }
 0x11a   : > { %1297 = vrot.lane.b32.xlu1 %v815_v52, %s8294_s10  ;;  %1295 = vrot.lane.b32.xlu0 %v814_v55, %s8294_s10  ;;  %v822_v52 = vld [vmem:[#allocation2 + $0x4dc] sm:$0xff] }
 0x11e   : > { %1301 = vrot.lane.b32.xlu1 %v817_v60, %s8294_s10  ;;  %1299 = vrot.lane.b32.xlu0 %v816_v2, %s8294_s10  ;;  %v825_v2 = vld [vmem:[#allocation2 + $0x51c] sm:$0xff] }
 0x122   : > { %1305 = vrot.lane.b32.xlu1 %v819_v5, %s8294_s10  ;;  %1303 = vrot.lane.b32.xlu0 %v818_v6, %s8294_s10  ;;  %v824_v5 = vld [vmem:[#allocation2 + $0x514] sm:$0xff] }
 0x124   : > { %v9270_v11 = vpop.permute.xlu1 %1065  ;;  %v9272_v12 = vpop.permute.xlu0 %1063 }
 0x125   : > { %13056 = vst [vmem:[#allocation15_spill] sm:$0xff] %v9270_v11  ;;  %13057 = vst [vmem:[#allocation16_spill] sm:$0xff] %v9272_v12 }
 0x126   : > { %1309 = vrot.lane.b32.xlu1 %v821_v9, %s8294_s10  ;;  %1307 = vrot.lane.b32.xlu0 %v820_v10, %s8294_s10  ;;  %v9288_v9 = vld [vmem:[#allocation2 + $0x554] sm:$0xff]  ;;  %v9290_v10 = vld [vmem:[#allocation2 + $0x54c] sm:$0xff] }
 0x128   : > { %v9276_v55 = vpop.permute.xlu1 %1069  ;;  %v9278_v60 = vpop.permute.xlu0 %1067 }
 0x129   : > { %13058 = vst [vmem:[#allocation17_spill] sm:$0xff] %v9276_v55  ;;  %13059 = vst [vmem:[#allocation18_spill] sm:$0xff] %v9278_v60 }
 0x12a   : > { %1313 = vrot.lane.b32.xlu1 %v823_v13, %s8294_s10  ;;  %1311 = vrot.lane.b32.xlu0 %v822_v52, %s8294_s10  ;;  %v9300_v13 = vld [vmem:[#allocation2 + $0x58c] sm:$0xff]  ;;  %v9302_v52 = vld [vmem:[#allocation2 + $0x584] sm:$0xff] }
 0x12c   : > { %v9282_v6 = vpop.permute.xlu1 %1073  ;;  %v9284_v0 = vpop.permute.xlu0 %1071 }
 0x12d   : > { %13060 = vst [vmem:[#allocation19_spill] sm:$0xff] %v9282_v6  ;;  %13061 = vst [vmem:[#allocation20_spill] sm:$0xff] %v9284_v0 }
 0x12e   : > { %1317 = vrot.lane.b32.xlu1 %v825_v2, %s8294_s10  ;;  %1315 = vrot.lane.b32.xlu0 %v824_v5, %s8294_s10 }
 0x130   : > { %v9292_v55 = vpop.permute.xlu1 %1077  ;;  %v9294_v60 = vpop.permute.xlu0 %1075 }
 0x131   : > { %13062 = vst [vmem:[#allocation21_spill] sm:$0xff] %v9292_v55  ;;  %13063 = vst [vmem:[#allocation22_spill] sm:$0xff] %v9294_v60  ;;  %v9312_v60 = vld [vmem:[#allocation2 + $0x5c4] sm:$0xff]  ;;  %v9314_v55 = vld [vmem:[#allocation2 + $0x5bc] sm:$0xff] }
 0x132   : > { %1321 = vrot.lane.b32.xlu1 %v9288_v9, %s8294_s10  ;;  %1319 = vrot.lane.b32.xlu0 %v9290_v10, %s8294_s10 }
 0x134   : > { %v9304_v2 = vpop.permute.xlu1 %1081  ;;  %v9306_v5 = vpop.permute.xlu0 %1079 }
 0x135   : > { %13064 = vst [vmem:[#allocation23_spill] sm:$0xff] %v9304_v2  ;;  %13065 = vst [vmem:[#allocation24_spill] sm:$0xff] %v9306_v5  ;;  %v9324_v5 = vld [vmem:[#allocation2 + $0x5fc] sm:$0xff]  ;;  %v9326_v2 = vld [vmem:[#allocation2 + $0x5f4] sm:$0xff] }
 0x136   : > { %1325 = vrot.lane.b32.xlu1 %v9300_v13, %s8294_s10  ;;  %1323 = vrot.lane.b32.xlu0 %v9302_v52, %s8294_s10 }
 0x138   : > { %v9316_v0 = vpop.permute.xlu1 %1085  ;;  %v9318_v6 = vpop.permute.xlu0 %1083 }
 0x139   : > { %13066 = vst [vmem:[#allocation25_spill] sm:$0xff] %v9316_v0  ;;  %13067 = vst [vmem:[#allocation26_spill] sm:$0xff] %v9318_v6  ;;  %v9336_v6 = vld [vmem:[#allocation2 + $0x634] sm:$0xff]  ;;  %v9338_v0 = vld [vmem:[#allocation2 + $0x62c] sm:$0xff] }
 0x13a   : > { %1329 = vrot.lane.b32.xlu1 %v9312_v60, %s8294_s10  ;;  %1327 = vrot.lane.b32.xlu0 %v9314_v55, %s8294_s10 }
 0x13c   : > { %v9328_v12 = vpop.permute.xlu1 %1089  ;;  %v9330_v11 = vpop.permute.xlu0 %1087 }
 0x13d   : > { %13068 = vst [vmem:[#allocation27_spill] sm:$0xff] %v9328_v12  ;;  %13069 = vst [vmem:[#allocation28_spill] sm:$0xff] %v9330_v11  ;;  %v9348_v11 = vld [vmem:[#allocation2 + $0x66c] sm:$0xff]  ;;  %v9350_v12 = vld [vmem:[#allocation2 + $0x664] sm:$0xff] }
 0x13e   : > { %1333 = vrot.lane.b32.xlu1 %v9324_v5, %s8294_s10  ;;  %1331 = vrot.lane.b32.xlu0 %v9326_v2, %s8294_s10 }
 0x140   : > { %v9340_v8 = vpop.permute.xlu1 %1093  ;;  %v9342_v7 = vpop.permute.xlu0 %1091 }
 0x141   : > { %13070 = vst [vmem:[#allocation29_spill] sm:$0xff] %v9340_v8  ;;  %13071 = vst [vmem:[#allocation30_spill] sm:$0xff] %v9342_v7  ;;  %v9360_v7 = vld [vmem:[#allocation2 + $0x6a4] sm:$0xff]  ;;  %v9362_v8 = vld [vmem:[#allocation2 + $0x69c] sm:$0xff] }
 0x142   : > { %1337 = vrot.lane.b32.xlu1 %v9336_v6, %s8294_s10  ;;  %1335 = vrot.lane.b32.xlu0 %v9338_v0, %s8294_s10 }
 0x144   : > { %v9352_v4 = vpop.permute.xlu1 %1097  ;;  %v9354_v3 = vpop.permute.xlu0 %1095 }
 0x145   : > { %13072 = vst [vmem:[#allocation31_spill] sm:$0xff] %v9352_v4  ;;  %13073 = vst [vmem:[#allocation32_spill] sm:$0xff] %v9354_v3  ;;  %v9372_v3 = vld [vmem:[#allocation2 + $0x6dc] sm:$0xff]  ;;  %v9374_v4 = vld [vmem:[#allocation2 + $0x6d4] sm:$0xff] }
 0x146   : > { %1341 = vrot.lane.b32.xlu1 %v9348_v11, %s8294_s10  ;;  %1339 = vrot.lane.b32.xlu0 %v9350_v12, %s8294_s10 }
 0x148   : > { %v9364_v59 = vpop.permute.xlu1 %1101  ;;  %v9366_v56 = vpop.permute.xlu0 %1099 }
 0x149   : > { %13074 = vst [vmem:[#allocation33_spill] sm:$0xff] %v9364_v59  ;;  %13075 = vst [vmem:[#allocation34_spill] sm:$0xff] %v9366_v56  ;;  %v9384_v56 = vld [vmem:[#allocation2 + $0x714] sm:$0xff]  ;;  %v9386_v59 = vld [vmem:[#allocation2 + $0x70c] sm:$0xff] }
 0x14a   : > { %1345 = vrot.lane.b32.xlu1 %v9360_v7, %s8294_s10  ;;  %1343 = vrot.lane.b32.xlu0 %v9362_v8, %s8294_s10 }
 0x14c   : > { %v9376_v51 = vpop.permute.xlu1 %1169  ;;  %v9378_v48 = vpop.permute.xlu0 %1167 }
 0x14d   : > { %13076 = vst [vmem:[#allocation35_spill] sm:$0xff] %v9376_v51  ;;  %13077 = vst [vmem:[#allocation36_spill] sm:$0xff] %v9378_v48  ;;  %v9396_v48 = vld [vmem:[#allocation2 + $0x74c] sm:$0xff]  ;;  %v9398_v51 = vld [vmem:[#allocation2 + $0x744] sm:$0xff] }
 0x14e   : > { %1349 = vrot.lane.b32.xlu1 %v9372_v3, %s8294_s10  ;;  %1347 = vrot.lane.b32.xlu0 %v9374_v4, %s8294_s10 }
 0x150   : > { %v9388_v43 = vpop.permute.xlu1 %1173  ;;  %v9390_v42 = vpop.permute.xlu0 %1171 }
 0x151   : > { %13078 = vst [vmem:[#allocation37_spill] sm:$0xff] %v9388_v43  ;;  %13079 = vst [vmem:[#allocation38_spill] sm:$0xff] %v9390_v42 }
 0x152   : > { %1353 = vrot.lane.b32.xlu1 %v9384_v56, %s8294_s10  ;;  %1351 = vrot.lane.b32.xlu0 %v9386_v59, %s8294_s10 }
 0x154   : > { %v9400_v31 = vpop.permute.xlu1 %1177  ;;  %v9402_v30 = vpop.permute.xlu0 %1175 }
 0x155   : > { %13080 = vst [vmem:[#allocation39_spill] sm:$0xff] %v9400_v31  ;;  %13081 = vst [vmem:[#allocation40_spill] sm:$0xff] %v9402_v30 }
 0x156   : > { %1357 = vrot.lane.b32.xlu1 %v9396_v48, %s8294_s10  ;;  %1355 = vrot.lane.b32.xlu0 %v9398_v51, %s8294_s10 }
 0x158   : > { %v9408_v42 = vpop.permute.xlu1 %1181  ;;  %v9410_v43 = vpop.permute.xlu0 %1179 }
 0x159   : > { %13082 = vst [vmem:[#allocation41_spill] sm:$0xff] %v9408_v42  ;;  %13083 = vst [vmem:[#allocation42_spill] sm:$0xff] %v9410_v43 }
 0x15a   : > { %1425 = vrot.lane.b32.xlu1 %v9044_v33, %s8295_s11  ;;  %1423 = vrot.lane.b32.xlu0 %v9046_v34, %s8295_s11 }
 0x15c   : > { %v9416_v31 = vpop.permute.xlu1 %1185  ;;  %v9418_v30 = vpop.permute.xlu0 %1183 }
 0x15d   : > { %13084 = vst [vmem:[#allocation43_spill] sm:$0xff] %v9416_v31  ;;  %13085 = vst [vmem:[#allocation44_spill] sm:$0xff] %v9418_v30 }
 0x15e   : > { %1429 = vrot.lane.b32.xlu1 %v9052_v35, %s8295_s11  ;;  %1427 = vrot.lane.b32.xlu0 %v9054_v36, %s8295_s11 }
 0x160   : > { %v9424_v42 = vpop.permute.xlu1 %1189  ;;  %v9426_v43 = vpop.permute.xlu0 %1187 }
 0x161   : > { %13086 = vst [vmem:[#allocation45_spill] sm:$0xff] %v9424_v42  ;;  %13087 = vst [vmem:[#allocation46_spill] sm:$0xff] %v9426_v43 }
 0x162   : > { %1433 = vrot.lane.b32.xlu1 %v9060_v37, %s8295_s11  ;;  %1431 = vrot.lane.b32.xlu0 %v9062_v38, %s8295_s11 }
 0x164   : > { %v9432_v33 = vpop.permute.xlu1 %1193  ;;  %v9434_v34 = vpop.permute.xlu0 %1191 }
 0x165   : > { %13088 = vst [vmem:[#allocation47_spill] sm:$0xff] %v9432_v33  ;;  %13089 = vst [vmem:[#allocation48_spill] sm:$0xff] %v9434_v34 }
 0x166   : > { %1437 = vrot.lane.b32.xlu1 %v9068_v39, %s8295_s11  ;;  %1435 = vrot.lane.b32.xlu0 %v9070_v40, %s8295_s11 }
 0x168   : > { %v9440_v35 = vpop.permute.xlu1 %1197  ;;  %v9442_v36 = vpop.permute.xlu0 %1195 }
 0x169   : > { %13090 = vst [vmem:[#allocation49_spill] sm:$0xff] %v9440_v35  ;;  %13091 = vst [vmem:[#allocation50_spill] sm:$0xff] %v9442_v36 }
 0x16a   : > { %1441 = vrot.lane.b32.xlu1 %v9080_v44, %s8295_s11  ;;  %1439 = vrot.lane.b32.xlu0 %v9082_v45, %s8295_s11 }
 0x16c   : > { %v9448_v37 = vpop.permute.xlu1 %1201  ;;  %v9450_v38 = vpop.permute.xlu0 %1199 }
 0x16d   : > { %13092 = vst [vmem:[#allocation51_spill] sm:$0xff] %v9448_v37  ;;  %13093 = vst [vmem:[#allocation52_spill] sm:$0xff] %v9450_v38  ;;  %v9548_v38 = vld [vmem:[#allocation2 + $0x752] sm:$0xff]  ;;  %v9550_v37 = vld [vmem:[#allocation2 + $0x74a] sm:$0xff] }
 0x16e   : > { %1445 = vrot.lane.b32.xlu1 %v9096_v49, %s8295_s11  ;;  %1443 = vrot.lane.b32.xlu0 %v9098_v50, %s8295_s11 }
 0x170   : > { %v9456_v39 = vpop.permute.xlu1 %1205  ;;  %v9458_v40 = vpop.permute.xlu0 %1203 }
 0x171   : > { %13094 = vst [vmem:[#allocation53_spill] sm:$0xff] %v9456_v39  ;;  %13095 = vst [vmem:[#allocation54_spill] sm:$0xff] %v9458_v40 }
 0x172   : > { %1449 = vrot.lane.b32.xlu1 %v9108_v53, %s8295_s11  ;;  %1447 = vrot.lane.b32.xlu0 %v9110_v54, %s8295_s11 }
 0x174   : > { %v9464_v44 = vpop.permute.xlu1 %1209  ;;  %v9466_v45 = vpop.permute.xlu0 %1207 }
 0x175   : > { %13096 = vst [vmem:[#allocation55_spill] sm:$0xff] %v9464_v44  ;;  %13097 = vst [vmem:[#allocation56_spill] sm:$0xff] %v9466_v45 }
 0x176   : > { %1453 = vrot.lane.b32.xlu1 %v9119_v57, %s8295_s11  ;;  %1451 = vrot.lane.b32.xlu0 %v9121_v58, %s8295_s11  ;;  %v9488_v57 = vld [vmem:[#allocation2 + $0x63a] sm:$0xff]  ;;  %v9490_v58 = vld [vmem:[#allocation2 + $0x632] sm:$0xff] }
 0x178   : > { %v9472_v49 = vpop.permute.xlu1 %1213  ;;  %v9474_v50 = vpop.permute.xlu0 %1211 }
 0x179   : > { %13098 = vst [vmem:[#allocation57_spill] sm:$0xff] %v9472_v49  ;;  %13099 = vst [vmem:[#allocation58_spill] sm:$0xff] %v9474_v50 }
 0x17a   : > { %1457 = vrot.lane.b32.xlu1 %v9131_v61, %s8295_s11  ;;  %1455 = vrot.lane.b32.xlu0 %v9133_v62, %s8295_s11  ;;  %v9500_v62 = vld [vmem:[#allocation2 + $0x672] sm:$0xff] }
 0x17c   : > { %v9480_v53 = vpop.permute.xlu1 %1217  ;;  %v9482_v54 = vpop.permute.xlu0 %1215 }
 0x17d   : > { %13100 = vst [vmem:[#allocation59_spill] sm:$0xff] %v9480_v53  ;;  %13101 = vst [vmem:[#allocation60_spill] sm:$0xff] %v9482_v54 }
 0x17e   : > { %1461 = vrot.lane.b32.xlu1 %v9140_v63, %s8295_s11  ;;  %1459 = vrot.lane.b32.xlu0 %v9142_v1, %s8295_s11  ;;  %v9502_v63 = vld [vmem:[#allocation2 + $0x66a] sm:$0xff] }
 0x180   : > { %v9492_v50 = vpop.permute.xlu1 %1221  ;;  %v9494_v61 = vpop.permute.xlu0 %1219 }
 0x181   : > { %13102 = vst [vmem:[#allocation61_spill] sm:$0xff] %v9492_v50  ;;  %13103 = vst [vmem:[#allocation62_spill] sm:$0xff] %v9494_v61  ;;  %v9512_v61 = vld [vmem:[#allocation2 + $0x6aa] sm:$0xff]  ;;  %v9514_v50 = vld [vmem:[#allocation2 + $0x6a2] sm:$0xff] }
 0x182   : > { %1465 = vrot.lane.b32.xlu1 %v9488_v57, %s8295_s11  ;;  %1463 = vrot.lane.b32.xlu0 %v9490_v58, %s8295_s11 }
 0x184   : > { %v9504_v54 = vpop.permute.xlu1 %1225  ;;  %v9506_v1 = vpop.permute.xlu0 %1223 }
 0x185   : > { %13104 = vst [vmem:[#allocation63_spill] sm:$0xff] %v9504_v54  ;;  %13105 = vst [vmem:[#allocation64_spill] sm:$0xff] %v9506_v1  ;;  %v9524_v1 = vld [vmem:[#allocation2 + $0x6e2] sm:$0xff]  ;;  %v9526_v54 = vld [vmem:[#allocation2 + $0x6da] sm:$0xff] }
 0x186   : > { %1469 = vrot.lane.b32.xlu1 %v9500_v62, %s8295_s11  ;;  %1467 = vrot.lane.b32.xlu0 %v9502_v63, %s8295_s11 }
 0x188   : > { %v9516_v53 = vpop.permute.xlu1 %1229  ;;  %v9518_v49 = vpop.permute.xlu0 %1227 }
 0x189   : > { %13106 = vst [vmem:[#allocation65_spill] sm:$0xff] %v9516_v53  ;;  %13107 = vst [vmem:[#allocation66_spill] sm:$0xff] %v9518_v49  ;;  %v9536_v49 = vld [vmem:[#allocation2 + $0x71a] sm:$0xff]  ;;  %v9538_v53 = vld [vmem:[#allocation2 + $0x712] sm:$0xff] }
 0x18a   : > { %1473 = vrot.lane.b32.xlu1 %v9512_v61, %s8295_s11  ;;  %1471 = vrot.lane.b32.xlu0 %v9514_v50, %s8295_s11 }
 0x18c   : > { %v9528_v45 = vpop.permute.xlu1 %1297  ;;  %v9530_v44 = vpop.permute.xlu0 %1295 }
 0x18e   : > { %1477 = vrot.lane.b32.xlu1 %v9524_v1, %s8295_s11  ;;  %1475 = vrot.lane.b32.xlu0 %v9526_v54, %s8295_s11 }
 0x190   : > { %v9540_v40 = vpop.permute.xlu1 %1301  ;;  %v9542_v39 = vpop.permute.xlu0 %1299 }
 0x192   : > { %1481 = vrot.lane.b32.xlu1 %v9536_v49, %s8295_s11  ;;  %1479 = vrot.lane.b32.xlu0 %v9538_v53, %s8295_s11 }
 0x194   : > { %v9552_v36 = vpop.permute.xlu1 %1305  ;;  %v9554_v35 = vpop.permute.xlu0 %1303 }
 0x196   : > { %1485 = vrot.lane.b32.xlu1 %v9548_v38, %s8295_s11  ;;  %1483 = vrot.lane.b32.xlu0 %v9550_v37, %s8295_s11 }
 0x198   : > { %v9560_v34 = vpop.permute.xlu1 %1309  ;;  %v9562_v33 = vpop.permute.xlu0 %1307 }
 0x19a   : > { %1553 = vrot.lane.b32.xlu1 %v9160_v14, %s8296_s12  ;;  %1551 = vrot.lane.b32.xlu0 %v9162_v15, %s8296_s12 }
 0x19c   : > { %v9568_v43 = vpop.permute.xlu1 %1313  ;;  %v9570_v42 = vpop.permute.xlu0 %1311 }
 0x19d   : > { %13108 = vst [vmem:[#allocation67_spill] sm:$0xff] %v9568_v43  ;;  %13109 = vst [vmem:[#allocation68_spill] sm:$0xff] %v9570_v42 }
 0x19e   : > { %1557 = vrot.lane.b32.xlu1 %v9168_v16, %s8296_s12  ;;  %1555 = vrot.lane.b32.xlu0 %v9170_v17, %s8296_s12 }
 0x1a0   : > { %v9576_v30 = vpop.permute.xlu1 %1317  ;;  %v9578_v31 = vpop.permute.xlu0 %1315 }
 0x1a1   : > { %13110 = vst [vmem:[#allocation69_spill] sm:$0xff] %v9576_v30  ;;  %13111 = vst [vmem:[#allocation70_spill] sm:$0xff] %v9578_v31 }
 0x1a2   : > { %1561 = vrot.lane.b32.xlu1 %v9176_v18, %s8296_s12  ;;  %1559 = vrot.lane.b32.xlu0 %v9178_v19, %s8296_s12 }
 0x1a4   : > { %v9584_v14 = vpop.permute.xlu1 %1321  ;;  %v9586_v15 = vpop.permute.xlu0 %1319 }
 0x1a5   : > { %13112 = vst [vmem:[#allocation71_spill] sm:$0xff] %v9584_v14  ;;  %13113 = vst [vmem:[#allocation72_spill] sm:$0xff] %v9586_v15 }
 0x1a6   : > { %1565 = vrot.lane.b32.xlu1 %v9184_v20, %s8296_s12  ;;  %1563 = vrot.lane.b32.xlu0 %v9186_v21, %s8296_s12 }
 0x1a8   : > { %v9592_v16 = vpop.permute.xlu1 %1325  ;;  %v9594_v17 = vpop.permute.xlu0 %1323 }
 0x1a9   : > { %13114 = vst [vmem:[#allocation73_spill] sm:$0xff] %v9592_v16  ;;  %13115 = vst [vmem:[#allocation74_spill] sm:$0xff] %v9594_v17 }
 0x1aa   : > { %1569 = vrot.lane.b32.xlu1 %v9192_v22, %s8296_s12  ;;  %1567 = vrot.lane.b32.xlu0 %v9194_v23, %s8296_s12 }
 0x1ac   : > { %v9600_v18 = vpop.permute.xlu1 %1329  ;;  %v9602_v19 = vpop.permute.xlu0 %1327 }
 0x1ad   : > { %13116 = vst [vmem:[#allocation75_spill] sm:$0xff] %v9600_v18  ;;  %13117 = vst [vmem:[#allocation76_spill] sm:$0xff] %v9602_v19  ;;  %v9700_v19 = vld [vmem:[#allocation2 + $0x758] sm:$0xff]  ;;  %v9702_v18 = vld [vmem:[#allocation2 + $0x750] sm:$0xff] }
 0x1ae   : > { %1573 = vrot.lane.b32.xlu1 %v9200_v24, %s8296_s12  ;;  %1571 = vrot.lane.b32.xlu0 %v9202_v25, %s8296_s12 }
 0x1b0   : > { %v9608_v20 = vpop.permute.xlu1 %1333  ;;  %v9610_v21 = vpop.permute.xlu0 %1331 }
 0x1b1   : > { %13118 = vst [vmem:[#allocation77_spill] sm:$0xff] %v9608_v20  ;;  %13119 = vst [vmem:[#allocation78_spill] sm:$0xff] %v9610_v21 }
 0x1b2   : > { %1577 = vrot.lane.b32.xlu1 %v9208_v26, %s8296_s12  ;;  %1575 = vrot.lane.b32.xlu0 %v9210_v27, %s8296_s12 }
 0x1b4   : > { %v9616_v22 = vpop.permute.xlu1 %1337  ;;  %v9618_v23 = vpop.permute.xlu0 %1335 }
 0x1b5   : > { %13120 = vst [vmem:[#allocation79_spill] sm:$0xff] %v9616_v22  ;;  %13121 = vst [vmem:[#allocation80_spill] sm:$0xff] %v9618_v23 }
 0x1b6   : > { %1581 = vrot.lane.b32.xlu1 %v9216_v28, %s8296_s12  ;;  %1579 = vrot.lane.b32.xlu0 %v9218_v29, %s8296_s12  ;;  %v9640_v28 = vld [vmem:[#allocation2 + $0x640] sm:$0xff]  ;;  %v9642_v29 = vld [vmem:[#allocation2 + $0x638] sm:$0xff] }
 0x1b8   : > { %v9624_v24 = vpop.permute.xlu1 %1341  ;;  %v9626_v25 = vpop.permute.xlu0 %1339 }
 0x1b9   : > { %13122 = vst [vmem:[#allocation81_spill] sm:$0xff] %v9624_v24  ;;  %13123 = vst [vmem:[#allocation82_spill] sm:$0xff] %v9626_v25 }
 0x1ba   : > { %1585 = vrot.lane.b32.xlu1 %v9228_v32, %s8296_s12  ;;  %1583 = vrot.lane.b32.xlu0 %v9230_v41, %s8296_s12  ;;  %v9652_v41 = vld [vmem:[#allocation2 + $0x678] sm:$0xff] }
 0x1bc   : > { %v9632_v26 = vpop.permute.xlu1 %1345  ;;  %v9634_v27 = vpop.permute.xlu0 %1343 }
 0x1bd   : > { %13124 = vst [vmem:[#allocation83_spill] sm:$0xff] %v9632_v26  ;;  %13125 = vst [vmem:[#allocation84_spill] sm:$0xff] %v9634_v27 }
 0x1be   : > { %1589 = vrot.lane.b32.xlu1 %v9240_v46, %s8296_s12  ;;  %1587 = vrot.lane.b32.xlu0 %v9242_v47, %s8296_s12  ;;  %v9654_v46 = vld [vmem:[#allocation2 + $0x670] sm:$0xff] }
 0x1c0   : > { %v9644_v25 = vpop.permute.xlu1 %1349  ;;  %v9646_v32 = vpop.permute.xlu0 %1347 }
 0x1c1   : > { %13126 = vst [vmem:[#allocation85_spill] sm:$0xff] %v9644_v25  ;;  %13127 = vst [vmem:[#allocation86_spill] sm:$0xff] %v9646_v32  ;;  %v9664_v32 = vld [vmem:[#allocation2 + $0x6b0] sm:$0xff]  ;;  %v9666_v25 = vld [vmem:[#allocation2 + $0x6a8] sm:$0xff] }
 0x1c2   : > { %1593 = vrot.lane.b32.xlu1 %v9640_v28, %s8296_s12  ;;  %1591 = vrot.lane.b32.xlu0 %v9642_v29, %s8296_s12 }
 0x1c4   : > { %v9656_v27 = vpop.permute.xlu1 %1353  ;;  %v9658_v47 = vpop.permute.xlu0 %1351 }
 0x1c5   : > { %13128 = vst [vmem:[#allocation87_spill] sm:$0xff] %v9656_v27  ;;  %13129 = vst [vmem:[#allocation88_spill] sm:$0xff] %v9658_v47  ;;  %v9676_v47 = vld [vmem:[#allocation2 + $0x6e8] sm:$0xff]  ;;  %v9678_v27 = vld [vmem:[#allocation2 + $0x6e0] sm:$0xff] }
 0x1c6   : > { %1597 = vrot.lane.b32.xlu1 %v9652_v41, %s8296_s12  ;;  %1595 = vrot.lane.b32.xlu0 %v9654_v46, %s8296_s12 }
 0x1c8   : > { %v9668_v26 = vpop.permute.xlu1 %1357  ;;  %v9670_v24 = vpop.permute.xlu0 %1355 }
 0x1c9   : > { %13130 = vst [vmem:[#allocation89_spill] sm:$0xff] %v9668_v26  ;;  %13131 = vst [vmem:[#allocation90_spill] sm:$0xff] %v9670_v24  ;;  %v9688_v24 = vld [vmem:[#allocation2 + $0x720] sm:$0xff]  ;;  %v9690_v26 = vld [vmem:[#allocation2 + $0x718] sm:$0xff] }
 0x1ca   : > { %1601 = vrot.lane.b32.xlu1 %v9664_v32, %s8296_s12  ;;  %1599 = vrot.lane.b32.xlu0 %v9666_v25, %s8296_s12 }
 0x1cc   : > { %v9680_v23 = vpop.permute.xlu1 %1425  ;;  %v9682_v22 = vpop.permute.xlu0 %1423 }
 0x1ce   : > { %1605 = vrot.lane.b32.xlu1 %v9676_v47, %s8296_s12  ;;  %1603 = vrot.lane.b32.xlu0 %v9678_v27, %s8296_s12 }
 0x1d0   : > { %v9692_v21 = vpop.permute.xlu1 %1429  ;;  %v9694_v20 = vpop.permute.xlu0 %1427 }
 0x1d2   : > { %1609 = vrot.lane.b32.xlu1 %v9688_v24, %s8296_s12  ;;  %1607 = vrot.lane.b32.xlu0 %v9690_v26, %s8296_s12 }
 0x1d4   : > { %v9704_v17 = vpop.permute.xlu1 %1433  ;;  %v9706_v16 = vpop.permute.xlu0 %1431 }
 0x1d6   : > { %1613 = vrot.lane.b32.xlu1 %v9700_v19, %s8296_s12  ;;  %1611 = vrot.lane.b32.xlu0 %v9702_v18, %s8296_s12 }
 0x1d8   : > { %v9712_v15 = vpop.permute.xlu1 %1437  ;;  %v9714_v14 = vpop.permute.xlu0 %1435 }
 0x1da   : > { %1681 = vrot.lane.b32.xlu1 %v9288_v9, %s8297_s13  ;;  %1679 = vrot.lane.b32.xlu0 %v9290_v10, %s8297_s13 }
 0x1dc   : > { %v9720_v31 = vpop.permute.xlu1 %1441  ;;  %v9722_v30 = vpop.permute.xlu0 %1439 }
 0x1dd   : > { %13132 = vst [vmem:[#allocation91_spill] sm:$0xff] %v9720_v31  ;;  %13133 = vst [vmem:[#allocation92_spill] sm:$0xff] %v9722_v30  ;;  %v3072_v30 = vld [vmem:[#allocation2 + $0x3d2] sm:$0xff]  ;;  %v3071_v31 = vld [vmem:[#allocation2 + $0x3ca] sm:$0xff] }
 0x1de   : > { %1685 = vrot.lane.b32.xlu1 %v9300_v13, %s8297_s13  ;;  %1683 = vrot.lane.b32.xlu0 %v9302_v52, %s8297_s13 }
 0x1e0   : > { %v9728_v42 = vpop.permute.xlu1 %1445  ;;  %v9730_v43 = vpop.permute.xlu0 %1443 }
 0x1e1   : > { %13134 = vst [vmem:[#allocation93_spill] sm:$0xff] %v9728_v42  ;;  %13135 = vst [vmem:[#allocation94_spill] sm:$0xff] %v9730_v43  ;;  %v725_v43 = vld [vmem:[#allocation2 + $0x35c] sm:$0xff]  ;;  %v727_v42 = vld [vmem:[#allocation2 + $0x394] sm:$0xff] }
 0x1e2   : > { %1689 = vrot.lane.b32.xlu1 %v9312_v60, %s8297_s13  ;;  %1687 = vrot.lane.b32.xlu0 %v9314_v55, %s8297_s13 }
 0x1e4   : > { %v9736_v9 = vpop.permute.xlu1 %1449  ;;  %v9738_v10 = vpop.permute.xlu0 %1447 }
 0x1e5   : > { %13136 = vst [vmem:[#allocation95_spill] sm:$0xff] %v9736_v9  ;;  %13137 = vst [vmem:[#allocation96_spill] sm:$0xff] %v9738_v10 }
 0x1e6   : > { %1693 = vrot.lane.b32.xlu1 %v9324_v5, %s8297_s13  ;;  %1691 = vrot.lane.b32.xlu0 %v9326_v2, %s8297_s13 }
 0x1e8   : > { %v9744_v13 = vpop.permute.xlu1 %1453  ;;  %v9746_v52 = vpop.permute.xlu0 %1451 }
 0x1e9   : > { %13138 = vst [vmem:[#allocation97_spill] sm:$0xff] %v9744_v13  ;;  %13139 = vst [vmem:[#allocation98_spill] sm:$0xff] %v9746_v52 }
 0x1ea   : > { %1697 = vrot.lane.b32.xlu1 %v9336_v6, %s8297_s13  ;;  %1695 = vrot.lane.b32.xlu0 %v9338_v0, %s8297_s13 }
 0x1ec   : > { %v9752_v55 = vpop.permute.xlu1 %1457  ;;  %v9754_v60 = vpop.permute.xlu0 %1455 }
 0x1ed   : > { %13140 = vst [vmem:[#allocation99_spill] sm:$0xff] %v9752_v55  ;;  %13141 = vst [vmem:[#allocation100_spill] sm:$0xff] %v9754_v60 }
 0x1ee   : > { %1701 = vrot.lane.b32.xlu1 %v9348_v11, %s8297_s13  ;;  %1699 = vrot.lane.b32.xlu0 %v9350_v12, %s8297_s13 }
 0x1f0   : > { %v9760_v2 = vpop.permute.xlu1 %1461  ;;  %v9762_v5 = vpop.permute.xlu0 %1459 }
 0x1f1   : > { %13142 = vst [vmem:[#allocation101_spill] sm:$0xff] %v9760_v2  ;;  %13143 = vst [vmem:[#allocation102_spill] sm:$0xff] %v9762_v5 }
 0x1f2   : > { %1705 = vrot.lane.b32.xlu1 %v9360_v7, %s8297_s13  ;;  %1703 = vrot.lane.b32.xlu0 %v9362_v8, %s8297_s13 }
 0x1f4   : > { %v9768_v0 = vpop.permute.xlu1 %1465  ;;  %v9770_v6 = vpop.permute.xlu0 %1463 }
 0x1f5   : > { %13144 = vst [vmem:[#allocation103_spill] sm:$0xff] %v9768_v0  ;;  %13145 = vst [vmem:[#allocation104_spill] sm:$0xff] %v9770_v6 }
 0x1f6   : > { %1709 = vrot.lane.b32.xlu1 %v9372_v3, %s8297_s13  ;;  %1707 = vrot.lane.b32.xlu0 %v9374_v4, %s8297_s13  ;;  %v932_v3 = vld [vmem:[#allocation2 + $0x784] sm:$0xff]  ;;  %v931_v4 = vld [vmem:[#allocation2 + $0x77c] sm:$0xff] }
 0x1f8   : > { %v9776_v11 = vpop.permute.xlu1 %1469  ;;  %v9778_v12 = vpop.permute.xlu0 %1467 }
 0x1f9   : > { %13146 = vst [vmem:[#allocation105_spill] sm:$0xff] %v9776_v11  ;;  %13147 = vst [vmem:[#allocation106_spill] sm:$0xff] %v9778_v12 }
 0x1fa   : > { %1713 = vrot.lane.b32.xlu1 %v9384_v56, %s8297_s13  ;;  %1711 = vrot.lane.b32.xlu0 %v9386_v59, %s8297_s13  ;;  %v934_v56 = vld [vmem:[#allocation2 + $0x7bc] sm:$0xff]  ;;  %v933_v59 = vld [vmem:[#allocation2 + $0x7b4] sm:$0xff] }
 0x1fc   : > { %v9784_v7 = vpop.permute.xlu1 %1473  ;;  %v9786_v8 = vpop.permute.xlu0 %1471 }
 0x1fd   : > { %13148 = vst [vmem:[#allocation107_spill] sm:$0xff] %v9784_v7  ;;  %13149 = vst [vmem:[#allocation108_spill] sm:$0xff] %v9786_v8 }
 0x1fe   : > { %1717 = vrot.lane.b32.xlu1 %v9396_v48, %s8297_s13  ;;  %1715 = vrot.lane.b32.xlu0 %v9398_v51, %s8297_s13  ;;  %v936_v48 = vld [vmem:[#allocation2 + $0x7f4] sm:$0xff]  ;;  %v935_v51 = vld [vmem:[#allocation2 + $0x7ec] sm:$0xff] }
 0x200   : > { %v9792_v11 = vpop.permute.xlu1 %1477  ;;  %v9794_v12 = vpop.permute.xlu0 %1475 }
 0x201   : > { %13150 = vst [vmem:[#allocation109_spill] sm:$0xff] %v9792_v11  ;;  %13151 = vst [vmem:[#allocation110_spill] sm:$0xff] %v9794_v12 }
 0x202   : > { %1721 = vrot.lane.b32.xlu1 %v932_v3, %s8297_s13  ;;  %1719 = vrot.lane.b32.xlu0 %v931_v4, %s8297_s13  ;;  %v938_v3 = vld [vmem:[#allocation2 + $0x82c] sm:$0xff]  ;;  %v937_v4 = vld [vmem:[#allocation2 + $0x824] sm:$0xff] }
 0x204   : > { %v9798_v7 = vpop.permute.xlu1 %1481  ;;  %v9800_v8 = vpop.permute.xlu0 %1479 }
 0x205   : > { %13152 = vst [vmem:[#allocation111_spill] sm:$0xff] %v9798_v7  ;;  %13153 = vst [vmem:[#allocation112_spill] sm:$0xff] %v9800_v8 }
 0x206   : > { %1725 = vrot.lane.b32.xlu1 %v934_v56, %s8297_s13  ;;  %1723 = vrot.lane.b32.xlu0 %v933_v59, %s8297_s13  ;;  %v940_v56 = vld [vmem:[#allocation2 + $0x864] sm:$0xff]  ;;  %v939_v59 = vld [vmem:[#allocation2 + $0x85c] sm:$0xff] }
 0x208   : > { %v9804_v6 = vpop.permute.xlu1 %1485  ;;  %v9806_v11 = vpop.permute.xlu0 %1483 }
 0x209   : > { %13154 = vst [vmem:[#allocation113_spill] sm:$0xff] %v9804_v6  ;;  %13155 = vst [vmem:[#allocation114_spill] sm:$0xff] %v9806_v11 }
 0x20a   : > { %1729 = vrot.lane.b32.xlu1 %v936_v48, %s8297_s13  ;;  %1727 = vrot.lane.b32.xlu0 %v935_v51, %s8297_s13  ;;  %v942_v48 = vld [vmem:[#allocation2 + $0x89c] sm:$0xff]  ;;  %v941_v51 = vld [vmem:[#allocation2 + $0x894] sm:$0xff] }
 0x20c   : > { %v9810_v12 = vpop.permute.xlu1 %1553  ;;  %v9812_v7 = vpop.permute.xlu0 %1551 }
 0x20e   : > { %1733 = vrot.lane.b32.xlu1 %v938_v3, %s8297_s13  ;;  %1731 = vrot.lane.b32.xlu0 %v937_v4, %s8297_s13  ;;  %v944_v3 = vld [vmem:[#allocation2 + $0x55a] sm:$0xff]  ;;  %v943_v4 = vld [vmem:[#allocation2 + $0x552] sm:$0xff] }
 0x210   : > { %v9816_v8 = vpop.permute.xlu1 %1557  ;;  %v9818_v6 = vpop.permute.xlu0 %1555 }
 0x212   : > { %1737 = vrot.lane.b32.xlu1 %v940_v56, %s8297_s13  ;;  %1735 = vrot.lane.b32.xlu0 %v939_v59, %s8297_s13  ;;  %v946_v56 = vld [vmem:[#allocation2 + $0x592] sm:$0xff]  ;;  %v945_v59 = vld [vmem:[#allocation2 + $0x58a] sm:$0xff] }
 0x214   : > { %v9822_v11 = vpop.permute.xlu1 %1561  ;;  %v9824_v0 = vpop.permute.xlu0 %1559 }
 0x216   : > { %1741 = vrot.lane.b32.xlu1 %v942_v48, %s8297_s13  ;;  %1739 = vrot.lane.b32.xlu0 %v941_v51, %s8297_s13  ;;  %v948_v48 = vld [vmem:[#allocation2 + $0x5ca] sm:$0xff]  ;;  %v947_v51 = vld [vmem:[#allocation2 + $0x5c2] sm:$0xff] }
 0x218   : > { %v9828_v5 = vpop.permute.xlu1 %1565  ;;  %v9830_v2 = vpop.permute.xlu0 %1563 }
 0x21a   : > { %1809 = vrot.lane.b32.xlu1 %v944_v3, %s8298_s14  ;;  %1807 = vrot.lane.b32.xlu0 %v943_v4, %s8298_s14  ;;  %v950_v3 = vld [vmem:[#allocation2 + $0x602] sm:$0xff]  ;;  %v949_v4 = vld [vmem:[#allocation2 + $0x5fa] sm:$0xff] }
 0x21c   : > { %v9834_v60 = vpop.permute.xlu1 %1569  ;;  %v9836_v55 = vpop.permute.xlu0 %1567 }
 0x21d   : > { %13156 = vst [vmem:[#allocation115_spill] sm:$0xff] %v9834_v60  ;;  %13157 = vst [vmem:[#allocation116_spill] sm:$0xff] %v9836_v55  ;;  %v13230_v55 = vld [vmem:[#allocation6_spill] sm:$0xff] }
 0x21e   : > { %1813 = vrot.lane.b32.xlu1 %v946_v56, %s8298_s14  ;;  %1811 = vrot.lane.b32.xlu0 %v945_v59, %s8298_s14 }
 0x220   : > { %v9840_v52 = vpop.permute.xlu1 %1573  ;;  %v9842_v13 = vpop.permute.xlu0 %1571 }
 0x221   : > { %13158 = vst [vmem:[#allocation117_spill] sm:$0xff] %v9840_v52  ;;  %13159 = vst [vmem:[#allocation118_spill] sm:$0xff] %v9842_v13  ;;  %v723_v13 = vld [vmem:[#allocation2 + $0x324] sm:$0xff] }
 0x222   : > { %1817 = vrot.lane.b32.xlu1 %v948_v48, %s8298_s14  ;;  %1815 = vrot.lane.b32.xlu0 %v947_v51, %s8298_s14 }
 0x224   : > { %v9846_v10 = vpop.permute.xlu1 %1577  ;;  %v9848_v9 = vpop.permute.xlu0 %1575 }
 0x225   : > { %13160 = vst [vmem:[#allocation119_spill] sm:$0xff] %v9846_v10  ;;  %13161 = vst [vmem:[#allocation120_spill] sm:$0xff] %v9848_v9 }
 0x226   : > { %1821 = vrot.lane.b32.xlu1 %v950_v3, %s8298_s14  ;;  %1819 = vrot.lane.b32.xlu0 %v949_v4, %s8298_s14 }
 0x228   : > { %v9852_v56 = vpop.permute.xlu1 %1581  ;;  %v9854_v59 = vpop.permute.xlu0 %1579 }
 0x229   : > { %13162 = vst [vmem:[#allocation121_spill] sm:$0xff] %v9852_v56  ;;  %13163 = vst [vmem:[#allocation122_spill] sm:$0xff] %v9854_v59 }
 0x22a   : > { %1825 = vrot.lane.b32.xlu1 %v9488_v57, %s8298_s14  ;;  %1823 = vrot.lane.b32.xlu0 %v9490_v58, %s8298_s14 }
 0x22c   : > { %v9860_v48 = vpop.permute.xlu1 %1585  ;;  %v9862_v51 = vpop.permute.xlu0 %1583 }
 0x22d   : > { %13164 = vst [vmem:[#allocation123_spill] sm:$0xff] %v9860_v48  ;;  %13165 = vst [vmem:[#allocation124_spill] sm:$0xff] %v9862_v51 }
 0x22e   : > { %1829 = vrot.lane.b32.xlu1 %v9500_v62, %s8298_s14  ;;  %1827 = vrot.lane.b32.xlu0 %v9502_v63, %s8298_s14 }
 0x230   : > { %v9868_v3 = vpop.permute.xlu1 %1589  ;;  %v9870_v4 = vpop.permute.xlu0 %1587 }
 0x231   : > { %13166 = vst [vmem:[#allocation125_spill] sm:$0xff] %v9868_v3  ;;  %13167 = vst [vmem:[#allocation126_spill] sm:$0xff] %v9870_v4 }
 0x232   : > { %1833 = vrot.lane.b32.xlu1 %v9512_v61, %s8298_s14  ;;  %1831 = vrot.lane.b32.xlu0 %v9514_v50, %s8298_s14 }
 0x234   : > { %v9876_v57 = vpop.permute.xlu1 %1593  ;;  %v9878_v58 = vpop.permute.xlu0 %1591 }
 0x235   : > { %13168 = vst [vmem:[#allocation127_spill] sm:$0xff] %v9876_v57  ;;  %13169 = vst [vmem:[#allocation128_spill] sm:$0xff] %v9878_v58  ;;  %v967_v58 = vld [vmem:[#allocation2 + $0x7f2] sm:$0xff] }
 0x236   : > { %1837 = vrot.lane.b32.xlu1 %v9524_v1, %s8298_s14  ;;  %1835 = vrot.lane.b32.xlu0 %v9526_v54, %s8298_s14  ;;  %v964_v54 = vld [vmem:[#allocation2 + $0x78a] sm:$0xff]  ;;  %v963_v1 = vld [vmem:[#allocation2 + $0x782] sm:$0xff] }
 0x238   : > { %v9884_v62 = vpop.permute.xlu1 %1597  ;;  %v9886_v63 = vpop.permute.xlu0 %1595 }
 0x239   : > { %13170 = vst [vmem:[#allocation129_spill] sm:$0xff] %v9884_v62  ;;  %13171 = vst [vmem:[#allocation130_spill] sm:$0xff] %v9886_v63 }
 0x23a   : > { %1841 = vrot.lane.b32.xlu1 %v9536_v49, %s8298_s14  ;;  %1839 = vrot.lane.b32.xlu0 %v9538_v53, %s8298_s14  ;;  %v2294_v49 = vld [vmem:[%s13006_s1] sm:$0xff] }
 0x23b   : > { %v966_v53 = vld [vmem:[#allocation2 + $0x7c2] sm:$0xff] }
 0x23c   : > { %v9892_v50 = vpop.permute.xlu1 %1601  ;;  %v9894_v61 = vpop.permute.xlu0 %1599 }
 0x23d   : > { %13172 = vst [vmem:[#allocation131_spill] sm:$0xff] %v9892_v50  ;;  %13173 = vst [vmem:[#allocation132_spill] sm:$0xff] %v9894_v61 }
 0x23e   : > { %1845 = vrot.lane.b32.xlu1 %v9548_v38, %s8298_s14  ;;  %1843 = vrot.lane.b32.xlu0 %v9550_v37, %s8298_s14  ;;  %v2295_v38 = vld [vmem:[%s13006_s1 + $0x8] sm:$0xff]  ;;  %v965_v37 = vld [vmem:[#allocation2 + $0x7ba] sm:$0xff] }
 0x23f   : > { %v8108_v61 = vpack.c.bf16 %v2295_v38, %v2294_v49 }
 0x240   : > { %v9900_v62 = vpop.permute.xlu1 %1605  ;;  %v9902_v63 = vpop.permute.xlu0 %1603 }
 0x241   : > { %13174 = vst [vmem:[#allocation133_spill] sm:$0xff] %v9900_v62  ;;  %13175 = vst [vmem:[#allocation134_spill] sm:$0xff] %v9902_v63  ;;  %8109 = vmatprep.subr.bf16.mxu0 %v8108_v61  ;;  %v968_v63 = vld [vmem:[#allocation2 + $0x7fa] sm:$0xff] }
 0x242   : > { %1849 = vrot.lane.b32.xlu1 %v964_v54, %s8298_s14  ;;  %1847 = vrot.lane.b32.xlu0 %v963_v1, %s8298_s14  ;;  %v2296_v54 = vld [vmem:[%s13006_s1 + $0x10] sm:$0xff]  ;;  %v2297_v1 = vld [vmem:[%s13006_s1 + $0x18] sm:$0xff] }
 0x243   : > { %8111 = vmatpush3.bf16.msra.mxu0 %v8108_v61  ;;  %v8112_v49 = vpack.c.bf16 %v2297_v1, %v2296_v54  ;;  %v2298_v61 = vld [vmem:[%s13006_s1 + $0x20] sm:$0xf] }
 0x244   : > { %v9912_v50 = vpop.permute.xlu1 %1609  ;;  %v9914_v62 = vpop.permute.xlu0 %1607 }
 0x245   : > { %13176 = vst [vmem:[#allocation135_spill] sm:$0xff] %v9912_v50  ;;  %13177 = vst [vmem:[#allocation136_spill] sm:$0xff] %v9914_v62  ;;  %8113 = vmatprep.subr.bf16.mxu0 %v8112_v49 }
 0x246   : > { %1853 = vrot.lane.b32.xlu1 %v966_v53, %s8298_s14  ;;  %1851 = vrot.lane.b32.xlu0 %v965_v37, %s8298_s14  ;;  %v970_v53 = vld [vmem:[#allocation2 + $0x832] sm:$0xff]  ;;  %v969_v37 = vld [vmem:[#allocation2 + $0x82a] sm:$0xff] }
 0x247   : > { %8115 = vmatpush3.bf16.msra.mxu0 %v8112_v49  ;;  %v974_v49 = vld [vmem:[#allocation2 + $0x8a2] sm:$0xff] }
 0x248   : > { %v9924_v38 = vpop.permute.xlu1 %1613  ;;  %v9926_v62 = vpop.permute.xlu0 %1611  ;;  %7792 = vmatprep.subr.msk.mxu0 %vm2401_vm1, %v2298_v61 }
 0x249   : > { %13178 = vst [vmem:[#allocation137_spill] sm:$0xff] %v9924_v38  ;;  %13179 = vst [vmem:[#allocation138_spill] sm:$0xff] %v9926_v62  ;;  %v973_v62 = vld [vmem:[#allocation2 + $0x89a] sm:$0xff] }
 0x24a   : > { %1857 = vrot.lane.b32.xlu1 %v968_v63, %s8298_s14  ;;  %1855 = vrot.lane.b32.xlu0 %v967_v58, %s8298_s14  ;;  %v972_v63 = vld [vmem:[#allocation2 + $0x86a] sm:$0xff]  ;;  %v971_v58 = vld [vmem:[#allocation2 + $0x862] sm:$0xff] }
 0x24b   : > { %7793 = vmatpush3.msk.msra.mxu0 %vm2401_vm1, %v2298_v61 }
 0x24c   : > { %v9930_v50 = vpop.permute.xlu1 %1681  ;;  %v9932_v57 = vpop.permute.xlu0 %1679 }
 0x24e   : > { %1861 = vrot.lane.b32.xlu1 %v970_v53, %s8298_s14  ;;  %1859 = vrot.lane.b32.xlu0 %v969_v37, %s8298_s14  ;;  %v976_v53 = vld [vmem:[#allocation2 + $0x560] sm:$0xff]  ;;  %v975_v37 = vld [vmem:[#allocation2 + $0x558] sm:$0xff] }
 0x250   : > { %v9941_v54 = vpop.permute.xlu1 %1685  ;;  %v9943_v1 = vpop.permute.xlu0 %1683 }
 0x252   : > { %1865 = vrot.lane.b32.xlu1 %v972_v63, %s8298_s14  ;;  %1863 = vrot.lane.b32.xlu0 %v971_v58, %s8298_s14  ;;  %v978_v63 = vld [vmem:[#allocation2 + $0x598] sm:$0xff]  ;;  %v977_v58 = vld [vmem:[#allocation2 + $0x590] sm:$0xff] }
 0x254   : > { %v9947_v38 = vpop.permute.xlu1 %1689  ;;  %v9949_v4 = vpop.permute.xlu0 %1687 }
 0x256   : > { %1869 = vrot.lane.b32.xlu1 %v974_v49, %s8298_s14  ;;  %1867 = vrot.lane.b32.xlu0 %v973_v62, %s8298_s14  ;;  %v980_v62 = vld [vmem:[#allocation2 + $0x5d0] sm:$0xff]  ;;  %v979_v49 = vld [vmem:[#allocation2 + $0x5c8] sm:$0xff] }
 0x258   : > { %v9953_v61 = vpop.permute.xlu1 %1693  ;;  %v9955_v3 = vpop.permute.xlu0 %1691 }
 0x259   : > { %13180 = vst [vmem:[#allocation139_spill] sm:$0xff] %v9955_v3 }
 0x25a   : > { %1937 = vrot.lane.b32.xlu1 %v976_v53, %s8299_s28  ;;  %1935 = vrot.lane.b32.xlu0 %v975_v37, %s8299_s28  ;;  %v982_v53 = vld [vmem:[#allocation2 + $0x608] sm:$0xff]  ;;  %v981_v37 = vld [vmem:[#allocation2 + $0x600] sm:$0xff] }
 0x25c   : > { %v9959_v51 = vpop.permute.xlu1 %1697  ;;  %v9961_v48 = vpop.permute.xlu0 %1695 }
 0x25d   : > { %13181 = vst [vmem:[#allocation140_spill] sm:$0xff] %v9959_v51  ;;  %13182 = vst [vmem:[#allocation141_spill] sm:$0xff] %v9961_v48  ;;  %v13228_v48 = vld [vmem:[#allocation4_spill] sm:$0xff]  ;;  %v13229_v51 = vld [vmem:[#allocation5_spill] sm:$0xff] }
 0x25e   : > { %1941 = vrot.lane.b32.xlu1 %v978_v63, %s8299_s28  ;;  %1939 = vrot.lane.b32.xlu0 %v977_v58, %s8299_s28 }
 0x260   : > { %v9965_v59 = vpop.permute.xlu1 %1701  ;;  %v9967_v56 = vpop.permute.xlu0 %1699 }
 0x261   : > { %13183 = vst [vmem:[#allocation142_spill] sm:$0xff] %v9965_v59  ;;  %13184 = vst [vmem:[#allocation143_spill] sm:$0xff] %v9967_v56  ;;  %v3069_v59 = vld [vmem:[#allocation2 + $0x392] sm:$0xff] }
 0x262   : > { %1945 = vrot.lane.b32.xlu1 %v980_v62, %s8299_s28  ;;  %1943 = vrot.lane.b32.xlu0 %v979_v49, %s8299_s28 }
 0x264   : > { %v9971_v9 = vpop.permute.xlu1 %1705  ;;  %v9973_v10 = vpop.permute.xlu0 %1703 }
 0x265   : > { %13185 = vst [vmem:[#allocation144_spill] sm:$0xff] %v9971_v9  ;;  %13186 = vst [vmem:[#allocation145_spill] sm:$0xff] %v9973_v10 }
 0x266   : > { %1949 = vrot.lane.b32.xlu1 %v982_v53, %s8299_s28  ;;  %1947 = vrot.lane.b32.xlu0 %v981_v37, %s8299_s28 }
 0x268   : > { %v9977_v63 = vpop.permute.xlu1 %1709  ;;  %v9979_v58 = vpop.permute.xlu0 %1707 }
 0x269   : > { %13187 = vst [vmem:[#allocation146_spill] sm:$0xff] %v9977_v63  ;;  %13188 = vst [vmem:[#allocation147_spill] sm:$0xff] %v9979_v58 }
 0x26a   : > { %1953 = vrot.lane.b32.xlu1 %v9640_v28, %s8299_s28  ;;  %1951 = vrot.lane.b32.xlu0 %v9642_v29, %s8299_s28 }
 0x26c   : > { %v9985_v62 = vpop.permute.xlu1 %1713  ;;  %v9987_v49 = vpop.permute.xlu0 %1711 }
 0x26d   : > { %13189 = vst [vmem:[#allocation148_spill] sm:$0xff] %v9985_v62  ;;  %13190 = vst [vmem:[#allocation149_spill] sm:$0xff] %v9987_v49 }
 0x26e   : > { %1957 = vrot.lane.b32.xlu1 %v9652_v41, %s8299_s28  ;;  %1955 = vrot.lane.b32.xlu0 %v9654_v46, %s8299_s28 }
 0x270   : > { %v9993_v53 = vpop.permute.xlu1 %1717  ;;  %v9995_v37 = vpop.permute.xlu0 %1715 }
 0x271   : > { %13191 = vst [vmem:[#allocation150_spill] sm:$0xff] %v9993_v53  ;;  %13192 = vst [vmem:[#allocation151_spill] sm:$0xff] %v9995_v37 }
 0x272   : > { %1961 = vrot.lane.b32.xlu1 %v9664_v32, %s8299_s28  ;;  %1959 = vrot.lane.b32.xlu0 %v9666_v25, %s8299_s28 }
 0x274   : > { %v10001_v28 = vpop.permute.xlu1 %1721  ;;  %v10003_v29 = vpop.permute.xlu0 %1719 }
 0x275   : > { %13193 = vst [vmem:[#allocation152_spill] sm:$0xff] %v10001_v28  ;;  %13194 = vst [vmem:[#allocation153_spill] sm:$0xff] %v10003_v29 }
 0x276   : > { %1965 = vrot.lane.b32.xlu1 %v9676_v47, %s8299_s28  ;;  %1963 = vrot.lane.b32.xlu0 %v9678_v27, %s8299_s28  ;;  %v996_v27 = vld [vmem:[#allocation2 + $0x790] sm:$0xff]  ;;  %v995_v47 = vld [vmem:[#allocation2 + $0x788] sm:$0xff] }
 0x278   : > { %v10009_v41 = vpop.permute.xlu1 %1725  ;;  %v10011_v46 = vpop.permute.xlu0 %1723 }
 0x279   : > { %13195 = vst [vmem:[#allocation154_spill] sm:$0xff] %v10009_v41  ;;  %13196 = vst [vmem:[#allocation155_spill] sm:$0xff] %v10011_v46 }
 0x27a   : > { %1969 = vrot.lane.b32.xlu1 %v9688_v24, %s8299_s28  ;;  %1967 = vrot.lane.b32.xlu0 %v9690_v26, %s8299_s28  ;;  %v998_v24 = vld [vmem:[#allocation2 + $0x7c8] sm:$0xff]  ;;  %v997_v26 = vld [vmem:[#allocation2 + $0x7c0] sm:$0xff] }
 0x27c   : > { %v10017_v25 = vpop.permute.xlu1 %1729  ;;  %v10019_v32 = vpop.permute.xlu0 %1727 }
 0x27d   : > { %13197 = vst [vmem:[#allocation156_spill] sm:$0xff] %v10017_v25  ;;  %13198 = vst [vmem:[#allocation157_spill] sm:$0xff] %v10019_v32 }
 0x27e   : > { %1973 = vrot.lane.b32.xlu1 %v9700_v19, %s8299_s28  ;;  %1971 = vrot.lane.b32.xlu0 %v9702_v18, %s8299_s28  ;;  %v1000_v18 = vld [vmem:[#allocation2 + $0x800] sm:$0xff]  ;;  %v999_v19 = vld [vmem:[#allocation2 + $0x7f8] sm:$0xff] }
 0x280   : > { %v10025_v41 = vpop.permute.xlu1 %1733  ;;  %v10027_v46 = vpop.permute.xlu0 %1731 }
 0x281   : > { %13199 = vst [vmem:[#allocation158_spill] sm:$0xff] %v10025_v41  ;;  %13200 = vst [vmem:[#allocation159_spill] sm:$0xff] %v10027_v46 }
 0x282   : > { %1977 = vrot.lane.b32.xlu1 %v996_v27, %s8299_s28  ;;  %1975 = vrot.lane.b32.xlu0 %v995_v47, %s8299_s28  ;;  %v1002_v27 = vld [vmem:[#allocation2 + $0x838] sm:$0xff]  ;;  %v1001_v47 = vld [vmem:[#allocation2 + $0x830] sm:$0xff] }
 0x284   : > { %v10031_v25 = vpop.permute.xlu1 %1737  ;;  %v10033_v32 = vpop.permute.xlu0 %1735 }
 0x285   : > { %13201 = vst [vmem:[#allocation160_spill] sm:$0xff] %v10031_v25  ;;  %13202 = vst [vmem:[#allocation161_spill] sm:$0xff] %v10033_v32 }
 0x286   : > { %1981 = vrot.lane.b32.xlu1 %v998_v24, %s8299_s28  ;;  %1979 = vrot.lane.b32.xlu0 %v997_v26, %s8299_s28  ;;  %v1004_v24 = vld [vmem:[#allocation2 + $0x870] sm:$0xff]  ;;  %v1003_v26 = vld [vmem:[#allocation2 + $0x868] sm:$0xff] }
 0x288   : > { %v10037_v29 = vpop.permute.xlu1 %1741  ;;  %v10039_v41 = vpop.permute.xlu0 %1739 }
 0x289   : > { %13203 = vst [vmem:[#allocation162_spill] sm:$0xff] %v10037_v29  ;;  %13204 = vst [vmem:[#allocation163_spill] sm:$0xff] %v10039_v41 }
 0x28a   : > { %1985 = vrot.lane.b32.xlu1 %v1000_v18, %s8299_s28  ;;  %1983 = vrot.lane.b32.xlu0 %v999_v19, %s8299_s28  ;;  %v1006_v18 = vld [vmem:[#allocation2 + $0x8a8] sm:$0xff]  ;;  %v1005_v19 = vld [vmem:[#allocation2 + $0x8a0] sm:$0xff] }
 0x28c   : > { %v10043_v46 = vpop.permute.xlu1 %1809  ;;  %v10045_v25 = vpop.permute.xlu0 %1807 }
 0x28e   : > { %1989 = vrot.lane.b32.xlu1 %v1002_v27, %s8299_s28  ;;  %1987 = vrot.lane.b32.xlu0 %v1001_v47, %s8299_s28  ;;  %v3050_v27 = vld [vmem:[#allocation2 + $0x16a] sm:$0xff]  ;;  %v3049_v47 = vld [vmem:[#allocation2 + $0x162] sm:$0xff] }
 0x290   : > { %v10049_v32 = vpop.permute.xlu1 %1813  ;;  %v10051_v29 = vpop.permute.xlu0 %1811 }
 0x292   : > { %1993 = vrot.lane.b32.xlu1 %v1004_v24, %s8299_s28  ;;  %1991 = vrot.lane.b32.xlu0 %v1003_v26, %s8299_s28  ;;  %v3052_v24 = vld [vmem:[#allocation2 + $0x1a2] sm:$0xff]  ;;  %v3051_v26 = vld [vmem:[#allocation2 + $0x19a] sm:$0xff] }
 0x294   : > { %v10055_v41 = vpop.permute.xlu1 %1817  ;;  %v10057_v28 = vpop.permute.xlu0 %1815 }
 0x296   : > { %1997 = vrot.lane.b32.xlu1 %v1006_v18, %s8299_s28  ;;  %1995 = vrot.lane.b32.xlu0 %v1005_v19, %s8299_s28  ;;  %v3054_v18 = vld [vmem:[#allocation2 + $0x1da] sm:$0xff]  ;;  %v3053_v19 = vld [vmem:[#allocation2 + $0x1d2] sm:$0xff] }
 0x298   : > { %v10061_v37 = vpop.permute.xlu1 %1821  ;;  %v10063_v53 = vpop.permute.xlu0 %1819 }
 0x299   : > { %13205 = vst [vmem:[#allocation164_spill] sm:$0xff] %v10061_v37  ;;  %13206 = vst [vmem:[#allocation165_spill] sm:$0xff] %v10063_v53  ;;  %v13231_v53 = vld [vmem:[#allocation7_spill] sm:$0xff] }
 0x29a   : > { %3308 = vrot.lane.b32.xlu1 %v3050_v27, %s8292_s8  ;;  %3306 = vrot.lane.b32.xlu0 %v3049_v47, %s8292_s8  ;;  %v3056_v27 = vld [vmem:[#allocation2 + $0x212] sm:$0xff]  ;;  %v3055_v47 = vld [vmem:[#allocation2 + $0x20a] sm:$0xff]  ;;  %v10137_v37 = vsel %vm279_vm0, %v723_v13, %v13231_v53 }
 0x29b   : > { %v13238_v53 = vld [vmem:[#allocation12_spill] sm:$0xff] }
 0x29c   : > { %v10067_v49 = vpop.permute.xlu1 %1825  ;;  %v10069_v62 = vpop.permute.xlu0 %1823 }
 0x29d   : > { %13207 = vst [vmem:[#allocation166_spill] sm:$0xff] %v10067_v49  ;;  %13208 = vst [vmem:[#allocation167_spill] sm:$0xff] %v10069_v62  ;;  %v729_v62 = vld [vmem:[#allocation2 + $0x3cc] sm:$0xff]  ;;  %v728_v49 = vld [vmem:[#allocation2 + $0x3c4] sm:$0xff] }
 0x29e   : > { %3312 = vrot.lane.b32.xlu1 %v3052_v24, %s8292_s8  ;;  %3310 = vrot.lane.b32.xlu0 %v3051_v26, %s8292_s8  ;;  %v3058_v24 = vld [vmem:[#allocation2 + $0x24a] sm:$0xff]  ;;  %v3057_v26 = vld [vmem:[#allocation2 + $0x242] sm:$0xff] }
 0x2a0   : > { %v10073_v58 = vpop.permute.xlu1 %1829  ;;  %v10075_v63 = vpop.permute.xlu0 %1827 }
 0x2a1   : > { %13209 = vst [vmem:[#allocation168_spill] sm:$0xff] %v10073_v58  ;;  %13210 = vst [vmem:[#allocation169_spill] sm:$0xff] %v10075_v63 }
 0x2a2   : > { %3316 = vrot.lane.b32.xlu1 %v3054_v18, %s8292_s8  ;;  %3314 = vrot.lane.b32.xlu0 %v3053_v19, %s8292_s8  ;;  %v3060_v18 = vld [vmem:[#allocation2 + $0x282] sm:$0xff]  ;;  %v3059_v19 = vld [vmem:[#allocation2 + $0x27a] sm:$0xff] }
 0x2a4   : > { %v10079_v10 = vpop.permute.xlu1 %1833  ;;  %v10081_v9 = vpop.permute.xlu0 %1831 }
 0x2a5   : > { %13211 = vst [vmem:[#allocation170_spill] sm:$0xff] %v10079_v10  ;;  %13212 = vst [vmem:[#allocation171_spill] sm:$0xff] %v10081_v9 }
 0x2a6   : > { %3320 = vrot.lane.b32.xlu1 %v3056_v27, %s8292_s8  ;;  %3318 = vrot.lane.b32.xlu0 %v3055_v47, %s8292_s8  ;;  %v3062_v27 = vld [vmem:[#allocation2 + $0x2ba] sm:$0xff]  ;;  %v3061_v47 = vld [vmem:[#allocation2 + $0x2b2] sm:$0xff] }
 0x2a8   : > { %v10085_v56 = vpop.permute.xlu1 %1837  ;;  %v10087_v58 = vpop.permute.xlu0 %1835 }
 0x2a9   : > { %13213 = vst [vmem:[#allocation172_spill] sm:$0xff] %v10085_v56  ;;  %13214 = vst [vmem:[#allocation173_spill] sm:$0xff] %v10087_v58 }
 0x2aa   : > { %3324 = vrot.lane.b32.xlu1 %v3058_v24, %s8292_s8  ;;  %3322 = vrot.lane.b32.xlu0 %v3057_v26, %s8292_s8  ;;  %v3064_v24 = vld [vmem:[#allocation2 + $0x2f2] sm:$0xff]  ;;  %v3063_v26 = vld [vmem:[#allocation2 + $0x2ea] sm:$0xff] }
 0x2ac   : > { %v10091_v63 = vpop.permute.xlu1 %1841  ;;  %v10093_v10 = vpop.permute.xlu0 %1839 }
 0x2ad   : > { %13215 = vst [vmem:[#allocation174_spill] sm:$0xff] %v10091_v63  ;;  %13216 = vst [vmem:[#allocation175_spill] sm:$0xff] %v10093_v10 }
 0x2ae   : > { %3328 = vrot.lane.b32.xlu1 %v3060_v18, %s8292_s8  ;;  %3326 = vrot.lane.b32.xlu0 %v3059_v19, %s8292_s8  ;;  %v3066_v18 = vld [vmem:[#allocation2 + $0x32a] sm:$0xff]  ;;  %v3065_v19 = vld [vmem:[#allocation2 + $0x322] sm:$0xff] }
 0x2b0   : > { %v10097_v9 = vpop.permute.xlu1 %1845  ;;  %v10099_v56 = vpop.permute.xlu0 %1843 }
 0x2b1   : > { %13217 = vst [vmem:[#allocation176_spill] sm:$0xff] %v10097_v9  ;;  %13218 = vst [vmem:[#allocation177_spill] sm:$0xff] %v10099_v56 }
 0x2b2   : > { %3332 = vrot.lane.b32.xlu1 %v3062_v27, %s8292_s8  ;;  %3330 = vrot.lane.b32.xlu0 %v3061_v47, %s8292_s8  ;;  %v3068_v27 = vld [vmem:[#allocation2 + $0x362] sm:$0xff]  ;;  %v3067_v47 = vld [vmem:[#allocation2 + $0x35a] sm:$0xff] }
 0x2b4   : > { %v10103_v58 = vpop.permute.xlu1 %1849  ;;  %v10105_v63 = vpop.permute.xlu0 %1847 }
 0x2b5   : > { %13219 = vst [vmem:[#allocation178_spill] sm:$0xff] %v10103_v58  ;;  %13220 = vst [vmem:[#allocation179_spill] sm:$0xff] %v10105_v63  ;;  %v720_v63 = vld [vmem:[#allocation2 + $0x2e4] sm:$0xff] }
 0x2b6   : > { %3336 = vrot.lane.b32.xlu1 %v3064_v24, %s8292_s8  ;;  %3334 = vrot.lane.b32.xlu0 %v3063_v26, %s8292_s8  ;;  %v718_v24 = vld [vmem:[#allocation2 + $0x2ac] sm:$0xff] }
 0x2b7   : > { %v721_v26 = vld [vmem:[#allocation2 + $0x2ec] sm:$0xff] }
 0x2b8   : > { %v10109_v10 = vpop.permute.xlu1 %1853  ;;  %v10111_v9 = vpop.permute.xlu0 %1851 }
 0x2b9   : > { %13221 = vst [vmem:[#allocation180_spill] sm:$0xff] %v10109_v10  ;;  %13222 = vst [vmem:[#allocation181_spill] sm:$0xff] %v10111_v9  ;;  %v3070_v10 = vld [vmem:[#allocation2 + $0x39a] sm:$0xff] }
 0x2ba   : > { %3340 = vrot.lane.b32.xlu1 %v3066_v18, %s8292_s8  ;;  %3338 = vrot.lane.b32.xlu0 %v3065_v19, %s8292_s8  ;;  %v719_v9 = vld [vmem:[#allocation2 + $0x2b4] sm:$0xff]  ;;  %v722_v18 = vld [vmem:[#allocation2 + $0x31c] sm:$0xff] }
 0x2bb   : > { %v2032_v60 = vsel %vm279_vm0, %v719_v9, %v13230_v55  ;;  %v13237_v55 = vld [vmem:[#allocation11_spill] sm:$0xff] }
 0x2bc   : > { %v10115_v56 = vpop.permute.xlu1 %1857  ;;  %v10117_v58 = vpop.permute.xlu0 %1855  ;;  %v10157_v13 = vsel %vm279_vm0, %v727_v42, %v13237_v55  ;;  %v13242_v42 = vld [vmem:[#allocation16_spill] sm:$0xff] }
 0x2bd   : > { %13223 = vst [vmem:[#allocation182_spill] sm:$0xff] %v10115_v56  ;;  %13224 = vst [vmem:[#allocation183_spill] sm:$0xff] %v10117_v58  ;;  %v724_v56 = vld [vmem:[#allocation2 + $0x354] sm:$0xff]  ;;  %v726_v58 = vld [vmem:[#allocation2 + $0x38c] sm:$0xff] }
 0x2be   : > { %3344 = vrot.lane.b32.xlu1 %v3068_v27, %s8292_s8  ;;  %3342 = vrot.lane.b32.xlu0 %v3067_v47, %s8292_s8  ;;  %v13227_v27 = vld [vmem:[#allocation3_spill] sm:$0xff] }
 0x2bf   : > { %v2033_v47 = vsel %vm279_vm0, %v720_v63, %v13227_v27  ;;  %v13233_v63 = vld [vmem:[#allocation9_spill] sm:$0xff] }
 0x2c0   : > { %v10121_v52 = vpop.permute.xlu1 %1861  ;;  %v10123_v19 = vpop.permute.xlu0 %1859  ;;  %v10145_v27 = vsel %vm279_vm0, %v725_v43, %v13233_v63  ;;  %v8251_v63 = vld [vmem:[#allocation2 + $0x404] sm:$0xff] }
 0x2c1   : > { %13225 = vst [vmem:[#allocation184_spill] sm:$0xff] %v10121_v52  ;;  %13226 = vst [vmem:[#allocation185_spill] sm:$0xff] %v10123_v19  ;;  %v2031_v52 = vsel %vm279_vm0, %v718_v24, %v13228_v48  ;;  %v2034_v19 = vsel %vm279_vm0, %v721_v26, %v13229_v51  ;;  %v13234_v48 = vld [vmem:[#allocation10_spill] sm:$0xff]  ;;  %v10161_v26 = vsel %vm279_vm0, %v726_v58, %v13238_v53  ;;  %v13243_v53 = vld [vmem:[#allocation17_spill] sm:$0xff] }
 0x2c2   : > { %3348 = vrot.lane.b32.xlu1 %v3070_v10, %s8292_s8  ;;  %3346 = vrot.lane.b32.xlu0 %v3069_v59, %s8292_s8  ;;  %v13232_v10 = vld [vmem:[#allocation8_spill] sm:$0xff]  ;;  %v10149_v51 = vsel %vm279_vm0, %v724_v56, %v13234_v48  ;;  %v13241_v48 = vld [vmem:[#allocation15_spill] sm:$0xff] }
 0x2c3   : > { %v10141_v59 = vsel %vm279_vm0, %v722_v18, %v13232_v10  ;;  %v13239_v18 = vld [vmem:[#allocation13_spill] sm:$0xff]  ;;  %v13240_v10 = vld [vmem:[#allocation14_spill] sm:$0xff] }
 0x2c4   : > { %v10151_v24 = vpop.permute.xlu1 %1865  ;;  %v10153_v9 = vpop.permute.xlu0 %1863  ;;  %v10165_v43 = vsel %vm279_vm0, %v729_v62, %v13239_v18  ;;  %v10169_v56 = vsel %vm279_vm0, %v728_v49, %v13240_v10  ;;  %v8253_v58 = vld [vmem:[#allocation2 + $0x43c] sm:$0xff]  ;;  %v8254_v62 = vld [vmem:[#allocation2 + $0x434] sm:$0xff] }
 0x2c5   : > { %13235 = vst [vmem:[#allocation3_spill] sm:$0xff] %v10151_v24  ;;  %13236 = vst [vmem:[#allocation4_spill] sm:$0xff] %v10153_v9  ;;  %v10173_v9 = vsel %vm279_vm0, %v8251_v63, %v13241_v48  ;;  %v8252_v24 = vld [vmem:[#allocation2 + $0x3fc] sm:$0xff]  ;;  %v10181_v3 = vsel %vm279_vm0, %v8253_v58, %v13243_v53  ;;  %v8255_v53 = vld [vmem:[#allocation2 + $0x474] sm:$0xff] }
 0x2c6   : > { %v10177_v55 = vsel %vm279_vm0, %v8252_v24, %v13242_v42  ;;  %13244 = vst [vmem:[#allocation5_spill] sm:$0xff] %v10181_v3  ;;  %3352 = vrot.lane.b32.xlu1 %v3072_v30, %s8292_s8  ;;  %3350 = vrot.lane.b32.xlu0 %v3071_v31, %s8292_s8  ;;  %v13245_v49 = vld [vmem:[#allocation18_spill] sm:$0xff]  ;;  %v13246_v10 = vld [vmem:[#allocation35_spill] sm:$0xff]  ;;  %v13247_v24 = vld [vmem:[#allocation36_spill] sm:$0xff] }
 0x2c7   : > { %v10187_v18 = vsel %vm279_vm0, %v8254_v62, %v13245_v49  ;;  %v2065_v63 = vsel %vm2063_vm2, %v2032_v60, %v13246_v10  ;;  %v2064_v48 = vsel %vm2063_vm2, %v2031_v52, %v13247_v24  ;;  %v3074_v42 = vld [vmem:[#allocation2 + $0x40a] sm:$0xff]  ;;  %v3073_v58 = vld [vmem:[#allocation2 + $0x402] sm:$0xff] }
 0x2c8   : > { %v13248_v3 = vld [vmem:[#allocation19_spill] sm:$0xff]  ;;  %v2098_v31 = vsel %vm2096_vm3, %v2065_v63, %v9528_v45  ;;  %v2097_v62 = vsel %vm2096_vm3, %v2064_v48, %v9530_v44  ;;  %v10201_v49 = vpop.permute.xlu1 %1869  ;;  %v10203_v60 = vpop.permute.xlu0 %1867  ;;  %v8256_v52 = vld [vmem:[#allocation2 + $0x46c] sm:$0xff] }
 0x2c9   : > { %v10195_v30 = vsel %vm279_vm0, %v8255_v53, %v13248_v3  ;;  %v13249_v10 = vld [vmem:[#allocation20_spill] sm:$0xff]  ;;  %v2131_v3 = vsel %vm2129_vm4, %v2098_v31, %v9680_v23  ;;  %v2130_v53 = vsel %vm2129_vm4, %v2097_v62, %v9682_v22  ;;  %v13250_v45 = vld [vmem:[#allocation37_spill] sm:$0xff] }
 0x2ca   : > { %v10207_v24 = vsel %vm279_vm0, %v8256_v52, %v13249_v10  ;;  %v2067_v44 = vsel %vm2063_vm2, %v2034_v19, %v13250_v45  ;;  %v2164_v63 = vsel %vm2162_vm5, %v2131_v3, %v9810_v12  ;;  %v2163_v48 = vsel %vm2162_vm5, %v2130_v53, %v9812_v7  ;;  %3356 = vrot.lane.b32.xlu1 %v3074_v42, %s8292_s8  ;;  %v13251_v52 = vld [vmem:[#allocation38_spill] sm:$0xff]  ;;  %v3076_v10 = vld [vmem:[#allocation2 + $0x442] sm:$0xff] }
 0x2cb   : > { %3354 = vrot.lane.b32.xlu0 %v3073_v58, %s8292_s8  ;;  %v2066_v31 = vsel %vm2063_vm2, %v2033_v47, %v13251_v52  ;;  %v2100_v62 = vsel %vm2096_vm3, %v2067_v44, %v9540_v40  ;;  %v2197_v19 = vsel %vm2195_vm6, %v2164_v63, %v9930_v50  ;;  %v2196_v12 = vsel %vm2195_vm6, %v2163_v48, %v9932_v57  ;;  %v3075_v3 = vld [vmem:[#allocation2 + $0x43a] sm:$0xff]  ;;  %v13252_v44 = vld [vmem:[#allocation21_spill] sm:$0xff] }
 0x2cc   : > { %v2099_v7 = vsel %vm2096_vm3, %v2066_v31, %v9542_v39  ;;  %v2230_v42 = vsel %vm2228_vm7, %v2197_v19, %v10043_v46  ;;  %v2229_v47 = vsel %vm2228_vm7, %v2196_v12, %v10045_v25  ;;  %v1938_v58 = vpop.permute.xlu1 %1937  ;;  %v1936_v53 = vpop.permute.xlu0 %1935  ;;  %v2133_v40 = vsel %vm2129_vm4, %v2100_v62, %v9692_v21  ;;  %v8257_v39 = vld [vmem:[#allocation2 + $0x4ac] sm:$0xff]  ;;  %v13253_v48 = vld [vmem:[#allocation39_spill] sm:$0xff] }
 0x2cd   : > { %v2132_v57 = vsel %vm2129_vm4, %v2099_v7, %v9694_v20  ;;  %v2263_v50 = vsel %vm2261_vm8, %v2230_v42, %v1938_v58  ;;  %v2262_v45 = vsel %vm2261_vm8, %v2229_v47, %v1936_v53  ;;  %v10243_v46 = vsel %vm279_vm0, %v8257_v39, %v13252_v44  ;;  %v13254_v31 = vld [vmem:[#allocation40_spill] sm:$0xff]  ;;  %v3077_v12 = vld [vmem:[#allocation2 + $0x472] sm:$0xff] }
 0x2ce   : > { %v2166_v25 = vsel %vm2162_vm5, %v2133_v40, %v9816_v8  ;;  %v2165_v63 = vsel %vm2162_vm5, %v2132_v57, %v9818_v6  ;;  %3360 = vrot.lane.b32.xlu1 %v3076_v10, %s8292_s8  ;;  %v2069_v52 = vsel %vm2063_vm2, %v10137_v37, %v13253_v48  ;;  %v2068_v62 = vsel %vm2063_vm2, %v10141_v59, %v13254_v31  ;;  %v3078_v6 = vld [vmem:[#allocation2 + $0x47a] sm:$0xff]  ;;  %v8258_v47 = vld [vmem:[#allocation2 + $0x4a4] sm:$0xff]  ;;  %v13256_v40 = vld [vmem:[#allocation41_spill] sm:$0xff] }
 0x2cf   : > { %3358 = vrot.lane.b32.xlu0 %v3075_v3, %s8292_s8  ;;  %v2199_v19 = vsel %vm2195_vm6, %v2166_v25, %v9941_v54  ;;  %v2198_v8 = vsel %vm2195_vm6, %v2165_v63, %v9943_v1  ;;  %7794 = vmatprep.mubr.msk.f32.mxu0 %vm2304_vm9, %v2262_v45  ;;  %v2102_v10 = vsel %vm2096_vm3, %v2069_v52, %v9552_v36  ;;  %v13255_v58 = vld [vmem:[#allocation22_spill] sm:$0xff]  ;;  %v3079_v44 = vld [vmem:[#allocation2 + $0x4aa] sm:$0xff] }
 0x2d0   : > { %v2101_v37 = vsel %vm2096_vm3, %v2068_v62, %v9554_v35  ;;  %v2232_v3 = vsel %vm2228_vm7, %v2199_v19, %v10049_v32  ;;  %v2231_v59 = vsel %vm2228_vm7, %v2198_v8, %v10051_v29  ;;  %7795 = vmatmul.mubr.msk.f32.vlgmr.msra.gmra.mrb[0].mxu0 %vm2304_vm9, %v2263_v50  ;;  %v1942_v54 = vpop.permute.xlu1 %1941  ;;  %v1940_v1 = vpop.permute.xlu0 %1939  ;;  %v2135_v7 = vsel %vm2129_vm4, %v2102_v10, %v9704_v17  ;;  %v13257_v50 = vld [vmem:[#allocation42_spill] sm:$0xff]  ;;  %v8259_v31 = vld [vmem:[#allocation2 + $0x4e4] sm:$0xff] }
 0x2d1   : > { %v2134_v42 = vsel %vm2129_vm4, %v2101_v37, %v9706_v16  ;;  %v2265_v36 = vsel %vm2261_vm8, %v2232_v3, %v1942_v54  ;;  %v2264_v35 = vsel %vm2261_vm8, %v2231_v59, %v1940_v1  ;;  %v10279_v32 = vsel %vm279_vm0, %v8258_v47, %v13255_v58  ;;  %v13258_v62 = vld [vmem:[#allocation23_spill] sm:$0xff]  ;;  %v3081_v59 = vld [vmem:[#allocation2 + $0x16e] sm:$0xff] }
 0x2d2   : > { %v2168_v29 = vsel %vm2162_vm5, %v2135_v7, %v9822_v11  ;;  %v2167_v53 = vsel %vm2162_vm5, %v2134_v42, %v9824_v0  ;;  %3364 = vrot.lane.b32.xlu1 %v3078_v6, %s8292_s8  ;;  %v2071_v57 = vsel %vm2063_vm2, %v10145_v27, %v13256_v40  ;;  %v2070_v45 = vsel %vm2063_vm2, %v10149_v51, %v13257_v50  ;;  %v3080_v0 = vld [vmem:[#allocation2 + $0x4b2] sm:$0xff]  ;;  %v13259_v8 = vld [vmem:[#allocation43_spill] sm:$0xff]  ;;  %v13263_v7 = vld [vmem:[#allocation68_spill] sm:$0xff] }
 0x2d3   : > { %3362 = vrot.lane.b32.xlu0 %v3077_v12, %s8292_s8  ;;  %v2201_v39 = vsel %vm2195_vm6, %v2168_v29, %v9947_v38  ;;  %v2200_v11 = vsel %vm2195_vm6, %v2167_v53, %v9949_v4  ;;  %7797 = vmatprep.mubr.msk.f32.mxu0 %vm2304_vm9, %v2264_v35  ;;  %v2104_v25 = vsel %vm2096_vm3, %v2071_v57, %v9560_v34  ;;  %v13260_v12 = vld [vmem:[#allocation44_spill] sm:$0xff]  ;;  %v13261_v3 = vld [vmem:[#allocation139_spill] sm:$0xff] }
 0x2d4   : > { %v2103_v27 = vsel %vm2096_vm3, %v2070_v45, %v9562_v33  ;;  %v2234_v63 = vsel %vm2228_vm7, %v2201_v39, %v10055_v41  ;;  %v2233_v51 = vsel %vm2228_vm7, %v2200_v11, %v10057_v28  ;;  %7798 = vmatmul.mubr.msk.f32.gmra.mrb[2].mxu0 %vm2304_vm9, %v2265_v36  ;;  %v1946_v38 = vpop.permute.xlu1 %1945  ;;  %v1944_v4 = vpop.permute.xlu0 %1943  ;;  %v2137_v48 = vsel %vm2129_vm4, %v2104_v25, %v9712_v15  ;;  %v13262_v54 = vld [vmem:[#allocation67_spill] sm:$0xff]  ;;  %v13264_v42 = vld [vmem:[#allocation164_spill] sm:$0xff] }
 0x2d5   : > { %v2136_v52 = vsel %vm2129_vm4, %v2103_v27, %v9714_v14  ;;  %v2267_v34 = vsel %vm2261_vm8, %v2234_v63, %v1946_v38  ;;  %v2266_v33 = vsel %vm2261_vm8, %v2233_v51, %v1944_v4  ;;  %v10315_v41 = vsel %vm279_vm0, %v8259_v31, %v13258_v62  ;;  %v13266_v58 = vld [vmem:[#allocation91_spill] sm:$0xff]  ;;  %v13267_v53 = vld [vmem:[#allocation92_spill] sm:$0xff]  ;;  %v13271_v63 = vld [vmem:[#allocation45_spill] sm:$0xff] }
 0x2d6   : > { %v2170_v28 = vsel %vm2162_vm5, %v2137_v48, %v9828_v5  ;;  %v2169_v19 = vsel %vm2162_vm5, %v2136_v52, %v9830_v2  ;;  %3368 = vrot.lane.b32.xlu1 %v3080_v0, %s8292_s8  ;;  %v2073_v6 = vsel %vm2063_vm2, %v10157_v13, %v13259_v8  ;;  %v2072_v10 = vsel %vm2063_vm2, %v10161_v26, %v13260_v12  ;;  %v3082_v2 = vld [vmem:[#allocation2 + $0x176] sm:$0xff]  ;;  %v13268_v39 = vld [vmem:[#allocation24_spill] sm:$0xff]  ;;  %v13269_v0 = vld [vmem:[#allocation115_spill] sm:$0xff] }
 0x2d7   : > { %3366 = vrot.lane.b32.xlu0 %v3079_v44, %s8292_s8  ;;  %v2203_v37 = vsel %vm2195_vm6, %v2170_v28, %v9953_v61  ;;  %v2202_v5 = vsel %vm2195_vm6, %v2169_v19, %v13261_v3  ;;  %7800 = vmatprep.mubr.msk.f32.mxu0 %vm2304_vm9, %v2266_v33  ;;  %v2106_v1 = vsel %vm2096_vm3, %v2073_v6, %v13262_v54  ;;  %v13265_v26 = vld [vmem:[#allocation165_spill] sm:$0xff]  ;;  %v8260_v45 = vld [vmem:[#allocation2 + $0x4dc] sm:$0xff]  ;;  %v13270_v25 = vld [vmem:[#allocation116_spill] sm:$0xff] }
 0x2d8   : > { %v2105_v13 = vsel %vm2096_vm3, %v2072_v10, %v13263_v7  ;;  %v2236_v36 = vsel %vm2228_vm7, %v2203_v37, %v13264_v42  ;;  %v2235_v35 = vsel %vm2228_vm7, %v2202_v5, %v13265_v26  ;;  %7801 = vmatmul.mubr.msk.f32.gmra.mrb[4].mxu0 %vm2304_vm9, %v2267_v34  ;;  %v1950_v61 = vpop.permute.xlu1 %1949  ;;  %v1948_v47 = vpop.permute.xlu0 %1947  ;;  %v2139_v29 = vsel %vm2129_vm4, %v2106_v1, %v13266_v58  ;;  %v13272_v38 = vld [vmem:[#allocation46_spill] sm:$0xff]  ;;  %v13273_v48 = vld [vmem:[#allocation140_spill] sm:$0xff]  ;;  %v13274_v34 = vld [vmem:[#allocation141_spill] sm:$0xff] }
 0x2d9   : > { %v2138_v40 = vsel %vm2129_vm4, %v2105_v13, %v13267_v53  ;;  %v2269_v57 = vsel %vm2261_vm8, %v2236_v36, %v1950_v61  ;;  %v2268_v50 = vsel %vm2261_vm8, %v2235_v35, %v1948_v47  ;;  %v10351_v11 = vsel %vm279_vm0, %v8260_v45, %v13268_v39  ;;  %v3084_v31 = vld [vmem:[#allocation2 + $0x1ae] sm:$0xff]  ;;  %v3083_v62 = vld [vmem:[#allocation2 + $0x1a6] sm:$0xff]  ;;  %v13276_v8 = vld [vmem:[#allocation70_spill] sm:$0xff] }
 0x2da   : > { %v2172_v44 = vsel %vm2162_vm5, %v2139_v29, %v13269_v0  ;;  %v2171_v27 = vsel %vm2162_vm5, %v2138_v40, %v13270_v25  ;;  %3436 = vrot.lane.b32.xlu1 %v3082_v2, %s8293_s9  ;;  %v2075_v51 = vsel %vm2063_vm2, %v10165_v43, %v13271_v63  ;;  %v2074_v4 = vsel %vm2063_vm2, %v10169_v56, %v13272_v38  ;;  %v13275_v28 = vld [vmem:[#allocation69_spill] sm:$0xff]  ;;  %v13277_v6 = vld [vmem:[#allocation166_spill] sm:$0xff]  ;;  %v13278_v56 = vld [vmem:[#allocation167_spill] sm:$0xff] }
 0x2db   : > { %3434 = vrot.lane.b32.xlu0 %v3081_v59, %s8293_s9  ;;  %v2205_v52 = vsel %vm2195_vm6, %v2172_v44, %v13273_v48  ;;  %v2204_v33 = vsel %vm2195_vm6, %v2171_v27, %v13274_v34  ;;  %7803 = vmatprep.mubr.msk.f32.mxu0 %vm2304_vm9, %v2268_v50  ;;  %v2108_v19 = vsel %vm2096_vm3, %v2075_v51, %v13275_v28  ;;  %v13279_v5 = vld [vmem:[#allocation93_spill] sm:$0xff]  ;;  %v13280_v59 = vld [vmem:[#allocation94_spill] sm:$0xff]  ;;  %v13284_v29 = vld [vmem:[#allocation47_spill] sm:$0xff] }
 0x2dc   : > { %v2107_v43 = vsel %vm2096_vm3, %v2074_v4, %v13276_v8  ;;  %v2238_v12 = vsel %vm2228_vm7, %v2205_v52, %v13277_v6  ;;  %v2237_v10 = vsel %vm2228_vm7, %v2204_v33, %v13278_v56  ;;  %7804 = vmatmul.mubr.msk.f32.gmra.mrb[6].mxu0 %vm2304_vm9, %v2269_v57  ;;  %v1954_v37 = vpop.permute.xlu1 %1953  ;;  %v1952_v3 = vpop.permute.xlu0 %1951  ;;  %v2141_v2 = vsel %vm2129_vm4, %v2108_v19, %v13279_v5  ;;  %v8261_v13 = vld [vmem:[#allocation2 + $0x51c] sm:$0xff]  ;;  %v13281_v42 = vld [vmem:[#allocation25_spill] sm:$0xff]  ;;  %v13285_v57 = vld [vmem:[#allocation48_spill] sm:$0xff] }
 0x2dd   : > { %v2140_v54 = vsel %vm2129_vm4, %v2107_v43, %v13280_v59  ;;  %v2271_v1 = vsel %vm2261_vm8, %v2238_v12, %v1954_v37  ;;  %v2270_v7 = vsel %vm2261_vm8, %v2237_v10, %v1952_v3  ;;  %v10387_v36 = vsel %vm279_vm0, %v8261_v13, %v13281_v42  ;;  %v13282_v26 = vld [vmem:[#allocation117_spill] sm:$0xff]  ;;  %v13283_v61 = vld [vmem:[#allocation118_spill] sm:$0xff]  ;;  %v13287_v0 = vld [vmem:[#allocation143_spill] sm:$0xff] }
 0x2de   : > { %v2174_v35 = vsel %vm2162_vm5, %v2141_v2, %v13282_v26  ;;  %v2173_v47 = vsel %vm2162_vm5, %v2140_v54, %v13283_v61  ;;  %3440 = vrot.lane.b32.xlu1 %v3084_v31, %s8293_s9  ;;  %v2077_v40 = vsel %vm2063_vm2, %v10173_v9, %v13284_v29  ;;  %v2076_v50 = vsel %vm2063_vm2, %v10177_v55, %v13285_v57  ;;  %v13286_v45 = vld [vmem:[#allocation142_spill] sm:$0xff]  ;;  %v3086_v25 = vld [vmem:[#allocation2 + $0x1e6] sm:$0xff]  ;;  %v13291_v55 = vld [vmem:[#allocation169_spill] sm:$0xff] }
 0x2df   : > { %3438 = vrot.lane.b32.xlu0 %v3083_v62, %s8293_s9  ;;  %v2207_v39 = vsel %vm2195_vm6, %v2174_v35, %v13286_v45  ;;  %v2206_v44 = vsel %vm2195_vm6, %v2173_v47, %v13287_v0  ;;  %7806 = vmatprep.mubr.msk.f32.mxu0 %vm2304_vm9, %v2270_v7  ;;  %v3085_v27 = vld [vmem:[#allocation2 + $0x1de] sm:$0xff]  ;;  %v13289_v38 = vld [vmem:[#allocation72_spill] sm:$0xff]  ;;  %v8262_v6 = vld [vmem:[#allocation2 + $0x514] sm:$0xff] }
 0x2e0   : > { %v13288_v63 = vld [vmem:[#allocation71_spill] sm:$0xff]  ;;  %v2109_v9 = vsel %vm2096_vm3, %v2076_v50, %v13289_v38  ;;  %v13290_v4 = vld [vmem:[#allocation168_spill] sm:$0xff]  ;;  %v2239_v52 = vsel %vm2228_vm7, %v2206_v44, %v13291_v55  ;;  %7807 = vmatmul.mubr.msk.f32.gmra.mrb[8].mxu0 %vm2304_vm9, %v2271_v1  ;;  %v1958_v34 = vpop.permute.xlu1 %1957  ;;  %v1956_v33 = vpop.permute.xlu0 %1955  ;;  %v13294_v12 = vld [vmem:[#allocation26_spill] sm:$0xff] }
 0x2e1   : > { %v2110_v51 = vsel %vm2096_vm3, %v2077_v40, %v13288_v63  ;;  %v2240_v48 = vsel %vm2228_vm7, %v2207_v39, %v13290_v4  ;;  %v13292_v31 = vld [vmem:[#allocation95_spill] sm:$0xff]  ;;  %v13293_v28 = vld [vmem:[#allocation96_spill] sm:$0xff]  ;;  %v2272_v43 = vsel %vm2261_vm8, %v2239_v52, %v1956_v33  ;;  %v10423_v56 = vsel %vm279_vm0, %v8262_v6, %v13294_v12  ;;  %v13297_v54 = vld [vmem:[#allocation49_spill] sm:$0xff] }
 0x2e2   : > { %v2143_v62 = vsel %vm2129_vm4, %v2110_v51, %v13292_v31  ;;  %v2142_v19 = vsel %vm2129_vm4, %v2109_v9, %v13293_v28  ;;  %v2273_v8 = vsel %vm2261_vm8, %v2240_v48, %v1958_v34  ;;  %v13295_v10 = vld [vmem:[#allocation119_spill] sm:$0xff]  ;;  %v13296_v3 = vld [vmem:[#allocation120_spill] sm:$0xff]  ;;  %3444 = vrot.lane.b32.xlu1 %v3086_v25, %s8293_s9  ;;  %v13298_v1 = vld [vmem:[#allocation5_spill] sm:$0xff]  ;;  %7809 = vmatprep.mubr.msk.f32.mxu0 %vm2304_vm9, %v2272_v43 }
 0x2e3   : > { %v2176_v37 = vsel %vm2162_vm5, %v2143_v62, %v13295_v10  ;;  %v2175_v2 = vsel %vm2162_vm5, %v2142_v19, %v13296_v3  ;;  %3442 = vrot.lane.b32.xlu0 %v3085_v27, %s8293_s9  ;;  %v2079_v7 = vsel %vm2063_vm2, %v13298_v1, %v13297_v54  ;;  %v13299_v13 = vld [vmem:[#allocation50_spill] sm:$0xff]  ;;  %v13300_v26 = vld [vmem:[#allocation144_spill] sm:$0xff]  ;;  %v13301_v61 = vld [vmem:[#allocation145_spill] sm:$0xff] }
 0x2e4   : > { %v2078_v42 = vsel %vm2063_vm2, %v10187_v18, %v13299_v13  ;;  %v2209_v35 = vsel %vm2195_vm6, %v2176_v37, %v13300_v26  ;;  %v2208_v47 = vsel %vm2195_vm6, %v2175_v2, %v13301_v61  ;;  %v3088_v29 = vld [vmem:[#allocation2 + $0x21e] sm:$0xff]  ;;  %v3087_v40 = vld [vmem:[#allocation2 + $0x216] sm:$0xff]  ;;  %7810 = vmatmul.mubr.msk.f32.gmra.mrb[10].mxu0 %vm2304_vm9, %v2273_v8  ;;  %v1962_v27 = vpop.permute.xlu1 %1961  ;;  %v1960_v63 = vpop.permute.xlu0 %1959  ;;  %v13312_v10 = vld [vmem:[#allocation52_spill] sm:$0xff] }
 0x2e5   : > { %v13302_v57 = vld [vmem:[#allocation73_spill] sm:$0xff]  ;;  %v13303_v45 = vld [vmem:[#allocation74_spill] sm:$0xff]  ;;  %v13305_v18 = vld [vmem:[#allocation171_spill] sm:$0xff]  ;;  %v2080_v37 = vsel %vm2063_vm2, %v10207_v24, %v13312_v10 }
 0x2e6   : > { %v2112_v50 = vsel %vm2096_vm3, %v2079_v7, %v13302_v57  ;;  %v2111_v39 = vsel %vm2096_vm3, %v2078_v42, %v13303_v45  ;;  %v13304_v0 = vld [vmem:[#allocation170_spill] sm:$0xff]  ;;  %v2241_v25 = vsel %vm2228_vm7, %v2208_v47, %v13305_v18  ;;  %v13306_v51 = vld [vmem:[#allocation97_spill] sm:$0xff]  ;;  %v13308_v34 = vld [vmem:[#allocation27_spill] sm:$0xff]  ;;  %3448 = vrot.lane.b32.xlu1 %v3088_v29, %s8293_s9 }
 0x2e7   : > { %v2242_v44 = vsel %vm2228_vm7, %v2209_v35, %v13304_v0  ;;  %v2145_v38 = vsel %vm2129_vm4, %v2112_v50, %v13306_v51  ;;  %v13307_v9 = vld [vmem:[#allocation98_spill] sm:$0xff]  ;;  %v2274_v55 = vsel %vm2261_vm8, %v2241_v25, %v1960_v63  ;;  %v13309_v62 = vld [vmem:[#allocation121_spill] sm:$0xff]  ;;  %3446 = vrot.lane.b32.xlu0 %v3087_v40, %s8293_s9  ;;  %v13311_v6 = vld [vmem:[#allocation51_spill] sm:$0xff] }
 0x2e8   : > { %v2144_v4 = vsel %vm2129_vm4, %v2111_v39, %v13307_v9  ;;  %v2275_v48 = vsel %vm2261_vm8, %v2242_v44, %v1962_v27  ;;  %v8263_v52 = vld [vmem:[#allocation2 + $0x554] sm:$0xff]  ;;  %v2178_v19 = vsel %vm2162_vm5, %v2145_v38, %v13309_v62  ;;  %v2081_v12 = vsel %vm2063_vm2, %v10195_v30, %v13311_v6  ;;  %v13314_v54 = vld [vmem:[#allocation147_spill] sm:$0xff]  ;;  %7812 = vmatprep.mubr.msk.f32.mxu0 %vm2304_vm9, %v2274_v55  ;;  %v13316_v35 = vld [vmem:[#allocation76_spill] sm:$0xff]  ;;  %v1966_v40 = vpop.permute.xlu1 %1965  ;;  %v1964_v57 = vpop.permute.xlu0 %1963 }
 0x2e9   : > { %v10459_v33 = vsel %vm279_vm0, %v8263_v52, %v13308_v34  ;;  %v13310_v8 = vld [vmem:[#allocation122_spill] sm:$0xff]  ;;  %v3089_v13 = vld [vmem:[#allocation2 + $0x24e] sm:$0xff]  ;;  %v13315_v42 = vld [vmem:[#allocation75_spill] sm:$0xff]  ;;  %v2113_v30 = vsel %vm2096_vm3, %v2080_v37, %v13316_v35  ;;  %7813 = vmatmul.mubr.msk.f32.gmra.mrb[12].mxu0 %vm2304_vm9, %v2275_v48 }
 0x2ea   : > { %v2177_v43 = vsel %vm2162_vm5, %v2144_v4, %v13310_v8  ;;  %v13313_v3 = vld [vmem:[#allocation146_spill] sm:$0xff]  ;;  %v2114_v26 = vsel %vm2096_vm3, %v2081_v12, %v13315_v42  ;;  %v13317_v61 = vld [vmem:[#allocation172_spill] sm:$0xff]  ;;  %v13318_v24 = vld [vmem:[#allocation173_spill] sm:$0xff] }
 0x2eb   : > { %v2211_v2 = vsel %vm2195_vm6, %v2178_v19, %v13313_v3  ;;  %v2210_v1 = vsel %vm2195_vm6, %v2177_v43, %v13314_v54  ;;  %v3090_v7 = vld [vmem:[#allocation2 + $0x256] sm:$0xff]  ;;  %v13319_v50 = vld [vmem:[#allocation99_spill] sm:$0xff]  ;;  %v13320_v39 = vld [vmem:[#allocation100_spill] sm:$0xff]  ;;  %3450 = vrot.lane.b32.xlu0 %v3089_v13, %s8293_s9 }
 0x2ec   : > { %v2244_v47 = vsel %vm2228_vm7, %v2211_v2, %v13317_v61  ;;  %v2243_v29 = vsel %vm2228_vm7, %v2210_v1, %v13318_v24  ;;  %v2147_v45 = vsel %vm2129_vm4, %v2114_v26, %v13319_v50  ;;  %v2146_v0 = vsel %vm2129_vm4, %v2113_v30, %v13320_v39  ;;  %v8264_v25 = vld [vmem:[#allocation2 + $0x54c] sm:$0xff]  ;;  %v13322_v38 = vld [vmem:[#allocation123_spill] sm:$0xff]  ;;  %3452 = vrot.lane.b32.xlu1 %v3090_v7, %s8293_s9  ;;  %v13325_v62 = vld [vmem:[#allocation54_spill] sm:$0xff]  ;;  %v1970_v42 = vpop.permute.xlu1 %1969  ;;  %v1968_v26 = vpop.permute.xlu0 %1967 }
 0x2ed   : > { %v2277_v44 = vsel %vm2261_vm8, %v2244_v47, %v1966_v40  ;;  %v2276_v18 = vsel %vm2261_vm8, %v2243_v29, %v1964_v57  ;;  %v13321_v27 = vld [vmem:[#allocation28_spill] sm:$0xff]  ;;  %v2180_v4 = vsel %vm2162_vm5, %v2147_v45, %v13322_v38  ;;  %v13324_v52 = vld [vmem:[#allocation53_spill] sm:$0xff]  ;;  %v2082_v19 = vsel %vm2063_vm2, %v10279_v32, %v13325_v62  ;;  %v13329_v54 = vld [vmem:[#allocation78_spill] sm:$0xff] }
 0x2ee   : > { %v10495_v63 = vsel %vm279_vm0, %v8264_v25, %v13321_v27  ;;  %v13323_v48 = vld [vmem:[#allocation124_spill] sm:$0xff]  ;;  %v2083_v34 = vsel %vm2063_vm2, %v10243_v46, %v13324_v52  ;;  %v13327_v6 = vld [vmem:[#allocation149_spill] sm:$0xff]  ;;  %7815 = vmatprep.mubr.msk.f32.mxu0 %vm2304_vm9, %v2276_v18  ;;  %v2115_v46 = vsel %vm2096_vm3, %v2082_v19, %v13329_v54  ;;  %v13330_v1 = vld [vmem:[#allocation174_spill] sm:$0xff] }
 0x2ef   : > { %v2179_v55 = vsel %vm2162_vm5, %v2146_v0, %v13323_v48  ;;  %v13326_v8 = vld [vmem:[#allocation148_spill] sm:$0xff]  ;;  %v13328_v3 = vld [vmem:[#allocation77_spill] sm:$0xff]  ;;  %v13331_v32 = vld [vmem:[#allocation175_spill] sm:$0xff]  ;;  %7816 = vmatmul.mubr.msk.f32.gmra.mrb[14].mxu0 %vm2304_vm9, %v2277_v44 }
 0x2f0   : > { %v2213_v43 = vsel %vm2195_vm6, %v2180_v4, %v13326_v8  ;;  %v2212_v12 = vsel %vm2195_vm6, %v2179_v55, %v13327_v6  ;;  %v3092_v10 = vld [vmem:[#allocation2 + $0x28e] sm:$0xff]  ;;  %v3091_v37 = vld [vmem:[#allocation2 + $0x286] sm:$0xff]  ;;  %v2116_v2 = vsel %vm2096_vm3, %v2083_v34, %v13328_v3  ;;  %v13333_v61 = vld [vmem:[#allocation102_spill] sm:$0xff]  ;;  %v1972_v54 = vpop.permute.xlu0 %1971 }
 0x2f1   : > { %v2246_v7 = vsel %vm2228_vm7, %v2213_v43, %v13330_v1  ;;  %v2245_v13 = vsel %vm2228_vm7, %v2212_v12, %v13331_v32  ;;  %v13332_v35 = vld [vmem:[#allocation101_spill] sm:$0xff]  ;;  %v2148_v47 = vsel %vm2129_vm4, %v2115_v46, %v13333_v61  ;;  %v13336_v18 = vld [vmem:[#allocation126_spill] sm:$0xff]  ;;  %3456 = vrot.lane.b32.xlu1 %v3092_v10, %s8293_s9  ;;  %3454 = vrot.lane.b32.xlu0 %v3091_v37, %s8293_s9  ;;  %v13337_v27 = vld [vmem:[#allocation55_spill] sm:$0xff] }
 0x2f2   : > { %v2149_v30 = vsel %vm2129_vm4, %v2116_v2, %v13332_v35  ;;  %v2279_v24 = vsel %vm2261_vm8, %v2246_v7, %v1970_v42  ;;  %v2278_v29 = vsel %vm2261_vm8, %v2245_v13, %v1968_v26  ;;  %v8265_v40 = vld [vmem:[#allocation2 + $0x58c] sm:$0xff]  ;;  %v2181_v25 = vsel %vm2162_vm5, %v2148_v47, %v13336_v18  ;;  %v13339_v55 = vld [vmem:[#allocation150_spill] sm:$0xff]  ;;  %v13340_v34 = vld [vmem:[#allocation151_spill] sm:$0xff]  ;;  %v1974_v2 = vpop.permute.xlu1 %1973 }
 0x2f3   : > { %v13334_v57 = vld [vmem:[#allocation29_spill] sm:$0xff]  ;;  %v2085_v38 = vsel %vm2063_vm2, %v10315_v41, %v13337_v27  ;;  %v13338_v4 = vld [vmem:[#allocation56_spill] sm:$0xff]  ;;  %v2214_v62 = vsel %vm2195_vm6, %v2181_v25, %v13340_v34  ;;  %7818 = vmatprep.mubr.msk.f32.mxu0 %vm2304_vm9, %v2278_v29  ;;  %v3093_v8 = vld [vmem:[#allocation2 + $0x2be] sm:$0xff] }
 0x2f4   : > { %v10531_v45 = vsel %vm279_vm0, %v8265_v40, %v13334_v57  ;;  %v13335_v0 = vld [vmem:[#allocation125_spill] sm:$0xff]  ;;  %v2084_v48 = vsel %vm2063_vm2, %v10351_v11, %v13338_v4  ;;  %v3094_v19 = vld [vmem:[#allocation2 + $0x2c6] sm:$0xff]  ;;  %7819 = vmatmul.mubr.msk.f32.gmra.mrb[16].mxu0 %vm2304_vm9, %v2279_v24  ;;  %v13351_v18 = vld [vmem:[#allocation58_spill] sm:$0xff] }
 0x2f5   : > { %v2182_v44 = vsel %vm2162_vm5, %v2149_v30, %v13335_v0  ;;  %v13341_v43 = vld [vmem:[#allocation79_spill] sm:$0xff]  ;;  %v13342_v12 = vld [vmem:[#allocation80_spill] sm:$0xff]  ;;  %v13344_v11 = vld [vmem:[#allocation177_spill] sm:$0xff]  ;;  %3460 = vrot.lane.b32.xlu1 %v3094_v19, %s8293_s9  ;;  %3458 = vrot.lane.b32.xlu0 %v3093_v8, %s8293_s9  ;;  %v2086_v25 = vsel %vm2063_vm2, %v10423_v56, %v13351_v18 }
 0x2f6   : > { %v2215_v52 = vsel %vm2195_vm6, %v2182_v44, %v13339_v55  ;;  %v2118_v6 = vsel %vm2096_vm3, %v2085_v38, %v13341_v43  ;;  %v2117_v41 = vsel %vm2096_vm3, %v2084_v48, %v13342_v12  ;;  %v13343_v10 = vld [vmem:[#allocation176_spill] sm:$0xff]  ;;  %v2247_v3 = vsel %vm2228_vm7, %v2214_v62, %v13344_v11  ;;  %v13345_v46 = vld [vmem:[#allocation103_spill] sm:$0xff]  ;;  %v13347_v30 = vld [vmem:[#allocation30_spill] sm:$0xff]  ;;  %v1978_v12 = vpop.permute.xlu1 %1977 }
 0x2f7   : > { %v2248_v37 = vsel %vm2228_vm7, %v2215_v52, %v13343_v10  ;;  %v2151_v1 = vsel %vm2129_vm4, %v2118_v6, %v13345_v46  ;;  %v13346_v7 = vld [vmem:[#allocation104_spill] sm:$0xff]  ;;  %v2280_v42 = vsel %vm2261_vm8, %v2247_v3, %v1972_v54  ;;  %v13348_v29 = vld [vmem:[#allocation127_spill] sm:$0xff]  ;;  %v13350_v0 = vld [vmem:[#allocation57_spill] sm:$0xff] }
 0x2f8   : > { %v2150_v32 = vsel %vm2129_vm4, %v2117_v41, %v13346_v7  ;;  %v2281_v13 = vsel %vm2261_vm8, %v2248_v37, %v1974_v2  ;;  %v8266_v26 = vld [vmem:[#allocation2 + $0x584] sm:$0xff]  ;;  %v2184_v40 = vsel %vm2162_vm5, %v2151_v1, %v13348_v29  ;;  %v2087_v44 = vsel %vm2063_vm2, %v10387_v36, %v13350_v0  ;;  %v13353_v4 = vld [vmem:[#allocation153_spill] sm:$0xff]  ;;  %7821 = vmatprep.mubr.msk.f32.mxu0 %vm2304_vm9, %v2280_v42  ;;  %v13355_v19 = vld [vmem:[#allocation82_spill] sm:$0xff]  ;;  %v1976_v41 = vpop.permute.xlu0 %1975 }
 0x2f9   : > { %v2057_v47 = vsel %vm279_vm0, %v8266_v26, %v13347_v30  ;;  %v13349_v24 = vld [vmem:[#allocation128_spill] sm:$0xff]  ;;  %v3096_v55 = vld [vmem:[#allocation2 + $0x2fe] sm:$0xff]  ;;  %v3095_v52 = vld [vmem:[#allocation2 + $0x2f6] sm:$0xff]  ;;  %v2119_v36 = vsel %vm2096_vm3, %v2086_v25, %v13355_v19  ;;  %7822 = vmatmul.mubr.msk.f32.gmra.mrb[18].mxu0 %vm2304_vm9, %v2281_v13 }
 0x2fa   : > { %v2183_v57 = vsel %vm2162_vm5, %v2150_v32, %v13349_v24  ;;  %v13352_v27 = vld [vmem:[#allocation152_spill] sm:$0xff]  ;;  %v13354_v34 = vld [vmem:[#allocation81_spill] sm:$0xff]  ;;  %v13356_v8 = vld [vmem:[#allocation178_spill] sm:$0xff]  ;;  %3464 = vrot.lane.b32.xlu1 %v3096_v55, %s8293_s9  ;;  %3462 = vrot.lane.b32.xlu0 %v3095_v52, %s8293_s9 }
 0x2fb   : > { %v2217_v38 = vsel %vm2195_vm6, %v2184_v40, %v13352_v27  ;;  %v2216_v48 = vsel %vm2195_vm6, %v2183_v57, %v13353_v4  ;;  %v2120_v62 = vsel %vm2096_vm3, %v2087_v44, %v13354_v34  ;;  %v13357_v56 = vld [vmem:[#allocation179_spill] sm:$0xff]  ;;  %v13358_v10 = vld [vmem:[#allocation105_spill] sm:$0xff]  ;;  %v13359_v11 = vld [vmem:[#allocation106_spill] sm:$0xff] }
 0x2fc   : > { %v2250_v43 = vsel %vm2228_vm7, %v2217_v38, %v13356_v8  ;;  %v2249_v6 = vsel %vm2228_vm7, %v2216_v48, %v13357_v56  ;;  %v2153_v37 = vsel %vm2129_vm4, %v2120_v62, %v13358_v10  ;;  %v2152_v3 = vsel %vm2129_vm4, %v2119_v36, %v13359_v11  ;;  %v8267_v1 = vld [vmem:[#allocation2 + $0x5c4] sm:$0xff]  ;;  %v13361_v26 = vld [vmem:[#allocation129_spill] sm:$0xff]  ;;  %v13362_v13 = vld [vmem:[#allocation130_spill] sm:$0xff]  ;;  %v1982_v36 = vpop.permute.xlu1 %1981  ;;  %v1980_v8 = vpop.permute.xlu0 %1979 }
 0x2fd   : > { %v2283_v2 = vsel %vm2261_vm8, %v2250_v43, %v1978_v12  ;;  %v2282_v54 = vsel %vm2261_vm8, %v2249_v6, %v1976_v41  ;;  %v13360_v32 = vld [vmem:[#allocation31_spill] sm:$0xff]  ;;  %v2186_v30 = vsel %vm2162_vm5, %v2153_v37, %v13361_v26  ;;  %v2185_v29 = vsel %vm2162_vm5, %v2152_v3, %v13362_v13  ;;  %v13364_v57 = vld [vmem:[#allocation60_spill] sm:$0xff]  ;;  %v13365_v44 = vld [vmem:[#allocation154_spill] sm:$0xff] }
 0x2fe   : > { %v2060_v42 = vsel %vm279_vm0, %v8267_v1, %v13360_v32  ;;  %v13363_v40 = vld [vmem:[#allocation59_spill] sm:$0xff]  ;;  %v2088_v0 = vsel %vm2063_vm2, %v10495_v63, %v13364_v57  ;;  %v2219_v18 = vsel %vm2195_vm6, %v2186_v30, %v13365_v44  ;;  %7824 = vmatprep.mubr.msk.f32.mxu0 %vm2304_vm9, %v2282_v54  ;;  %v3098_v38 = vld [vmem:[#allocation2 + $0x336] sm:$0xff]  ;;  %v3097_v4 = vld [vmem:[#allocation2 + $0x32e] sm:$0xff] }
 0x2ff   : > { %v2089_v24 = vsel %vm2063_vm2, %v10459_v33, %v13363_v40  ;;  %v13366_v25 = vld [vmem:[#allocation155_spill] sm:$0xff]  ;;  %v13368_v52 = vld [vmem:[#allocation84_spill] sm:$0xff]  ;;  %v13370_v63 = vld [vmem:[#allocation181_spill] sm:$0xff]  ;;  %7825 = vmatmul.mubr.msk.f32.gmra.mrb[20].mxu0 %vm2304_vm9, %v2283_v2  ;;  %3468 = vrot.lane.b32.xlu1 %v3098_v38, %s8293_s9 }
 0x300   : > { %v2218_v27 = vsel %vm2195_vm6, %v2185_v29, %v13366_v25  ;;  %v13367_v48 = vld [vmem:[#allocation83_spill] sm:$0xff]  ;;  %v2121_v33 = vsel %vm2096_vm3, %v2088_v0, %v13368_v52  ;;  %v13369_v34 = vld [vmem:[#allocation180_spill] sm:$0xff]  ;;  %3466 = vrot.lane.b32.xlu0 %v3097_v4, %s8293_s9  ;;  %v13376_v13 = vld [vmem:[#allocation61_spill] sm:$0xff] }
 0x301   : > { %v2122_v55 = vsel %vm2096_vm3, %v2089_v24, %v13367_v48  ;;  %v2252_v62 = vsel %vm2228_vm7, %v2219_v18, %v13369_v34  ;;  %v2251_v19 = vsel %vm2228_vm7, %v2218_v27, %v13370_v63  ;;  %v13371_v43 = vld [vmem:[#allocation107_spill] sm:$0xff]  ;;  %v13372_v6 = vld [vmem:[#allocation108_spill] sm:$0xff]  ;;  %v2091_v29 = vsel %vm2063_vm2, %v10531_v45, %v13376_v13  ;;  %v13377_v40 = vld [vmem:[#allocation62_spill] sm:$0xff]  ;;  %v1986_v34 = vpop.permute.xlu1 %1985 }
 0x302   : > { %v2155_v56 = vsel %vm2129_vm4, %v2122_v55, %v13371_v43  ;;  %v2154_v12 = vsel %vm2129_vm4, %v2121_v33, %v13372_v6  ;;  %v2285_v41 = vsel %vm2261_vm8, %v2252_v62, %v1982_v36  ;;  %v2284_v37 = vsel %vm2261_vm8, %v2251_v19, %v1980_v8  ;;  %v8268_v3 = vld [vmem:[#allocation2 + $0x5bc] sm:$0xff]  ;;  %v13373_v54 = vld [vmem:[#allocation32_spill] sm:$0xff]  ;;  %v13379_v44 = vld [vmem:[#allocation157_spill] sm:$0xff]  ;;  %v1984_v62 = vpop.permute.xlu0 %1983 }
 0x303   : > { %v2059_v1 = vsel %vm279_vm0, %v8268_v3, %v13373_v54  ;;  %v13374_v32 = vld [vmem:[#allocation131_spill] sm:$0xff]  ;;  %v13375_v2 = vld [vmem:[#allocation132_spill] sm:$0xff]  ;;  %v2090_v24 = vsel %vm2063_vm2, %v2057_v47, %v13377_v40  ;;  %7827 = vmatprep.mubr.msk.f32.mxu0 %vm2304_vm9, %v2284_v37  ;;  %v13380_v38 = vld [vmem:[#allocation85_spill] sm:$0xff] }
 0x304   : > { %v2188_v26 = vsel %vm2162_vm5, %v2155_v56, %v13374_v32  ;;  %v2187_v30 = vsel %vm2162_vm5, %v2154_v12, %v13375_v2  ;;  %v13378_v57 = vld [vmem:[#allocation156_spill] sm:$0xff]  ;;  %v2124_v4 = vsel %vm2096_vm3, %v2091_v29, %v13380_v38  ;;  %v13381_v48 = vld [vmem:[#allocation86_spill] sm:$0xff]  ;;  %v13383_v47 = vld [vmem:[#allocation183_spill] sm:$0xff]  ;;  %7828 = vmatmul.mubr.msk.f32.gmra.mrb[22].mxu0 %vm2304_vm9, %v2285_v41 }
 0x305   : > { %v2221_v0 = vsel %vm2195_vm6, %v2188_v26, %v13378_v57  ;;  %v2220_v18 = vsel %vm2195_vm6, %v2187_v30, %v13379_v44  ;;  %v3100_v25 = vld [vmem:[#allocation2 + $0x36e] sm:$0xff]  ;;  %v3099_v27 = vld [vmem:[#allocation2 + $0x366] sm:$0xff]  ;;  %v2123_v55 = vsel %vm2096_vm3, %v2090_v24, %v13381_v48  ;;  %v13382_v45 = vld [vmem:[#allocation182_spill] sm:$0xff] }
 0x306   : > { %v2254_v52 = vsel %vm2228_vm7, %v2221_v0, %v13382_v45  ;;  %v2253_v33 = vsel %vm2228_vm7, %v2220_v18, %v13383_v47  ;;  %v13384_v63 = vld [vmem:[#allocation109_spill] sm:$0xff]  ;;  %v13385_v36 = vld [vmem:[#allocation110_spill] sm:$0xff]  ;;  %3472 = vrot.lane.b32.xlu1 %v3100_v25, %s8293_s9  ;;  %3470 = vrot.lane.b32.xlu0 %v3099_v27, %s8293_s9  ;;  %v13389_v30 = vld [vmem:[#allocation63_spill] sm:$0xff]  ;;  %v1988_v47 = vpop.permute.xlu0 %1987 }
 0x307   : > { %v2157_v19 = vsel %vm2129_vm4, %v2124_v4, %v13384_v63  ;;  %v2156_v8 = vsel %vm2129_vm4, %v2123_v55, %v13385_v36  ;;  %v2287_v56 = vsel %vm2261_vm8, %v2254_v52, %v1986_v34  ;;  %v2286_v12 = vsel %vm2261_vm8, %v2253_v33, %v1984_v62  ;;  %v8269_v37 = vld [vmem:[#allocation2 + $0x5fc] sm:$0xff]  ;;  %v13386_v3 = vld [vmem:[#allocation33_spill] sm:$0xff]  ;;  %v13390_v29 = vld [vmem:[#allocation64_spill] sm:$0xff]  ;;  %v1990_v52 = vpop.permute.xlu1 %1989 }
 0x308   : > { %v2062_v54 = vsel %vm279_vm0, %v8269_v37, %v13386_v3  ;;  %v13387_v32 = vld [vmem:[#allocation133_spill] sm:$0xff]  ;;  %v13388_v41 = vld [vmem:[#allocation134_spill] sm:$0xff]  ;;  %v2093_v13 = vsel %vm2063_vm2, %v2060_v42, %v13389_v30  ;;  %v2092_v40 = vsel %vm2063_vm2, %v2059_v1, %v13390_v29  ;;  %v13392_v0 = vld [vmem:[#allocation159_spill] sm:$0xff]  ;;  %7830 = vmatprep.mubr.msk.f32.mxu0 %vm2304_vm9, %v2286_v12 }
 0x309   : > { %v2190_v26 = vsel %vm2162_vm5, %v2157_v19, %v13387_v32  ;;  %v2189_v2 = vsel %vm2162_vm5, %v2156_v8, %v13388_v41  ;;  %v13391_v24 = vld [vmem:[#allocation158_spill] sm:$0xff]  ;;  %v3102_v18 = vld [vmem:[#allocation2 + $0x3a6] sm:$0xff]  ;;  %v13396_v1 = vld [vmem:[#allocation185_spill] sm:$0xff]  ;;  %7831 = vmatmul.mubr.msk.f32.gmra.mrb[24].mxu0 %vm2304_vm9, %v2287_v56 }
 0x30a   : > { %v2223_v57 = vsel %vm2195_vm6, %v2190_v26, %v13391_v24  ;;  %v2222_v44 = vsel %vm2195_vm6, %v2189_v2, %v13392_v0  ;;  %v3101_v38 = vld [vmem:[#allocation2 + $0x39e] sm:$0xff]  ;;  %v13394_v27 = vld [vmem:[#allocation88_spill] sm:$0xff]  ;;  %v8270_v37 = vld [vmem:[#allocation2 + $0x5f4] sm:$0xff]  ;;  %3476 = vrot.lane.b32.xlu1 %v3102_v18, %s8293_s9 }
 0x30b   : > { %v13393_v4 = vld [vmem:[#allocation87_spill] sm:$0xff]  ;;  %v2125_v48 = vsel %vm2096_vm3, %v2092_v40, %v13394_v27  ;;  %v13395_v42 = vld [vmem:[#allocation184_spill] sm:$0xff]  ;;  %v2255_v45 = vsel %vm2228_vm7, %v2222_v44, %v13396_v1  ;;  %v13399_v3 = vld [vmem:[#allocation34_spill] sm:$0xff]  ;;  %3474 = vrot.lane.b32.xlu0 %v3101_v38, %s8293_s9 }
 0x30c   : > { %v2126_v25 = vsel %vm2096_vm3, %v2093_v13, %v13393_v4  ;;  %v2256_v55 = vsel %vm2228_vm7, %v2223_v57, %v13395_v42  ;;  %v13397_v33 = vld [vmem:[#allocation111_spill] sm:$0xff]  ;;  %v13398_v62 = vld [vmem:[#allocation112_spill] sm:$0xff]  ;;  %v2288_v12 = vsel %vm2261_vm8, %v2255_v45, %v1988_v47  ;;  %v2061_v32 = vsel %vm279_vm0, %v8270_v37, %v13399_v3  ;;  %v13402_v30 = vld [vmem:[#allocation65_spill] sm:$0xff]  ;;  %v1994_v45 = vpop.permute.xlu1 %1993 }
 0x30d   : > { %v2159_v34 = vsel %vm2129_vm4, %v2126_v25, %v13397_v33  ;;  %v2158_v19 = vsel %vm2129_vm4, %v2125_v48, %v13398_v62  ;;  %v2289_v8 = vsel %vm2261_vm8, %v2256_v55, %v1990_v52  ;;  %v13400_v26 = vld [vmem:[#allocation135_spill] sm:$0xff]  ;;  %v13401_v56 = vld [vmem:[#allocation136_spill] sm:$0xff]  ;;  %v2095_v13 = vsel %vm2063_vm2, %v2062_v54, %v13402_v30  ;;  %v13403_v29 = vld [vmem:[#allocation66_spill] sm:$0xff]  ;;  %7833 = vmatprep.mubr.msk.f32.mxu0 %vm2304_vm9, %v2288_v12  ;;  %v1992_v52 = vpop.permute.xlu0 %1991 }
 0x30e   : > { %v2192_v41 = vsel %vm2162_vm5, %v2159_v34, %v13400_v26  ;;  %v2191_v2 = vsel %vm2162_vm5, %v2158_v19, %v13401_v56  ;;  %v2094_v40 = vsel %vm2063_vm2, %v2061_v32, %v13403_v29  ;;  %v13404_v24 = vld [vmem:[#allocation160_spill] sm:$0xff]  ;;  %v13405_v0 = vld [vmem:[#allocation161_spill] sm:$0xff]  ;;  %v3104_v4 = vld [vmem:[#allocation2 + $0x3de] sm:$0xff]  ;;  %7834 = vmatmul.mubr.msk.f32.gmra.mrb[26].mxu0 %vm2304_vm9, %v2289_v8 }
 0x30f   : > { %v2225_v57 = vsel %vm2195_vm6, %v2192_v41, %v13404_v24  ;;  %v2224_v44 = vsel %vm2195_vm6, %v2191_v2, %v13405_v0  ;;  %v3103_v25 = vld [vmem:[#allocation2 + $0x3d6] sm:$0xff]  ;;  %v13408_v54 = vld [vmem:[#allocation3_spill] sm:$0xff]  ;;  %v13409_v55 = vld [vmem:[#allocation4_spill] sm:$0xff]  ;;  %3480 = vrot.lane.b32.xlu1 %v3104_v4, %s8293_s9 }
 0x310   : > { %v13406_v27 = vld [vmem:[#allocation89_spill] sm:$0xff]  ;;  %v13407_v38 = vld [vmem:[#allocation90_spill] sm:$0xff]  ;;  %v2258_v42 = vsel %vm2228_vm7, %v2225_v57, %v13408_v54  ;;  %v2257_v1 = vsel %vm2228_vm7, %v2224_v44, %v13409_v55  ;;  %3478 = vrot.lane.b32.xlu0 %v3103_v25, %s8293_s9  ;;  %v13415_v30 = vld [vmem:[#allocation163_spill] sm:$0xff]  ;;  %v1998_v0 = vpop.permute.xlu1 %1997 }
 0x311   : > { %v2128_v18 = vsel %vm2096_vm3, %v2095_v13, %v13406_v27  ;;  %v2127_v48 = vsel %vm2096_vm3, %v2094_v40, %v13407_v38  ;;  %v13410_v47 = vld [vmem:[#allocation113_spill] sm:$0xff]  ;;  %v13411_v19 = vld [vmem:[#allocation114_spill] sm:$0xff]  ;;  %v2291_v37 = vsel %vm2261_vm8, %v2258_v42, %v1994_v45  ;;  %v2290_v3 = vsel %vm2261_vm8, %v2257_v1, %v1992_v52  ;;  %v1996_v44 = vpop.permute.xlu0 %1995  ;;  %v10759_v27 = vld [vmem:[#allocation2 + $0x446] sm:$0xff] }
 0x312   : > { %v2161_v34 = vsel %vm2129_vm4, %v2128_v18, %v13410_v47  ;;  %v2160_v12 = vsel %vm2129_vm4, %v2127_v48, %v13411_v19  ;;  %v13412_v32 = vld [vmem:[#allocation137_spill] sm:$0xff]  ;;  %v13413_v41 = vld [vmem:[#allocation138_spill] sm:$0xff]  ;;  %7836 = vmatprep.mubr.msk.f32.mxu0 %vm2304_vm9, %v2290_v3  ;;  %v10770_v38 = vld [vmem:[#allocation2 + $0x486] sm:$0xff] }
 0x313   : > { %v2194_v26 = vsel %vm2162_vm5, %v2161_v34, %v13412_v32  ;;  %v2193_v56 = vsel %vm2162_vm5, %v2160_v12, %v13413_v41  ;;  %v13414_v8 = vld [vmem:[#allocation162_spill] sm:$0xff]  ;;  %v10743_v40 = vld [vmem:[#allocation2 + $0x40e] sm:$0xff]  ;;  %7837 = vmatmul.mubr.msk.f32.gmra.mrb[28].mxu0 %vm2304_vm9, %v2291_v37  ;;  %v3125_v47 = vld [vmem:[#allocation2 + $0x546] sm:$0xff] }
 0x314   : > { %v2227_v2 = vsel %vm2195_vm6, %v2194_v26, %v13414_v8  ;;  %v2226_v13 = vsel %vm2195_vm6, %v2193_v56, %v13415_v30  ;;  %v10741_v29 = vld [vmem:[#allocation2 + $0x416] sm:$0xff]  ;;  %3482 = vrot.lane.b32.xlu0 %v10743_v40, %s8293_s9  ;;  %v10772_v48 = vld [vmem:[#allocation2 + $0x47e] sm:$0xff]  ;;  %v3115_v26 = vld [vmem:[#allocation2 + $0x42e] sm:$0xff] }
 0x315   : > { %v2260_v24 = vsel %vm2228_vm7, %v2227_v2, %v10201_v49  ;;  %v2259_v57 = vsel %vm2228_vm7, %v2226_v13, %v10203_v60  ;;  %3484 = vrot.lane.b32.xlu1 %v10741_v29, %s8293_s9  ;;  %v10757_v49 = vld [vmem:[#allocation2 + $0x44e] sm:$0xff]  ;;  %v10762_v60 = vpop.permute.xlu1 %3308  ;;  %v10764_v18 = vpop.permute.xlu0 %3306  ;;  %v10782_v55 = vld [vmem:[#allocation2 + $0x4be] sm:$0xff]  ;;  %v10784_v1 = vld [vmem:[#allocation2 + $0x4b6] sm:$0xff] }
 0x316   : > { %v2293_v4 = vsel %vm2261_vm8, %v2260_v24, %v1998_v0  ;;  %v2292_v25 = vsel %vm2261_vm8, %v2259_v57, %v1996_v44  ;;  %v3114_v34 = vld [vmem:[#allocation2 + $0x3fe] sm:$0xff]  ;;  %v3113_v12 = vld [vmem:[#allocation2 + $0x3f6] sm:$0xff]  ;;  %v3118_v8 = vld [vmem:[#allocation2 + $0x46e] sm:$0xff] }
 0x317   : > { %7839 = vmatprep.mubr.msk.f32.mxu0 %vm2304_vm9, %v2292_v25  ;;  %v3116_v32 = vld [vmem:[#allocation2 + $0x436] sm:$0xff]  ;;  %v3117_v2 = vld [vmem:[#allocation2 + $0x466] sm:$0xff]  ;;  %v3119_v57 = vld [vmem:[#allocation2 + $0x49e] sm:$0xff] }
 0x318   : > { %7840 = vmatmul.mubr.msk.f32.gmra.mrb[30].mxu0 %vm2304_vm9, %v2293_v4  ;;  %3486 = vrot.lane.b32.xlu0 %v10759_v27, %s8293_s9  ;;  %v3120_v24 = vld [vmem:[#allocation2 + $0x4a6] sm:$0xff]  ;;  %v3122_v4 = vld [vmem:[#allocation2 + $0x4de] sm:$0xff]  ;;  %v3121_v25 = vld [vmem:[#allocation2 + $0x4d6] sm:$0xff] }
 0x319   : > { %3488 = vrot.lane.b32.xlu1 %v10757_v49, %s8293_s9  ;;  %v10774_v54 = vpop.permute.xlu1 %3312  ;;  %v10776_v42 = vpop.permute.xlu0 %3310  ;;  %v3232_v53 = vld [vmem:[#allocation2 + $0x90a] sm:$0xff] }
 0x31c   : > { %3490 = vrot.lane.b32.xlu0 %v10772_v48, %s8293_s9 }
 0x31d   : > { %3492 = vrot.lane.b32.xlu1 %v10770_v38, %s8293_s9  ;;  %v10786_v45 = vpop.permute.xlu1 %3316  ;;  %v10788_v52 = vpop.permute.xlu0 %3314 }
 0x320   : > { %3494 = vrot.lane.b32.xlu0 %v10784_v1, %s8293_s9 }
 0x321   : > { %3496 = vrot.lane.b32.xlu1 %v10782_v55, %s8293_s9  ;;  %v10794_v37 = vpop.permute.xlu1 %3320  ;;  %v10796_v3 = vpop.permute.xlu0 %3318 }
 0x324   : > { %3562 = vrot.lane.b32.xlu0 %v3113_v12, %s8294_s10 }
 0x325   : > { %3564 = vrot.lane.b32.xlu1 %v3114_v34, %s8294_s10  ;;  %v10800_v41 = vpop.permute.xlu1 %3324  ;;  %v10802_v56 = vpop.permute.xlu0 %3322  ;;  %v2662_v34 = vld [vmem:[%s13010_s5] sm:$0xff] }
 0x326   : > { %7842 = vmatprep.subr.mxu1 %v2662_v34 }
 0x327   : > { %7843 = vmatpush3.msra.mxu1 %v2662_v34 }
 0x328   : > { %3566 = vrot.lane.b32.xlu0 %v3115_v26, %s8294_s10  ;;  %v3124_v26 = vld [vmem:[#allocation2 + $0x516] sm:$0xff] }
 0x329   : > { %3568 = vrot.lane.b32.xlu1 %v3116_v32, %s8294_s10  ;;  %v10806_v30 = vpop.permute.xlu1 %3328  ;;  %v10808_v13 = vpop.permute.xlu0 %3326 }
 0x32a   : > { %13416 = vst [vmem:[#allocation6_spill] sm:$0xff] %v10806_v30  ;;  %13417 = vst [vmem:[#allocation7_spill] sm:$0xff] %v10808_v13  ;;  %v3187_v30 = vld [vmem:[#allocation2 + $0x77e] sm:$0xff] }
 0x32c   : > { %3570 = vrot.lane.b32.xlu0 %v3117_v2, %s8294_s10 }
 0x32d   : > { %3572 = vrot.lane.b32.xlu1 %v3118_v8, %s8294_s10  ;;  %v10812_v0 = vpop.permute.xlu1 %3332  ;;  %v10814_v44 = vpop.permute.xlu0 %3330  ;;  %v3123_v8 = vld [vmem:[#allocation2 + $0x50e] sm:$0xff] }
 0x32e   : > { %13418 = vst [vmem:[#allocation8_spill] sm:$0xff] %v10812_v0  ;;  %13419 = vst [vmem:[#allocation9_spill] sm:$0xff] %v10814_v44  ;;  %v4426_v44 = vld [vmem:[%s13007_s2] sm:$0xff] }
 0x330   : > { %3574 = vrot.lane.b32.xlu0 %v3119_v57, %s8294_s10  ;;  %v3126_v57 = vld [vmem:[#allocation2 + $0x54e] sm:$0xff] }
 0x331   : > { %3576 = vrot.lane.b32.xlu1 %v3120_v24, %s8294_s10  ;;  %v10821_v12 = vpop.permute.xlu1 %3336  ;;  %v10823_v32 = vpop.permute.xlu0 %3334 }
 0x332   : > { %13420 = vst [vmem:[#allocation10_spill] sm:$0xff] %v10821_v12  ;;  %13421 = vst [vmem:[#allocation11_spill] sm:$0xff] %v10823_v32 }
 0x334   : > { %3578 = vrot.lane.b32.xlu0 %v3121_v25, %s8294_s10  ;;  %v3127_v25 = vld [vmem:[#allocation2 + $0x57e] sm:$0xff] }
 0x335   : > { %3580 = vrot.lane.b32.xlu1 %v3122_v4, %s8294_s10  ;;  %v10827_v2 = vpop.permute.xlu1 %3340  ;;  %v10829_v24 = vpop.permute.xlu0 %3338  ;;  %v3128_v4 = vld [vmem:[#allocation2 + $0x586] sm:$0xff] }
 0x336   : > { %13422 = vst [vmem:[#allocation12_spill] sm:$0xff] %v10827_v2  ;;  %13423 = vst [vmem:[#allocation13_spill] sm:$0xff] %v10829_v24 }
 0x338   : > { %3582 = vrot.lane.b32.xlu0 %v3123_v8, %s8294_s10  ;;  %v3129_v8 = vld [vmem:[#allocation2 + $0x5b6] sm:$0xff] }
 0x339   : > { %3584 = vrot.lane.b32.xlu1 %v3124_v26, %s8294_s10  ;;  %v10833_v19 = vpop.permute.xlu1 %3344  ;;  %v10835_v62 = vpop.permute.xlu0 %3342  ;;  %v3130_v26 = vld [vmem:[#allocation2 + $0x5be] sm:$0xff] }
 0x33a   : > { %13424 = vst [vmem:[#allocation14_spill] sm:$0xff] %v10833_v19  ;;  %13425 = vst [vmem:[#allocation15_spill] sm:$0xff] %v10835_v62 }
 0x33c   : > { %3586 = vrot.lane.b32.xlu0 %v3125_v47, %s8294_s10  ;;  %v3132_v47 = vld [vmem:[#allocation2 + $0x5f6] sm:$0xff] }
 0x33d   : > { %3588 = vrot.lane.b32.xlu1 %v3126_v57, %s8294_s10  ;;  %v10839_v34 = vpop.permute.xlu1 %3348  ;;  %v10841_v33 = vpop.permute.xlu0 %3346  ;;  %v3131_v57 = vld [vmem:[#allocation2 + $0x5ee] sm:$0xff] }
 0x33e   : > { %13426 = vst [vmem:[#allocation16_spill] sm:$0xff] %v10839_v34  ;;  %13427 = vst [vmem:[#allocation17_spill] sm:$0xff] %v10841_v33 }
 0x340   : > { %3590 = vrot.lane.b32.xlu0 %v3127_v25, %s8294_s10  ;;  %v3133_v25 = vld [vmem:[#allocation2 + $0x626] sm:$0xff] }
 0x341   : > { %3592 = vrot.lane.b32.xlu1 %v3128_v4, %s8294_s10  ;;  %v10845_v36 = vpop.permute.xlu1 %3352  ;;  %v10847_v63 = vpop.permute.xlu0 %3350  ;;  %v3134_v4 = vld [vmem:[#allocation2 + $0x62e] sm:$0xff] }
 0x342   : > { %13428 = vst [vmem:[#allocation18_spill] sm:$0xff] %v10845_v36  ;;  %13429 = vst [vmem:[#allocation35_spill] sm:$0xff] %v10847_v63  ;;  %v10907_v36 = vld [vmem:[#allocation2 + $0x73e] sm:$0xff] }
 0x344   : > { %3594 = vrot.lane.b32.xlu0 %v3129_v8, %s8294_s10  ;;  %v3135_v8 = vld [vmem:[#allocation2 + $0x65e] sm:$0xff] }
 0x345   : > { %3596 = vrot.lane.b32.xlu1 %v3130_v26, %s8294_s10  ;;  %v10851_v6 = vpop.permute.xlu1 %3356  ;;  %v10853_v43 = vpop.permute.xlu0 %3354  ;;  %v3136_v26 = vld [vmem:[#allocation2 + $0x666] sm:$0xff] }
 0x346   : > { %13430 = vst [vmem:[#allocation36_spill] sm:$0xff] %v10851_v6  ;;  %13431 = vst [vmem:[#allocation19_spill] sm:$0xff] %v10853_v43  ;;  %v10905_v43 = vld [vmem:[#allocation2 + $0x746] sm:$0xff] }
 0x348   : > { %3598 = vrot.lane.b32.xlu0 %v3131_v57, %s8294_s10  ;;  %v10871_v57 = vld [vmem:[#allocation2 + $0x696] sm:$0xff] }
 0x349   : > { %3600 = vrot.lane.b32.xlu1 %v3132_v47, %s8294_s10  ;;  %v10857_v11 = vpop.permute.xlu1 %3360  ;;  %v10859_v10 = vpop.permute.xlu0 %3358  ;;  %v10869_v47 = vld [vmem:[#allocation2 + $0x69e] sm:$0xff] }
 0x34a   : > { %13432 = vst [vmem:[#allocation20_spill] sm:$0xff] %v10857_v11  ;;  %13433 = vst [vmem:[#allocation37_spill] sm:$0xff] %v10859_v10 }
 0x34c   : > { %3602 = vrot.lane.b32.xlu0 %v3133_v25, %s8294_s10  ;;  %v10883_v25 = vld [vmem:[#allocation2 + $0x6ce] sm:$0xff] }
 0x34d   : > { %3604 = vrot.lane.b32.xlu1 %v3134_v4, %s8294_s10  ;;  %v10863_v63 = vpop.permute.xlu1 %3364  ;;  %v10865_v6 = vpop.permute.xlu0 %3362  ;;  %v10881_v4 = vld [vmem:[#allocation2 + $0x6d6] sm:$0xff] }
 0x34e   : > { %13434 = vst [vmem:[#allocation38_spill] sm:$0xff] %v10863_v63  ;;  %13435 = vst [vmem:[#allocation21_spill] sm:$0xff] %v10865_v6 }
 0x350   : > { %3606 = vrot.lane.b32.xlu0 %v3135_v8, %s8294_s10 }
 0x351   : > { %3608 = vrot.lane.b32.xlu1 %v3136_v26, %s8294_s10  ;;  %v10873_v11 = vpop.permute.xlu1 %3368  ;;  %v10875_v10 = vpop.permute.xlu0 %3366 }
 0x352   : > { %13436 = vst [vmem:[#allocation39_spill] sm:$0xff] %v10873_v11  ;;  %13437 = vst [vmem:[#allocation40_spill] sm:$0xff] %v10875_v10  ;;  %v10893_v11 = vld [vmem:[#allocation2 + $0x70e] sm:$0xff]  ;;  %v10895_v10 = vld [vmem:[#allocation2 + $0x706] sm:$0xff] }
 0x354   : > { %3610 = vrot.lane.b32.xlu0 %v10871_v57, %s8294_s10 }
 0x355   : > { %3612 = vrot.lane.b32.xlu1 %v10869_v47, %s8294_s10  ;;  %v10885_v26 = vpop.permute.xlu1 %3436  ;;  %v10887_v8 = vpop.permute.xlu0 %3434 }
 0x358   : > { %3614 = vrot.lane.b32.xlu0 %v10883_v25, %s8294_s10 }
 0x359   : > { %3616 = vrot.lane.b32.xlu1 %v10881_v4, %s8294_s10  ;;  %v10897_v6 = vpop.permute.xlu1 %3440  ;;  %v10899_v63 = vpop.permute.xlu0 %3438 }
 0x35c   : > { %3618 = vrot.lane.b32.xlu0 %v10895_v10, %s8294_s10 }
 0x35d   : > { %3620 = vrot.lane.b32.xlu1 %v10893_v11, %s8294_s10  ;;  %v10909_v7 = vpop.permute.xlu1 %3444  ;;  %v10911_v46 = vpop.permute.xlu0 %3442 }
 0x360   : > { %3622 = vrot.lane.b32.xlu0 %v10907_v36, %s8294_s10 }
 0x361   : > { %3624 = vrot.lane.b32.xlu1 %v10905_v43, %s8294_s10  ;;  %v10917_v33 = vpop.permute.xlu1 %3448  ;;  %v10919_v34 = vpop.permute.xlu0 %3446 }
 0x364   : > { %3690 = vrot.lane.b32.xlu0 %v10743_v40, %s8296_s12 }
 0x365   : > { %3692 = vrot.lane.b32.xlu1 %v10741_v29, %s8296_s12  ;;  %v10925_v61 = vpop.permute.xlu1 %3452  ;;  %v10927_v35 = vpop.permute.xlu0 %3450 }
 0x366   : > { %13438 = vst [vmem:[#allocation22_spill] sm:$0xff] %v10925_v61 }
 0x368   : > { %3694 = vrot.lane.b32.xlu0 %v10759_v27, %s8296_s12  ;;  %v3153_v27 = vld [vmem:[#allocation2 + $0x4ee] sm:$0xff] }
 0x369   : > { %3696 = vrot.lane.b32.xlu1 %v10757_v49, %s8296_s12  ;;  %v10933_v62 = vpop.permute.xlu1 %3456  ;;  %v10935_v19 = vpop.permute.xlu0 %3454  ;;  %v3154_v49 = vld [vmem:[#allocation2 + $0x4f6] sm:$0xff] }
 0x36a   : > { %13439 = vst [vmem:[#allocation41_spill] sm:$0xff] %v10933_v62  ;;  %13440 = vst [vmem:[#allocation42_spill] sm:$0xff] %v10935_v19 }
 0x36c   : > { %3698 = vrot.lane.b32.xlu0 %v10772_v48, %s8296_s12  ;;  %v3155_v48 = vld [vmem:[#allocation2 + $0x526] sm:$0xff] }
 0x36d   : > { %3700 = vrot.lane.b32.xlu1 %v10770_v38, %s8296_s12  ;;  %v10941_v29 = vpop.permute.xlu1 %3460  ;;  %v10943_v40 = vpop.permute.xlu0 %3458  ;;  %v3156_v38 = vld [vmem:[#allocation2 + $0x52e] sm:$0xff] }
 0x36e   : > { %13441 = vst [vmem:[#allocation23_spill] sm:$0xff] %v10941_v29  ;;  %13442 = vst [vmem:[#allocation43_spill] sm:$0xff] %v10943_v40 }
 0x370   : > { %3702 = vrot.lane.b32.xlu0 %v10784_v1, %s8296_s12  ;;  %v3157_v1 = vld [vmem:[#allocation2 + $0x55e] sm:$0xff] }
 0x371   : > { %3704 = vrot.lane.b32.xlu1 %v10782_v55, %s8296_s12  ;;  %v10949_v39 = vpop.permute.xlu1 %3464  ;;  %v10951_v50 = vpop.permute.xlu0 %3462  ;;  %v3158_v55 = vld [vmem:[#allocation2 + $0x566] sm:$0xff] }
 0x372   : > { %13443 = vst [vmem:[#allocation44_spill] sm:$0xff] %v10949_v39  ;;  %13444 = vst [vmem:[#allocation139_spill] sm:$0xff] %v10951_v50  ;;  %v11035_v39 = vld [vmem:[#allocation2 + $0x756] sm:$0xff] }
 0x374   : > { %3706 = vrot.lane.b32.xlu0 %v3153_v27, %s8296_s12  ;;  %v3159_v27 = vld [vmem:[#allocation2 + $0x596] sm:$0xff] }
 0x375   : > { %3708 = vrot.lane.b32.xlu1 %v3154_v49, %s8296_s12  ;;  %v10955_v24 = vpop.permute.xlu1 %3468  ;;  %v10957_v2 = vpop.permute.xlu0 %3466  ;;  %v3160_v49 = vld [vmem:[#allocation2 + $0x59e] sm:$0xff] }
 0x376   : > { %13445 = vst [vmem:[#allocation67_spill] sm:$0xff] %v10955_v24  ;;  %13446 = vst [vmem:[#allocation68_spill] sm:$0xff] %v10957_v2 }
 0x378   : > { %3710 = vrot.lane.b32.xlu0 %v3155_v48, %s8296_s12  ;;  %v3161_v48 = vld [vmem:[#allocation2 + $0x5ce] sm:$0xff] }
 0x379   : > { %3712 = vrot.lane.b32.xlu1 %v3156_v38, %s8296_s12  ;;  %v10961_v9 = vpop.permute.xlu1 %3472  ;;  %v10963_v51 = vpop.permute.xlu0 %3470  ;;  %v3162_v38 = vld [vmem:[#allocation2 + $0x5d6] sm:$0xff] }
 0x37a   : > { %13447 = vst [vmem:[#allocation164_spill] sm:$0xff] %v10961_v9  ;;  %13448 = vst [vmem:[#allocation165_spill] sm:$0xff] %v10963_v51 }
 0x37c   : > { %3714 = vrot.lane.b32.xlu0 %v3157_v1, %s8296_s12  ;;  %v3163_v1 = vld [vmem:[#allocation2 + $0x606] sm:$0xff] }
 0x37d   : > { %3716 = vrot.lane.b32.xlu1 %v3158_v55, %s8296_s12  ;;  %v10967_v50 = vpop.permute.xlu1 %3476  ;;  %v10969_v24 = vpop.permute.xlu0 %3474  ;;  %v3164_v55 = vld [vmem:[#allocation2 + $0x60e] sm:$0xff] }
 0x37e   : > { %13449 = vst [vmem:[#allocation24_spill] sm:$0xff] %v10967_v50  ;;  %13450 = vst [vmem:[#allocation115_spill] sm:$0xff] %v10969_v24 }
 0x380   : > { %3718 = vrot.lane.b32.xlu0 %v3159_v27, %s8296_s12  ;;  %v3165_v27 = vld [vmem:[#allocation2 + $0x63e] sm:$0xff] }
 0x381   : > { %3720 = vrot.lane.b32.xlu1 %v3160_v49, %s8296_s12  ;;  %v10973_v2 = vpop.permute.xlu1 %3480  ;;  %v3166_v49 = vld [vmem:[#allocation2 + $0x646] sm:$0xff] }
 0x382   : > { %13451 = vst [vmem:[#allocation116_spill] sm:$0xff] %v10973_v2  ;;  %v10975_v9 = vpop.permute.xlu0 %3478 }
 0x383   : > { %13452 = vst [vmem:[#allocation45_spill] sm:$0xff] %v10975_v9 }
 0x384   : > { %3722 = vrot.lane.b32.xlu0 %v3161_v48, %s8296_s12  ;;  %v3167_v48 = vld [vmem:[#allocation2 + $0x676] sm:$0xff] }
 0x385   : > { %3724 = vrot.lane.b32.xlu1 %v3162_v38, %s8296_s12  ;;  %v3168_v38 = vld [vmem:[#allocation2 + $0x67e] sm:$0xff] }
 0x386   : > { %v10981_v50 = vpop.permute.xlu0 %3482 }
 0x387   : > { %v10979_v51 = vpop.permute.xlu1 %3484  ;;  %13454 = vst [vmem:[#allocation140_spill] sm:$0xff] %v10981_v50  ;;  %v11033_v50 = vld [vmem:[#allocation2 + $0x75e] sm:$0xff] }
 0x388   : > { %13453 = vst [vmem:[#allocation46_spill] sm:$0xff] %v10979_v51  ;;  %3726 = vrot.lane.b32.xlu0 %v3163_v1, %s8296_s12  ;;  %v10999_v1 = vld [vmem:[#allocation2 + $0x6ae] sm:$0xff] }
 0x389   : > { %3728 = vrot.lane.b32.xlu1 %v3164_v55, %s8296_s12  ;;  %v10997_v55 = vld [vmem:[#allocation2 + $0x6b6] sm:$0xff] }
 0x38a   : > { %v10987_v2 = vpop.permute.xlu0 %3486 }
 0x38b   : > { %v10985_v24 = vpop.permute.xlu1 %3488  ;;  %13456 = vst [vmem:[#allocation69_spill] sm:$0xff] %v10987_v2 }
 0x38c   : > { %13455 = vst [vmem:[#allocation141_spill] sm:$0xff] %v10985_v24  ;;  %3730 = vrot.lane.b32.xlu0 %v3165_v27, %s8296_s12  ;;  %v11011_v27 = vld [vmem:[#allocation2 + $0x6e6] sm:$0xff] }
 0x38d   : > { %3732 = vrot.lane.b32.xlu1 %v3166_v49, %s8296_s12  ;;  %v11009_v49 = vld [vmem:[#allocation2 + $0x6ee] sm:$0xff] }
 0x38e   : > { %v10993_v51 = vpop.permute.xlu0 %3490 }
 0x38f   : > { %v10991_v9 = vpop.permute.xlu1 %3492  ;;  %13458 = vst [vmem:[#allocation166_spill] sm:$0xff] %v10993_v51 }
 0x390   : > { %13457 = vst [vmem:[#allocation70_spill] sm:$0xff] %v10991_v9  ;;  %3734 = vrot.lane.b32.xlu0 %v3167_v48, %s8296_s12 }
 0x391   : > { %3736 = vrot.lane.b32.xlu1 %v3168_v38, %s8296_s12 }
 0x392   : > { %v11003_v2 = vpop.permute.xlu0 %3494 }
 0x393   : > { %v11001_v24 = vpop.permute.xlu1 %3496  ;;  %13460 = vst [vmem:[#allocation25_spill] sm:$0xff] %v11003_v2  ;;  %v11023_v2 = vld [vmem:[#allocation2 + $0x71e] sm:$0xff] }
 0x394   : > { %13459 = vst [vmem:[#allocation167_spill] sm:$0xff] %v11001_v24  ;;  %3738 = vrot.lane.b32.xlu0 %v10999_v1, %s8296_s12  ;;  %v11021_v24 = vld [vmem:[#allocation2 + $0x726] sm:$0xff] }
 0x395   : > { %3740 = vrot.lane.b32.xlu1 %v10997_v55, %s8296_s12 }
 0x396   : > { %v11015_v48 = vpop.permute.xlu0 %3562 }
 0x397   : > { %v11013_v38 = vpop.permute.xlu1 %3564 }
 0x398   : > { %3742 = vrot.lane.b32.xlu0 %v11011_v27, %s8296_s12 }
 0x399   : > { %3744 = vrot.lane.b32.xlu1 %v11009_v49, %s8296_s12 }
 0x39a   : > { %v11027_v9 = vpop.permute.xlu0 %3566 }
 0x39b   : > { %v11025_v51 = vpop.permute.xlu1 %3568 }
 0x39c   : > { %3746 = vrot.lane.b32.xlu0 %v11023_v2, %s8296_s12 }
 0x39d   : > { %3748 = vrot.lane.b32.xlu1 %v11021_v24, %s8296_s12 }
 0x39e   : > { %v11039_v12 = vpop.permute.xlu0 %3570 }
 0x39f   : > { %v11037_v32 = vpop.permute.xlu1 %3572 }
 0x3a0   : > { %3750 = vrot.lane.b32.xlu0 %v11035_v39, %s8296_s12 }
 0x3a1   : > { %3752 = vrot.lane.b32.xlu1 %v11033_v50, %s8296_s12 }
 0x3a2   : > { %v11047_v31 = vpop.permute.xlu0 %3574 }
 0x3a3   : > { %v11045_v28 = vpop.permute.xlu1 %3576  ;;  %v7796_v5 = vpop.f32.mrb[0].mxu0 }
 0x3a4   : > { %3818 = vrot.lane.b32.xlu0 %v10871_v57, %s8297_s13 }
 0x3a5   : > { %3820 = vrot.lane.b32.xlu1 %v10869_v47, %s8297_s13  ;;  %v4427_v47 = vld [vmem:[%s13007_s2 + $0x8] sm:$0xff] }
 0x3a6   : > { %v11055_v29 = vpop.permute.xlu0 %3578  ;;  %v8116_v59 = vpack.c.bf16 %v4427_v47, %v4426_v44  ;;  %v4429_v44 = vld [vmem:[%s13007_s2 + $0x18] sm:$0xff] }
 0x3a7   : > { %v11053_v40 = vpop.permute.xlu1 %3580 }
 0x3a8   : > { %13461 = vst [vmem:[#allocation117_spill] sm:$0xff] %v11053_v40  ;;  %3822 = vrot.lane.b32.xlu0 %v10883_v25, %s8297_s13  ;;  %v4428_v25 = vld [vmem:[%s13007_s2 + $0x10] sm:$0xff]  ;;  %8117 = vmatprep.subr.bf16.mxu0 %v8116_v59 }
 0x3a9   : > { %3824 = vrot.lane.b32.xlu1 %v10881_v4, %s8297_s13  ;;  %v11074_v4 = vld [vmem:[%s13009_s4] ss:$0 sm:$0xff]  ;;  %8132 = vmatprep.subr.bf16.mxu1 %v8116_v59 }
 0x3aa   : > { %v11069_v57 = vpop.permute.xlu0 %3582  ;;  %v2477_v47 = vadd.f32 %v7796_v5, %v11074_v4  ;;  %8119 = vmatpush3.bf16.msra.mxu0 %v8116_v59 }
 0x3ab   : > { %v11067_v0 = vpop.permute.xlu1 %3584  ;;  %13463 = vst [vmem:[#allocation47_spill] sm:$0xff] %v11069_v57  ;;  %v2471_v57 = vpop.f32.mrb[1].mxu0 }
 0x3ac   : > { %13462 = vst [vmem:[#allocation118_spill] sm:$0xff] %v11067_v0  ;;  %3826 = vrot.lane.b32.xlu0 %v10895_v10, %s8297_s13  ;;  %v2472_v10 = vadd.f32 %v11074_v4, %v2471_v57  ;;  %v7799_v13 = vpop.f32.mrb[2].mxu0  ;;  %v2631_v5 = vmax.f32 %v2477_v47, 0.0  ;;  %v4430_v57 = vld [vmem:[%s13007_s2 + $0x20] sm:$0xf] }
 0x3ad   : > { %3828 = vrot.lane.b32.xlu1 %v10893_v11, %s8297_s13  ;;  %v8120_v11 = vpack.c.bf16 %v4429_v44, %v4428_v25  ;;  %v2487_v58 = vadd.f32 %v7799_v13, %v11074_v4  ;;  %v3186_v25 = vld [vmem:[#allocation2 + $0x776] sm:$0xff]  ;;  %v3210_v47 = vld [vmem:[#allocation2 + $0x6a2] sm:$0xff] }
 0x3ae   : > { %v11090_v19 = vpop.permute.xlu0 %3586  ;;  %v2630_v62 = vmax.f32 %v2472_v10, 0.0 }
 0x3af   : > { %v11087_v0 = vpop.permute.xlu1 %3588  ;;  %13465 = vst [vmem:[#allocation142_spill] sm:$0xff] %v11090_v19  ;;  %8121 = vmatprep.subr.bf16.mxu0 %v8120_v11  ;;  %v2633_v10 = vmax.f32 %v2487_v58, 0.0 }
 0x3b0   : > { %13464 = vst [vmem:[#allocation48_spill] sm:$0xff] %v11087_v0  ;;  %3830 = vrot.lane.b32.xlu0 %v10907_v36, %s8297_s13  ;;  %v2481_v0 = vpop.f32.mrb[3].mxu0  ;;  %8123 = vmatpush3.bf16.msra.mxu0 %v8120_v11 }
 0x3b1   : > { %3832 = vrot.lane.b32.xlu1 %v10905_v43, %s8297_s13  ;;  %v2482_v43 = vadd.f32 %v11074_v4, %v2481_v0  ;;  %7844 = vmatprep.mubr.msk.f32.mxu1 %vm2063_vm2, %v2630_v62  ;;  %v7802_v44 = vpop.f32.mrb[4].mxu0  ;;  %v3188_v62 = vld [vmem:[#allocation2 + $0x7ae] sm:$0xff] }
 0x3b2   : > { %v11104_v36 = vpop.permute.xlu0 %3590  ;;  %7900 = vmatprep.subr.msk.mxu0 %vm2401_vm1, %v4430_v57  ;;  %7845 = vmatmul.mubr.msk.f32.vlgmr.msra.gmra.mrb[0].mxu1 %vm2063_vm2, %v2631_v5  ;;  %v2491_v0 = vpop.f32.mrb[5].mxu0 }
 0x3b3   : > { %v11097_v40 = vpop.permute.xlu1 %3592  ;;  %13467 = vst [vmem:[#allocation71_spill] sm:$0xff] %v11104_v36  ;;  %v2632_v13 = vmax.f32 %v2482_v43, 0.0  ;;  %8135 = vmatpush3.bf16.msra.mxu1 %v8116_v59  ;;  %v2492_v5 = vadd.f32 %v11074_v4, %v2491_v0  ;;  %v7805_v59 = vpop.f32.mrb[6].mxu0  ;;  %v3211_v0 = vld [vmem:[#allocation2 + $0x6aa] sm:$0xff] }
 0x3b4   : > { %13466 = vst [vmem:[#allocation143_spill] sm:$0xff] %v11097_v40  ;;  %3834 = vrot.lane.b32.xlu0 %v3186_v25, %s8297_s13  ;;  %v2497_v40 = vadd.f32 %v7802_v44, %v11074_v4  ;;  %7901 = vmatpush3.msk.msra.mxu0 %vm2401_vm1, %v4430_v57  ;;  %v2507_v43 = vadd.f32 %v7805_v59, %v11074_v4  ;;  %v2501_v44 = vpop.f32.mrb[7].mxu0 }
 0x3b5   : > { %3836 = vrot.lane.b32.xlu1 %v3187_v30, %s8297_s13  ;;  %8133 = vmatprep.subr.bf16.mxu1 %v8120_v11  ;;  %v2634_v58 = vmax.f32 %v2492_v5, 0.0 }
 0x3b6   : > { %7847 = vmatprep.mubr.msk.f32.mxu1 %vm2063_vm2, %v2632_v13  ;;  %v11116_v30 = vpop.permute.xlu0 %3594  ;;  %v2635_v25 = vmax.f32 %v2497_v40, 0.0  ;;  %v2502_v13 = vadd.f32 %v11074_v4, %v2501_v44 }
 0x3b7   : > { %v11111_v19 = vpop.permute.xlu1 %3596  ;;  %13469 = vst [vmem:[#allocation168_spill] sm:$0xff] %v11116_v30  ;;  %7848 = vmatmul.mubr.msk.f32.gmra.mrb[2].mxu1 %vm2063_vm2, %v2633_v10 }
 0x3b8   : > { %13468 = vst [vmem:[#allocation72_spill] sm:$0xff] %v11111_v19  ;;  %3838 = vrot.lane.b32.xlu0 %v3188_v62, %s8297_s13  ;;  %8136 = vmatpush3.bf16.msra.mxu1 %v8120_v11  ;;  %v2636_v40 = vmax.f32 %v2502_v13, 0.0  ;;  %v7808_v11 = vpop.f32.mrb[8].mxu0  ;;  %v2637_v62 = vmax.f32 %v2507_v43, 0.0 }
 0x3b9   : > { %3946 = vrot.lane.b32.xlu1 %v3210_v47, %s8298_s14  ;;  %8134 = vmatprep.subr.msk.mxu1 %vm2401_vm1, %v4430_v57  ;;  %v3212_v47 = vld [vmem:[#allocation2 + $0x6da] sm:$0xff]  ;;  %v2517_v5 = vadd.f32 %v7808_v11, %v11074_v4  ;;  %v2511_v59 = vpop.f32.mrb[9].mxu0 }
 0x3ba   : > { %7850 = vmatprep.mubr.msk.f32.mxu1 %vm2063_vm2, %v2634_v58  ;;  %v11127_v10 = vpop.permute.xlu0 %3598  ;;  %v2512_v58 = vadd.f32 %v11074_v4, %v2511_v59  ;;  %v3213_v59 = vld [vmem:[#allocation2 + $0x6e2] sm:$0xff] }
 0x3bb   : > { %v11122_v19 = vpop.permute.xlu1 %3600  ;;  %13471 = vst [vmem:[#allocation26_spill] sm:$0xff] %v11127_v10  ;;  %7851 = vmatmul.mubr.msk.f32.gmra.mrb[4].mxu1 %vm2063_vm2, %v2635_v25 }
 0x3bc   : > { %13470 = vst [vmem:[#allocation169_spill] sm:$0xff] %v11122_v19  ;;  %3948 = vrot.lane.b32.xlu0 %v3211_v0, %s8298_s14  ;;  %8137 = vmatpush3.msk.msra.mxu1 %vm2401_vm1, %v4430_v57  ;;  %v7811_v0 = vpop.f32.mrb[10].mxu0  ;;  %v2639_v57 = vmax.f32 %v2517_v5, 0.0 }
 0x3bd   : > { %4074 = vrot.lane.b32.xlu1 %v10999_v1, %s8299_s28  ;;  %7853 = vmatprep.mubr.msk.f32.mxu1 %vm2063_vm2, %v2636_v40  ;;  %v2638_v1 = vmax.f32 %v2512_v58, 0.0  ;;  %v2527_v43 = vadd.f32 %v7811_v0, %v11074_v4  ;;  %v2521_v13 = vpop.f32.mrb[11].mxu0 }
 0x3be   : > { %v11139_v25 = vpop.permute.xlu0 %3602  ;;  %v2522_v40 = vadd.f32 %v11074_v4, %v2521_v13 }
 0x3bf   : > { %v11135_v44 = vpop.permute.xlu1 %3604  ;;  %13473 = vst [vmem:[#allocation120_spill] sm:$0xff] %v11139_v25  ;;  %7854 = vmatmul.mubr.msk.f32.gmra.mrb[6].mxu1 %vm2063_vm2, %v2637_v62  ;;  %v3214_v62 = vld [vmem:[#allocation2 + $0x712] sm:$0xff]  ;;  %v2641_v5 = vmax.f32 %v2527_v43, 0.0 }
 0x3c0   : > { %13472 = vst [vmem:[#allocation119_spill] sm:$0xff] %v11135_v44  ;;  %4076 = vrot.lane.b32.xlu0 %v10997_v55, %s8299_s28  ;;  %7856 = vmatprep.mubr.msk.f32.mxu1 %vm2063_vm2, %v2638_v1  ;;  %v7814_v55 = vpop.f32.mrb[12].mxu0 }
 0x3c1   : > { %3950 = vrot.lane.b32.xlu1 %v3212_v47, %s8298_s14  ;;  %v2640_v47 = vmax.f32 %v2522_v40, 0.0  ;;  %v2537_v58 = vadd.f32 %v7814_v55, %v11074_v4  ;;  %v2531_v0 = vpop.f32.mrb[13].mxu0 }
 0x3c2   : > { %v11150_v25 = vpop.permute.xlu0 %3606  ;;  %v2532_v1 = vadd.f32 %v11074_v4, %v2531_v0  ;;  %v3215_v0 = vld [vmem:[#allocation2 + $0x71a] sm:$0xff] }
 0x3c3   : > { %v11146_v11 = vpop.permute.xlu1 %3608  ;;  %13475 = vst [vmem:[#allocation5_spill] sm:$0xff] %v11150_v25  ;;  %7857 = vmatmul.mubr.msk.f32.gmra.mrb[8].mxu1 %vm2063_vm2, %v2639_v57  ;;  %v7817_v57 = vpop.f32.mrb[14].mxu0  ;;  %v2643_v43 = vmax.f32 %v2537_v58, 0.0 }
 0x3c4   : > { %13474 = vst [vmem:[#allocation49_spill] sm:$0xff] %v11146_v11  ;;  %3952 = vrot.lane.b32.xlu0 %v3213_v59, %s8298_s14  ;;  %7859 = vmatprep.mubr.msk.f32.mxu1 %vm2063_vm2, %v2640_v47  ;;  %v2547_v59 = vadd.f32 %v7817_v57, %v11074_v4  ;;  %v2541_v40 = vpop.f32.mrb[15].mxu0 }
 0x3c5   : > { %4078 = vrot.lane.b32.xlu1 %v11011_v27, %s8299_s28  ;;  %v2642_v27 = vmax.f32 %v2532_v1, 0.0  ;;  %v2542_v47 = vadd.f32 %v11074_v4, %v2541_v40 }
 0x3c6   : > { %v11161_v13 = vpop.permute.xlu0 %3610  ;;  %v2645_v58 = vmax.f32 %v2547_v59, 0.0 }
 0x3c7   : > { %v11157_v11 = vpop.permute.xlu1 %3612  ;;  %13477 = vst [vmem:[#allocation144_spill] sm:$0xff] %v11161_v13  ;;  %7860 = vmatmul.mubr.msk.f32.gmra.mrb[10].mxu1 %vm2063_vm2, %v2641_v5  ;;  %v3216_v5 = vld [vmem:[#allocation2 + $0x74a] sm:$0xff] }
 0x3c8   : > { %13476 = vst [vmem:[#allocation50_spill] sm:$0xff] %v11157_v11  ;;  %4080 = vrot.lane.b32.xlu0 %v11009_v49, %s8299_s28  ;;  %7862 = vmatprep.mubr.msk.f32.mxu1 %vm2063_vm2, %v2642_v27  ;;  %v2644_v49 = vmax.f32 %v2542_v47, 0.0 }
 0x3c9   : > { %3954 = vrot.lane.b32.xlu1 %v3214_v62, %s8298_s14  ;;  %v7820_v62 = vpop.f32.mrb[16].mxu0 }
 0x3ca   : > { %v11171_v11 = vpop.permute.xlu0 %3614  ;;  %v2557_v1 = vadd.f32 %v7820_v62, %v11074_v4  ;;  %v2551_v57 = vpop.f32.mrb[17].mxu0  ;;  %v3217_v62 = vld [vmem:[#allocation2 + $0x752] sm:$0xff] }
 0x3cb   : > { %v11168_v55 = vpop.permute.xlu1 %3616  ;;  %13479 = vst [vmem:[#allocation73_spill] sm:$0xff] %v11171_v11  ;;  %7863 = vmatmul.mubr.msk.f32.gmra.mrb[12].mxu1 %vm2063_vm2, %v2643_v43  ;;  %v2552_v40 = vadd.f32 %v11074_v4, %v2551_v57 }
 0x3cc   : > { %13478 = vst [vmem:[#allocation145_spill] sm:$0xff] %v11168_v55  ;;  %3956 = vrot.lane.b32.xlu0 %v3215_v0, %s8298_s14  ;;  %7865 = vmatprep.mubr.msk.f32.mxu1 %vm2063_vm2, %v2644_v49  ;;  %v7823_v27 = vpop.f32.mrb[18].mxu0  ;;  %v2647_v43 = vmax.f32 %v2557_v1, 0.0 }
 0x3cd   : > { %4082 = vrot.lane.b32.xlu1 %v11023_v2, %s8299_s28  ;;  %v2646_v2 = vmax.f32 %v2552_v40, 0.0  ;;  %v2567_v59 = vadd.f32 %v7823_v27, %v11074_v4  ;;  %v2561_v0 = vpop.f32.mrb[19].mxu0 }
 0x3ce   : > { %v11182_v11 = vpop.permute.xlu0 %3618  ;;  %v2562_v57 = vadd.f32 %v11074_v4, %v2561_v0 }
 0x3cf   : > { %v11179_v55 = vpop.permute.xlu1 %3620  ;;  %13481 = vst [vmem:[#allocation170_spill] sm:$0xff] %v11182_v11  ;;  %7866 = vmatmul.mubr.msk.f32.gmra.mrb[14].mxu1 %vm2063_vm2, %v2645_v58  ;;  %v2649_v58 = vmax.f32 %v2567_v59, 0.0 }
 0x3d0   : > { %13480 = vst [vmem:[#allocation74_spill] sm:$0xff] %v11179_v55  ;;  %4084 = vrot.lane.b32.xlu0 %v11021_v24, %s8299_s28  ;;  %7868 = vmatprep.mubr.msk.f32.mxu1 %vm2063_vm2, %v2646_v2  ;;  %v2648_v24 = vmax.f32 %v2562_v57, 0.0 }
 0x3d1   : > { %3958 = vrot.lane.b32.xlu1 %v3216_v5, %s8298_s14  ;;  %v3218_v5 = vld [vmem:[#allocation2 + $0x782] sm:$0xff] }
 0x3d2   : > { %v11193_v11 = vpop.permute.xlu0 %3622  ;;  %v7826_v49 = vpop.f32.mrb[20].mxu0 }
 0x3d3   : > { %v11190_v47 = vpop.permute.xlu1 %3624  ;;  %13483 = vst [vmem:[#allocation27_spill] sm:$0xff] %v11193_v11  ;;  %7869 = vmatmul.mubr.msk.f32.gmra.mrb[16].mxu1 %vm2063_vm2, %v2647_v43  ;;  %v2577_v1 = vadd.f32 %v7826_v49, %v11074_v4  ;;  %v2571_v40 = vpop.f32.mrb[21].mxu0  ;;  %v3250_v43 = vld [vmem:[#allocation2 + $0x78e] sm:$0xff] }
 0x3d4   : > { %13482 = vst [vmem:[#allocation171_spill] sm:$0xff] %v11190_v47  ;;  %3960 = vrot.lane.b32.xlu0 %v3217_v62, %s8298_s14  ;;  %v2572_v0 = vadd.f32 %v11074_v4, %v2571_v40  ;;  %7871 = vmatprep.mubr.msk.f32.mxu1 %vm2063_vm2, %v2648_v24  ;;  %v3219_v40 = vld [vmem:[#allocation2 + $0x78a] sm:$0xff] }
 0x3d5   : > { %4086 = vrot.lane.b32.xlu1 %v11035_v39, %s8299_s28  ;;  %v2651_v59 = vmax.f32 %v2577_v1, 0.0  ;;  %v3189_v1 = vld [vmem:[#allocation2 + $0x7b6] sm:$0xff] }
 0x3d6   : > { %v11204_v47 = vpop.permute.xlu0 %3690  ;;  %v2650_v39 = vmax.f32 %v2572_v0, 0.0  ;;  %v13484_v0 = vmov 0.0  }
 0x3d7   : > { %v11201_v27 = vpop.permute.xlu1 %3692  ;;  %7872 = vmatmul.mubr.msk.f32.gmra.mrb[18].mxu1 %vm2063_vm2, %v2649_v58  ;;  %v7829_v2 = vpop.f32.mrb[22].mxu0  ;;  %287 = vst.msk [vmem:[#allocation2 + $0x30] sm:$0xf] %vm286_vm10, %v13484_v0  ;;  %294 = vst.msk [vmem:[#allocation2 + $0x68] sm:$0xf] %vm286_vm10, %v13484_v0 }
 0x3d8   : > { %4088 = vrot.lane.b32.xlu0 %v11033_v50, %s8299_s28  ;;  %v11212_v62 = vadd.f32 %v7829_v2, %v11074_v4  ;;  %v2581_v57 = vpop.f32.mrb[23].mxu0  ;;  %7874 = vmatprep.mubr.msk.f32.mxu1 %vm2063_vm2, %v2650_v39  ;;  %301 = vst.msk [vmem:[#allocation2 + $0xa0] sm:$0xf] %vm286_vm10, %v13484_v0  ;;  %308 = vst.msk [vmem:[#allocation2 + $0xd8] sm:$0xf] %vm286_vm10, %v13484_v0 }
 0x3d9   : > { %3962 = vrot.lane.b32.xlu1 %v3218_v5, %s8298_s14  ;;  %v11217_v24 = vadd.f32 %v11074_v4, %v2581_v57  ;;  %315 = vst.msk [vmem:[#allocation2 + $0x110] sm:$0xf] %vm286_vm10, %v13484_v0  ;;  %322 = vst.msk [vmem:[#allocation2 + $0x148] sm:$0xf] %vm286_vm10, %v13484_v0  ;;  %v3251_v57 = vld [vmem:[#allocation2 + $0x796] sm:$0xff] }
 0x3da   : > { %v11219_v58 = vpop.permute.xlu0 %3694  ;;  %329 = vst.msk [vmem:[#allocation2 + $0x180] sm:$0xf] %vm286_vm10, %v13484_v0  ;;  %336 = vst.msk [vmem:[#allocation2 + $0x1b8] sm:$0xf] %vm286_vm10, %v13484_v0  ;;  %v2653_v39 = vmax.f32 %v11212_v62, 0.0 }
 0x3db   : > { %v11214_v49 = vpop.permute.xlu1 %3696  ;;  %7875 = vmatmul.mubr.msk.f32.gmra.mrb[20].mxu1 %vm2063_vm2, %v2651_v59  ;;  %v2652_v50 = vmax.f32 %v11217_v24, 0.0  ;;  %343 = vst.msk [vmem:[#allocation2 + $0x1f0] sm:$0xf] %vm286_vm10, %v13484_v0  ;;  %350 = vst.msk [vmem:[#allocation2 + $0x228] sm:$0xf] %vm286_vm10, %v13484_v0 }
 0x3dc   : > { %3964 = vrot.lane.b32.xlu0 %v3219_v40, %s8298_s14  ;;  %v7832_v5 = vpop.f32.mrb[24].mxu0  ;;  %357 = vst.msk [vmem:[#allocation2 + $0x260] sm:$0xf] %vm286_vm10, %v13484_v0  ;;  %364 = vst.msk [vmem:[#allocation2 + $0x298] sm:$0xf] %vm286_vm10, %v13484_v0 }
 0x3dd   : > { %4090 = vrot.lane.b32.xlu1 %v3250_v43, %s8299_s28  ;;  %371 = vst.msk [vmem:[#allocation2 + $0x2d0] sm:$0xf] %vm286_vm10, %v13484_v0  ;;  %378 = vst.msk [vmem:[#allocation2 + $0x308] sm:$0xf] %vm286_vm10, %v13484_v0  ;;  %v2597_v2 = vadd.f32 %v7832_v5, %v11074_v4  ;;  %v2591_v43 = vpop.f32.mrb[25].mxu0  ;;  %7877 = vmatprep.mubr.msk.f32.mxu1 %vm2063_vm2, %v2652_v50 }
 0x3de   : > { %385 = vst.msk [vmem:[#allocation2 + $0x340] sm:$0xf] %vm286_vm10, %v13484_v0  ;;  %392 = vst.msk [vmem:[#allocation2 + $0x378] sm:$0xf] %vm286_vm10, %v13484_v0  ;;  %v2592_v40 = vadd.f32 %v11074_v4, %v2591_v43  ;;  %v11327_v24 = vpop.permute.xlu0 %3698  ;;  %v3220_v43 = vld [vmem:[#allocation2 + $0x7ba] sm:$0xff] }
 0x3df   : > { %413 = vst.msk [vmem:[#allocation2 + $0x420] sm:$0xf] %vm286_vm10, %v13484_v0  ;;  %420 = vst.msk [vmem:[#allocation2 + $0x458] sm:$0xf] %vm286_vm10, %v13484_v0  ;;  %v11324_v59 = vpop.permute.xlu1 %3700  ;;  %7878 = vmatmul.mubr.msk.f32.gmra.mrb[22].mxu1 %vm2063_vm2, %v2653_v39  ;;  %v2655_v5 = vmax.f32 %v2597_v2, 0.0  ;;  %v3253_v39 = vld [vmem:[#allocation2 + $0x7ce] sm:$0xff] }
 0x3e0   : > { %427 = vst.msk [vmem:[#allocation2 + $0x490] sm:$0xf] %vm286_vm10, %v13484_v0  ;;  %434 = vst.msk [vmem:[#allocation2 + $0x4c8] sm:$0xf] %vm286_vm10, %v13484_v0  ;;  %v2654_v11 = vmax.f32 %v2592_v40, 0.0  ;;  %4092 = vrot.lane.b32.xlu0 %v3251_v57, %s8299_s28 }
 0x3e1   : > { %441 = vst.msk [vmem:[#allocation2 + $0x500] sm:$0xf] %vm286_vm10, %v13484_v0  ;;  %448 = vst.msk [vmem:[#allocation2 + $0x538] sm:$0xf] %vm286_vm10, %v13484_v0  ;;  %3840 = vrot.lane.b32.xlu1 %v3189_v1, %s8297_s13  ;;  %v7835_v62 = vpop.f32.mrb[26].mxu0 }
 0x3e2   : > { %455 = vst.msk [vmem:[#allocation2 + $0x570] sm:$0xf] %vm286_vm10, %v13484_v0  ;;  %462 = vst.msk [vmem:[#allocation2 + $0x5a8] sm:$0xf] %vm286_vm10, %v13484_v0  ;;  %v2607_v55 = vadd.f32 %v7835_v62, %v11074_v4  ;;  %v2601_v13 = vpop.f32.mrb[27].mxu0  ;;  %v11337_v10 = vpop.permute.xlu0 %3702  ;;  %7880 = vmatprep.mubr.msk.f32.mxu1 %vm2063_vm2, %v2654_v11 }
 0x3e3   : > { %469 = vst.msk [vmem:[#allocation2 + $0x5e0] sm:$0xf] %vm286_vm10, %v13484_v0  ;;  %476 = vst.msk [vmem:[#allocation2 + $0x618] sm:$0xf] %vm286_vm10, %v13484_v0  ;;  %v11334_v25 = vpop.permute.xlu1 %3704  ;;  %v2602_v44 = vadd.f32 %v11074_v4, %v2601_v13  ;;  %7881 = vmatmul.mubr.msk.f32.gmra.mrb[24].mxu1 %vm2063_vm2, %v2655_v5  ;;  %v3252_v13 = vld [vmem:[#allocation2 + $0x7c6] sm:$0xff] }
 0x3e4   : > { %483 = vst.msk [vmem:[#allocation2 + $0x650] sm:$0xf] %vm286_vm10, %v13484_v0  ;;  %490 = vst.msk [vmem:[#allocation2 + $0x688] sm:$0xf] %vm286_vm10, %v13484_v0  ;;  %3966 = vrot.lane.b32.xlu0 %v3220_v43, %s8298_s14  ;;  %v2657_v2 = vmax.f32 %v2607_v55, 0.0  ;;  %v3191_v55 = vld [vmem:[#allocation2 + $0x7ee] sm:$0xff] }
 0x3e5   : > { %497 = vst.msk [vmem:[#allocation2 + $0x6c0] sm:$0xf] %vm286_vm10, %v13484_v0  ;;  %504 = vst.msk [vmem:[#allocation2 + $0x6f8] sm:$0xf] %vm286_vm10, %v13484_v0  ;;  %v2656_v50 = vmax.f32 %v2602_v44, 0.0 }
 0x3e6   : > { %511 = vst.msk [vmem:[#allocation2 + $0x730] sm:$0xf] %vm286_vm10, %v13484_v0  ;;  %518 = vst.msk [vmem:[#allocation2 + $0x768] sm:$0xf] %vm286_vm10, %v13484_v0  ;;  %v7838_v1 = vpop.f32.mrb[28].mxu0  ;;  %v11347_v30 = vpop.permute.xlu0 %3706 }
 0x3e7   : > { %539 = vst.msk [vmem:[#allocation2 + $0x810] sm:$0xf] %vm286_vm10, %v13484_v0  ;;  %546 = vst.msk [vmem:[#allocation2 + $0x848] sm:$0xf] %vm286_vm10, %v13484_v0  ;;  %v2617_v57 = vadd.f32 %v7838_v1, %v11074_v4  ;;  %v2611_v40 = vpop.f32.mrb[29].mxu0  ;;  %v11344_v62 = vpop.permute.xlu1 %3708  ;;  %7883 = vmatprep.mubr.msk.f32.mxu1 %vm2063_vm2, %v2656_v50  ;;  %v11363_v50 = vld [vmem:[#allocation2 + $0x7fa] sm:$0xff] }
 0x3e8   : > { %553 = vst.msk [vmem:[#allocation2 + $0x880] sm:$0xf] %vm286_vm10, %v13484_v0  ;;  %560 = vst.msk [vmem:[#allocation2 + $0x8b8] sm:$0xf] %vm286_vm10, %v13484_v0  ;;  %v2612_v19 = vadd.f32 %v11074_v4, %v2611_v40  ;;  %7884 = vmatmul.mubr.msk.f32.gmra.mrb[26].mxu1 %vm2063_vm2, %v2657_v2  ;;  %4094 = vrot.lane.b32.xlu0 %v3252_v13, %s8299_s28  ;;  %v3190_v40 = vld [vmem:[#allocation2 + $0x7e6] sm:$0xff] }
 0x3e9   : > { %567 = vst.msk [vmem:[#allocation2 + $0x8f0] sm:$0xf] %vm286_vm10, %v13484_v0  ;;  %574 = vst.msk [vmem:[#allocation2 + $0x928] sm:$0xf] %vm286_vm10, %v13484_v0 }
 0x3ea   : > { %581 = vst.msk [vmem:[#allocation2 + $0x960] sm:$0xf] %vm286_vm10, %v13484_v0  ;;  %588 = vst.msk [vmem:[#allocation2 + $0x998] sm:$0xf] %vm286_vm10, %v13484_v0  ;;  %v2658_v44 = vmax.f32 %v2612_v19, 0.0 }
 0x3eb   : > { %595 = vst.msk [vmem:[#allocation2 + $0x9d0] sm:$0xf] %vm286_vm10, %v13484_v0  ;;  %602 = vst.msk [vmem:[#allocation2 + $0xa08] sm:$0xf] %vm286_vm10, %v13484_v0  ;;  %v7841_v11 = vpop.f32.mrb[30].mxu0  ;;  %v11354_v1 = vpop.permute.xlu1 %3712 }
 0x3ec   : > { %609 = vst.msk [vmem:[#allocation2 + $0xa40] sm:$0xf] %vm286_vm10, %v13484_v0  ;;  %616 = vst.msk [vmem:[#allocation2 + $0xa78] sm:$0xf] %vm286_vm10, %v13484_v0  ;;  %v2627_v5 = vadd.f32 %v7841_v11, %v11074_v4  ;;  %v2621_v43 = vpop.f32.mrb[31].mxu0  ;;  %7886 = vmatprep.mubr.msk.f32.mxu1 %vm2063_vm2, %v2658_v44  ;;  %3842 = vrot.lane.b32.xlu0 %v3190_v40, %s8297_s13  ;;  %v3254_v44 = vld [vmem:[#allocation2 + $0x7fe] sm:$0xff] }
 0x3ed   : > { %623 = vst.msk [vmem:[#allocation2 + $0xab0] sm:$0xf] %vm286_vm10, %v13484_v0  ;;  %630 = vst.msk [vmem:[#allocation2 + $0xae8] sm:$0xf] %vm286_vm10, %v13484_v0  ;;  %v2622_v36 = vadd.f32 %v11074_v4, %v2621_v43  ;;  %v3255_v4 = vld [vmem:[#allocation2 + $0x806] sm:$0xff]  ;;  %v11389_v40 = vld [vmem:[#allocation2 + $0x832] sm:$0xff] }
 0x3ee   : > { %637 = vst.msk [vmem:[#allocation2 + $0xb20] sm:$0xf] %vm286_vm10, %v13484_v0  ;;  %644 = vst.msk [vmem:[#allocation2 + $0xb58] sm:$0xf] %vm286_vm10, %v13484_v0  ;;  %v3221_v0 = vld [vmem:[#allocation2 + $0x7c2] sm:$0xff] }
 0x3ef   : > { %3968 = vrot.lane.b32.xlu1 %v3221_v0, %s8298_s14  ;;  %13485 = vst [vmem:[#allocation121_spill] sm:$0xff] %v11344_v62  ;;  %13486 = vst [vmem:[#allocation122_spill] sm:$0xff] %v11347_v30  ;;  %v2659_v0 = vmax.f32 %v2617_v57, 0.0  ;;  %v11357_v62 = vpop.permute.xlu0 %3710  ;;  %v2660_v19 = vmax.f32 %v2622_v36, 0.0  ;;  %v11365_v2 = vpop.permute.xlu1 %3716  ;;  %v11367_v57 = vld [vmem:[#allocation2 + $0x7f2] sm:$0xff]  ;;  %v3018_v30 = vld [vmem:[#allocation2 + $0x15e] sm:$0xff] }
 0x3f0   : > { %13487 = vst [vmem:[#allocation51_spill] sm:$0xff] %v11354_v1  ;;  %13488 = vst [vmem:[#allocation52_spill] sm:$0xff] %v11357_v62  ;;  %3970 = vrot.lane.b32.xlu0 %v11367_v57, %s8298_s14 }
 0x3f1   : > { %7887 = vmatmul.mubr.msk.f32.gmra.mrb[28].mxu1 %vm2063_vm2, %v2659_v0  ;;  %13489 = vst [vmem:[#allocation146_spill] sm:$0xff] %v11363_v50  ;;  %13490 = vst [vmem:[#allocation147_spill] sm:$0xff] %v11365_v2 }
 0x3f2   : > { %13491 = vst [vmem:[#allocation75_spill] sm:$0xff] %v11367_v57  ;;  %7889 = vmatprep.mubr.msk.f32.mxu1 %vm2063_vm2, %v2660_v19  ;;  %13497 = vst [vmem:[#allocation124_spill] sm:$0xff] %v11389_v40 }
 0x3f3   : > { %4096 = vrot.lane.b32.xlu1 %v3253_v39, %s8299_s28  ;;  %v2661_v39 = vmax.f32 %v2627_v5, 0.0  ;;  %v11369_v13 = vpop.permute.xlu0 %3714  ;;  %v11377_v36 = vpop.permute.xlu1 %3720  ;;  %v3192_v5 = vld [vmem:[#allocation2 + $0x81e] sm:$0xff] }
 0x3f4   : > { %13492 = vst [vmem:[#allocation76_spill] sm:$0xff] %v11369_v13  ;;  %13493 = vst [vmem:[#allocation172_spill] sm:$0xff] %v11377_v36  ;;  %4098 = vrot.lane.b32.xlu0 %v3254_v44, %s8299_s28  ;;  %v3262_v36 = vld [vmem:[#allocation2 + $0x8de] sm:$0xff]  ;;  %v3017_v13 = vld [vmem:[#allocation2 + $0x156] sm:$0xff] }
 0x3f5   : > { %7890 = vmatmul.mubr.msk.f32.gmra.mrb[30].mxu1 %vm2063_vm2, %v2661_v39  ;;  %v11393_v39 = vld [vmem:[#allocation2 + $0x82a] sm:$0xff] }
 0x3f6   : > { %13499 = vst [vmem:[#allocation54_spill] sm:$0xff] %v11393_v39 }
 0x3f7   : > { %3844 = vrot.lane.b32.xlu1 %v3191_v55, %s8297_s13  ;;  %v11379_v11 = vpop.permute.xlu0 %3718  ;;  %v3193_v55 = vld [vmem:[#allocation2 + $0x826] sm:$0xff]  ;;  %v11383_v0 = vpop.permute.xlu1 %3724 }
 0x3f8   : > { %13494 = vst [vmem:[#allocation173_spill] sm:$0xff] %v11379_v11  ;;  %13495 = vst [vmem:[#allocation28_spill] sm:$0xff] %v11383_v0  ;;  %3846 = vrot.lane.b32.xlu0 %v3192_v5, %s8297_s13  ;;  %v3195_v5 = vld [vmem:[#allocation2 + $0x85e] sm:$0xff] }
 0x3fb   : > { %3972 = vrot.lane.b32.xlu1 %v11363_v50, %s8298_s14  ;;  %v11385_v43 = vpop.permute.xlu0 %3722  ;;  %v11391_v19 = vpop.permute.xlu1 %3728 }
 0x3fc   : > { %13496 = vst [vmem:[#allocation123_spill] sm:$0xff] %v11385_v43  ;;  %13498 = vst [vmem:[#allocation53_spill] sm:$0xff] %v11391_v19  ;;  %3974 = vrot.lane.b32.xlu0 %v11393_v39, %s8298_s14 }
 0x3ff   : > { %4100 = vrot.lane.b32.xlu1 %v3255_v4, %s8299_s28  ;;  %v11395_v50 = vpop.permute.xlu0 %3726  ;;  %v3257_v4 = vld [vmem:[#allocation2 + $0x83e] sm:$0xff]  ;;  %v11401_v44 = vpop.permute.xlu1 %3732 }
 0x400   : > { %13500 = vst [vmem:[#allocation148_spill] sm:$0xff] %v11395_v50  ;;  %13501 = vst [vmem:[#allocation149_spill] sm:$0xff] %v11401_v44  ;;  %v3194_v50 = vld [vmem:[#allocation2 + $0x856] sm:$0xff]  ;;  %v3226_v44 = vld [vmem:[#allocation2 + $0x862] sm:$0xff] }
 0x403   : > { %3848 = vrot.lane.b32.xlu1 %v3193_v55, %s8297_s13  ;;  %v3256_v55 = vld [vmem:[#allocation2 + $0x836] sm:$0xff]  ;;  %v11403_v57 = vpop.permute.xlu0 %3730  ;;  %v11407_v19 = vpop.permute.xlu1 %3736 }
 0x404   : > { %13502 = vst [vmem:[#allocation77_spill] sm:$0xff] %v11403_v57  ;;  %4102 = vrot.lane.b32.xlu0 %v3256_v55, %s8299_s28  ;;  %13503 = vst [vmem:[#allocation78_spill] sm:$0xff] %v11407_v19  ;;  %v3258_v19 = vld [vmem:[#allocation2 + $0x86e] sm:$0xff] }
 0x407   : > { %3976 = vrot.lane.b32.xlu1 %v11389_v40, %s8298_s14  ;;  %v11409_v43 = vpop.permute.xlu0 %3734  ;;  %v3227_v40 = vld [vmem:[#allocation2 + $0x86a] sm:$0xff]  ;;  %v11413_v39 = vpop.permute.xlu1 %3740 }
 0x408   : > { %13504 = vst [vmem:[#allocation174_spill] sm:$0xff] %v11409_v43  ;;  %3850 = vrot.lane.b32.xlu0 %v3194_v50, %s8297_s13  ;;  %13505 = vst [vmem:[#allocation175_spill] sm:$0xff] %v11413_v39  ;;  %v3197_v50 = vld [vmem:[#allocation2 + $0x896] sm:$0xff]  ;;  %v3196_v39 = vld [vmem:[#allocation2 + $0x88e] sm:$0xff] }
 0x40b   : > { %4104 = vrot.lane.b32.xlu1 %v3257_v4, %s8299_s28  ;;  %v11415_v0 = vpop.permute.xlu0 %3738  ;;  %v3259_v4 = vld [vmem:[#allocation2 + $0x876] sm:$0xff]  ;;  %v11419_v55 = vpop.permute.xlu1 %3744 }
 0x40c   : > { %13506 = vst [vmem:[#allocation29_spill] sm:$0xff] %v11415_v0  ;;  %3978 = vrot.lane.b32.xlu0 %v3226_v44, %s8298_s14  ;;  %13507 = vst [vmem:[#allocation125_spill] sm:$0xff] %v11419_v55  ;;  %v3228_v55 = vld [vmem:[#allocation2 + $0x89a] sm:$0xff] }
 0x40f   : > { %3852 = vrot.lane.b32.xlu1 %v3195_v5, %s8297_s13  ;;  %v11421_v57 = vpop.permute.xlu0 %3742  ;;  %v11425_v5 = vpop.permute.xlu1 %3748 }
 0x410   : > { %13508 = vst [vmem:[#allocation126_spill] sm:$0xff] %v11421_v57  ;;  %4106 = vrot.lane.b32.xlu0 %v3258_v19, %s8299_s28  ;;  %13509 = vst [vmem:[#allocation55_spill] sm:$0xff] %v11425_v5  ;;  %v3261_v19 = vld [vmem:[#allocation2 + $0x8ae] sm:$0xff]  ;;  %v3260_v5 = vld [vmem:[#allocation2 + $0x8a6] sm:$0xff] }
 0x413   : > { %3980 = vrot.lane.b32.xlu1 %v3227_v40, %s8298_s14  ;;  %v11427_v43 = vpop.permute.xlu0 %3746  ;;  %v3229_v40 = vld [vmem:[#allocation2 + $0x8a2] sm:$0xff]  ;;  %v11431_v44 = vpop.permute.xlu1 %3752 }
 0x414   : > { %13510 = vst [vmem:[#allocation56_spill] sm:$0xff] %v11427_v43  ;;  %3854 = vrot.lane.b32.xlu0 %v3196_v39, %s8297_s13  ;;  %13511 = vst [vmem:[#allocation150_spill] sm:$0xff] %v11431_v44  ;;  %v3199_v39 = vld [vmem:[#allocation2 + $0x8ce] sm:$0xff]  ;;  %v3198_v44 = vld [vmem:[#allocation2 + $0x8c6] sm:$0xff] }
 0x417   : > { %4108 = vrot.lane.b32.xlu1 %v3259_v4, %s8299_s28  ;;  %v11433_v0 = vpop.permute.xlu0 %3750  ;;  %v11437_v4 = vpop.permute.xlu1 %3820 }
 0x418   : > { %13512 = vst [vmem:[#allocation151_spill] sm:$0xff] %v11433_v0  ;;  %3982 = vrot.lane.b32.xlu0 %v3228_v55, %s8298_s14  ;;  %v3231_v55 = vld [vmem:[#allocation2 + $0x8da] sm:$0xff]  ;;  %v3230_v0 = vld [vmem:[#allocation2 + $0x8d2] sm:$0xff] }
 0x41b   : > { %3856 = vrot.lane.b32.xlu1 %v3197_v50, %s8297_s13  ;;  %v3819_v57 = vpop.permute.xlu0 %3818  ;;  %v11441_v50 = vpop.permute.xlu1 %3824 }
 0x41c   : > { %4110 = vrot.lane.b32.xlu0 %v3260_v5, %s8299_s28  ;;  %v3263_v5 = vld [vmem:[#allocation2 + $0x8e6] sm:$0xff] }
 0x41f   : > { %3984 = vrot.lane.b32.xlu1 %v3229_v40, %s8298_s14  ;;  %v11443_v43 = vpop.permute.xlu0 %3822  ;;  %v11447_v40 = vpop.permute.xlu1 %3828 }
 0x420   : > { %3858 = vrot.lane.b32.xlu0 %v3198_v44, %s8297_s13  ;;  %v3201_v44 = vld [vmem:[#allocation2 + $0x906] sm:$0xff] }
 0x423   : > { %4112 = vrot.lane.b32.xlu1 %v3261_v19, %s8299_s28  ;;  %v11449_v11 = vpop.permute.xlu0 %3826  ;;  %v11453_v19 = vpop.permute.xlu1 %3832 }
 0x424   : > { %3986 = vrot.lane.b32.xlu0 %v3230_v0, %s8298_s14 }
 0x427   : > { %3860 = vrot.lane.b32.xlu1 %v3199_v39, %s8297_s13  ;;  %v11455_v2 = vpop.permute.xlu0 %3830  ;;  %v4170_v39 = vsel %vm279_vm0, %v3017_v13, %v10764_v18  ;;  %v11461_v62 = vpop.permute.xlu1 %3836  ;;  %v4171_v18 = vsel %vm279_vm0, %v3018_v30, %v10762_v60  ;;  %v3019_v13 = vld [vmem:[#allocation2 + $0x18e] sm:$0xff]  ;;  %v3265_v60 = vld [vmem:[#allocation2 + $0x91e] sm:$0xff] }
 0x428   : > { %4114 = vrot.lane.b32.xlu0 %v3262_v36, %s8299_s28  ;;  %13513 = vst [vmem:[#allocation79_spill] sm:$0xff] %v11461_v62  ;;  %v4202_v0 = vsel %vm2063_vm2, %v4170_v39, %v10887_v8  ;;  %v3233_v36 = vld [vmem:[#allocation2 + $0x912] sm:$0xff]  ;;  %v4203_v62 = vsel %vm2063_vm2, %v4171_v18, %v10885_v26 }
 0x429   : > { %v4234_v61 = vsel %vm2096_vm3, %v4202_v0, %v11015_v48  ;;  %v3264_v26 = vld [vmem:[#allocation2 + $0x916] sm:$0xff] }
 0x42a   : > { %v4266_v8 = vsel %vm2129_vm4, %v4234_v61, %v9682_v22  ;;  %v4172_v61 = vsel %vm279_vm0, %v3019_v13, %v10776_v42  ;;  %v3021_v13 = vld [vmem:[#allocation2 + $0x1c6] sm:$0xff] }
 0x42b   : > { %3988 = vrot.lane.b32.xlu1 %v3231_v55, %s8298_s14  ;;  %v3200_v55 = vld [vmem:[#allocation2 + $0x8fe] sm:$0xff]  ;;  %v11465_v1 = vpop.permute.xlu0 %3834  ;;  %v4298_v48 = vsel %vm2162_vm5, %v4266_v8, %v11204_v47  ;;  %v4204_v47 = vsel %vm2063_vm2, %v4172_v61, %v10899_v63  ;;  %v3020_v8 = vld [vmem:[#allocation2 + $0x196] sm:$0xff] }
 0x42c   : > { %3862 = vrot.lane.b32.xlu0 %v3200_v55, %s8297_s13  ;;  %v4330_v55 = vsel %vm2195_vm6, %v4298_v48, %v3819_v57  ;;  %v3203_v63 = vld [vmem:[#allocation2 + $0x93e] sm:$0xff] }
 0x42f   : > { %4116 = vrot.lane.b32.xlu1 %v3263_v5, %s8299_s28  ;;  %v3947_v5 = vpop.permute.xlu1 %3946  ;;  %v11475_v39 = vpop.permute.xlu0 %3838 }
 0x430   : > { %3990 = vrot.lane.b32.xlu0 %v3232_v53, %s8298_s14  ;;  %v4362_v30 = vsel %vm2228_vm7, %v4330_v55, %v3947_v5  ;;  %v3202_v5 = vld [vmem:[#allocation2 + $0x936] sm:$0xff] }
 0x433   : > { %3864 = vrot.lane.b32.xlu1 %v3201_v44, %s8297_s13  ;;  %v4235_v44 = vsel %vm2096_vm3, %v4203_v62, %v11013_v38  ;;  %v4075_v0 = vpop.permute.xlu1 %4074  ;;  %v3949_v18 = vpop.permute.xlu0 %3948  ;;  %v4236_v38 = vsel %vm2096_vm3, %v4204_v47, %v11027_v9  ;;  %v4173_v9 = vsel %vm279_vm0, %v3020_v8, %v10774_v54 }
 0x434   : > { %v4267_v53 = vsel %vm2129_vm4, %v4235_v44, %v9680_v23  ;;  %4118 = vrot.lane.b32.xlu0 %v3264_v26, %s8299_s28  ;;  %v4268_v48 = vsel %vm2129_vm4, %v4236_v38, %v9694_v20  ;;  %v3234_v26 = vld [vmem:[#allocation2 + $0x942] sm:$0xff] }
 0x435   : > { %v4299_v42 = vsel %vm2162_vm5, %v4267_v53, %v11201_v27  ;;  %v4205_v27 = vsel %vm2063_vm2, %v4173_v9, %v10897_v6  ;;  %v4174_v6 = vsel %vm279_vm0, %v3021_v13, %v10788_v52 }
 0x436   : > { %v4331_v62 = vsel %vm2195_vm6, %v4299_v42, %v11437_v4  ;;  %v4237_v54 = vsel %vm2096_vm3, %v4205_v27, %v11025_v51  ;;  %v4206_v47 = vsel %vm2063_vm2, %v4174_v6, %v10911_v46  ;;  %v3267_v46 = vld [vmem:[#allocation2 + $0x956] sm:$0xff]  ;;  %v3266_v42 = vld [vmem:[#allocation2 + $0x94e] sm:$0xff] }
 0x437   : > { %3992 = vrot.lane.b32.xlu1 %v3233_v36, %s8298_s14  ;;  %v4394_v36 = vsel %vm2261_vm8, %v4362_v30, %v4075_v0  ;;  %v3951_v57 = vpop.permute.xlu1 %3950  ;;  %v4363_v44 = vsel %vm2228_vm7, %v4331_v62, %v3949_v18  ;;  %v4077_v55 = vpop.permute.xlu0 %4076  ;;  %v3235_v30 = vld [vmem:[#allocation2 + $0x94a] sm:$0xff]  ;;  %v4269_v8 = vsel %vm2129_vm4, %v4237_v54, %v9692_v21  ;;  %v3236_v6 = vld [vmem:[#allocation2 + $0x97a] sm:$0xff] }
 0x438   : > { %7902 = vmatprep.mubr.msk.f32.mxu0 %vm2304_vm9, %v4394_v36  ;;  %v4395_v4 = vsel %vm2261_vm8, %v4363_v44, %v4077_v55  ;;  %3866 = vrot.lane.b32.xlu0 %v3202_v5, %s8297_s13  ;;  %v3022_v18 = vld [vmem:[#allocation2 + $0x1ce] sm:$0xff]  ;;  %v4301_v52 = vsel %vm2162_vm5, %v4269_v8, %v11214_v49  ;;  %v3268_v8 = vld [vmem:[#allocation2 + $0x986] sm:$0xff] }
 0x439   : > { %7903 = vmatmul.mubr.msk.f32.vlgmr.msra.gmra.mrb[32].mxu0 %vm2304_vm9, %v4395_v4  ;;  %v4333_v38 = vsel %vm2195_vm6, %v4301_v52, %v11441_v50  ;;  %v3204_v55 = vld [vmem:[#allocation2 + $0x96e] sm:$0xff]  ;;  %v3024_v4 = vld [vmem:[#allocation2 + $0x206] sm:$0xff] }
 0x43b   : > { %4120 = vrot.lane.b32.xlu1 %v3265_v60, %s8299_s28  ;;  %v4300_v60 = vsel %vm2162_vm5, %v4268_v48, %v11219_v58  ;;  %v4079_v0 = vpop.permute.xlu1 %4078  ;;  %v3953_v36 = vpop.permute.xlu0 %3952  ;;  %v3205_v48 = vld [vmem:[#allocation2 + $0x976] sm:$0xff] }
 0x43c   : > { %v4332_v61 = vsel %vm2195_vm6, %v4300_v60, %v11443_v43  ;;  %v4238_v43 = vsel %vm2096_vm3, %v4206_v47, %v11039_v12  ;;  %3994 = vrot.lane.b32.xlu0 %v3234_v26, %s8298_s14  ;;  %v4175_v12 = vsel %vm279_vm0, %v3022_v18, %v10786_v45  ;;  %v3269_v18 = vld [vmem:[#allocation2 + $0x98e] sm:$0xff] }
 0x43d   : > { %v4364_v58 = vsel %vm2228_vm7, %v4332_v61, %v3951_v57  ;;  %v4270_v62 = vsel %vm2129_vm4, %v4238_v43, %v9706_v16  ;;  %v4365_v57 = vsel %vm2228_vm7, %v4333_v38, %v3953_v36  ;;  %v4207_v49 = vsel %vm2063_vm2, %v4175_v12, %v10909_v7  ;;  %v3026_v38 = vld [vmem:[#allocation2 + $0x23e] sm:$0xff] }
 0x43e   : > { %v4396_v51 = vsel %vm2261_vm8, %v4364_v58, %v4079_v0  ;;  %v4302_v9 = vsel %vm2162_vm5, %v4270_v62, %v11327_v24  ;;  %v4239_v45 = vsel %vm2096_vm3, %v4207_v49, %v11037_v32  ;;  %v3025_v58 = vld [vmem:[#allocation2 + $0x236] sm:$0xff]  ;;  %v13514_v62 = vld [vmem:[#allocation92_spill] sm:$0xff] }
 0x43f   : > { %3868 = vrot.lane.b32.xlu1 %v3203_v63, %s8297_s13  ;;  %7905 = vmatprep.mubr.msk.f32.mxu0 %vm2304_vm9, %v4396_v51  ;;  %v3955_v53 = vpop.permute.xlu1 %3954  ;;  %v3023_v63 = vld [vmem:[#allocation2 + $0x1fe] sm:$0xff]  ;;  %v4081_v5 = vpop.permute.xlu0 %4080  ;;  %v4334_v13 = vsel %vm2195_vm6, %v4302_v9, %v11449_v11  ;;  %v4271_v54 = vsel %vm2129_vm4, %v4239_v45, %v9704_v17 }
 0x440   : > { %v4397_v50 = vsel %vm2261_vm8, %v4365_v57, %v4081_v5  ;;  %4122 = vrot.lane.b32.xlu0 %v3266_v42, %s8299_s28  ;;  %v4176_v7 = vsel %vm279_vm0, %v3023_v63, %v10796_v3  ;;  %v4366_v24 = vsel %vm2228_vm7, %v4334_v13, %v3955_v53  ;;  %v4303_v3 = vsel %vm2162_vm5, %v4271_v54, %v11324_v59  ;;  %v3206_v63 = vld [vmem:[#allocation2 + $0x9a6] sm:$0xff]  ;;  %v13515_v9 = vld [vmem:[#allocation22_spill] sm:$0xff] }
 0x441   : > { %7906 = vmatmul.mubr.msk.f32.gmra.mrb[34].mxu0 %vm2304_vm9, %v4397_v50  ;;  %v4208_v27 = vsel %vm2063_vm2, %v4176_v7, %v10919_v34  ;;  %v3237_v34 = vld [vmem:[#allocation2 + $0x982] sm:$0xff]  ;;  %v4335_v61 = vsel %vm2195_vm6, %v4303_v3, %v11447_v40  ;;  %v13516_v50 = vld [vmem:[#allocation122_spill] sm:$0xff] }
 0x442   : > { %v4240_v11 = vsel %vm2096_vm3, %v4208_v27, %v11047_v31  ;;  %v4177_v31 = vsel %vm279_vm0, %v3024_v4, %v10794_v37  ;;  %v3239_v7 = vld [vmem:[#allocation2 + $0x9ba] sm:$0xff]  ;;  %v3027_v4 = vld [vmem:[#allocation2 + $0x26e] sm:$0xff] }
 0x443   : > { %3996 = vrot.lane.b32.xlu1 %v3235_v30, %s8298_s14  ;;  %v4083_v44 = vpop.permute.xlu1 %4082  ;;  %v3957_v60 = vpop.permute.xlu0 %3956  ;;  %v4272_v0 = vsel %vm2129_vm4, %v4240_v11, %v9714_v14  ;;  %v4209_v59 = vsel %vm2063_vm2, %v4177_v31, %v10917_v33  ;;  %v4178_v33 = vsel %vm279_vm0, %v3025_v58, %v10802_v56  ;;  %v3028_v27 = vld [vmem:[#allocation2 + $0x276] sm:$0xff]  ;;  %v13518_v11 = vld [vmem:[#allocation91_spill] sm:$0xff] }
 0x444   : > { %v4398_v32 = vsel %vm2261_vm8, %v4366_v24, %v4083_v44  ;;  %3870 = vrot.lane.b32.xlu0 %v3204_v55, %s8297_s13  ;;  %v4367_v26 = vsel %vm2228_vm7, %v4335_v61, %v3957_v60  ;;  %v4304_v51 = vsel %vm2162_vm5, %v4272_v0, %v11337_v10  ;;  %v4241_v37 = vsel %vm2096_vm3, %v4209_v59, %v11045_v28  ;;  %v3238_v55 = vld [vmem:[#allocation2 + $0x9b2] sm:$0xff]  ;;  %v3270_v0 = vld [vmem:[#allocation2 + $0x9be] sm:$0xff] }
 0x445   : > { %7908 = vmatprep.mubr.msk.f32.mxu0 %vm2304_vm9, %v4398_v32  ;;  %v4336_v36 = vsel %vm2195_vm6, %v4304_v51, %v11455_v2  ;;  %v4210_v52 = vsel %vm2063_vm2, %v4178_v33, %v10927_v35  ;;  %v4273_v53 = vsel %vm2129_vm4, %v4241_v37, %v9712_v15  ;;  %v3207_v35 = vld [vmem:[#allocation2 + $0x9ae] sm:$0xff]  ;;  %v13520_v61 = vld [vmem:[#allocation6_spill] sm:$0xff] }
 0x446   : > { %v4242_v2 = vsel %vm2096_vm3, %v4210_v52, %v11055_v29  ;;  %v4305_v56 = vsel %vm2162_vm5, %v4273_v53, %v11334_v25  ;;  %v4179_v29 = vsel %vm279_vm0, %v3026_v38, %v10800_v41  ;;  %v13523_v59 = vld [vmem:[#allocation41_spill] sm:$0xff]  ;;  %v13525_v33 = vld [vmem:[#allocation118_spill] sm:$0xff] }
 0x447   : > { %4124 = vrot.lane.b32.xlu1 %v3267_v46, %s8299_s28  ;;  %v3959_v30 = vpop.permute.xlu1 %3958  ;;  %v4085_v47 = vpop.permute.xlu0 %4084  ;;  %v4337_v42 = vsel %vm2195_vm6, %v4305_v56, %v11453_v19  ;;  %v4274_v57 = vsel %vm2129_vm4, %v4242_v2, %v13514_v62  ;;  %v4211_v25 = vsel %vm2063_vm2, %v4179_v29, %v13515_v9  ;;  %v13517_v19 = vld [vmem:[#allocation117_spill] sm:$0xff]  ;;  %v13530_v29 = vld [vmem:[#allocation52_spill] sm:$0xff] }
 0x448   : > { %v4399_v40 = vsel %vm2261_vm8, %v4367_v26, %v4085_v47  ;;  %3998 = vrot.lane.b32.xlu0 %v3236_v6, %s8298_s14  ;;  %v4368_v10 = vsel %vm2228_vm7, %v4336_v36, %v3959_v30  ;;  %v4306_v45 = vsel %vm2162_vm5, %v4274_v57, %v13516_v50  ;;  %v4181_v30 = vsel %vm279_vm0, %v3028_v27, %v13520_v61  ;;  %v13521_v6 = vld [vmem:[#allocation79_spill] sm:$0xff]  ;;  %v13524_v36 = vld [vmem:[#allocation42_spill] sm:$0xff]  ;;  %v13527_v2 = vld [vmem:[#allocation93_spill] sm:$0xff] }
 0x449   : > { %7909 = vmatmul.mubr.msk.f32.gmra.mrb[36].mxu0 %vm2304_vm9, %v4399_v40  ;;  %v4338_v41 = vsel %vm2195_vm6, %v4306_v45, %v11465_v1  ;;  %v13519_v1 = vld [vmem:[#allocation121_spill] sm:$0xff]  ;;  %v13522_v26 = vld [vmem:[#allocation7_spill] sm:$0xff]  ;;  %v4213_v51 = vsel %vm2063_vm2, %v4181_v30, %v13523_v59  ;;  %v13535_v30 = vld [vmem:[#allocation48_spill] sm:$0xff] }
 0x44a   : > { %v4180_v47 = vsel %vm279_vm0, %v3027_v4, %v13522_v26  ;;  %v5178_v38 = vld [vmem:[#allocation2 + $0x12] sm:$0xff]  ;;  %v5179_v45 = vld [vmem:[#allocation2 + $0x1a] sm:$0xff] }
 0x44b   : > { %3872 = vrot.lane.b32.xlu1 %v3205_v48, %s8297_s13  ;;  %v4087_v43 = vpop.permute.xlu1 %4086  ;;  %v3961_v46 = vpop.permute.xlu0 %3960  ;;  %v4243_v48 = vsel %vm2096_vm3, %v4211_v25, %v13517_v19  ;;  %v13537_v59 = vld [vmem:[#allocation95_spill] sm:$0xff] }
 0x44c   : > { %v4400_v28 = vsel %vm2261_vm8, %v4368_v10, %v4087_v43  ;;  %4126 = vrot.lane.b32.xlu0 %v3268_v8, %s8299_s28  ;;  %v4369_v5 = vsel %vm2228_vm7, %v4337_v42, %v3961_v46  ;;  %v4275_v54 = vsel %vm2129_vm4, %v4243_v48, %v13518_v11  ;;  %v4245_v10 = vsel %vm2096_vm3, %v4213_v51, %v13525_v33  ;;  %v13526_v8 = vld [vmem:[#allocation47_spill] sm:$0xff] }
 0x44d   : > { %7911 = vmatprep.mubr.msk.f32.mxu0 %vm2304_vm9, %v4400_v28  ;;  %v4307_v3 = vsel %vm2162_vm5, %v4275_v54, %v13519_v1  ;;  %v3208_v28 = vld [vmem:[#allocation2 + $0x9de] sm:$0xff]  ;;  %v4277_v53 = vsel %vm2129_vm4, %v4245_v10, %v13527_v2  ;;  %v13540_v10 = vld [vmem:[#allocation76_spill] sm:$0xff] }
 0x44e   : > { %v4339_v31 = vsel %vm2195_vm6, %v4307_v3, %v13521_v6  ;;  %v13533_v54 = vld [vmem:[#allocation23_spill] sm:$0xff] }
 0x44f   : > { %4000 = vrot.lane.b32.xlu1 %v3237_v34, %s8298_s14  ;;  %v3963_v12 = vpop.permute.xlu1 %3962  ;;  %v4089_v49 = vpop.permute.xlu0 %4088  ;;  %v3271_v34 = vld [vmem:[#allocation2 + $0x9c6] sm:$0xff] }
 0x450   : > { %v4401_v13 = vsel %vm2261_vm8, %v4369_v5, %v4089_v49  ;;  %3874 = vrot.lane.b32.xlu0 %v3206_v63, %s8297_s13  ;;  %v4370_v24 = vsel %vm2228_vm7, %v4338_v41, %v3963_v12  ;;  %v13529_v12 = vld [vmem:[#allocation94_spill] sm:$0xff]  ;;  %v5210_v49 = vld [vmem:[#allocation2 + $0x24] sm:$0xff] }
 0x451   : > { %7912 = vmatmul.mubr.msk.f32.gmra.mrb[38].mxu0 %vm2304_vm9, %v4401_v13  ;;  %v3030_v13 = vld [vmem:[#allocation2 + $0x2ae] sm:$0xff] }
 0x453   : > { %4128 = vrot.lane.b32.xlu1 %v3269_v18, %s8299_s28  ;;  %v4091_v44 = vpop.permute.xlu1 %4090  ;;  %v3965_v60 = vpop.permute.xlu0 %3964  ;;  %v4212_v18 = vsel %vm2063_vm2, %v4180_v47, %v13524_v36  ;;  %v5211_v47 = vld [vmem:[#allocation2 + $0x2c] sm:$0xff] }
 0x454   : > { %v4402_v32 = vsel %vm2261_vm8, %v4370_v24, %v4091_v44  ;;  %4002 = vrot.lane.b32.xlu0 %v3238_v55, %s8298_s14  ;;  %v4371_v40 = vsel %vm2228_vm7, %v4339_v31, %v3965_v60  ;;  %v4244_v52 = vsel %vm2096_vm3, %v4212_v18, %v13526_v8  ;;  %v13531_v44 = vld [vmem:[#allocation8_spill] sm:$0xff]  ;;  %v13532_v60 = vld [vmem:[#allocation9_spill] sm:$0xff]  ;;  %v13536_v31 = vld [vmem:[#allocation142_spill] sm:$0xff] }
 0x455   : > { %7914 = vmatprep.mubr.msk.f32.mxu0 %vm2304_vm9, %v4402_v32  ;;  %v4276_v63 = vsel %vm2129_vm4, %v4244_v52, %v13529_v12  ;;  %v4183_v55 = vsel %vm279_vm0, %v3030_v13, %v13531_v44  ;;  %v3209_v32 = vld [vmem:[#allocation2 + $0x9e6] sm:$0xff]  ;;  %v3272_v52 = vld [vmem:[#allocation2 + $0x9f6] sm:$0xff] }
 0x456   : > { %v4308_v57 = vsel %vm2162_vm5, %v4276_v63, %v13530_v29  ;;  %v4215_v1 = vsel %vm2063_vm2, %v4183_v55, %v13533_v54  ;;  %v13539_v18 = vld [vmem:[#allocation96_spill] sm:$0xff]  ;;  %v3031_v29 = vld [vmem:[#allocation2 + $0x2de] sm:$0xff]  ;;  %v13547_v54 = vld [vmem:[#allocation97_spill] sm:$0xff] }
 0x457   : > { %3876 = vrot.lane.b32.xlu1 %v3207_v35, %s8297_s13  ;;  %v3841_v58 = vpop.permute.xlu1 %3840  ;;  %v4093_v37 = vpop.permute.xlu0 %4092  ;;  %v13528_v35 = vld [vmem:[#allocation51_spill] sm:$0xff]  ;;  %v4340_v9 = vsel %vm2195_vm6, %v4308_v57, %v11475_v39  ;;  %v3240_v39 = vld [vmem:[#allocation2 + $0x9ea] sm:$0xff]  ;;  %v4247_v6 = vsel %vm2096_vm3, %v4215_v1, %v13535_v30  ;;  %v13549_v30 = vld [vmem:[#allocation98_spill] sm:$0xff] }
 0x458   : > { %v4403_v43 = vsel %vm2261_vm8, %v4371_v40, %v4093_v37  ;;  %4130 = vrot.lane.b32.xlu0 %v3270_v0, %s8299_s28  ;;  %v4309_v42 = vsel %vm2162_vm5, %v4277_v53, %v13528_v35  ;;  %v5242_v0 = vld [vmem:[#allocation2 + $0x3f0] sm:$0xff]  ;;  %v4279_v51 = vsel %vm2129_vm4, %v4247_v6, %v13537_v59  ;;  %v13538_v37 = vld [vmem:[#allocation147_spill] sm:$0xff] }
 0x459   : > { %7915 = vmatmul.mubr.msk.f32.gmra.mrb[40].mxu0 %vm2304_vm9, %v4403_v43  ;;  %v4341_v5 = vsel %vm2195_vm6, %v4309_v42, %v3841_v58  ;;  %v4311_v36 = vsel %vm2162_vm5, %v4279_v51, %v13538_v37  ;;  %v3241_v53 = vld [vmem:[#allocation2 + $0x9f2] sm:$0xff]  ;;  %v13546_v55 = vld [vmem:[#allocation71_spill] sm:$0xff] }
 0x45a   : > { %v5181_v37 = vld [vmem:[#allocation2 + $0x52] sm:$0xff] }
 0x45b   : > { %4004 = vrot.lane.b32.xlu1 %v3239_v7, %s8298_s14  ;;  %v3967_v56 = vpop.permute.xlu0 %3966  ;;  %v3029_v7 = vld [vmem:[#allocation2 + $0x2a6] sm:$0xff] }
 0x45c   : > { %5435 = vrot.lane.b32.xlu0 %v5178_v38, %s8292_s8  ;;  %v4372_v19 = vsel %vm2228_vm7, %v4340_v9, %v3967_v56  ;;  %v4182_v4 = vsel %vm279_vm0, %v3029_v7, %v13532_v60  ;;  %v3032_v56 = vld [vmem:[#allocation2 + $0x2e6] sm:$0xff] }
 0x45d   : > { %v13544_v7 = vld [vmem:[#allocation139_spill] sm:$0xff] }
 0x45f   : > { %4132 = vrot.lane.b32.xlu1 %v3271_v34, %s8299_s28  ;;  %v4095_v41 = vpop.permute.xlu0 %4094  ;;  %v13534_v34 = vld [vmem:[#allocation43_spill] sm:$0xff] }
 0x460   : > { %v4404_v24 = vsel %vm2261_vm8, %v4372_v19, %v4095_v41  ;;  %5437 = vrot.lane.b32.xlu0 %v5179_v45, %s8292_s8  ;;  %v4214_v61 = vsel %vm2063_vm2, %v4182_v4, %v13534_v34  ;;  %v13542_v45 = vld [vmem:[#allocation11_spill] sm:$0xff]  ;;  %v13543_v19 = vld [vmem:[#allocation44_spill] sm:$0xff] }
 0x461   : > { %v3969_v46 = vpop.permute.xlu1 %3968  ;;  %7917 = vmatprep.mubr.msk.f32.mxu0 %vm2304_vm9, %v4404_v24  ;;  %v4246_v58 = vsel %vm2096_vm3, %v4214_v61, %v13536_v31  ;;  %v4184_v13 = vsel %vm279_vm0, %v3031_v29, %v13542_v45  ;;  %v5180_v4 = vld [vmem:[#allocation2 + $0x4a] sm:$0xff] }
 0x462   : > { %v4373_v25 = vsel %vm2228_vm7, %v4341_v5, %v3969_v46  ;;  %v4278_v33 = vsel %vm2129_vm4, %v4246_v58, %v13539_v18  ;;  %v3273_v5 = vld [vmem:[#allocation2 + $0x9fe] sm:$0xff]  ;;  %v4216_v24 = vsel %vm2063_vm2, %v4184_v13, %v13544_v7  ;;  %v13548_v34 = vld [vmem:[#allocation172_spill] sm:$0xff]  ;;  %v13550_v31 = vld [vmem:[#allocation173_spill] sm:$0xff] }
 0x463   : > { %3878 = vrot.lane.b32.xlu1 %v3208_v28, %s8297_s13  ;;  %v3843_v3 = vpop.permute.xlu0 %3842  ;;  %v4310_v43 = vsel %vm2162_vm5, %v4278_v33, %v13540_v10  ;;  %v13552_v29 = vld [vmem:[#allocation13_spill] sm:$0xff]  ;;  %v13555_v45 = vld [vmem:[#allocation72_spill] sm:$0xff] }
 0x464   : > { %3880 = vrot.lane.b32.xlu0 %v3209_v32, %s8297_s13  ;;  %v4342_v28 = vsel %vm2195_vm6, %v4310_v43, %v3843_v3  ;;  %v5274_v32 = vld [vmem:[#allocation2 + $0x414] sm:$0xff]  ;;  %v5244_v7 = vld [vmem:[#allocation2 + $0x428] sm:$0xff] }
 0x465   : > { %v4097_v50 = vpop.permute.xlu1 %4096 }
 0x466   : > { %v4405_v48 = vsel %vm2261_vm8, %v4373_v25, %v4097_v50  ;;  %v5243_v50 = vld [vmem:[#allocation2 + $0x3f8] sm:$0xff] }
 0x467   : > { %5563 = vrot.lane.b32.xlu1 %v5210_v49, %s8293_s9  ;;  %7918 = vmatmul.mubr.msk.f32.gmra.mrb[42].mxu0 %vm2304_vm9, %v4405_v48  ;;  %v3971_v40 = vpop.permute.xlu0 %3970  ;;  %v13541_v49 = vld [vmem:[#allocation10_spill] sm:$0xff] }
 0x468   : > { %5565 = vrot.lane.b32.xlu0 %v5211_v47, %s8293_s9  ;;  %v4374_v35 = vsel %vm2228_vm7, %v4342_v28, %v3971_v40  ;;  %v4185_v9 = vsel %vm279_vm0, %v3032_v56, %v13541_v49  ;;  %v6555_v28 = vld [vmem:[%s13008_s3] sm:$0xff] }
 0x469   : > { %v3845_v27 = vpop.permute.xlu1 %3844  ;;  %v4217_v48 = vsel %vm2063_vm2, %v4185_v9, %v13543_v19  ;;  %v6557_v19 = vld [vmem:[%s13008_s3 + $0x10] sm:$0xff] }
 0x46a   : > { %v4343_v8 = vsel %vm2195_vm6, %v4311_v36, %v3845_v27  ;;  %v4248_v27 = vsel %vm2096_vm3, %v4216_v24, %v13546_v55  ;;  %v3034_v36 = vld [vmem:[#allocation2 + $0x31e] sm:$0xff] }
 0x46b   : > { %4006 = vrot.lane.b32.xlu1 %v3240_v39, %s8298_s14  ;;  %v4099_v63 = vpop.permute.xlu0 %4098  ;;  %v13545_v39 = vld [vmem:[#allocation143_spill] sm:$0xff]  ;;  %v4280_v6 = vsel %vm2129_vm4, %v4248_v27, %v13549_v30  ;;  %v6558_v24 = vld [vmem:[%s13008_s3 + $0x18] sm:$0xff] }
 0x46c   : > { %v4406_v57 = vsel %vm2261_vm8, %v4374_v35, %v4099_v63  ;;  %4008 = vrot.lane.b32.xlu0 %v3241_v53, %s8298_s14  ;;  %v4249_v44 = vsel %vm2096_vm3, %v4217_v48, %v13545_v39  ;;  %v4312_v58 = vsel %vm2162_vm5, %v4280_v6, %v13550_v31  ;;  %v13551_v53 = vld [vmem:[#allocation12_spill] sm:$0xff]  ;;  %v8128_v55 = vpack.c.bf16 %v6558_v24, %v6557_v19  ;;  %v13557_v27 = vld [vmem:[#allocation99_spill] sm:$0xff]  ;;  %v13570_v24 = vld [vmem:[#allocation53_spill] sm:$0xff] }
 0x46d   : > { %v3973_v26 = vpop.permute.xlu1 %3972  ;;  %7920 = vmatprep.mubr.msk.f32.mxu0 %vm2304_vm9, %v4406_v57  ;;  %v4281_v1 = vsel %vm2129_vm4, %v4249_v44, %v13547_v54  ;;  %v4187_v56 = vsel %vm279_vm0, %v3034_v36, %v13551_v53  ;;  %v13556_v48 = vld [vmem:[#allocation168_spill] sm:$0xff]  ;;  %v13563_v53 = vld [vmem:[#allocation15_spill] sm:$0xff] }
 0x46e   : > { %v4375_v46 = vsel %vm2228_vm7, %v4343_v8, %v3973_v26  ;;  %v4313_v61 = vsel %vm2162_vm5, %v4281_v1, %v13548_v34  ;;  %v5212_v26 = vld [vmem:[#allocation2 + $0x5c] sm:$0xff]  ;;  %v5213_v44 = vld [vmem:[#allocation2 + $0x64] sm:$0xff] }
 0x46f   : > { %5691 = vrot.lane.b32.xlu1 %v5242_v0, %s8294_s10  ;;  %v3847_v41 = vpop.permute.xlu0 %3846  ;;  %v3033_v8 = vld [vmem:[#allocation2 + $0x316] sm:$0xff]  ;;  %v5371_v19 = vld [vmem:[#allocation2 + $0x804] sm:$0xff] }
 0x470   : > { %5693 = vrot.lane.b32.xlu0 %v5243_v50, %s8294_s10  ;;  %v4344_v47 = vsel %vm2195_vm6, %v4312_v58, %v3847_v41  ;;  %v4186_v57 = vsel %vm279_vm0, %v3033_v8, %v13552_v29  ;;  %v13561_v8 = vld [vmem:[#allocation75_spill] sm:$0xff]  ;;  %v13565_v29 = vld [vmem:[#allocation165_spill] sm:$0xff] }
 0x471   : > { %v4101_v38 = vpop.permute.xlu1 %4100 }
 0x472   : > { %v4407_v42 = vsel %vm2261_vm8, %v4375_v46, %v4101_v38  ;;  %v5307_v46 = vld [vmem:[#allocation2 + $0x7e0] sm:$0xff]  ;;  %v6556_v38 = vld [vmem:[%s13008_s3 + $0x8] sm:$0xff] }
 0x473   : > { %4134 = vrot.lane.b32.xlu1 %v3272_v52, %s8299_s28  ;;  %7921 = vmatmul.mubr.msk.f32.gmra.mrb[44].mxu0 %vm2304_vm9, %v4407_v42  ;;  %v3975_v3 = vpop.permute.xlu0 %3974  ;;  %v5275_v42 = vld [vmem:[#allocation2 + $0x41c] sm:$0xff]  ;;  %v8124_v63 = vpack.c.bf16 %v6556_v38, %v6555_v28  ;;  %v5245_v38 = vld [vmem:[#allocation2 + $0x430] sm:$0xff] }
 0x474   : > { %5439 = vrot.lane.b32.xlu0 %v5180_v4, %s8292_s8  ;;  %v4376_v33 = vsel %vm2228_vm7, %v4344_v47, %v3975_v3  ;;  %v13558_v4 = vld [vmem:[#allocation28_spill] sm:$0xff] }
 0x475   : > { %v3849_v25 = vpop.permute.xlu1 %3848  ;;  %8125 = vmatprep.subr.bf16.mxu0 %v8124_v63  ;;  %v13559_v3 = vld [vmem:[#allocation100_spill] sm:$0xff] }
 0x476   : > { %v4345_v0 = vsel %vm2195_vm6, %v4313_v61, %v3849_v25  ;;  %v13554_v25 = vld [vmem:[#allocation68_spill] sm:$0xff]  ;;  %8127 = vmatpush3.bf16.msra.mxu0 %v8124_v63  ;;  %v13560_v61 = vld [vmem:[#allocation123_spill] sm:$0xff] }
 0x477   : > { %4136 = vrot.lane.b32.xlu1 %v3273_v5, %s8299_s28  ;;  %v4103_v43 = vpop.permute.xlu0 %4102  ;;  %v13553_v5 = vld [vmem:[#allocation67_spill] sm:$0xff]  ;;  %v4218_v50 = vsel %vm2063_vm2, %v4186_v57, %v13554_v25  ;;  %8129 = vmatprep.subr.bf16.mxu0 %v8128_v55  ;;  %v5308_v47 = vld [vmem:[#allocation2 + $0x7e8] sm:$0xff]  ;;  %v13568_v25 = vld [vmem:[#allocation26_spill] sm:$0xff] }
 0x478   : > { %v4408_v52 = vsel %vm2261_vm8, %v4376_v33, %v4103_v43  ;;  %5441 = vrot.lane.b32.xlu0 %v5181_v37, %s8292_s8  ;;  %v4219_v49 = vsel %vm2063_vm2, %v4187_v56, %v13553_v5  ;;  %v4250_v41 = vsel %vm2096_vm3, %v4218_v50, %v13556_v48  ;;  %v13566_v5 = vld [vmem:[#allocation169_spill] sm:$0xff] }
 0x479   : > { %v3977_v60 = vpop.permute.xlu1 %3976  ;;  %7923 = vmatprep.mubr.msk.f32.mxu0 %vm2304_vm9, %v4408_v52  ;;  %v4251_v13 = vsel %vm2096_vm3, %v4219_v49, %v13555_v45  ;;  %v4282_v34 = vsel %vm2129_vm4, %v4250_v41, %v13559_v3  ;;  %v13562_v52 = vld [vmem:[#allocation14_spill] sm:$0xff]  ;;  %v5182_v45 = vld [vmem:[#allocation2 + $0x82] sm:$0xff]  ;;  %v13569_v48 = vld [vmem:[#allocation101_spill] sm:$0xff] }
 0x47a   : > { %v4377_v51 = vsel %vm2228_vm7, %v4345_v0, %v3977_v60  ;;  %v4314_v6 = vsel %vm2162_vm5, %v4282_v34, %v13560_v61  ;;  %8131 = vmatpush3.bf16.msra.mxu0 %v8128_v55 }
 0x47b   : > { %5819 = vrot.lane.b32.xlu1 %v5274_v32, %s8296_s12  ;;  %v3851_v9 = vpop.permute.xlu0 %3850  ;;  %v4283_v32 = vsel %vm2129_vm4, %v4251_v13, %v13557_v27 }
 0x47c   : > { %5821 = vrot.lane.b32.xlu0 %v5275_v42, %s8296_s12  ;;  %v4315_v1 = vsel %vm2162_vm5, %v4283_v32, %v13558_v4  ;;  %v4346_v58 = vsel %vm2195_vm6, %v4314_v6, %v3851_v9  ;;  %v13567_v9 = vld [vmem:[#allocation146_spill] sm:$0xff]  ;;  %v13572_v32 = vld [vmem:[#allocation148_spill] sm:$0xff] }
 0x47d   : > { %v4105_v40 = vpop.permute.xlu1 %4104 }
 0x47e   : > { %v4409_v10 = vsel %vm2261_vm8, %v4377_v51, %v4105_v40  ;;  %v6559_v51 = vld [vmem:[%s13008_s3 + $0x20] sm:$0xf]  ;;  %v3036_v40 = vld [vmem:[#allocation2 + $0x356] sm:$0xff] }
 0x47f   : > { %5567 = vrot.lane.b32.xlu1 %v5212_v26, %s8293_s9  ;;  %7924 = vmatmul.mubr.msk.f32.gmra.mrb[46].mxu0 %vm2304_vm9, %v4409_v10  ;;  %v3979_v60 = vpop.permute.xlu0 %3978  ;;  %v3035_v10 = vld [vmem:[#allocation2 + $0x34e] sm:$0xff]  ;;  %v4189_v28 = vsel %vm279_vm0, %v3036_v40, %v13562_v52 }
 0x480   : > { %5569 = vrot.lane.b32.xlu0 %v5213_v44, %s8293_s9  ;;  %v4378_v37 = vsel %vm2228_vm7, %v4346_v58, %v3979_v60  ;;  %8008 = vmatprep.subr.msk.mxu0 %vm2401_vm1, %v6559_v51  ;;  %v4188_v56 = vsel %vm279_vm0, %v3035_v10, %v13563_v53  ;;  %v13571_v44 = vld [vmem:[#allocation102_spill] sm:$0xff]  ;;  %v3038_v58 = vld [vmem:[#allocation2 + $0x38e] sm:$0xff] }
 0x481   : > { %v3853_v35 = vpop.permute.xlu1 %3852  ;;  %8009 = vmatpush3.msk.msra.mxu0 %vm2401_vm1, %v6559_v51  ;;  %v4220_v57 = vsel %vm2063_vm2, %v4188_v56, %v13565_v29  ;;  %v3037_v51 = vld [vmem:[#allocation2 + $0x386] sm:$0xff]  ;;  %v13574_v52 = vld [vmem:[#allocation17_spill] sm:$0xff] }
 0x482   : > { %v4347_v31 = vsel %vm2195_vm6, %v4315_v1, %v3853_v35  ;;  %v13564_v35 = vld [vmem:[#allocation164_spill] sm:$0xff]  ;;  %v4252_v50 = vsel %vm2096_vm3, %v4220_v57, %v13568_v25  ;;  %v13576_v56 = vld [vmem:[#allocation115_spill] sm:$0xff] }
 0x483   : > { %5947 = vrot.lane.b32.xlu1 %v5307_v46, %s8297_s13  ;;  %v4107_v33 = vpop.permute.xlu0 %4106  ;;  %v4221_v42 = vsel %vm2063_vm2, %v4189_v28, %v13564_v35  ;;  %v4284_v55 = vsel %vm2129_vm4, %v4252_v50, %v13571_v44  ;;  %v5372_v1 = vld [vmem:[#allocation2 + $0x80c] sm:$0xff]  ;;  %v4190_v28 = vsel %vm279_vm0, %v3037_v51, %v13574_v52  ;;  %v13579_v25 = vld [vmem:[#allocation103_spill] sm:$0xff] }
 0x484   : > { %v4410_v43 = vsel %vm2261_vm8, %v4378_v37, %v4107_v33  ;;  %5949 = vrot.lane.b32.xlu0 %v5308_v47, %s8297_s13  ;;  %v4253_v49 = vsel %vm2096_vm3, %v4221_v42, %v13566_v5  ;;  %v4316_v60 = vsel %vm2162_vm5, %v4284_v55, %v13572_v32  ;;  %v11826_v37 = vld [vmem:[%s13010_s5 + $0x8] sm:$0xff]  ;;  %v4222_v35 = vsel %vm2063_vm2, %v4190_v28, %v13576_v56  ;;  %v13577_v42 = vld [vmem:[#allocation119_spill] sm:$0xff]  ;;  %v5309_v5 = vld [vmem:[#allocation2 + $0x818] sm:$0xff] }
 0x485   : > { %v3981_v39 = vpop.permute.xlu1 %3980  ;;  %7926 = vmatprep.mubr.msk.f32.mxu0 %vm2304_vm9, %v4410_v43  ;;  %v4285_v41 = vsel %vm2129_vm4, %v4253_v49, %v13569_v48  ;;  %v13573_v33 = vld [vmem:[#allocation16_spill] sm:$0xff]  ;;  %7950 = vmatprep.subr.mxu1 %v11826_v37  ;;  %v5246_v32 = vld [vmem:[#allocation2 + $0x460] sm:$0xff]  ;;  %v13586_v28 = vld [vmem:[#allocation45_spill] sm:$0xff] }
 0x486   : > { %v4379_v0 = vsel %vm2228_vm7, %v4347_v31, %v3981_v39  ;;  %v4317_v39 = vsel %vm2162_vm5, %v4285_v41, %v13570_v24  ;;  %v5276_v31 = vld [vmem:[#allocation2 + $0x44c] sm:$0xff]  ;;  %v4191_v10 = vsel %vm279_vm0, %v3038_v58, %v13573_v33  ;;  %v13584_v33 = vld [vmem:[#allocation35_spill] sm:$0xff]  ;;  %v13588_v56 = vld [vmem:[#allocation54_spill] sm:$0xff] }
 0x487   : > { %5695 = vrot.lane.b32.xlu1 %v5244_v7, %s8294_s10  ;;  %v3855_v63 = vpop.permute.xlu0 %3854  ;;  %v13578_v29 = vld [vmem:[#allocation120_spill] sm:$0xff]  ;;  %v13582_v24 = vld [vmem:[#allocation77_spill] sm:$0xff] }
 0x488   : > { %5697 = vrot.lane.b32.xlu0 %v5245_v38, %s8294_s10  ;;  %v4348_v34 = vsel %vm2195_vm6, %v4316_v60, %v3855_v63  ;;  %v4254_v57 = vsel %vm2096_vm3, %v4222_v35, %v13578_v29  ;;  %v13581_v41 = vld [vmem:[#allocation104_spill] sm:$0xff]  ;;  %v13589_v35 = vld [vmem:[#allocation5_spill] sm:$0xff] }
 0x489   : > { %v4109_v26 = vpop.permute.xlu1 %4108  ;;  %v5247_v29 = vld [vmem:[#allocation2 + $0x468] sm:$0xff] }
 0x48a   : > { %v4411_v36 = vsel %vm2261_vm8, %v4379_v0, %v4109_v26 }
 0x48b   : > { %6075 = vrot.lane.b32.xlu1 %v13561_v8, %s8298_s14  ;;  %7927 = vmatmul.mubr.msk.f32.gmra.mrb[48].mxu0 %vm2304_vm9, %v4411_v36  ;;  %v3983_v7 = vpop.permute.xlu0 %3982  ;;  %v5214_v36 = vld [vmem:[#allocation2 + $0x94] sm:$0xff]  ;;  %v5183_v8 = vld [vmem:[#allocation2 + $0x8a] sm:$0xff] }
 0x48c   : > { %6203 = vrot.lane.b32.xlu0 %v5371_v19, %s8299_s28  ;;  %v4380_v0 = vsel %vm2228_vm7, %v4348_v34, %v3983_v7  ;;  %v4286_v7 = vsel %vm2129_vm4, %v4254_v57, %v13581_v41  ;;  %v5215_v34 = vld [vmem:[#allocation2 + $0x9c] sm:$0xff]  ;;  %v13590_v57 = vld [vmem:[#allocation105_spill] sm:$0xff] }
 0x48d   : > { %v3857_v46 = vpop.permute.xlu1 %3856 }
 0x48e   : > { %v4349_v4 = vsel %vm2195_vm6, %v4317_v39, %v3857_v46  ;;  %v13575_v46 = vld [vmem:[#allocation24_spill] sm:$0xff]  ;;  %v4318_v39 = vsel %vm2162_vm5, %v4286_v7, %v13582_v24  ;;  %v13594_v7 = vld [vmem:[#allocation174_spill] sm:$0xff] }
 0x48f   : > { %6077 = vrot.lane.b32.xlu1 %v13567_v9, %s8298_s14  ;;  %v4111_v47 = vpop.permute.xlu0 %4110  ;;  %v4223_v38 = vsel %vm2063_vm2, %v4191_v10, %v13575_v46  ;;  %v5277_v9 = vld [vmem:[#allocation2 + $0x454] sm:$0xff] }
 0x490   : > { %v4412_v40 = vsel %vm2261_vm8, %v4380_v0, %v4111_v47  ;;  %5823 = vrot.lane.b32.xlu0 %v5276_v31, %s8296_s12  ;;  %v4255_v63 = vsel %vm2096_vm3, %v4223_v38, %v13577_v42  ;;  %v3039_v0 = vld [vmem:[#allocation2 + $0x3be] sm:$0xff]  ;;  %v13587_v38 = vld [vmem:[#allocation49_spill] sm:$0xff] }
 0x491   : > { %v3985_v13 = vpop.permute.xlu1 %3984  ;;  %7929 = vmatprep.mubr.msk.f32.mxu0 %vm2304_vm9, %v4412_v40  ;;  %v4287_v50 = vsel %vm2129_vm4, %v4255_v63, %v13579_v25  ;;  %v13583_v47 = vld [vmem:[#allocation18_spill] sm:$0xff]  ;;  %v4192_v10 = vsel %vm279_vm0, %v3039_v0, %v13584_v33  ;;  %v13596_v33 = vld [vmem:[#allocation19_spill] sm:$0xff] }
 0x492   : > { %v4381_v61 = vsel %vm2228_vm7, %v4349_v4, %v3985_v13  ;;  %v13580_v13 = vld [vmem:[#allocation149_spill] sm:$0xff]  ;;  %v4224_v46 = vsel %vm2063_vm2, %v4192_v10, %v13586_v28  ;;  %v8271_v0 = vld [vmem:[#allocation2 + $0x3fe] sm:$0xff]  ;;  %v13598_v28 = vld [vmem:[#allocation140_spill] sm:$0xff] }
 0x493   : > { %5443 = vrot.lane.b32.xlu1 %v5182_v45, %s8292_s8  ;;  %v3859_v53 = vpop.permute.xlu0 %3858  ;;  %v4319_v19 = vsel %vm2162_vm5, %v4287_v50, %v13580_v13  ;;  %v4256_v42 = vsel %vm2096_vm3, %v4224_v46, %v13589_v35 }
 0x494   : > { %5445 = vrot.lane.b32.xlu0 %v5183_v8, %s8292_s8  ;;  %v4350_v60 = vsel %vm2195_vm6, %v4318_v39, %v3859_v53 }
 0x495   : > { %v4113_v6 = vpop.permute.xlu1 %4112 }
 0x496   : > { %v4413_v26 = vsel %vm2261_vm8, %v4381_v61, %v4113_v6  ;;  %v3040_v61 = vld [vmem:[#allocation2 + $0x3c6] sm:$0xff] }
 0x497   : > { %6205 = vrot.lane.b32.xlu1 %v5372_v1, %s8299_s28  ;;  %7930 = vmatmul.mubr.msk.f32.gmra.mrb[50].mxu0 %vm2304_vm9, %v4413_v26  ;;  %v3987_v45 = vpop.permute.xlu0 %3986  ;;  %v4193_v51 = vsel %vm279_vm0, %v3040_v61, %v13583_v47 }
 0x498   : > { %5825 = vrot.lane.b32.xlu0 %v5277_v9, %s8296_s12  ;;  %v4382_v6 = vsel %vm2228_vm7, %v4350_v60, %v3987_v45  ;;  %v13591_v9 = vld [vmem:[#allocation78_spill] sm:$0xff] }
 0x499   : > { %v3861_v43 = vpop.permute.xlu1 %3860  ;;  %v13592_v45 = vld [vmem:[#allocation106_spill] sm:$0xff] }
 0x49a   : > { %v4351_v55 = vsel %vm2195_vm6, %v4319_v19, %v3861_v43  ;;  %v13585_v43 = vld [vmem:[#allocation116_spill] sm:$0xff]  ;;  %v4288_v13 = vsel %vm2129_vm4, %v4256_v42, %v13592_v45 }
 0x49b   : > { %5571 = vrot.lane.b32.xlu1 %v5214_v36, %s8293_s9  ;;  %v4115_v58 = vpop.permute.xlu0 %4114  ;;  %v5310_v36 = vld [vmem:[#allocation2 + $0x820] sm:$0xff]  ;;  %v4225_v8 = vsel %vm2063_vm2, %v4193_v51, %v13585_v43  ;;  %v13593_v19 = vld [vmem:[#allocation124_spill] sm:$0xff]  ;;  %v4320_v24 = vsel %vm2162_vm5, %v4288_v13, %v13594_v7  ;;  %v13597_v43 = vld [vmem:[#allocation46_spill] sm:$0xff] }
 0x49c   : > { %v4414_v26 = vsel %vm2261_vm8, %v4382_v6, %v4115_v58  ;;  %5573 = vrot.lane.b32.xlu0 %v5215_v34, %s8293_s9  ;;  %v4257_v53 = vsel %vm2096_vm3, %v4225_v8, %v13587_v38  ;;  %v5374_v58 = vld [vmem:[#allocation2 + $0x844] sm:$0xff]  ;;  %v13599_v38 = vld [vmem:[#allocation50_spill] sm:$0xff]  ;;  %v5216_v42 = vld [vmem:[#allocation2 + $0xcc] sm:$0xff] }
 0x49d   : > { %v3989_v49 = vpop.permute.xlu1 %3988  ;;  %7932 = vmatprep.mubr.msk.f32.mxu0 %vm2304_vm9, %v4414_v26  ;;  %v13595_v26 = vld [vmem:[#allocation36_spill] sm:$0xff] }
 0x49e   : > { %v4383_v4 = vsel %vm2228_vm7, %v4351_v55, %v3989_v49  ;;  %v5184_v55 = vld [vmem:[#allocation2 + $0xba] sm:$0xff]  ;;  %v4195_v47 = vsel %vm279_vm0, %v8271_v0, %v13595_v26 }
 0x49f   : > { %5951 = vrot.lane.b32.xlu1 %v5309_v5, %s8297_s13  ;;  %v3863_v52 = vpop.permute.xlu0 %3862  ;;  %v4289_v5 = vsel %vm2129_vm4, %v4257_v53, %v13590_v57  ;;  %v4227_v8 = vsel %vm2063_vm2, %v4195_v47, %v13597_v43  ;;  %v5248_v0 = vld [vmem:[#allocation2 + $0x498] sm:$0xff]  ;;  %v13605_v47 = vld [vmem:[#allocation20_spill] sm:$0xff] }
 0x4a0   : > { %5953 = vrot.lane.b32.xlu0 %v5310_v36, %s8297_s13  ;;  %v4321_v50 = vsel %vm2162_vm5, %v4289_v5, %v13591_v9  ;;  %v8272_v36 = vld [vmem:[#allocation2 + $0x3f6] sm:$0xff]  ;;  %v4259_v53 = vsel %vm2096_vm3, %v4227_v8, %v13599_v38  ;;  %v13601_v5 = vld [vmem:[#allocation107_spill] sm:$0xff] }
 0x4a1   : > { %v4117_v1 = vpop.permute.xlu1 %4116  ;;  %v4194_v10 = vsel %vm279_vm0, %v8272_v36, %v13596_v33  ;;  %v8273_v26 = vld [vmem:[#allocation2 + $0x436] sm:$0xff]  ;;  %v8274_v33 = vld [vmem:[#allocation2 + $0x42e] sm:$0xff] }
 0x4a2   : > { %v4415_v31 = vsel %vm2261_vm8, %v4383_v4, %v4117_v1  ;;  %v5373_v1 = vld [vmem:[#allocation2 + $0x83c] sm:$0xff]  ;;  %v4226_v46 = vsel %vm2063_vm2, %v4194_v10, %v13598_v28  ;;  %v5217_v36 = vld [vmem:[#allocation2 + $0xd4] sm:$0xff] }
 0x4a3   : > { %5699 = vrot.lane.b32.xlu1 %v5246_v32, %s8294_s10  ;;  %7933 = vmatmul.mubr.msk.f32.gmra.mrb[52].mxu0 %vm2304_vm9, %v4415_v31  ;;  %v3991_v49 = vpop.permute.xlu0 %3990  ;;  %v4352_v32 = vsel %vm2195_vm6, %v4320_v24, %v3863_v52  ;;  %v13604_v24 = vld [vmem:[#allocation29_spill] sm:$0xff] }
 0x4a4   : > { %5701 = vrot.lane.b32.xlu0 %v5247_v29, %s8294_s10  ;;  %v4384_v34 = vsel %vm2228_vm7, %v4352_v32, %v3991_v49  ;;  %v5185_v29 = vld [vmem:[#allocation2 + $0xc2] sm:$0xff]  ;;  %v4291_v49 = vsel %vm2129_vm4, %v4259_v53, %v13601_v5  ;;  %v5311_v32 = vld [vmem:[#allocation2 + $0x850] sm:$0xff] }
 0x4a5   : > { %v3865_v40 = vpop.permute.xlu1 %3864  ;;  %v13606_v10 = vld [vmem:[#allocation37_spill] sm:$0xff] }
 0x4a6   : > { %v4353_v39 = vsel %vm2195_vm6, %v4321_v50, %v3865_v40  ;;  %v5278_v40 = vld [vmem:[#allocation2 + $0x484] sm:$0xff]  ;;  %v4196_v43 = vsel %vm279_vm0, %v8274_v33, %v13606_v10  ;;  %v13607_v8 = vld [vmem:[#allocation141_spill] sm:$0xff] }
 0x4a7   : > { %6079 = vrot.lane.b32.xlu1 %v13588_v56, %s8298_s14  ;;  %v4119_v6 = vpop.permute.xlu0 %4118  ;;  %v13600_v56 = vld [vmem:[#allocation144_spill] sm:$0xff]  ;;  %v13602_v50 = vld [vmem:[#allocation175_spill] sm:$0xff]  ;;  %v13609_v53 = vld [vmem:[#allocation145_spill] sm:$0xff] }
 0x4a8   : > { %v4416_v31 = vsel %vm2261_vm8, %v4384_v34, %v4119_v6  ;;  %6207 = vrot.lane.b32.xlu0 %v5373_v1, %s8299_s28  ;;  %v4258_v35 = vsel %vm2096_vm3, %v4226_v46, %v13600_v56  ;;  %v4323_v13 = vsel %vm2162_vm5, %v4291_v49, %v13602_v50  ;;  %v5279_v34 = vld [vmem:[#allocation2 + $0x48c] sm:$0xff] }
 0x4a9   : > { %v3993_v63 = vpop.permute.xlu1 %3992  ;;  %7935 = vmatprep.mubr.msk.f32.mxu0 %vm2304_vm9, %v4416_v31  ;;  %v13608_v46 = vld [vmem:[#allocation69_spill] sm:$0xff] }
 0x4aa   : > { %v4385_v60 = vsel %vm2228_vm7, %v4353_v39, %v3993_v63  ;;  %v4228_v38 = vsel %vm2063_vm2, %v4196_v43, %v13608_v46  ;;  %v13611_v49 = vld [vmem:[#allocation109_spill] sm:$0xff]  ;;  %v13617_v46 = vld [vmem:[#allocation70_spill] sm:$0xff] }
 0x4ab   : > { %6081 = vrot.lane.b32.xlu1 %v13593_v19, %s8298_s14  ;;  %v3867_v52 = vpop.permute.xlu0 %3866  ;;  %v13603_v19 = vld [vmem:[#allocation108_spill] sm:$0xff]  ;;  %v5375_v43 = vld [vmem:[#allocation2 + $0x874] sm:$0xff] }
 0x4ac   : > { %5827 = vrot.lane.b32.xlu0 %v5278_v40, %s8296_s12  ;;  %v4290_v7 = vsel %vm2129_vm4, %v4258_v35, %v13603_v19  ;;  %v13610_v35 = vld [vmem:[#allocation73_spill] sm:$0xff] }
 0x4ad   : > { %v4121_v4 = vpop.permute.xlu1 %4120  ;;  %v4322_v39 = vsel %vm2162_vm5, %v4290_v7, %v13604_v24  ;;  %v13613_v24 = vld [vmem:[#allocation110_spill] sm:$0xff] }
 0x4ae   : > { %v4417_v61 = vsel %vm2261_vm8, %v4385_v60, %v4121_v4  ;;  %v4354_v60 = vsel %vm2195_vm6, %v4322_v39, %v3867_v52 }
 0x4af   : > { %5447 = vrot.lane.b32.xlu1 %v5184_v55, %s8292_s8  ;;  %7936 = vmatmul.mubr.msk.f32.gmra.mrb[54].mxu0 %vm2304_vm9, %v4417_v61  ;;  %v3995_v9 = vpop.permute.xlu0 %3994 }
 0x4b0   : > { %5449 = vrot.lane.b32.xlu0 %v5185_v29, %s8292_s8  ;;  %v4386_v61 = vsel %vm2228_vm7, %v4354_v60, %v3995_v9  ;;  %v5312_v29 = vld [vmem:[#allocation2 + $0x858] sm:$0xff] }
 0x4b1   : > { %v3869_v51 = vpop.permute.xlu1 %3868 }
 0x4b2   : > { %v4355_v55 = vsel %vm2195_vm6, %v4323_v13, %v3869_v51  ;;  %v4197_v51 = vsel %vm279_vm0, %v8273_v26, %v13605_v47  ;;  %v13612_v13 = vld [vmem:[#allocation125_spill] sm:$0xff] }
 0x4b3   : > { %6209 = vrot.lane.b32.xlu1 %v5374_v58, %s8299_s28  ;;  %v4123_v31 = vpop.permute.xlu0 %4122  ;;  %v4229_v52 = vsel %vm2063_vm2, %v4197_v51, %v13607_v8  ;;  %v8276_v47 = vld [vmem:[#allocation2 + $0x86a] sm:$0xff]  ;;  %v5186_v51 = vld [vmem:[#allocation2 + $0xf2] sm:$0xff] }
 0x4b4   : > { %v4418_v58 = vsel %vm2261_vm8, %v4386_v61, %v4123_v31  ;;  %5829 = vrot.lane.b32.xlu0 %v5279_v34, %s8296_s12  ;;  %v4261_v56 = vsel %vm2096_vm3, %v4229_v52, %v13609_v53  ;;  %v8278_v8 = vld [vmem:[#allocation2 + $0x466] sm:$0xff]  ;;  %v13616_v52 = vld [vmem:[#allocation21_spill] sm:$0xff] }
 0x4b5   : > { %v3997_v63 = vpop.permute.xlu1 %3996  ;;  %7938 = vmatprep.mubr.msk.f32.mxu0 %vm2304_vm9, %v4418_v58  ;;  %v4293_v9 = vsel %vm2129_vm4, %v4261_v56, %v13611_v49  ;;  %v13618_v56 = vld [vmem:[#allocation166_spill] sm:$0xff] }
 0x4b6   : > { %v4387_v4 = vsel %vm2228_vm7, %v4355_v55, %v3997_v63  ;;  %v4325_v7 = vsel %vm2162_vm5, %v4293_v9, %v13612_v13  ;;  %v8275_v55 = vld [vmem:[#allocation2 + $0x862] sm:$0xff] }
 0x4b7   : > { %5575 = vrot.lane.b32.xlu1 %v5216_v42, %s8293_s9  ;;  %v3871_v28 = vpop.permute.xlu0 %3870  ;;  %v4260_v42 = vsel %vm2096_vm3, %v4228_v38, %v13610_v35 }
 0x4b8   : > { %5577 = vrot.lane.b32.xlu0 %v5217_v36, %s8293_s9  ;;  %v4292_v39 = vsel %vm2129_vm4, %v4260_v42, %v13613_v24  ;;  %v13615_v36 = vld [vmem:[#allocation38_spill] sm:$0xff] }
 0x4b9   : > { %v4125_v1 = vpop.permute.xlu1 %4124  ;;  %v13619_v42 = vld [vmem:[#allocation74_spill] sm:$0xff] }
 0x4ba   : > { %v4419_v6 = vsel %vm2261_vm8, %v4387_v4, %v4125_v1 }
 0x4bb   : > { %5955 = vrot.lane.b32.xlu1 %v5311_v32, %s8297_s13  ;;  %7939 = vmatmul.mubr.msk.f32.gmra.mrb[56].mxu0 %vm2304_vm9, %v4419_v6  ;;  %v3999_v50 = vpop.permute.xlu0 %3998  ;;  %v13614_v32 = vld [vmem:[#allocation126_spill] sm:$0xff]  ;;  %v5249_v6 = vld [vmem:[#allocation2 + $0x4a0] sm:$0xff] }
 0x4bc   : > { %v4324_v60 = vsel %vm2162_vm5, %v4292_v39, %v13614_v32  ;;  %5957 = vrot.lane.b32.xlu0 %v5312_v29, %s8297_s13  ;;  %v13620_v29 = vld [vmem:[#allocation170_spill] sm:$0xff]  ;;  %v13621_v39 = vld [vmem:[#allocation111_spill] sm:$0xff] }
 0x4bd   : > { %v3873_v40 = vpop.permute.xlu1 %3872  ;;  %v4356_v1 = vsel %vm2195_vm6, %v4324_v60, %v3871_v28  ;;  %v4198_v28 = vsel %vm279_vm0, %v8278_v8, %v13616_v52  ;;  %v13622_v60 = vld [vmem:[#allocation55_spill] sm:$0xff] }
 0x4be   : > { %v4357_v4 = vsel %vm2195_vm6, %v4325_v7, %v3873_v40  ;;  %v4388_v31 = vsel %vm2228_vm7, %v4356_v1, %v3999_v50  ;;  %v8277_v40 = vld [vmem:[#allocation2 + $0x46e] sm:$0xff]  ;;  %v4230_v35 = vsel %vm2063_vm2, %v4198_v28, %v13618_v56  ;;  %v5376_v50 = vld [vmem:[#allocation2 + $0x87c] sm:$0xff]  ;;  %v5281_v52 = vld [vmem:[#allocation2 + $0x4c4] sm:$0xff] }
 0x4bf   : > { %5703 = vrot.lane.b32.xlu1 %v5248_v0, %s8294_s10  ;;  %v4127_v0 = vpop.permute.xlu0 %4126  ;;  %v4199_v33 = vsel %vm279_vm0, %v8277_v40, %v13615_v36  ;;  %v4262_v9 = vsel %vm2096_vm3, %v4230_v35, %v13620_v29  ;;  %v5280_v7 = vld [vmem:[#allocation2 + $0x4bc] sm:$0xff]  ;;  %v13623_v1 = vld [vmem:[#allocation112_spill] sm:$0xff] }
 0x4c0   : > { %v4420_v26 = vsel %vm2261_vm8, %v4388_v31, %v4127_v0  ;;  %5705 = vrot.lane.b32.xlu0 %v5249_v6, %s8294_s10  ;;  %v4231_v38 = vsel %vm2063_vm2, %v4199_v33, %v13617_v46  ;;  %v5250_v46 = vld [vmem:[#allocation2 + $0x4d0] sm:$0xff]  ;;  %v8279_v35 = vld [vmem:[#allocation2 + $0x49e] sm:$0xff] }
 0x4c1   : > { %v4001_v63 = vpop.permute.xlu1 %4000  ;;  %7941 = vmatprep.mubr.msk.f32.mxu0 %vm2304_vm9, %v4420_v26 }
 0x4c2   : > { %v4389_v34 = vsel %vm2228_vm7, %v4357_v4, %v4001_v63  ;;  %v4263_v63 = vsel %vm2096_vm3, %v4231_v38, %v13619_v42  ;;  %v13625_v42 = vld [vmem:[#allocation40_spill] sm:$0xff] }
 0x4c3   : > { %6083 = vrot.lane.b32.xlu1 %v8275_v55, %s8298_s14  ;;  %v3875_v53 = vpop.permute.xlu0 %3874  ;;  %v4295_v55 = vsel %vm2129_vm4, %v4263_v63, %v13621_v39  ;;  %v4200_v63 = vsel %vm279_vm0, %v8279_v35, %v13625_v42  ;;  %v5377_v42 = vld [vmem:[#allocation2 + $0x8ac] sm:$0xff] }
 0x4c4   : > { %6211 = vrot.lane.b32.xlu0 %v5375_v43, %s8299_s28  ;;  %v4327_v4 = vsel %vm2162_vm5, %v4295_v55, %v13622_v60  ;;  %v13627_v55 = vld [vmem:[#allocation27_spill] sm:$0xff] }
 0x4c5   : > { %v4129_v61 = vpop.permute.xlu1 %4128  ;;  %v8280_v60 = vld [vmem:[#allocation2 + $0x89a] sm:$0xff] }
 0x4c6   : > { %v4421_v58 = vsel %vm2261_vm8, %v4389_v34, %v4129_v61  ;;  %v4294_v34 = vsel %vm2129_vm4, %v4262_v9, %v13623_v1  ;;  %v13624_v61 = vld [vmem:[#allocation56_spill] sm:$0xff]  ;;  %v5314_v9 = vld [vmem:[#allocation2 + $0x890] sm:$0xff] }
 0x4c7   : > { %6085 = vrot.lane.b32.xlu1 %v8276_v47, %s8298_s14  ;;  %7942 = vmatmul.mubr.msk.f32.gmra.mrb[58].mxu0 %vm2304_vm9, %v4421_v58  ;;  %v4003_v32 = vpop.permute.xlu0 %4002  ;;  %v4326_v6 = vsel %vm2162_vm5, %v4294_v34, %v13624_v61  ;;  %v5218_v58 = vld [vmem:[#allocation2 + $0x104] sm:$0xff] }
 0x4c8   : > { %5831 = vrot.lane.b32.xlu0 %v5280_v7, %s8296_s12  ;;  %v4358_v0 = vsel %vm2195_vm6, %v4326_v6, %v3875_v53  ;;  %v5219_v53 = vld [vmem:[#allocation2 + $0x10c] sm:$0xff]  ;;  %v13628_v34 = vld [vmem:[#allocation39_spill] sm:$0xff] }
 0x4c9   : > { %v3877_v10 = vpop.permute.xlu1 %3876  ;;  %v4390_v40 = vsel %vm2228_vm7, %v4358_v0, %v4003_v32 }
 0x4ca   : > { %v4359_v31 = vsel %vm2195_vm6, %v4327_v4, %v3877_v10  ;;  %v5313_v10 = vld [vmem:[#allocation2 + $0x888] sm:$0xff] }
 0x4cb   : > { %5451 = vrot.lane.b32.xlu1 %v5186_v51, %s8292_s8  ;;  %v5187_v51 = vld [vmem:[#allocation2 + $0xfa] sm:$0xff]  ;;  %v4131_v33 = vpop.permute.xlu0 %4130  ;;  %v8281_v4 = vld [vmem:[#allocation2 + $0x4a6] sm:$0xff] }
 0x4cc   : > { %v4422_v43 = vsel %vm2261_vm8, %v4390_v40, %v4131_v33  ;;  %5453 = vrot.lane.b32.xlu0 %v5187_v51, %s8292_s8  ;;  %v4201_v61 = vsel %vm279_vm0, %v8281_v4, %v13628_v34  ;;  %v13631_v40 = vld [vmem:[#allocation171_spill] sm:$0xff]  ;;  %v5282_v34 = vld [vmem:[#allocation2 + $0x4f4] sm:$0xff] }
 0x4cd   : > { %v4005_v13 = vpop.permute.xlu1 %4004  ;;  %7944 = vmatprep.mubr.msk.f32.mxu0 %vm2304_vm9, %v4422_v43  ;;  %v13632_v33 = vld [vmem:[#allocation151_spill] sm:$0xff] }
 0x4ce   : > { %v4391_v26 = vsel %vm2228_vm7, %v4359_v31, %v4005_v13  ;;  %v5251_v31 = vld [vmem:[#allocation2 + $0x4d8] sm:$0xff] }
 0x4cf   : > { %6213 = vrot.lane.b32.xlu1 %v5376_v50, %s8299_s28  ;;  %v12004_v28 = vpop.permute.xlu0 %5435  ;;  %v13626_v50 = vld [vmem:[#allocation25_spill] sm:$0xff] }
 0x4d0   : > { %5833 = vrot.lane.b32.xlu0 %v5281_v52, %s8296_s12  ;;  %v4232_v13 = vsel %vm2063_vm2, %v4200_v63, %v13626_v50  ;;  %v13633_v63 = vld [vmem:[#allocation113_spill] sm:$0xff] }
 0x4d1   : > { %v4133_v47 = vpop.permute.xlu1 %4132  ;;  %v4264_v32 = vsel %vm2096_vm3, %v4232_v13, %v13627_v55  ;;  %v13634_v55 = vld [vmem:[#allocation150_spill] sm:$0xff] }
 0x4d2   : > { %v4423_v36 = vsel %vm2261_vm8, %v4391_v26, %v4133_v47  ;;  %v13630_v26 = vld [vmem:[#allocation114_spill] sm:$0xff] }
 0x4d3   : > { %5579 = vrot.lane.b32.xlu1 %v5218_v58, %s8293_s9  ;;  %7945 = vmatmul.mubr.msk.f32.gmra.mrb[60].mxu0 %vm2304_vm9, %v4423_v36  ;;  %v12010_v56 = vpop.permute.xlu0 %5437  ;;  %v13629_v58 = vld [vmem:[#allocation167_spill] sm:$0xff]  ;;  %v4296_v47 = vsel %vm2129_vm4, %v4264_v32, %v13630_v26 }
 0x4d4   : > { %5581 = vrot.lane.b32.xlu0 %v5219_v53, %s8293_s9  ;;  %v4233_v0 = vsel %vm2063_vm2, %v4201_v61, %v13629_v58  ;;  %v4328_v43 = vsel %vm2162_vm5, %v4296_v47, %v13632_v33  ;;  %v5220_v58 = vld [vmem:[#allocation2 + $0x13c] sm:$0xff] }
 0x4d5   : > { %v3879_v8 = vpop.permute.xlu1 %3878  ;;  %v4265_v36 = vsel %vm2096_vm3, %v4233_v0, %v13631_v40  ;;  %v5189_v0 = vld [vmem:[#allocation2 + $0x132] sm:$0xff]  ;;  %v5315_v40 = vld [vmem:[#allocation2 + $0x8c0] sm:$0xff] }
 0x4d6   : > { %v4360_v52 = vsel %vm2195_vm6, %v4328_v43, %v3879_v8  ;;  %v5283_v33 = vld [vmem:[#allocation2 + $0x4fc] sm:$0xff] }
 0x4d7   : > { %5959 = vrot.lane.b32.xlu1 %v5313_v10, %s8297_s13  ;;  %v3881_v7 = vpop.permute.xlu0 %3880  ;;  %v8282_v10 = vld [vmem:[#allocation2 + $0x8a2] sm:$0xff] }
 0x4d8   : > { %5961 = vrot.lane.b32.xlu0 %v5314_v9, %s8297_s13  ;;  %v4297_v9 = vsel %vm2129_vm4, %v4265_v36, %v13633_v63 }
 0x4d9   : > { %v12008_v38 = vpop.permute.xlu1 %5563  ;;  %v4329_v32 = vsel %vm2162_vm5, %v4297_v9, %v13634_v55 }
 0x4da   : > { %v4361_v8 = vsel %vm2195_vm6, %v4329_v32, %v3881_v7  ;;  %v5253_v32 = vld [vmem:[#allocation2 + $0x510] sm:$0xff] }
 0x4db   : > { %5707 = vrot.lane.b32.xlu1 %v5250_v46, %s8294_s10  ;;  %v12030_v51 = vpop.permute.xlu0 %5565  ;;  %v5188_v46 = vld [vmem:[#allocation2 + $0x12a] sm:$0xff] }
 0x4dc   : > { %5709 = vrot.lane.b32.xlu0 %v5251_v31, %s8294_s10 }
 0x4dd   : > { %v4007_v29 = vpop.permute.xlu1 %4006 }
 0x4de   : > { %v4392_v53 = vsel %vm2228_vm7, %v4360_v52, %v4007_v29  ;;  %v5378_v29 = vld [vmem:[#allocation2 + $0x8b4] sm:$0xff]  ;;  %v5221_v52 = vld [vmem:[#allocation2 + $0x144] sm:$0xff] }
 0x4df   : > { %6087 = vrot.lane.b32.xlu1 %v8280_v60, %s8298_s14  ;;  %v4009_v13 = vpop.permute.xlu0 %4008 }
 0x4e0   : > { %6215 = vrot.lane.b32.xlu0 %v5377_v42, %s8299_s28  ;;  %v4393_v60 = vsel %vm2228_vm7, %v4361_v8, %v4009_v13  ;;  %v5316_v42 = vld [vmem:[#allocation2 + $0x8c8] sm:$0xff]  ;;  %v5348_v13 = vld [vmem:[#allocation2 + $0x8da] sm:$0xff] }
 0x4e1   : > { %v12024_v6 = vpop.permute.xlu1 %5691 }
 0x4e3   : > { %6089 = vrot.lane.b32.xlu1 %v8282_v10, %s8298_s14  ;;  %v5694_v31 = vpop.permute.xlu0 %5693  ;;  %v5252_v10 = vld [vmem:[#allocation2 + $0x508] sm:$0xff] }
 0x4e4   : > { %5835 = vrot.lane.b32.xlu0 %v5282_v34, %s8296_s12 }
 0x4e5   : > { %v4135_v35 = vpop.permute.xlu1 %4134 }
 0x4e6   : > { %v4424_v50 = vsel %vm2261_vm8, %v4392_v53, %v4135_v35  ;;  %v5347_v53 = vld [vmem:[#allocation2 + $0x8d2] sm:$0xff] }
 0x4e7   : > { %5455 = vrot.lane.b32.xlu1 %v5188_v46, %s8292_s8  ;;  %7947 = vmatprep.mubr.msk.f32.mxu1 %vm2304_vm9, %v4424_v50  ;;  %v12055_v47 = vpop.permute.xlu0 %5439  ;;  %v5146_v50 = vld [vmem:[#allocation2] sm:$0xff] }
 0x4e8   : > { %5457 = vrot.lane.b32.xlu0 %v5189_v0, %s8292_s8  ;;  %v6299_v8 = vsel %vm279_vm0, %v5146_v50, %v12004_v28 }
 0x4e9   : > { %v4137_v4 = vpop.permute.xlu1 %4136 }
 0x4ea   : > { %v4425_v61 = vsel %vm2261_vm8, %v4393_v60, %v4137_v4  ;;  %v6331_v4 = vsel %vm2063_vm2, %v6299_v8, %v12008_v38 }
 0x4eb   : > { %6217 = vrot.lane.b32.xlu1 %v5378_v29, %s8299_s28  ;;  %7948 = vmatmul.mubr.msk.f32.vlgmr.msra.gmra.mrb[32].mxu1 %vm2304_vm9, %v4425_v61  ;;  %v12061_v43 = vpop.permute.xlu0 %5441  ;;  %v5147_v29 = vld [vmem:[#allocation2 + $0x8] sm:$0xff]  ;;  %v6363_v34 = vsel %vm2096_vm3, %v6331_v4, %v12024_v6  ;;  %v5285_v4 = vld [vmem:[#allocation2 + $0x534] sm:$0xff] }
 0x4ec   : > { %7951 = vmatpush3.msra.mxu1 %v11826_v37  ;;  %5837 = vrot.lane.b32.xlu0 %v5283_v33, %s8296_s12  ;;  %v5190_v61 = vld [vmem:[#allocation2 + $0x162] sm:$0xff] }
 0x4ed   : > { %v5820_v7 = vpop.permute.xlu1 %5819 }
 0x4ef   : > { %5583 = vrot.lane.b32.xlu1 %v5220_v58, %s8293_s9  ;;  %v5822_v46 = vpop.permute.xlu0 %5821  ;;  %v6300_v58 = vsel %vm279_vm0, %v5147_v29, %v12010_v56 }
 0x4f0   : > { %5585 = vrot.lane.b32.xlu0 %v5221_v52, %s8293_s9  ;;  %v6332_v28 = vsel %vm2063_vm2, %v6300_v58, %v12030_v51  ;;  %v5380_v52 = vld [vmem:[#allocation2 + $0x8ec] sm:$0xff] }
 0x4f1   : > { %v12059_v36 = vpop.permute.xlu1 %5567  ;;  %v6364_v38 = vsel %vm2096_vm3, %v6332_v28, %v5694_v31 }
 0x4f2   : > { %v6396_v51 = vsel %vm2129_vm4, %v6364_v38, %v9680_v23  ;;  %v5191_v23 = vld [vmem:[#allocation2 + $0x16a] sm:$0xff] }
 0x4f3   : > { %5963 = vrot.lane.b32.xlu1 %v5315_v40, %s8297_s13  ;;  %v12069_v9 = vpop.permute.xlu0 %5569  ;;  %v5379_v40 = vld [vmem:[#allocation2 + $0x8e4] sm:$0xff] }
 0x4f4   : > { %5965 = vrot.lane.b32.xlu0 %v5316_v42, %s8297_s13  ;;  %v5284_v42 = vld [vmem:[#allocation2 + $0x52c] sm:$0xff] }
 0x4f5   : > { %v5948_v37 = vpop.permute.xlu1 %5947 }
 0x4f7   : > { %5711 = vrot.lane.b32.xlu1 %v5252_v10, %s8294_s10  ;;  %v5950_v60 = vpop.permute.xlu0 %5949  ;;  %v6395_v10 = vsel %vm2129_vm4, %v6363_v34, %v9682_v22  ;;  %v6428_v22 = vsel %vm2162_vm5, %v6396_v51, %v5822_v46  ;;  %v5317_v46 = vld [vmem:[#allocation2 + $0x8f8] sm:$0xff]  ;;  %v5318_v51 = vld [vmem:[#allocation2 + $0x900] sm:$0xff] }
 0x4f8   : > { %5713 = vrot.lane.b32.xlu0 %v5253_v32, %s8294_s10  ;;  %v6427_v6 = vsel %vm2162_vm5, %v6395_v10, %v5820_v7  ;;  %v6460_v7 = vsel %vm2195_vm6, %v6428_v22, %v5950_v60 }
 0x4f9   : > { %v12067_v35 = vpop.permute.xlu1 %5695  ;;  %v6459_v56 = vsel %vm2195_vm6, %v6427_v6, %v5948_v37  ;;  %v5222_v37 = vld [vmem:[#allocation2 + $0x174] sm:$0xff] }
 0x4fb   : > { %6091 = vrot.lane.b32.xlu1 %v5347_v53, %s8298_s14  ;;  %v12085_v33 = vpop.permute.xlu0 %5697 }
 0x4fc   : > { %6219 = vrot.lane.b32.xlu0 %v5379_v40, %s8299_s28  ;;  %v5223_v40 = vld [vmem:[#allocation2 + $0x17c] sm:$0xff] }
 0x4fd   : > { %v6076_v55 = vpop.permute.xlu1 %6075 }
 0x4fe   : > { %v6491_v31 = vsel %vm2228_vm7, %v6459_v56, %v6076_v55 }
 0x4ff   : > { %6093 = vrot.lane.b32.xlu1 %v5348_v13, %s8298_s14  ;;  %v6204_v50 = vpop.permute.xlu0 %6203 }
 0x500   : > { %v6523_v13 = vsel %vm2261_vm8, %v6491_v31, %v6204_v50  ;;  %5839 = vrot.lane.b32.xlu0 %v5284_v42, %s8296_s12  ;;  %v5148_v50 = vld [vmem:[#allocation2 + $0x38] sm:$0xff] }
 0x501   : > { %v6078_v0 = vpop.permute.xlu1 %6077  ;;  %8010 = vmatprep.mubr.msk.f32.mxu0 %vm2304_vm9, %v6523_v13 }
 0x502   : > { %v6492_v32 = vsel %vm2228_vm7, %v6460_v7, %v6078_v0  ;;  %v12119_v0 = vld [vmem:[%s13009_s4 + $0x1] ss:$0 sm:$0xff]  ;;  %v5350_v7 = vld [vmem:[#allocation2 + $0x912] sm:$0xff] }
 0x503   : > { %5459 = vrot.lane.b32.xlu1 %v5190_v61, %s8292_s8  ;;  %v5824_v29 = vpop.permute.xlu0 %5823  ;;  %v5254_v61 = vld [vmem:[#allocation2 + $0x540] sm:$0xff] }
 0x504   : > { %5461 = vrot.lane.b32.xlu0 %v5191_v23, %s8292_s8  ;;  %v5149_v23 = vld [vmem:[#allocation2 + $0x40] sm:$0xff] }
 0x505   : > { %v12094_v53 = vpop.permute.xlu1 %5443 }
 0x507   : > { %6221 = vrot.lane.b32.xlu1 %v5380_v52, %s8299_s28  ;;  %v12112_v34 = vpop.permute.xlu0 %5445  ;;  %v5349_v52 = vld [vmem:[#allocation2 + $0x90a] sm:$0xff] }
 0x508   : > { %5841 = vrot.lane.b32.xlu0 %v5285_v4, %s8296_s12 }
 0x509   : > { %v6206_v8 = vpop.permute.xlu1 %6205 }
 0x50a   : > { %v6524_v55 = vsel %vm2261_vm8, %v6492_v32, %v6206_v8  ;;  %v5255_v32 = vld [vmem:[#allocation2 + $0x548] sm:$0xff]  ;;  %v6301_v8 = vsel %vm279_vm0, %v5148_v50, %v12055_v47  ;;  %v6302_v47 = vsel %vm279_vm0, %v5149_v23, %v12061_v43 }
 0x50b   : > { %5587 = vrot.lane.b32.xlu1 %v5222_v37, %s8293_s9  ;;  %8011 = vmatmul.mubr.msk.f32.vlgmr.msra.gmra.mrb[62].mxu0 %vm2304_vm9, %v6524_v55  ;;  %v5826_v28 = vpop.permute.xlu0 %5825 }
 0x50c   : > { %v7904_v38 = vpop.f32.mrb[32].mxu0  ;;  %5589 = vrot.lane.b32.xlu0 %v5223_v40, %s8293_s9 }
 0x50d   : > { %v12110_v60 = vpop.permute.xlu1 %5571  ;;  %v4607_v10 = vadd.f32 %v7904_v38, %v12119_v0  ;;  %v4601_v6 = vpop.f32.mrb[33].mxu0 }
 0x50e   : > { %v4602_v56 = vadd.f32 %v12119_v0, %v4601_v6 }
 0x50f   : > { %5967 = vrot.lane.b32.xlu1 %v5317_v46, %s8297_s13  ;;  %v12127_v31 = vpop.permute.xlu0 %5573  ;;  %v4761_v13 = vmax.f32 %v4607_v10, 0.0  ;;  %v6333_v46 = vsel %vm2063_vm2, %v6301_v8, %v12059_v36  ;;  %v5192_v10 = vld [vmem:[#allocation2 + $0x19a] sm:$0xff]  ;;  %v6334_v36 = vsel %vm2063_vm2, %v6302_v47, %v12069_v9  ;;  %v5286_v8 = vld [vmem:[#allocation2 + $0x564] sm:$0xff] }
 0x510   : > { %v4760_v22 = vmax.f32 %v4602_v56, 0.0  ;;  %5969 = vrot.lane.b32.xlu0 %v5318_v51, %s8297_s13  ;;  %v5381_v56 = vld [vmem:[#allocation2 + $0x91c] sm:$0xff] }
 0x511   : > { %v5952_v58 = vpop.permute.xlu1 %5951 }
 0x512   : > { %7952 = vmatprep.mubr.msk.f32.mxu1 %vm2063_vm2, %v4760_v22 }
 0x513   : > { %5715 = vrot.lane.b32.xlu1 %v5254_v61, %s8294_s10  ;;  %v5954_v55 = vpop.permute.xlu0 %5953  ;;  %7953 = vmatmul.mubr.msk.f32.vlgmr.msra.gmra.mrb[0].mxu1 %vm2063_vm2, %v4761_v13  ;;  %v6365_v61 = vsel %vm2096_vm3, %v6333_v46, %v12067_v35  ;;  %v6366_v35 = vsel %vm2096_vm3, %v6334_v36, %v12085_v33  ;;  %v5319_v36 = vld [vmem:[#allocation2 + $0x930] sm:$0xff] }
 0x514   : > { %v7907_v4 = vpop.f32.mrb[34].mxu0  ;;  %5717 = vrot.lane.b32.xlu0 %v5255_v32, %s8294_s10  ;;  %v6397_v50 = vsel %vm2129_vm4, %v6365_v61, %v9694_v20  ;;  %v6398_v33 = vsel %vm2129_vm4, %v6366_v35, %v9692_v21  ;;  %v5224_v21 = vld [vmem:[#allocation2 + $0x1ac] sm:$0xff] }
 0x515   : > { %v12125_v42 = vpop.permute.xlu1 %5699  ;;  %v4617_v40 = vadd.f32 %v7907_v4, %v12119_v0  ;;  %v4611_v38 = vpop.f32.mrb[35].mxu0  ;;  %v6429_v43 = vsel %vm2162_vm5, %v6397_v50, %v5824_v29  ;;  %v6430_v29 = vsel %vm2162_vm5, %v6398_v33, %v5826_v28  ;;  %v5287_v35 = vld [vmem:[#allocation2 + $0x56c] sm:$0xff]  ;;  %v5225_v33 = vld [vmem:[#allocation2 + $0x1b4] sm:$0xff] }
 0x516   : > { %v4612_v6 = vadd.f32 %v12119_v0, %v4611_v38  ;;  %v6461_v32 = vsel %vm2195_vm6, %v6429_v43, %v5952_v58  ;;  %v6462_v58 = vsel %vm2195_vm6, %v6430_v29, %v5954_v55 }
 0x517   : > { %6095 = vrot.lane.b32.xlu1 %v5349_v52, %s8298_s14  ;;  %v12147_v51 = vpop.permute.xlu0 %5701  ;;  %v4763_v13 = vmax.f32 %v4617_v40, 0.0 }
 0x518   : > { %v4762_v22 = vmax.f32 %v4612_v6, 0.0  ;;  %6223 = vrot.lane.b32.xlu0 %v5381_v56, %s8299_s28 }
 0x519   : > { %v6080_v37 = vpop.permute.xlu1 %6079 }
 0x51a   : > { %7955 = vmatprep.mubr.msk.f32.mxu1 %vm2063_vm2, %v4762_v22  ;;  %v6493_v20 = vsel %vm2228_vm7, %v6461_v32, %v6080_v37 }
 0x51b   : > { %6097 = vrot.lane.b32.xlu1 %v5350_v7, %s8298_s14  ;;  %v5382_v7 = vld [vmem:[#allocation2 + $0x924] sm:$0xff]  ;;  %v6208_v23 = vpop.permute.xlu0 %6207  ;;  %7956 = vmatmul.mubr.msk.f32.gmra.mrb[2].mxu1 %vm2063_vm2, %v4763_v13 }
 0x51c   : > { %v6525_v46 = vsel %vm2261_vm8, %v6493_v20, %v6208_v23  ;;  %v7910_v4 = vpop.f32.mrb[36].mxu0  ;;  %5843 = vrot.lane.b32.xlu0 %v5286_v8, %s8296_s12 }
 0x51d   : > { %v6082_v52 = vpop.permute.xlu1 %6081  ;;  %v4627_v61 = vadd.f32 %v7910_v4, %v12119_v0  ;;  %v4621_v40 = vpop.f32.mrb[37].mxu0  ;;  %8013 = vmatprep.mubr.msk.f32.mxu0 %vm2304_vm9, %v6525_v46  ;;  %v5351_v46 = vld [vmem:[#allocation2 + $0x942] sm:$0xff] }
 0x51e   : > { %v6494_v37 = vsel %vm2228_vm7, %v6462_v58, %v6082_v52  ;;  %v4622_v38 = vadd.f32 %v12119_v0, %v4621_v40  ;;  %v5320_v58 = vld [vmem:[#allocation2 + $0x938] sm:$0xff]  ;;  %v5150_v40 = vld [vmem:[#allocation2 + $0x70] sm:$0xff] }
 0x51f   : > { %5463 = vrot.lane.b32.xlu1 %v5192_v10, %s8292_s8  ;;  %v5193_v10 = vld [vmem:[#allocation2 + $0x1a2] sm:$0xff]  ;;  %v12174_v6 = vpop.permute.xlu0 %5827  ;;  %v4765_v55 = vmax.f32 %v4627_v61, 0.0 }
 0x520   : > { %v4764_v56 = vmax.f32 %v4622_v38, 0.0  ;;  %5465 = vrot.lane.b32.xlu0 %v5193_v10, %s8292_s8 }
 0x521   : > { %v12158_v9 = vpop.permute.xlu1 %5447 }
 0x522   : > { %7958 = vmatprep.mubr.msk.f32.mxu1 %vm2063_vm2, %v4764_v56  ;;  %v5257_v56 = vld [vmem:[#allocation2 + $0x580] sm:$0xff] }
 0x523   : > { %6225 = vrot.lane.b32.xlu1 %v5382_v7, %s8299_s28  ;;  %v12182_v50 = vpop.permute.xlu0 %5449  ;;  %7959 = vmatmul.mubr.msk.f32.gmra.mrb[4].mxu1 %vm2063_vm2, %v4765_v55  ;;  %v5256_v7 = vld [vmem:[#allocation2 + $0x578] sm:$0xff]  ;;  %v6303_v55 = vsel %vm279_vm0, %v5150_v40, %v12094_v53 }
 0x524   : > { %v7913_v22 = vpop.f32.mrb[38].mxu0  ;;  %5845 = vrot.lane.b32.xlu0 %v5287_v35, %s8296_s12  ;;  %v5384_v40 = vld [vmem:[#allocation2 + $0x95c] sm:$0xff] }
 0x525   : > { %v6210_v28 = vpop.permute.xlu1 %6209  ;;  %v4637_v43 = vadd.f32 %v7913_v22, %v12119_v0  ;;  %v4631_v13 = vpop.f32.mrb[39].mxu0  ;;  %v6335_v22 = vsel %vm2063_vm2, %v6303_v55, %v12110_v60 }
 0x526   : > { %v6526_v47 = vsel %vm2261_vm8, %v6494_v37, %v6210_v28  ;;  %v4632_v32 = vadd.f32 %v12119_v0, %v4631_v13  ;;  %v5352_v28 = vld [vmem:[#allocation2 + $0x94a] sm:$0xff]  ;;  %v6367_v13 = vsel %vm2096_vm3, %v6335_v22, %v12125_v42 }
 0x527   : > { %5591 = vrot.lane.b32.xlu1 %v5224_v21, %s8293_s9  ;;  %8014 = vmatmul.mubr.msk.f32.gmra.mrb[64].mxu0 %vm2304_vm9, %v6526_v47  ;;  %v5830_v20 = vpop.permute.xlu0 %5829  ;;  %v4767_v29 = vmax.f32 %v4637_v43, 0.0  ;;  %v5226_v22 = vld [vmem:[#allocation2 + $0x1e4] sm:$0xff] }
 0x528   : > { %v4766_v23 = vmax.f32 %v4632_v32, 0.0  ;;  %5593 = vrot.lane.b32.xlu0 %v5225_v33, %s8293_s9  ;;  %v5194_v32 = vld [vmem:[#allocation2 + $0x1d2] sm:$0xff] }
 0x529   : > { %v12180_v52 = vpop.permute.xlu1 %5575 }
 0x52a   : > { %7961 = vmatprep.mubr.msk.f32.mxu1 %vm2063_vm2, %v4766_v23  ;;  %v5383_v23 = vld [vmem:[#allocation2 + $0x954] sm:$0xff] }
 0x52b   : > { %5971 = vrot.lane.b32.xlu1 %v5319_v36, %s8297_s13  ;;  %v12194_v61 = vpop.permute.xlu0 %5577  ;;  %7962 = vmatmul.mubr.msk.f32.gmra.mrb[6].mxu1 %vm2063_vm2, %v4767_v29  ;;  %v5151_v36 = vld [vmem:[#allocation2 + $0x78] sm:$0xff] }
 0x52c   : > { %v7916_v21 = vpop.f32.mrb[40].mxu0  ;;  %5973 = vrot.lane.b32.xlu0 %v5320_v58, %s8297_s13  ;;  %v6304_v33 = vsel %vm279_vm0, %v5151_v36, %v12112_v34 }
 0x52d   : > { %v5956_v8 = vpop.permute.xlu1 %5955  ;;  %v4647_v37 = vadd.f32 %v7916_v21, %v12119_v0  ;;  %v4641_v38 = vpop.f32.mrb[41].mxu0  ;;  %v6336_v60 = vsel %vm2063_vm2, %v6304_v33, %v12127_v31  ;;  %v5289_v33 = vld [vmem:[#allocation2 + $0x5a4] sm:$0xff] }
 0x52e   : > { %v4642_v10 = vadd.f32 %v12119_v0, %v4641_v38  ;;  %v6368_v42 = vsel %vm2096_vm3, %v6336_v60, %v12147_v51  ;;  %v5288_v51 = vld [vmem:[#allocation2 + $0x59c] sm:$0xff]  ;;  %v5258_v60 = vld [vmem:[#allocation2 + $0x5b0] sm:$0xff] }
 0x52f   : > { %5719 = vrot.lane.b32.xlu1 %v5256_v7, %s8294_s10  ;;  %v5958_v35 = vpop.permute.xlu0 %5957  ;;  %v4769_v7 = vmax.f32 %v4647_v37, 0.0 }
 0x530   : > { %v4768_v43 = vmax.f32 %v4642_v10, 0.0  ;;  %5721 = vrot.lane.b32.xlu0 %v5257_v56, %s8294_s10 }
 0x531   : > { %v12192_v4 = vpop.permute.xlu1 %5703 }
 0x532   : > { %7964 = vmatprep.mubr.msk.f32.mxu1 %vm2063_vm2, %v4768_v43 }
 0x533   : > { %6099 = vrot.lane.b32.xlu1 %v5351_v46, %s8298_s14  ;;  %v12214_v29 = vpop.permute.xlu0 %5705  ;;  %7965 = vmatmul.mubr.msk.f32.gmra.mrb[8].mxu1 %vm2063_vm2, %v4769_v7  ;;  %v6399_v46 = vsel %vm2129_vm4, %v6367_v13, %v9706_v16  ;;  %v6400_v16 = vsel %vm2129_vm4, %v6368_v42, %v9704_v17  ;;  %v5195_v13 = vld [vmem:[#allocation2 + $0x1da] sm:$0xff] }
 0x534   : > { %v6431_v34 = vsel %vm2162_vm5, %v6399_v46, %v12174_v6  ;;  %6227 = vrot.lane.b32.xlu0 %v5383_v23, %s8299_s28  ;;  %v6432_v56 = vsel %vm2162_vm5, %v6400_v16, %v5830_v20 }
 0x535   : > { %v6084_v47 = vpop.permute.xlu1 %6083  ;;  %v6463_v31 = vsel %vm2195_vm6, %v6431_v34, %v5956_v8  ;;  %v6464_v8 = vsel %vm2195_vm6, %v6432_v56, %v5958_v35  ;;  %v5321_v35 = vld [vmem:[#allocation2 + $0x968] sm:$0xff] }
 0x536   : > { %v5354_v56 = vld [vmem:[#allocation2 + $0x982] sm:$0xff] }
 0x537   : > { %6101 = vrot.lane.b32.xlu1 %v5352_v28, %s8298_s14  ;;  %v6495_v28 = vsel %vm2228_vm7, %v6463_v31, %v6084_v47  ;;  %v6212_v6 = vpop.permute.xlu0 %6211 }
 0x538   : > { %v6527_v55 = vsel %vm2261_vm8, %v6495_v28, %v6212_v6  ;;  %5847 = vrot.lane.b32.xlu0 %v5288_v51, %s8296_s12  ;;  %v5322_v28 = vld [vmem:[#allocation2 + $0x970] sm:$0xff]  ;;  %v5152_v6 = vld [vmem:[#allocation2 + $0xa8] sm:$0xff] }
 0x539   : > { %v6086_v53 = vpop.permute.xlu1 %6085  ;;  %8016 = vmatprep.mubr.msk.f32.mxu0 %vm2304_vm9, %v6527_v55 }
 0x53a   : > { %v7919_v58 = vpop.f32.mrb[42].mxu0  ;;  %v6496_v17 = vsel %vm2228_vm7, %v6464_v8, %v6086_v53  ;;  %v5259_v8 = vld [vmem:[#allocation2 + $0x5b8] sm:$0xff] }
 0x53b   : > { %5467 = vrot.lane.b32.xlu1 %v5194_v32, %s8292_s8  ;;  %v4657_v21 = vadd.f32 %v7919_v58, %v12119_v0  ;;  %v4651_v37 = vpop.f32.mrb[43].mxu0  ;;  %v5832_v20 = vpop.permute.xlu0 %5831  ;;  %v5227_v58 = vld [vmem:[#allocation2 + $0x1ec] sm:$0xff] }
 0x53c   : > { %v4652_v10 = vadd.f32 %v12119_v0, %v4651_v37  ;;  %5469 = vrot.lane.b32.xlu0 %v5195_v13, %s8292_s8  ;;  %v5353_v37 = vld [vmem:[#allocation2 + $0x97a] sm:$0xff] }
 0x53d   : > { %v12227_v38 = vpop.permute.xlu1 %5451  ;;  %v4771_v47 = vmax.f32 %v4657_v21, 0.0 }
 0x53e   : > { %v4770_v36 = vmax.f32 %v4652_v10, 0.0 }
 0x53f   : > { %6229 = vrot.lane.b32.xlu1 %v5384_v40, %s8299_s28  ;;  %v12248_v53 = vpop.permute.xlu0 %5453 }
 0x540   : > { %7967 = vmatprep.mubr.msk.f32.mxu1 %vm2063_vm2, %v4770_v36  ;;  %5849 = vrot.lane.b32.xlu0 %v5289_v33, %s8296_s12  ;;  %v6305_v36 = vsel %vm279_vm0, %v5152_v6, %v12158_v9 }
 0x541   : > { %v6214_v43 = vpop.permute.xlu1 %6213  ;;  %7968 = vmatmul.mubr.msk.f32.gmra.mrb[10].mxu1 %vm2063_vm2, %v4771_v47  ;;  %v6337_v47 = vsel %vm2063_vm2, %v6305_v36, %v12180_v52  ;;  %v5197_v36 = vld [vmem:[#allocation2 + $0x212] sm:$0xff] }
 0x542   : > { %v6528_v7 = vsel %vm2261_vm8, %v6496_v17, %v6214_v43  ;;  %v6369_v43 = vsel %vm2096_vm3, %v6337_v47, %v12192_v4 }
 0x543   : > { %5595 = vrot.lane.b32.xlu1 %v5226_v22, %s8293_s9  ;;  %8017 = vmatmul.mubr.msk.f32.gmra.mrb[66].mxu0 %vm2304_vm9, %v6528_v7  ;;  %v5834_v31 = vpop.permute.xlu0 %5833  ;;  %v5153_v22 = vld [vmem:[#allocation2 + $0xb0] sm:$0xff] }
 0x544   : > { %5597 = vrot.lane.b32.xlu0 %v5227_v58, %s8293_s9  ;;  %v5196_v7 = vld [vmem:[#allocation2 + $0x20a] sm:$0xff]  ;;  %v6401_v58 = vsel %vm2129_vm4, %v6369_v43, %v9714_v14 }
 0x545   : > { %v12246_v32 = vpop.permute.xlu1 %5579 }
 0x546   : > { %v7922_v23 = vpop.f32.mrb[44].mxu0 }
 0x547   : > { %5975 = vrot.lane.b32.xlu1 %v5321_v35, %s8297_s13  ;;  %v4667_v42 = vadd.f32 %v7922_v23, %v12119_v0  ;;  %v4661_v46 = vpop.f32.mrb[45].mxu0  ;;  %v12258_v10 = vpop.permute.xlu0 %5581  ;;  %v6306_v35 = vsel %vm279_vm0, %v5153_v22, %v12182_v50  ;;  %v6433_v50 = vsel %vm2162_vm5, %v6401_v58, %v5832_v20  ;;  %v5229_v58 = vld [vmem:[#allocation2 + $0x224] sm:$0xff] }
 0x548   : > { %v4662_v40 = vadd.f32 %v12119_v0, %v4661_v46  ;;  %5977 = vrot.lane.b32.xlu0 %v5322_v28, %s8297_s13  ;;  %v6338_v52 = vsel %vm2063_vm2, %v6306_v35, %v12194_v61  ;;  %v5290_v28 = vld [vmem:[#allocation2 + $0x5d4] sm:$0xff]  ;;  %v5291_v35 = vld [vmem:[#allocation2 + $0x5dc] sm:$0xff] }
 0x549   : > { %v5960_v34 = vpop.permute.xlu1 %5959  ;;  %v4773_v51 = vmax.f32 %v4667_v42, 0.0  ;;  %v6370_v4 = vsel %vm2096_vm3, %v6338_v52, %v12214_v29  ;;  %v5260_v52 = vld [vmem:[#allocation2 + $0x5e8] sm:$0xff] }
 0x54a   : > { %v4772_v21 = vmax.f32 %v4662_v40, 0.0  ;;  %v6465_v61 = vsel %vm2195_vm6, %v6433_v50, %v5960_v34  ;;  %v6402_v29 = vsel %vm2129_vm4, %v6370_v4, %v9712_v15  ;;  %v5228_v15 = vld [vmem:[#allocation2 + $0x21c] sm:$0xff] }
 0x54b   : > { %5723 = vrot.lane.b32.xlu1 %v5258_v60, %s8294_s10  ;;  %v5962_v17 = vpop.permute.xlu0 %5961  ;;  %v5385_v60 = vld [vmem:[#allocation2 + $0x98c] sm:$0xff]  ;;  %v6434_v20 = vsel %vm2162_vm5, %v6402_v29, %v5834_v31 }
 0x54c   : > { %7970 = vmatprep.mubr.msk.f32.mxu1 %vm2063_vm2, %v4772_v21  ;;  %5725 = vrot.lane.b32.xlu0 %v5259_v8, %s8294_s10  ;;  %v5386_v21 = vld [vmem:[#allocation2 + $0x994] sm:$0xff]  ;;  %v6466_v34 = vsel %vm2195_vm6, %v6434_v20, %v5962_v17  ;;  %v5323_v17 = vld [vmem:[#allocation2 + $0x9a0] sm:$0xff] }
 0x54d   : > { %v12256_v16 = vpop.permute.xlu1 %5707  ;;  %7971 = vmatmul.mubr.msk.f32.gmra.mrb[12].mxu1 %vm2063_vm2, %v4773_v51 }
 0x54f   : > { %6103 = vrot.lane.b32.xlu1 %v5353_v37, %s8298_s14  ;;  %v12278_v46 = vpop.permute.xlu0 %5709 }
 0x550   : > { %6231 = vrot.lane.b32.xlu0 %v5385_v60, %s8299_s28 }
 0x551   : > { %v6088_v55 = vpop.permute.xlu1 %6087 }
 0x552   : > { %v7925_v13 = vpop.f32.mrb[46].mxu0  ;;  %v6497_v6 = vsel %vm2228_vm7, %v6465_v61, %v6088_v55  ;;  %v5324_v61 = vld [vmem:[#allocation2 + $0x9a8] sm:$0xff] }
 0x553   : > { %6105 = vrot.lane.b32.xlu1 %v5354_v56, %s8298_s14  ;;  %v4677_v33 = vadd.f32 %v7925_v13, %v12119_v0  ;;  %v4671_v9 = vpop.f32.mrb[47].mxu0  ;;  %v6216_v14 = vpop.permute.xlu0 %6215 }
 0x554   : > { %v4672_v42 = vadd.f32 %v12119_v0, %v4671_v9  ;;  %v6529_v56 = vsel %vm2261_vm8, %v6497_v6, %v6216_v14  ;;  %5851 = vrot.lane.b32.xlu0 %v5290_v28, %s8296_s12  ;;  %v5154_v28 = vld [vmem:[#allocation2 + $0xe0] sm:$0xff] }
 0x555   : > { %v6090_v23 = vpop.permute.xlu1 %6089  ;;  %v4775_v37 = vmax.f32 %v4677_v33, 0.0  ;;  %8019 = vmatprep.mubr.msk.f32.mxu0 %vm2304_vm9, %v6529_v56  ;;  %v5356_v6 = vld [vmem:[#allocation2 + $0x9ba] sm:$0xff] }
 0x556   : > { %v4774_v40 = vmax.f32 %v4672_v42, 0.0  ;;  %v6498_v55 = vsel %vm2228_vm7, %v6466_v34, %v6090_v23  ;;  %v6921_v23 = vld [vmem:[%s13010_s5 + $0x10] sm:$0xff] }
 0x557   : > { %5471 = vrot.lane.b32.xlu1 %v5196_v7, %s8292_s8  ;;  %v5836_v31 = vpop.permute.xlu0 %5835  ;;  %8058 = vmatprep.subr.mxu1 %v6921_v23  ;;  %v5261_v34 = vld [vmem:[#allocation2 + $0x5f0] sm:$0xff] }
 0x558   : > { %7973 = vmatprep.mubr.msk.f32.mxu1 %vm2063_vm2, %v4774_v40  ;;  %5473 = vrot.lane.b32.xlu0 %v5197_v36, %s8292_s8  ;;  %v5355_v40 = vld [vmem:[#allocation2 + $0x9b2] sm:$0xff] }
 0x559   : > { %v12288_v51 = vpop.permute.xlu1 %5455  ;;  %7974 = vmatmul.mubr.msk.f32.gmra.mrb[14].mxu1 %vm2063_vm2, %v4775_v37 }
 0x55a   : > { %8059 = vmatpush3.msra.mxu1 %v6921_v23 }
 0x55b   : > { %6233 = vrot.lane.b32.xlu1 %v5386_v21, %s8299_s28  ;;  %v12310_v9 = vpop.permute.xlu0 %5457 }
 0x55c   : > { %5853 = vrot.lane.b32.xlu0 %v5291_v35, %s8296_s12 }
 0x55d   : > { %v6218_v8 = vpop.permute.xlu1 %6217 }
 0x55e   : > { %v6530_v22 = vsel %vm2261_vm8, %v6498_v55, %v6218_v8  ;;  %v7928_v47 = vpop.f32.mrb[48].mxu0  ;;  %v5155_v55 = vld [vmem:[#allocation2 + $0xe8] sm:$0xff] }
 0x55f   : > { %5599 = vrot.lane.b32.xlu1 %v5228_v15, %s8293_s9  ;;  %8020 = vmatmul.mubr.msk.f32.gmra.mrb[68].mxu0 %vm2304_vm9, %v6530_v22  ;;  %v4687_v43 = vadd.f32 %v7928_v47, %v12119_v0  ;;  %v4681_v13 = vpop.f32.mrb[49].mxu0  ;;  %v5838_v50 = vpop.permute.xlu0 %5837  ;;  %v6307_v15 = vsel %vm279_vm0, %v5154_v28, %v12227_v38 }
 0x560   : > { %v4682_v33 = vadd.f32 %v12119_v0, %v4681_v13  ;;  %5601 = vrot.lane.b32.xlu0 %v5229_v58, %s8293_s9  ;;  %v6339_v22 = vsel %vm2063_vm2, %v6307_v15, %v12246_v32  ;;  %v6308_v13 = vsel %vm279_vm0, %v5155_v55, %v12248_v53  ;;  %v5292_v58 = vld [vmem:[#allocation2 + $0x60c] sm:$0xff] }
 0x561   : > { %v12307_v7 = vpop.permute.xlu1 %5583  ;;  %v4777_v42 = vmax.f32 %v4687_v43, 0.0  ;;  %v6371_v47 = vsel %vm2096_vm3, %v6339_v22, %v12256_v16  ;;  %v5198_v43 = vld [vmem:[#allocation2 + $0x242] sm:$0xff]  ;;  %v6340_v23 = vsel %vm2063_vm2, %v6308_v13, %v12258_v10 }
 0x562   : > { %v4776_v60 = vmax.f32 %v4682_v33, 0.0  ;;  %v5387_v33 = vld [vmem:[#allocation2 + $0x9c4] sm:$0xff]  ;;  %v6372_v32 = vsel %vm2096_vm3, %v6340_v23, %v12278_v46  ;;  %v6403_v16 = vsel %vm2129_vm4, %v6371_v47, %v13514_v62  ;;  %v5293_v47 = vld [vmem:[#allocation2 + $0x614] sm:$0xff] }
 0x563   : > { %5979 = vrot.lane.b32.xlu1 %v5323_v17, %s8297_s13  ;;  %v12323_v37 = vpop.permute.xlu0 %5585  ;;  %v6435_v53 = vsel %vm2162_vm5, %v6403_v16, %v5836_v31  ;;  %v6404_v46 = vsel %vm2129_vm4, %v6372_v32, %v13518_v11  ;;  %v5357_v23 = vld [vmem:[#allocation2 + $0x9ea] sm:$0xff] }
 0x564   : > { %7976 = vmatprep.mubr.msk.f32.mxu1 %vm2063_vm2, %v4776_v60  ;;  %5981 = vrot.lane.b32.xlu0 %v5324_v61, %s8297_s13  ;;  %v6436_v61 = vsel %vm2162_vm5, %v6404_v46, %v5838_v50  ;;  %v5156_v46 = vld [vmem:[#allocation2 + $0x118] sm:$0xff] }
 0x565   : > { %v5964_v4 = vpop.permute.xlu1 %5963  ;;  %7977 = vmatmul.mubr.msk.f32.gmra.mrb[16].mxu1 %vm2063_vm2, %v4777_v42 }
 0x566   : > { %v6467_v10 = vsel %vm2195_vm6, %v6435_v53, %v5964_v4 }
 0x567   : > { %5727 = vrot.lane.b32.xlu1 %v5260_v52, %s8294_s10  ;;  %v5966_v36 = vpop.permute.xlu0 %5965  ;;  %v5388_v52 = vld [vmem:[#allocation2 + $0x9cc] sm:$0xff] }
 0x568   : > { %5729 = vrot.lane.b32.xlu0 %v5261_v34, %s8294_s10  ;;  %v6468_v31 = vsel %vm2195_vm6, %v6436_v61, %v5966_v36 }
 0x569   : > { %v12321_v21 = vpop.permute.xlu1 %5711 }
 0x56a   : > { %v7931_v29 = vpop.f32.mrb[50].mxu0 }
 0x56b   : > { %6107 = vrot.lane.b32.xlu1 %v5355_v40, %s8298_s14  ;;  %v4697_v14 = vadd.f32 %v7931_v29, %v12119_v0  ;;  %v4691_v20 = vpop.f32.mrb[51].mxu0  ;;  %v12341_v60 = vpop.permute.xlu0 %5713  ;;  %v5230_v29 = vld [vmem:[#allocation2 + $0x254] sm:$0xff] }
 0x56c   : > { %v4692_v8 = vadd.f32 %v12119_v0, %v4691_v20  ;;  %6235 = vrot.lane.b32.xlu0 %v5387_v33, %s8299_s28 }
 0x56d   : > { %v6092_v56 = vpop.permute.xlu1 %6091  ;;  %v4779_v38 = vmax.f32 %v4697_v14, 0.0 }
 0x56e   : > { %v4778_v17 = vmax.f32 %v4692_v8, 0.0  ;;  %v6499_v40 = vsel %vm2228_vm7, %v6467_v10, %v6092_v56  ;;  %v5199_v56 = vld [vmem:[#allocation2 + $0x24a] sm:$0xff]  ;;  %v5325_v8 = vld [vmem:[#allocation2 + $0x9d8] sm:$0xff] }
 0x56f   : > { %6109 = vrot.lane.b32.xlu1 %v5356_v6, %s8298_s14  ;;  %v6220_v62 = vpop.permute.xlu0 %6219 }
 0x570   : > { %7979 = vmatprep.mubr.msk.f32.mxu1 %vm2063_vm2, %v4778_v17  ;;  %v6531_v28 = vsel %vm2261_vm8, %v6499_v40, %v6220_v62  ;;  %5855 = vrot.lane.b32.xlu0 %v5292_v58, %s8296_s12  ;;  %v5358_v62 = vld [vmem:[#allocation2 + $0x9f2] sm:$0xff] }
 0x571   : > { %v6094_v35 = vpop.permute.xlu1 %6093  ;;  %7980 = vmatmul.mubr.msk.f32.gmra.mrb[18].mxu1 %vm2063_vm2, %v4779_v38  ;;  %8022 = vmatprep.mubr.msk.f32.mxu0 %vm2304_vm9, %v6531_v28  ;;  %v5231_v38 = vld [vmem:[#allocation2 + $0x25c] sm:$0xff] }
 0x572   : > { %v6500_v6 = vsel %vm2228_vm7, %v6468_v31, %v6094_v35  ;;  %v5263_v31 = vld [vmem:[#allocation2 + $0x628] sm:$0xff] }
 0x573   : > { %5475 = vrot.lane.b32.xlu1 %v5198_v43, %s8292_s8  ;;  %v5840_v15 = vpop.permute.xlu0 %5839  ;;  %v5262_v43 = vld [vmem:[#allocation2 + $0x620] sm:$0xff] }
 0x574   : > { %5477 = vrot.lane.b32.xlu0 %v5199_v56, %s8292_s8 }
 0x575   : > { %v12353_v42 = vpop.permute.xlu1 %5459 }
 0x576   : > { %v7934_v4 = vpop.f32.mrb[52].mxu0 }
 0x577   : > { %6237 = vrot.lane.b32.xlu1 %v5388_v52, %s8299_s28  ;;  %v4707_v11 = vadd.f32 %v7934_v4, %v12119_v0  ;;  %v4701_v14 = vpop.f32.mrb[53].mxu0  ;;  %v12373_v17 = vpop.permute.xlu0 %5461  ;;  %v5326_v52 = vld [vmem:[#allocation2 + $0x9e0] sm:$0xff]  ;;  %v6309_v4 = vsel %vm279_vm0, %v5156_v46, %v12288_v51 }
 0x578   : > { %v4702_v50 = vadd.f32 %v12119_v0, %v4701_v14  ;;  %5857 = vrot.lane.b32.xlu0 %v5293_v47, %s8296_s12 }
 0x579   : > { %v6222_v20 = vpop.permute.xlu1 %6221  ;;  %v4781_v36 = vmax.f32 %v4707_v11, 0.0  ;;  %v6341_v11 = vsel %vm2063_vm2, %v6309_v4, %v12307_v7  ;;  %v5295_v4 = vld [vmem:[#allocation2 + $0x64c] sm:$0xff] }
 0x57a   : > { %v6532_v34 = vsel %vm2261_vm8, %v6500_v6, %v6222_v20  ;;  %v4780_v55 = vmax.f32 %v4702_v50, 0.0  ;;  %v6373_v14 = vsel %vm2096_vm3, %v6341_v11, %v12321_v21  ;;  %v5200_v20 = vld [vmem:[#allocation2 + $0x27a] sm:$0xff] }
 0x57b   : > { %5603 = vrot.lane.b32.xlu1 %v5230_v29, %s8293_s9  ;;  %8023 = vmatmul.mubr.msk.f32.gmra.mrb[70].mxu0 %vm2304_vm9, %v6532_v34  ;;  %v5842_v35 = vpop.permute.xlu0 %5841  ;;  %v5157_v29 = vld [vmem:[#allocation2 + $0x120] sm:$0xff]  ;;  %v5264_v11 = vld [vmem:[#allocation2 + $0x658] sm:$0xff] }
 0x57c   : > { %7982 = vmatprep.mubr.msk.f32.mxu1 %vm2063_vm2, %v4780_v55  ;;  %5605 = vrot.lane.b32.xlu0 %v5231_v38, %s8293_s9  ;;  %v6310_v51 = vsel %vm279_vm0, %v5157_v29, %v12310_v9  ;;  %v5389_v50 = vld [vmem:[#allocation2 + $0x9fc] sm:$0xff] }
 0x57d   : > { %v12371_v22 = vpop.permute.xlu1 %5587  ;;  %7983 = vmatmul.mubr.msk.f32.gmra.mrb[20].mxu1 %vm2063_vm2, %v4781_v36  ;;  %v6342_v34 = vsel %vm2063_vm2, %v6310_v51, %v12323_v37  ;;  %v5390_v36 = vld [vmem:[#allocation2 + $0xa04] sm:$0xff] }
 0x57e   : > { %v6374_v7 = vsel %vm2096_vm3, %v6342_v34, %v12341_v60 }
 0x57f   : > { %5983 = vrot.lane.b32.xlu1 %v5325_v8, %s8297_s13  ;;  %v12385_v58 = vpop.permute.xlu0 %5589  ;;  %v6405_v8 = vsel %vm2129_vm4, %v6373_v14, %v13529_v12  ;;  %v6406_v60 = vsel %vm2129_vm4, %v6374_v7, %v13527_v2 }
 0x580   : > { %5985 = vrot.lane.b32.xlu0 %v5326_v52, %s8297_s13  ;;  %v6437_v21 = vsel %vm2162_vm5, %v6405_v8, %v5840_v15  ;;  %v5359_v8 = vld [vmem:[#allocation2 + $0xa22] sm:$0xff] }
 0x581   : > { %v5968_v13 = vpop.permute.xlu1 %5967 }
 0x582   : > { %v7937_v33 = vpop.f32.mrb[54].mxu0  ;;  %v6469_v47 = vsel %vm2195_vm6, %v6437_v21, %v5968_v13 }
 0x583   : > { %5731 = vrot.lane.b32.xlu1 %v5262_v43, %s8294_s10  ;;  %v4717_v32 = vadd.f32 %v7937_v33, %v12119_v0  ;;  %v4711_v16 = vpop.f32.mrb[55].mxu0  ;;  %v5970_v6 = vpop.permute.xlu0 %5969  ;;  %v5294_v33 = vld [vmem:[#allocation2 + $0x644] sm:$0xff] }
 0x584   : > { %v4712_v10 = vadd.f32 %v12119_v0, %v4711_v16  ;;  %5733 = vrot.lane.b32.xlu0 %v5263_v31, %s8294_s10 }
 0x585   : > { %v12382_v53 = vpop.permute.xlu1 %5715  ;;  %v4783_v61 = vmax.f32 %v4717_v32, 0.0  ;;  %v6438_v32 = vsel %vm2162_vm5, %v6406_v60, %v5842_v35  ;;  %v5265_v60 = vld [vmem:[#allocation2 + $0x660] sm:$0xff] }
 0x586   : > { %v4782_v40 = vmax.f32 %v4712_v10, 0.0  ;;  %v6470_v13 = vsel %vm2195_vm6, %v6438_v32, %v5970_v6  ;;  %v5232_v10 = vld [vmem:[#allocation2 + $0x28c] sm:$0xff] }
 0x587   : > { %6111 = vrot.lane.b32.xlu1 %v5357_v23, %s8298_s14  ;;  %v12403_v55 = vpop.permute.xlu0 %5717 }
 0x588   : > { %7985 = vmatprep.mubr.msk.f32.mxu1 %vm2063_vm2, %v4782_v40  ;;  %6239 = vrot.lane.b32.xlu0 %v5389_v50, %s8299_s28 }
 0x589   : > { %v6096_v28 = vpop.permute.xlu1 %6095  ;;  %7986 = vmatmul.mubr.msk.f32.gmra.mrb[22].mxu1 %vm2063_vm2, %v4783_v61 }
 0x58a   : > { %v6501_v12 = vsel %vm2228_vm7, %v6469_v47, %v6096_v28  ;;  %v5327_v28 = vld [vmem:[#allocation2 + $0xa10] sm:$0xff] }
 0x58b   : > { %6113 = vrot.lane.b32.xlu1 %v5358_v62, %s8298_s14  ;;  %v6224_v15 = vpop.permute.xlu0 %6223  ;;  %v5201_v62 = vld [vmem:[#allocation2 + $0x282] sm:$0xff] }
 0x58c   : > { %v6533_v16 = vsel %vm2261_vm8, %v6501_v12, %v6224_v15  ;;  %5859 = vrot.lane.b32.xlu0 %v5294_v33, %s8296_s12 }
 0x58d   : > { %v6098_v56 = vpop.permute.xlu1 %6097  ;;  %8025 = vmatprep.mubr.msk.f32.mxu0 %vm2304_vm9, %v6533_v16 }
 0x58e   : > { %v7940_v9 = vpop.f32.mrb[56].mxu0  ;;  %v6502_v2 = vsel %vm2228_vm7, %v6470_v13, %v6098_v56  ;;  %v5233_v56 = vld [vmem:[#allocation2 + $0x294] sm:$0xff] }
 0x58f   : > { %5479 = vrot.lane.b32.xlu1 %v5200_v20, %s8292_s8  ;;  %v4727_v37 = vadd.f32 %v7940_v9, %v12119_v0  ;;  %v4721_v43 = vpop.f32.mrb[57].mxu0  ;;  %v5844_v35 = vpop.permute.xlu0 %5843 }
 0x590   : > { %v4722_v23 = vadd.f32 %v12119_v0, %v4721_v43  ;;  %5481 = vrot.lane.b32.xlu0 %v5201_v62, %s8292_s8  ;;  %v5360_v43 = vld [vmem:[#allocation2 + $0xa2a] sm:$0xff] }
 0x591   : > { %v12414_v38 = vpop.permute.xlu1 %5463  ;;  %v4785_v46 = vmax.f32 %v4727_v37, 0.0  ;;  %v5158_v37 = vld [vmem:[#allocation2 + $0x150] sm:$0xff] }
 0x592   : > { %v4784_v52 = vmax.f32 %v4722_v23, 0.0  ;;  %v6311_v12 = vsel %vm279_vm0, %v5158_v37, %v12353_v42  ;;  %v5159_v23 = vld [vmem:[#allocation2 + $0x158] sm:$0xff]  ;;  %v5329_v37 = vld [vmem:[#allocation2 + $0xa48] sm:$0xff] }
 0x593   : > { %6241 = vrot.lane.b32.xlu1 %v5390_v36, %s8299_s28  ;;  %v12435_v29 = vpop.permute.xlu0 %5465  ;;  %v5328_v36 = vld [vmem:[#allocation2 + $0xa18] sm:$0xff]  ;;  %v6343_v32 = vsel %vm2063_vm2, %v6311_v12, %v12371_v22  ;;  %v5266_v12 = vld [vmem:[#allocation2 + $0x690] sm:$0xff] }
 0x594   : > { %7988 = vmatprep.mubr.msk.f32.mxu1 %vm2063_vm2, %v4784_v52  ;;  %5861 = vrot.lane.b32.xlu0 %v5295_v4, %s8296_s12  ;;  %v6375_v16 = vsel %vm2096_vm3, %v6343_v32, %v12382_v53  ;;  %v5202_v52 = vld [vmem:[#allocation2 + $0x2b2] sm:$0xff] }
 0x595   : > { %v6226_v40 = vpop.permute.xlu1 %6225  ;;  %7989 = vmatmul.mubr.msk.f32.gmra.mrb[24].mxu1 %vm2063_vm2, %v4785_v46 }
 0x596   : > { %v6534_v61 = vsel %vm2261_vm8, %v6502_v2, %v6226_v40  ;;  %v5391_v40 = vld [vmem:[#allocation2 + $0xa34] sm:$0xff] }
 0x597   : > { %5607 = vrot.lane.b32.xlu1 %v5232_v10, %s8293_s9  ;;  %8026 = vmatmul.mubr.msk.f32.gmra.mrb[72].mxu0 %vm2304_vm9, %v6534_v61  ;;  %v5846_v34 = vpop.permute.xlu0 %5845  ;;  %v6312_v10 = vsel %vm279_vm0, %v5159_v23, %v12373_v17 }
 0x598   : > { %5609 = vrot.lane.b32.xlu0 %v5233_v56, %s8293_s9  ;;  %v6344_v22 = vsel %vm2063_vm2, %v6312_v10, %v12385_v58 }
 0x599   : > { %v12433_v31 = vpop.permute.xlu1 %5591  ;;  %v6376_v53 = vsel %vm2096_vm3, %v6344_v22, %v12403_v55 }
 0x59a   : > { %v7943_v6 = vpop.f32.mrb[58].mxu0  ;;  %v6408_v55 = vsel %vm2129_vm4, %v6376_v53, %v13537_v59  ;;  %v5234_v59 = vld [vmem:[#allocation2 + $0x2c4] sm:$0xff] }
 0x59b   : > { %5987 = vrot.lane.b32.xlu1 %v5327_v28, %s8297_s13  ;;  %v4737_v14 = vadd.f32 %v7943_v6, %v12119_v0  ;;  %v4731_v20 = vpop.f32.mrb[59].mxu0  ;;  %v12445_v47 = vpop.permute.xlu0 %5593  ;;  %v6407_v28 = vsel %vm2129_vm4, %v6375_v16, %v13539_v18  ;;  %v5392_v6 = vld [vmem:[#allocation2 + $0xa3c] sm:$0xff] }
 0x59c   : > { %v4732_v50 = vadd.f32 %v12119_v0, %v4731_v20  ;;  %5989 = vrot.lane.b32.xlu0 %v5328_v36, %s8297_s13  ;;  %v6439_v17 = vsel %vm2162_vm5, %v6407_v28, %v5844_v35  ;;  %v5296_v20 = vld [vmem:[#allocation2 + $0x67c] sm:$0xff]  ;;  %v6440_v35 = vsel %vm2162_vm5, %v6408_v55, %v5846_v34 }
 0x59d   : > { %v5972_v51 = vpop.permute.xlu1 %5971  ;;  %v4787_v21 = vmax.f32 %v4737_v14, 0.0  ;;  %v5361_v16 = vld [vmem:[#allocation2 + $0xa5a] sm:$0xff] }
 0x59e   : > { %v4786_v7 = vmax.f32 %v4732_v50, 0.0  ;;  %v6471_v58 = vsel %vm2195_vm6, %v6439_v17, %v5972_v51  ;;  %v5267_v28 = vld [vmem:[#allocation2 + $0x698] sm:$0xff] }
 0x59f   : > { %5735 = vrot.lane.b32.xlu1 %v5264_v11, %s8294_s10  ;;  %v5974_v15 = vpop.permute.xlu0 %5973 }
 0x5a0   : > { %7991 = vmatprep.mubr.msk.f32.mxu1 %vm2063_vm2, %v4786_v7  ;;  %5737 = vrot.lane.b32.xlu0 %v5265_v60, %s8294_s10  ;;  %v6472_v51 = vsel %vm2195_vm6, %v6440_v35, %v5974_v15  ;;  %v5235_v15 = vld [vmem:[#allocation2 + $0x2cc] sm:$0xff] }
 0x5a1   : > { %v12443_v9 = vpop.permute.xlu1 %5719  ;;  %7992 = vmatmul.mubr.msk.f32.gmra.mrb[26].mxu1 %vm2063_vm2, %v4787_v21  ;;  %v5203_v21 = vld [vmem:[#allocation2 + $0x2ba] sm:$0xff] }
 0x5a3   : > { %6115 = vrot.lane.b32.xlu1 %v5359_v8, %s8298_s14  ;;  %v12465_v61 = vpop.permute.xlu0 %5721 }
 0x5a4   : > { %6243 = vrot.lane.b32.xlu0 %v5391_v40, %s8299_s28 }
 0x5a5   : > { %v6100_v33 = vpop.permute.xlu1 %6099 }
 0x5a6   : > { %v7946_v13 = vpop.f32.mrb[60].mxu0  ;;  %v6503_v56 = vsel %vm2228_vm7, %v6471_v58, %v6100_v33  ;;  %v5297_v33 = vld [vmem:[#allocation2 + $0x684] sm:$0xff] }
 0x5a7   : > { %6117 = vrot.lane.b32.xlu1 %v5360_v43, %s8298_s14  ;;  %v4747_v2 = vadd.f32 %v7946_v13, %v12119_v0  ;;  %v4741_v42 = vpop.f32.mrb[61].mxu0  ;;  %v6228_v18 = vpop.permute.xlu0 %6227 }
 0x5a8   : > { %v4742_v62 = vadd.f32 %v12119_v0, %v4741_v42  ;;  %v6535_v50 = vsel %vm2261_vm8, %v6503_v56, %v6228_v18  ;;  %5863 = vrot.lane.b32.xlu0 %v5296_v20, %s8296_s12  ;;  %v5160_v42 = vld [vmem:[#allocation2 + $0x188] sm:$0xff] }
 0x5a9   : > { %v6102_v46 = vpop.permute.xlu1 %6101  ;;  %v4789_v11 = vmax.f32 %v4747_v2, 0.0  ;;  %8028 = vmatprep.mubr.msk.f32.mxu0 %vm2304_vm9, %v6535_v50  ;;  %v6313_v17 = vsel %vm279_vm0, %v5160_v42, %v12414_v38  ;;  %v5393_v18 = vld [vmem:[#allocation2 + $0xa6c] sm:$0xff] }
 0x5aa   : > { %v4788_v4 = vmax.f32 %v4742_v62, 0.0  ;;  %v6504_v7 = vsel %vm2228_vm7, %v6472_v51, %v6102_v46  ;;  %v5362_v62 = vld [vmem:[#allocation2 + $0xa62] sm:$0xff] }
 0x5ab   : > { %5483 = vrot.lane.b32.xlu1 %v5202_v52, %s8292_s8  ;;  %v5848_v34 = vpop.permute.xlu0 %5847  ;;  %v5330_v52 = vld [vmem:[#allocation2 + $0xa50] sm:$0xff]  ;;  %v5268_v42 = vld [vmem:[#allocation2 + $0x6c8] sm:$0xff] }
 0x5ac   : > { %7994 = vmatprep.mubr.msk.f32.mxu1 %vm2063_vm2, %v4788_v4  ;;  %5485 = vrot.lane.b32.xlu0 %v5203_v21, %s8292_s8  ;;  %v5161_v4 = vld [vmem:[#allocation2 + $0x190] sm:$0xff] }
 0x5ad   : > { %v12475_v14 = vpop.permute.xlu1 %5467  ;;  %7995 = vmatmul.mubr.msk.f32.gmra.mrb[28].mxu1 %vm2063_vm2, %v4789_v11  ;;  %v6345_v11 = vsel %vm2063_vm2, %v6313_v17, %v12433_v31  ;;  %v6314_v38 = vsel %vm279_vm0, %v5161_v4, %v12435_v29  ;;  %v5394_v29 = vld [vmem:[#allocation2 + $0xa74] sm:$0xff]  ;;  %v5162_v4 = vld [vmem:[#allocation2 + $0x1c0] sm:$0xff] }
 0x5ae   : > { %v6377_v55 = vsel %vm2096_vm3, %v6345_v11, %v12443_v9  ;;  %v6346_v31 = vsel %vm2063_vm2, %v6314_v38, %v12445_v47  ;;  %v5298_v47 = vld [vmem:[#allocation2 + $0x6b4] sm:$0xff] }
 0x5af   : > { %6245 = vrot.lane.b32.xlu1 %v5392_v6, %s8299_s28  ;;  %v12495_v60 = vpop.permute.xlu0 %5469  ;;  %v6378_v9 = vsel %vm2096_vm3, %v6346_v31, %v12465_v61  ;;  %v6409_v50 = vsel %vm2129_vm4, %v6377_v55, %v13549_v30  ;;  %v6315_v55 = vsel %vm279_vm0, %v5162_v4, %v12475_v14  ;;  %v5270_v4 = vld [vmem:[#allocation2 + $0x700] sm:$0xff] }
 0x5b0   : > { %5865 = vrot.lane.b32.xlu0 %v5297_v33, %s8296_s12  ;;  %v6441_v51 = vsel %vm2162_vm5, %v6409_v50, %v5848_v34 }
 0x5b1   : > { %v6230_v8 = vpop.permute.xlu1 %6229 }
 0x5b2   : > { %v6536_v36 = vsel %vm2261_vm8, %v6504_v7, %v6230_v8  ;;  %v6410_v8 = vsel %vm2129_vm4, %v6378_v9, %v13547_v54  ;;  %v5205_v54 = vld [vmem:[#allocation2 + $0x2f2] sm:$0xff] }
 0x5b3   : > { %5611 = vrot.lane.b32.xlu1 %v5234_v59, %s8293_s9  ;;  %8029 = vmatmul.mubr.msk.f32.gmra.mrb[74].mxu0 %vm2304_vm9, %v6536_v36  ;;  %v5850_v32 = vpop.permute.xlu0 %5849 }
 0x5b4   : > { %5613 = vrot.lane.b32.xlu0 %v5235_v15, %s8293_s9  ;;  %v6442_v30 = vsel %vm2162_vm5, %v6410_v8, %v5850_v32  ;;  %v5331_v32 = vld [vmem:[#allocation2 + $0xa80] sm:$0xff] }
 0x5b5   : > { %v12493_v43 = vpop.permute.xlu1 %5595 }
 0x5b7   : > { %5991 = vrot.lane.b32.xlu1 %v5329_v37, %s8297_s13  ;;  %v12503_v10 = vpop.permute.xlu0 %5597  ;;  %v5236_v37 = vld [vmem:[#allocation2 + $0x2fc] sm:$0xff] }
 0x5b8   : > { %5993 = vrot.lane.b32.xlu0 %v5330_v52, %s8297_s13  ;;  %v5299_v52 = vld [vmem:[#allocation2 + $0x6bc] sm:$0xff] }
 0x5b9   : > { %v5976_v23 = vpop.permute.xlu1 %5975 }
 0x5ba   : > { %v6473_v59 = vsel %vm2195_vm6, %v6441_v51, %v5976_v23 }
 0x5bb   : > { %5739 = vrot.lane.b32.xlu1 %v5266_v12, %s8294_s10  ;;  %v5978_v58 = vpop.permute.xlu0 %5977 }
 0x5bc   : > { %5741 = vrot.lane.b32.xlu0 %v5267_v28, %s8294_s10  ;;  %v6474_v34 = vsel %vm2195_vm6, %v6442_v30, %v5978_v58  ;;  %v5332_v28 = vld [vmem:[#allocation2 + $0xa88] sm:$0xff]  ;;  %v5364_v58 = vld [vmem:[#allocation2 + $0xa9a] sm:$0xff] }
 0x5bd   : > { %v12501_v13 = vpop.permute.xlu1 %5723 }
 0x5be   : > { %v7949_v2 = vpop.f32.mrb[32].mxu1 }
 0x5bf   : > { %v4757_v46 = vadd.f32 %v7949_v2, %v12119_v0  ;;  %6119 = vrot.lane.b32.xlu1 %v5361_v16, %s8298_s14  ;;  %v4751_v40 = vpop.f32.mrb[33].mxu1  ;;  %v12523_v35 = vpop.permute.xlu0 %5725 }
 0x5c0   : > { %v4752_v22 = vadd.f32 %v12119_v0, %v4751_v40  ;;  %v5204_v0 = vld [vmem:[#allocation2 + $0x2ea] sm:$0xff]  ;;  %6247 = vrot.lane.b32.xlu0 %v5393_v18, %s8299_s28  ;;  %v6347_v18 = vsel %vm2063_vm2, %v6315_v55, %v12493_v43 }
 0x5c1   : > { %v6104_v53 = vpop.permute.xlu1 %6103  ;;  %v4791_v20 = vmax.f32 %v4757_v46, 0.0  ;;  %v5237_v40 = vld [vmem:[#allocation2 + $0x304] sm:$0xff]  ;;  %v6379_v50 = vsel %vm2096_vm3, %v6347_v18, %v12501_v13  ;;  %v5164_v18 = vld [vmem:[#allocation2 + $0x1f8] sm:$0xff] }
 0x5c2   : > { %v4790_v6 = vmax.f32 %v4752_v22, 0.0  ;;  %v6505_v61 = vsel %vm2228_vm7, %v6473_v59, %v6104_v53  ;;  %v6411_v13 = vsel %vm2129_vm4, %v6379_v50, %v13559_v3  ;;  %v5365_v55 = vld [vmem:[#allocation2 + $0xaca] sm:$0xff] }
 0x5c3   : > { %6121 = vrot.lane.b32.xlu1 %v5362_v62, %s8298_s14  ;;  %v6232_v21 = vpop.permute.xlu0 %6231  ;;  %v5363_v62 = vld [vmem:[#allocation2 + $0xa92] sm:$0xff]  ;;  %v5271_v50 = vld [vmem:[#allocation2 + $0x708] sm:$0xff] }
 0x5c4   : > { %7997 = vmatprep.mubr.msk.f32.mxu1 %vm2063_vm2, %v4790_v6  ;;  %v6537_v36 = vsel %vm2261_vm8, %v6505_v61, %v6232_v21  ;;  %5867 = vrot.lane.b32.xlu0 %v5298_v47, %s8296_s12  ;;  %v12566_v6 = vld [vmem:[%s13009_s4 + $0x2] ss:$0 sm:$0xff]  ;;  %v5395_v47 = vld [vmem:[#allocation2 + $0xaa4] sm:$0xff] }
 0x5c5   : > { %v6106_v56 = vpop.permute.xlu1 %6105  ;;  %7998 = vmatmul.mubr.msk.f32.gmra.mrb[30].mxu1 %vm2063_vm2, %v4791_v20  ;;  %8031 = vmatprep.mubr.msk.f32.mxu0 %vm2304_vm9, %v6537_v36  ;;  %v5269_v20 = vld [vmem:[#allocation2 + $0x6d0] sm:$0xff] }
 0x5c6   : > { %v6506_v33 = vsel %vm2228_vm7, %v6474_v34, %v6106_v56 }
 0x5c7   : > { %5487 = vrot.lane.b32.xlu1 %v5204_v0, %s8292_s8  ;;  %v5852_v15 = vpop.permute.xlu0 %5851  ;;  %v5163_v0 = vld [vmem:[#allocation2 + $0x1c8] sm:$0xff] }
 0x5c8   : > { %5489 = vrot.lane.b32.xlu0 %v5205_v54, %s8292_s8  ;;  %v6316_v14 = vsel %vm279_vm0, %v5163_v0, %v12495_v60  ;;  %v6443_v36 = vsel %vm2162_vm5, %v6411_v13, %v5852_v15  ;;  %v5396_v60 = vld [vmem:[#allocation2 + $0xaac] sm:$0xff]  ;;  %v5238_v15 = vld [vmem:[#allocation2 + $0x334] sm:$0xff] }
 0x5c9   : > { %v12533_v7 = vpop.permute.xlu1 %5471  ;;  %v6348_v43 = vsel %vm2063_vm2, %v6316_v14, %v12503_v10 }
 0x5ca   : > { %v6380_v21 = vsel %vm2096_vm3, %v6348_v43, %v12523_v35  ;;  %v5300_v35 = vld [vmem:[#allocation2 + $0x6ec] sm:$0xff] }
 0x5cb   : > { %6249 = vrot.lane.b32.xlu1 %v5394_v29, %s8299_s28  ;;  %v12551_v2 = vpop.permute.xlu0 %5473  ;;  %v5206_v29 = vld [vmem:[#allocation2 + $0x322] sm:$0xff]  ;;  %v6412_v3 = vsel %vm2129_vm4, %v6380_v21, %v13557_v27  ;;  %v5207_v27 = vld [vmem:[#allocation2 + $0x32a] sm:$0xff] }
 0x5cc   : > { %5869 = vrot.lane.b32.xlu0 %v5299_v52, %s8296_s12 }
 0x5cd   : > { %v6234_v12 = vpop.permute.xlu1 %6233 }
 0x5ce   : > { %v6538_v23 = vsel %vm2261_vm8, %v6506_v33, %v6234_v12 }
 0x5cf   : > { %5615 = vrot.lane.b32.xlu1 %v5236_v37, %s8293_s9  ;;  %8032 = vmatmul.mubr.msk.f32.gmra.mrb[76].mxu0 %vm2304_vm9, %v6538_v23  ;;  %v5854_v22 = vpop.permute.xlu0 %5853 }
 0x5d0   : > { %5617 = vrot.lane.b32.xlu0 %v5237_v40, %s8293_s9  ;;  %v6444_v12 = vsel %vm2162_vm5, %v6412_v3, %v5854_v22  ;;  %v5333_v40 = vld [vmem:[#allocation2 + $0xab8] sm:$0xff] }
 0x5d1   : > { %v12549_v16 = vpop.permute.xlu1 %5599 }
 0x5d3   : > { %5995 = vrot.lane.b32.xlu1 %v5331_v32, %s8297_s13  ;;  %v12559_v17 = vpop.permute.xlu0 %5601 }
 0x5d4   : > { %5997 = vrot.lane.b32.xlu0 %v5332_v28, %s8297_s13 }
 0x5d5   : > { %v5980_v46 = vpop.permute.xlu1 %5979 }
 0x5d6   : > { %v6475_v10 = vsel %vm2195_vm6, %v6443_v36, %v5980_v46 }
 0x5d7   : > { %5743 = vrot.lane.b32.xlu1 %v5268_v42, %s8294_s10  ;;  %v5982_v38 = vpop.permute.xlu0 %5981 }
 0x5d8   : > { %5745 = vrot.lane.b32.xlu0 %v5269_v20, %s8294_s10  ;;  %v6476_v23 = vsel %vm2195_vm6, %v6444_v12, %v5982_v38  ;;  %v5334_v38 = vld [vmem:[#allocation2 + $0xac0] sm:$0xff] }
 0x5d9   : > { %v12557_v53 = vpop.permute.xlu1 %5727 }
 0x5db   : > { %6123 = vrot.lane.b32.xlu1 %v5363_v62, %s8298_s14  ;;  %v12582_v61 = vpop.permute.xlu0 %5729  ;;  %v5301_v62 = vld [vmem:[#allocation2 + $0x6f4] sm:$0xff] }
 0x5dc   : > { %6251 = vrot.lane.b32.xlu0 %v5395_v47, %s8299_s28 }
 0x5dd   : > { %v6108_v11 = vpop.permute.xlu1 %6107 }
 0x5de   : > { %v8012_v56 = vpop.f32.mrb[62].mxu0  ;;  %v6507_v37 = vsel %vm2228_vm7, %v6475_v10, %v6108_v11  ;;  %v5239_v11 = vld [vmem:[#allocation2 + $0x33c] sm:$0xff] }
 0x5df   : > { %v6736_v31 = vadd.f32 %v8012_v56, %v12566_v6  ;;  %6125 = vrot.lane.b32.xlu1 %v5364_v58, %s8298_s14  ;;  %v6730_v9 = vpop.f32.mrb[63].mxu0  ;;  %v6236_v33 = vpop.permute.xlu0 %6235 }
 0x5e0   : > { %v6731_v51 = vadd.f32 %v12566_v6, %v6730_v9  ;;  %v6539_v54 = vsel %vm2261_vm8, %v6507_v37, %v6236_v33  ;;  %5871 = vrot.lane.b32.xlu0 %v5300_v35, %s8296_s12 }
 0x5e1   : > { %v6110_v59 = vpop.permute.xlu1 %6109  ;;  %v6890_v30 = vmax.f32 %v6736_v31, 0.0  ;;  %8034 = vmatprep.mubr.msk.f32.mxu0 %vm2304_vm9, %v6539_v54  ;;  %v5366_v31 = vld [vmem:[#allocation2 + $0xad2] sm:$0xff] }
 0x5e2   : > { %v6889_v8 = vmax.f32 %v6731_v51, 0.0  ;;  %v6508_v32 = vsel %vm2228_vm7, %v6476_v23, %v6110_v59  ;;  %v6317_v51 = vsel %vm279_vm0, %v5164_v18, %v12533_v7  ;;  %v5241_v18 = vld [vmem:[#allocation2 + $0x374] sm:$0xff] }
 0x5e3   : > { %5491 = vrot.lane.b32.xlu1 %v5206_v29, %s8292_s8  ;;  %v5856_v46 = vpop.permute.xlu0 %5855  ;;  %v5165_v29 = vld [vmem:[#allocation2 + $0x200] sm:$0xff]  ;;  %v6349_v47 = vsel %vm2063_vm2, %v6317_v51, %v12549_v16  ;;  %v5336_v51 = vld [vmem:[#allocation2 + $0xaf8] sm:$0xff] }
 0x5e4   : > { %8060 = vmatprep.mubr.msk.f32.mxu1 %vm2063_vm2, %v6889_v8  ;;  %5493 = vrot.lane.b32.xlu0 %v5207_v27, %s8292_s8  ;;  %v6381_v21 = vsel %vm2096_vm3, %v6349_v47, %v12557_v53  ;;  %v6318_v7 = vsel %vm279_vm0, %v5165_v29, %v12551_v2  ;;  %v5398_v2 = vld [vmem:[#allocation2 + $0xae4] sm:$0xff]  ;;  %v5240_v27 = vld [vmem:[#allocation2 + $0x36c] sm:$0xff] }
 0x5e5   : > { %v12593_v34 = vpop.permute.xlu1 %5475  ;;  %8061 = vmatmul.mubr.msk.f32.vlgmr.msra.gmra.mrb[0].mxu1 %vm2063_vm2, %v6890_v30  ;;  %v5208_v30 = vld [vmem:[#allocation2 + $0x35a] sm:$0xff]  ;;  %v6350_v16 = vsel %vm2063_vm2, %v6318_v7, %v12559_v17  ;;  %v6413_v53 = vsel %vm2129_vm4, %v6381_v21, %v13571_v44 }
 0x5e6   : > { %v6382_v3 = vsel %vm2096_vm3, %v6350_v16, %v12582_v61  ;;  %v6445_v33 = vsel %vm2162_vm5, %v6413_v53, %v5856_v46  ;;  %v5302_v61 = vld [vmem:[#allocation2 + $0x724] sm:$0xff]  ;;  %v5167_v21 = vld [vmem:[#allocation2 + $0x238] sm:$0xff] }
 0x5e7   : > { %6253 = vrot.lane.b32.xlu1 %v5396_v60, %s8299_s28  ;;  %v12612_v28 = vpop.permute.xlu0 %5477  ;;  %v5397_v60 = vld [vmem:[#allocation2 + $0xadc] sm:$0xff]  ;;  %v6414_v44 = vsel %vm2129_vm4, %v6382_v3, %v13569_v48 }
 0x5e8   : > { %5873 = vrot.lane.b32.xlu0 %v5301_v62, %s8296_s12  ;;  %v5209_v48 = vld [vmem:[#allocation2 + $0x362] sm:$0xff] }
 0x5e9   : > { %v6238_v52 = vpop.permute.xlu1 %6237 }
 0x5ea   : > { %v6540_v42 = vsel %vm2261_vm8, %v6508_v32, %v6238_v52 }
 0x5eb   : > { %5619 = vrot.lane.b32.xlu1 %v5238_v15, %s8293_s9  ;;  %8035 = vmatmul.mubr.msk.f32.gmra.mrb[78].mxu0 %vm2304_vm9, %v6540_v42  ;;  %v5858_v20 = vpop.permute.xlu0 %5857 }
 0x5ec   : > { %5621 = vrot.lane.b32.xlu0 %v5239_v11, %s8293_s9  ;;  %v6446_v15 = vsel %vm2162_vm5, %v6414_v44, %v5858_v20  ;;  %v5303_v11 = vld [vmem:[#allocation2 + $0x72c] sm:$0xff]  ;;  %v5305_v44 = vld [vmem:[#allocation2 + $0x764] sm:$0xff] }
 0x5ed   : > { %v12610_v22 = vpop.permute.xlu1 %5603 }
 0x5ef   : > { %5999 = vrot.lane.b32.xlu1 %v5333_v40, %s8297_s13  ;;  %v12620_v56 = vpop.permute.xlu0 %5605 }
 0x5f0   : > { %6001 = vrot.lane.b32.xlu0 %v5334_v38, %s8297_s13 }
 0x5f1   : > { %v5984_v58 = vpop.permute.xlu1 %5983 }
 0x5f2   : > { %v6477_v17 = vsel %vm2195_vm6, %v6445_v33, %v5984_v58 }
 0x5f3   : > { %5747 = vrot.lane.b32.xlu1 %v5270_v4, %s8294_s10  ;;  %v5986_v14 = vpop.permute.xlu0 %5985  ;;  %v5335_v4 = vld [vmem:[#allocation2 + $0xaf0] sm:$0xff] }
 0x5f4   : > { %5749 = vrot.lane.b32.xlu0 %v5271_v50, %s8294_s10  ;;  %v6478_v52 = vsel %vm2195_vm6, %v6446_v15, %v5986_v14  ;;  %v5166_v14 = vld [vmem:[#allocation2 + $0x230] sm:$0xff] }
 0x5f5   : > { %v12618_v0 = vpop.permute.xlu1 %5731 }
 0x5f7   : > { %6127 = vrot.lane.b32.xlu1 %v5365_v55, %s8298_s14  ;;  %v12638_v35 = vpop.permute.xlu0 %5733  ;;  %v5272_v55 = vld [vmem:[#allocation2 + $0x738] sm:$0xff] }
 0x5f8   : > { %6255 = vrot.lane.b32.xlu0 %v5397_v60, %s8299_s28 }
 0x5f9   : > { %v6112_v9 = vpop.permute.xlu1 %6111 }
 0x5fa   : > { %v8015_v59 = vpop.f32.mrb[64].mxu0  ;;  %v6509_v54 = vsel %vm2228_vm7, %v6477_v17, %v6112_v9  ;;  %v5367_v9 = vld [vmem:[#allocation2 + $0xb02] sm:$0xff] }
 0x5fb   : > { %v6746_v43 = vadd.f32 %v8015_v59, %v12566_v6  ;;  %6129 = vrot.lane.b32.xlu1 %v5366_v31, %s8298_s14  ;;  %v6740_v8 = vpop.f32.mrb[65].mxu0  ;;  %v6240_v23 = vpop.permute.xlu0 %6239  ;;  %v5368_v59 = vld [vmem:[#allocation2 + $0xb0a] sm:$0xff] }
 0x5fc   : > { %v6741_v13 = vadd.f32 %v12566_v6, %v6740_v8  ;;  %v6541_v32 = vsel %vm2261_vm8, %v6509_v54, %v6240_v23  ;;  %5875 = vrot.lane.b32.xlu0 %v5302_v61, %s8296_s12  ;;  %v6319_v8 = vsel %vm279_vm0, %v5166_v14, %v12593_v34  ;;  %v6320_v34 = vsel %vm279_vm0, %v5167_v21, %v12612_v28  ;;  %v5400_v23 = vld [vmem:[#allocation2 + $0xb1c] sm:$0xff]  ;;  %v5169_v21 = vld [vmem:[#allocation2 + $0x270] sm:$0xff] }
 0x5fd   : > { %v6114_v36 = vpop.permute.xlu1 %6113  ;;  %v6892_v37 = vmax.f32 %v6746_v43, 0.0  ;;  %8037 = vmatprep.mubr.msk.f32.mxu0 %vm2304_vm9, %v6541_v32  ;;  %v5273_v43 = vld [vmem:[#allocation2 + $0x740] sm:$0xff] }
 0x5fe   : > { %v6891_v10 = vmax.f32 %v6741_v13, 0.0  ;;  %v6510_v42 = vsel %vm2228_vm7, %v6478_v52, %v6114_v36 }
 0x5ff   : > { %5495 = vrot.lane.b32.xlu1 %v5208_v30, %s8292_s8  ;;  %v5860_v62 = vpop.permute.xlu0 %5859  ;;  %v6351_v30 = vsel %vm2063_vm2, %v6319_v8, %v12610_v22  ;;  %v6352_v22 = vsel %vm2063_vm2, %v6320_v34, %v12620_v56 }
 0x600   : > { %8063 = vmatprep.mubr.msk.f32.mxu1 %vm2063_vm2, %v6891_v10  ;;  %5497 = vrot.lane.b32.xlu0 %v5209_v48, %s8292_s8  ;;  %v6383_v36 = vsel %vm2096_vm3, %v6351_v30, %v12618_v0  ;;  %v5304_v10 = vld [vmem:[#allocation2 + $0x75c] sm:$0xff]  ;;  %v6384_v0 = vsel %vm2096_vm3, %v6352_v22, %v12638_v35  ;;  %v5337_v48 = vld [vmem:[#allocation2 + $0xb28] sm:$0xff] }
 0x601   : > { %v12649_v12 = vpop.permute.xlu1 %5479  ;;  %8064 = vmatmul.mubr.msk.f32.gmra.mrb[2].mxu1 %vm2063_vm2, %v6892_v37  ;;  %v5399_v37 = vld [vmem:[#allocation2 + $0xb14] sm:$0xff]  ;;  %v6416_v35 = vsel %vm2129_vm4, %v6384_v0, %v13579_v25 }
 0x603   : > { %6257 = vrot.lane.b32.xlu1 %v5398_v2, %s8299_s28  ;;  %v12668_v20 = vpop.permute.xlu0 %5481  ;;  %v6415_v2 = vsel %vm2129_vm4, %v6383_v36, %v13581_v41 }
 0x604   : > { %5877 = vrot.lane.b32.xlu0 %v5303_v11, %s8296_s12  ;;  %v6447_v28 = vsel %vm2162_vm5, %v6415_v2, %v5860_v62  ;;  %v6322_v34 = vsel %vm279_vm0, %v5169_v21, %v12668_v20 }
 0x605   : > { %v6242_v46 = vpop.permute.xlu1 %6241 }
 0x606   : > { %v6542_v40 = vsel %vm2261_vm8, %v6510_v42, %v6242_v46  ;;  %v5338_v42 = vld [vmem:[#allocation2 + $0xb30] sm:$0xff] }
 0x607   : > { %5623 = vrot.lane.b32.xlu1 %v5240_v27, %s8293_s9  ;;  %8038 = vmatmul.mubr.msk.f32.gmra.mrb[80].mxu0 %vm2304_vm9, %v6542_v40  ;;  %v5862_v31 = vpop.permute.xlu0 %5861 }
 0x608   : > { %5625 = vrot.lane.b32.xlu0 %v5241_v18, %s8293_s9  ;;  %v6448_v32 = vsel %vm2162_vm5, %v6416_v35, %v5862_v31  ;;  %v5402_v18 = vld [vmem:[#allocation2 + $0xb54] sm:$0xff] }
 0x609   : > { %v12666_v58 = vpop.permute.xlu1 %5607 }
 0x60b   : > { %6003 = vrot.lane.b32.xlu1 %v5335_v4, %s8297_s13  ;;  %v12676_v29 = vpop.permute.xlu0 %5609  ;;  %v5370_v4 = vld [vmem:[#allocation2 + $0xb42] sm:$0xff] }
 0x60c   : > { %6005 = vrot.lane.b32.xlu0 %v5336_v51, %s8297_s13 }
 0x60d   : > { %v5988_v38 = vpop.permute.xlu1 %5987 }
 0x60e   : > { %v6479_v54 = vsel %vm2195_vm6, %v6447_v28, %v5988_v38 }
 0x60f   : > { %5751 = vrot.lane.b32.xlu1 %v5272_v55, %s8294_s10  ;;  %v5990_v13 = vpop.permute.xlu0 %5989  ;;  %v5369_v55 = vld [vmem:[#allocation2 + $0xb3a] sm:$0xff] }
 0x610   : > { %5753 = vrot.lane.b32.xlu0 %v5273_v43, %s8294_s10  ;;  %v6480_v27 = vsel %vm2195_vm6, %v6448_v32, %v5990_v13 }
 0x611   : > { %v12674_v50 = vpop.permute.xlu1 %5735 }
 0x613   : > { %6131 = vrot.lane.b32.xlu1 %v5367_v9, %s8298_s14  ;;  %v12694_v33 = vpop.permute.xlu0 %5737  ;;  %v5401_v9 = vld [vmem:[#allocation2 + $0xb4c] sm:$0xff] }
 0x614   : > { %6259 = vrot.lane.b32.xlu0 %v5399_v37, %s8299_s28 }
 0x615   : > { %v6116_v47 = vpop.permute.xlu1 %6115 }
 0x616   : > { %v8018_v7 = vpop.f32.mrb[66].mxu0  ;;  %v6511_v41 = vsel %vm2228_vm7, %v6479_v54, %v6116_v47  ;;  %v5168_v47 = vld [vmem:[#allocation2 + $0x268] sm:$0xff] }
 0x617   : > { %6133 = vrot.lane.b32.xlu1 %v5368_v59, %s8298_s14  ;;  %v6756_v60 = vadd.f32 %v8018_v7, %v12566_v6  ;;  %v6750_v16 = vpop.f32.mrb[67].mxu0  ;;  %v6244_v15 = vpop.permute.xlu0 %6243  ;;  %v6321_v8 = vsel %vm279_vm0, %v5168_v47, %v12649_v12  ;;  %v6354_v12 = vsel %vm2063_vm2, %v6322_v34, %v12676_v29 }
 0x618   : > { %v6751_v3 = vadd.f32 %v12566_v6, %v6750_v16  ;;  %v6543_v52 = vsel %vm2261_vm8, %v6511_v41, %v6244_v15  ;;  %6261 = vrot.lane.b32.xlu0 %v5400_v23, %s8299_s28  ;;  %v6353_v7 = vsel %vm2063_vm2, %v6321_v8, %v12666_v58  ;;  %v6386_v58 = vsel %vm2096_vm3, %v6354_v12, %v12694_v33 }
 0x619   : > { %v6118_v53 = vpop.permute.xlu1 %6117  ;;  %v6894_v61 = vmax.f32 %v6756_v60, 0.0  ;;  %8040 = vmatprep.mubr.msk.f32.mxu0 %vm2304_vm9, %v6543_v52  ;;  %v6385_v16 = vsel %vm2096_vm3, %v6353_v7, %v12674_v50  ;;  %v6418_v29 = vsel %vm2129_vm4, %v6386_v58, %v13590_v57 }
 0x61a   : > { %v6893_v17 = vmax.f32 %v6751_v3, 0.0  ;;  %v6512_v25 = vsel %vm2228_vm7, %v6480_v27, %v6118_v53  ;;  %v6417_v22 = vsel %vm2129_vm4, %v6385_v16, %v13592_v45 }
 0x61b   : > { %5879 = vrot.lane.b32.xlu1 %v5304_v10, %s8296_s12  ;;  %v5864_v62 = vpop.permute.xlu0 %5863 }
 0x61c   : > { %8066 = vmatprep.mubr.msk.f32.mxu1 %vm2063_vm2, %v6893_v17  ;;  %6007 = vrot.lane.b32.xlu0 %v5337_v48, %s8297_s13  ;;  %v6449_v50 = vsel %vm2162_vm5, %v6417_v22, %v5864_v62  ;;  %v5171_v48 = vld [vmem:[#allocation2 + $0x2a8] sm:$0xff] }
 0x61d   : > { %v12705_v56 = vpop.permute.xlu1 %5483  ;;  %8067 = vmatmul.mubr.msk.f32.gmra.mrb[4].mxu1 %vm2063_vm2, %v6894_v61 }
 0x61f   : > { %5881 = vrot.lane.b32.xlu1 %v5305_v44, %s8296_s12  ;;  %v12722_v38 = vpop.permute.xlu0 %5485 }
 0x620   : > { %6135 = vrot.lane.b32.xlu0 %v5369_v55, %s8298_s14 }
 0x621   : > { %v6246_v46 = vpop.permute.xlu1 %6245 }
 0x622   : > { %v6544_v40 = vsel %vm2261_vm8, %v6512_v25, %v6246_v46 }
 0x623   : > { %6009 = vrot.lane.b32.xlu1 %v5338_v42, %s8297_s13  ;;  %8041 = vmatmul.mubr.msk.f32.gmra.mrb[82].mxu0 %vm2304_vm9, %v6544_v40  ;;  %v5866_v51 = vpop.permute.xlu0 %5865  ;;  %v5170_v42 = vld [vmem:[#allocation2 + $0x2a0] sm:$0xff]  ;;  %s12872_s13 = scalar_lea.vmem %s13012_s7, %s7572_s27 }
 0x624   : > { %6263 = vrot.lane.b32.xlu0 %v5401_v9, %s8299_s28  ;;  %v6450_v28 = vsel %vm2162_vm5, %v6418_v29, %v5866_v51  ;;  %v6323_v46 = vsel %vm279_vm0, %v5170_v42, %v12705_v56  ;;  %v6324_v51 = vsel %vm279_vm0, %v5171_v48, %v12722_v38 }
 0x625   : > { %v5612_v11 = vpop.permute.xlu1 %5611 }
 0x627   : > { %6137 = vrot.lane.b32.xlu1 %v5370_v4, %s8298_s14  ;;  %v5614_v59 = vpop.permute.xlu0 %5613  ;;  %v6355_v4 = vsel %vm2063_vm2, %v6323_v46, %v5612_v11 }
 0x629   : > { %v5992_v31 = vpop.permute.xlu1 %5991 }
 0x62a   : > { %v6481_v2 = vsel %vm2195_vm6, %v6449_v50, %v5992_v31  ;;  %v5172_v50 = vld [vmem:[#allocation2 + $0x2d8] sm:$0xff] }
 0x62b   : > { %6265 = vrot.lane.b32.xlu1 %v5402_v18, %s8299_s28  ;;  %v5994_v13 = vpop.permute.xlu0 %5993 }
 0x62c   : > { %v6482_v61 = vsel %vm2195_vm6, %v6450_v28, %v5994_v13 }
 0x62d   : > { %v5740_v14 = vpop.permute.xlu1 %5739 }
 0x62e   : > { %v6387_v31 = vsel %vm2096_vm3, %v6355_v4, %v5740_v14 }
 0x62f   : > { %v5742_v37 = vpop.permute.xlu0 %5741  ;;  %v6419_v11 = vsel %vm2129_vm4, %v6387_v31, %v13603_v19 }
 0x631   : > { %v6120_v43 = vpop.permute.xlu1 %6119 }
 0x632   : > { %v8021_v30 = vpop.f32.mrb[68].mxu0  ;;  %v6513_v17 = vsel %vm2228_vm7, %v6481_v2, %v6120_v43  ;;  %v6356_v43 = vsel %vm2063_vm2, %v6324_v51, %v5614_v59 }
 0x633   : > { %v6766_v36 = vadd.f32 %v8021_v30, %v12566_v6  ;;  %v6760_v60 = vpop.f32.mrb[69].mxu0  ;;  %v6248_v33 = vpop.permute.xlu0 %6247  ;;  %v6388_v21 = vsel %vm2096_vm3, %v6356_v43, %v5742_v37 }
 0x634   : > { %v6761_v10 = vadd.f32 %v12566_v6, %v6760_v60  ;;  %v6545_v45 = vsel %vm2261_vm8, %v6513_v17, %v6248_v33  ;;  %v6420_v38 = vsel %vm2129_vm4, %v6388_v21, %v13601_v5  ;;  %v5173_v17 = vld [vmem:[#allocation2 + $0x2e0] sm:$0xff] }
 0x635   : > { %v6122_v3 = vpop.permute.xlu1 %6121  ;;  %v6896_v0 = vmax.f32 %v6766_v36, 0.0  ;;  %8043 = vmatprep.mubr.msk.f32.mxu0 %vm2304_vm9, %v6545_v45 }
 0x636   : > { %v6895_v53 = vmax.f32 %v6761_v10, 0.0  ;;  %v6514_v44 = vsel %vm2228_vm7, %v6482_v61, %v6122_v3 }
 0x637   : > { %v5868_v35 = vpop.permute.xlu0 %5867 }
 0x638   : > { %8069 = vmatprep.mubr.msk.f32.mxu1 %vm2063_vm2, %v6895_v53  ;;  %v6451_v30 = vsel %vm2162_vm5, %v6419_v11, %v5868_v35  ;;  %v5174_v11 = vld [vmem:[#allocation2 + $0x310] sm:$0xff] }
 0x639   : > { %v12747_v20 = vpop.permute.xlu1 %5487  ;;  %8070 = vmatmul.mubr.msk.f32.gmra.mrb[6].mxu1 %vm2063_vm2, %v6896_v0 }
 0x63a   : > { %v6325_v29 = vsel %vm279_vm0, %v5172_v50, %v12747_v20 }
 0x63b   : > { %v5490_v41 = vpop.permute.xlu0 %5489 }
 0x63d   : > { %v6250_v54 = vpop.permute.xlu1 %6249 }
 0x63e   : > { %v6546_v23 = vsel %vm2261_vm8, %v6514_v44, %v6250_v54 }
 0x63f   : > { %8044 = vmatmul.mubr.msk.f32.gmra.mrb[84].mxu0 %vm2304_vm9, %v6546_v23  ;;  %v5870_v32 = vpop.permute.xlu0 %5869  ;;  %v6326_v23 = vsel %vm279_vm0, %v5173_v17, %v5490_v41 }
 0x640   : > { %v6452_v60 = vsel %vm2162_vm5, %v6420_v38, %v5870_v32 }
 0x641   : > { %v5616_v57 = vpop.permute.xlu1 %5615 }
 0x642   : > { %v6357_v28 = vsel %vm2063_vm2, %v6325_v29, %v5616_v57 }
 0x643   : > { %v5618_v27 = vpop.permute.xlu0 %5617 }
 0x644   : > { %v6358_v32 = vsel %vm2063_vm2, %v6326_v23, %v5618_v27  ;;  %v5176_v23 = vld [vmem:[#allocation2 + $0x348] sm:$0xff] }
 0x645   : > { %v5996_v15 = vpop.permute.xlu1 %5995 }
 0x646   : > { %v6483_v14 = vsel %vm2195_vm6, %v6451_v30, %v5996_v15 }
 0x647   : > { %v5998_v40 = vpop.permute.xlu0 %5997 }
 0x648   : > { %v6484_v16 = vsel %vm2195_vm6, %v6452_v60, %v5998_v40 }
 0x649   : > { %v5744_v52 = vpop.permute.xlu1 %5743 }
 0x64a   : > { %v6389_v61 = vsel %vm2096_vm3, %v6357_v28, %v5744_v52 }
 0x64b   : > { %v5746_v56 = vpop.permute.xlu0 %5745 }
 0x64c   : > { %v6390_v20 = vsel %vm2096_vm3, %v6358_v32, %v5746_v56 }
 0x64d   : > { %v6124_v25 = vpop.permute.xlu1 %6123  ;;  %v6422_v40 = vsel %vm2129_vm4, %v6390_v20, %v13611_v49 }
 0x64e   : > { %v8024_v62 = vpop.f32.mrb[70].mxu0  ;;  %v6515_v59 = vsel %vm2228_vm7, %v6483_v14, %v6124_v25  ;;  %v6421_v25 = vsel %vm2129_vm4, %v6389_v61, %v13613_v24  ;;  %v5177_v61 = vld [vmem:[#allocation2 + $0x350] sm:$0xff] }
 0x64f   : > { %v6776_v55 = vadd.f32 %v8024_v62, %v12566_v6  ;;  %v6770_v18 = vpop.f32.mrb[71].mxu0  ;;  %v6252_v36 = vpop.permute.xlu0 %6251 }
 0x650   : > { %v6771_v9 = vadd.f32 %v12566_v6, %v6770_v18  ;;  %v6547_v19 = vsel %vm2261_vm8, %v6515_v59, %v6252_v36  ;;  %v5175_v36 = vld [vmem:[#allocation2 + $0x318] sm:$0xff] }
 0x651   : > { %v6126_v47 = vpop.permute.xlu1 %6125  ;;  %v6898_v13 = vmax.f32 %v6776_v55, 0.0  ;;  %8046 = vmatprep.mubr.msk.f32.mxu0 %vm2304_vm9, %v6547_v19 }
 0x652   : > { %v6897_v8 = vmax.f32 %v6771_v9, 0.0  ;;  %v6516_v10 = vsel %vm2228_vm7, %v6484_v16, %v6126_v47 }
 0x653   : > { %v5872_v12 = vpop.permute.xlu0 %5871 }
 0x654   : > { %8072 = vmatprep.mubr.msk.f32.mxu1 %vm2063_vm2, %v6897_v8  ;;  %v6453_v46 = vsel %vm2162_vm5, %v6421_v25, %v5872_v12 }
 0x655   : > { %v12775_v7 = vpop.permute.xlu1 %5491  ;;  %8073 = vmatmul.mubr.msk.f32.gmra.mrb[8].mxu1 %vm2063_vm2, %v6898_v13 }
 0x656   : > { %v6327_v30 = vsel %vm279_vm0, %v5174_v11, %v12775_v7 }
 0x657   : > { %v5494_v53 = vpop.permute.xlu0 %5493 }
 0x659   : > { %v6254_v34 = vpop.permute.xlu1 %6253 }
 0x65a   : > { %v6548_v3 = vsel %vm2261_vm8, %v6516_v10, %v6254_v34 }
 0x65b   : > { %8047 = vmatmul.mubr.msk.f32.gmra.mrb[86].mxu0 %vm2304_vm9, %v6548_v3  ;;  %v5874_v58 = vpop.permute.xlu0 %5873  ;;  %v6328_v3 = vsel %vm279_vm0, %v5175_v36, %v5494_v53 }
 0x65c   : > { %v6454_v4 = vsel %vm2162_vm5, %v6422_v40, %v5874_v58 }
 0x65d   : > { %v5620_v5 = vpop.permute.xlu1 %5619 }
 0x65e   : > { %v6359_v59 = vsel %vm2063_vm2, %v6327_v30, %v5620_v5 }
 0x65f   : > { %v5622_v0 = vpop.permute.xlu0 %5621 }
 0x660   : > { %v6360_v58 = vsel %vm2063_vm2, %v6328_v3, %v5622_v0 }
 0x661   : > { %v6000_v37 = vpop.permute.xlu1 %5999 }
 0x662   : > { %v6485_v48 = vsel %vm2195_vm6, %v6453_v46, %v6000_v37 }
 0x663   : > { %v6002_v33 = vpop.permute.xlu0 %6001 }
 0x664   : > { %v6486_v55 = vsel %vm2195_vm6, %v6454_v4, %v6002_v33 }
 0x665   : > { %v5748_v22 = vpop.permute.xlu1 %5747 }
 0x666   : > { %v6391_v16 = vsel %vm2096_vm3, %v6359_v59, %v5748_v22 }
 0x667   : > { %v5750_v42 = vpop.permute.xlu0 %5749  ;;  %v6423_v7 = vsel %vm2129_vm4, %v6391_v16, %v13623_v1 }
 0x668   : > { %v6392_v5 = vsel %vm2096_vm3, %v6360_v58, %v5750_v42 }
 0x669   : > { %v6128_v2 = vpop.permute.xlu1 %6127  ;;  %v6424_v0 = vsel %vm2129_vm4, %v6392_v5, %v13621_v39 }
 0x66a   : > { %v8027_v45 = vpop.f32.mrb[72].mxu0  ;;  %v6517_v27 = vsel %vm2228_vm7, %v6485_v48, %v6128_v2 }
 0x66b   : > { %v6786_v44 = vadd.f32 %v8027_v45, %v12566_v6  ;;  %v6780_v54 = vpop.f32.mrb[73].mxu0  ;;  %v6256_v62 = vpop.permute.xlu0 %6255 }
 0x66c   : > { %v6781_v35 = vadd.f32 %v12566_v6, %v6780_v54  ;;  %v6549_v24 = vsel %vm2261_vm8, %v6517_v27, %v6256_v62 }
 0x66d   : > { %v6130_v15 = vpop.permute.xlu1 %6129  ;;  %v6900_v52 = vmax.f32 %v6786_v44, 0.0  ;;  %8049 = vmatprep.mubr.msk.f32.mxu0 %vm2304_vm9, %v6549_v24 }
 0x66e   : > { %v6899_v57 = vmax.f32 %v6781_v35, 0.0  ;;  %v6518_v18 = vsel %vm2228_vm7, %v6486_v55, %v6130_v15 }
 0x66f   : > { %v5876_v51 = vpop.permute.xlu0 %5875 }
 0x670   : > { %8075 = vmatprep.mubr.msk.f32.mxu1 %vm2063_vm2, %v6899_v57  ;;  %v6455_v2 = vsel %vm2162_vm5, %v6423_v7, %v5876_v51 }
 0x671   : > { %v5496_v41 = vpop.permute.xlu1 %5495  ;;  %8076 = vmatmul.mubr.msk.f32.gmra.mrb[10].mxu1 %vm2063_vm2, %v6900_v52 }
 0x672   : > { %v6329_v32 = vsel %vm279_vm0, %v5176_v23, %v5496_v41 }
 0x673   : > { %v5498_v47 = vpop.permute.xlu0 %5497 }
 0x674   : > { %v6330_v39 = vsel %vm279_vm0, %v5177_v61, %v5498_v47 }
 0x675   : > { %v6258_v31 = vpop.permute.xlu1 %6257 }
 0x676   : > { %v6550_v9 = vsel %vm2261_vm8, %v6518_v18, %v6258_v31 }
 0x677   : > { %8050 = vmatmul.mubr.msk.f32.gmra.mrb[88].mxu0 %vm2304_vm9, %v6550_v9  ;;  %v5878_v8 = vpop.permute.xlu0 %5877 }
 0x678   : > { %v6456_v33 = vsel %vm2162_vm5, %v6424_v0, %v5878_v8 }
 0x679   : > { %v5624_v49 = vpop.permute.xlu1 %5623 }
 0x67a   : > { %v6361_v25 = vsel %vm2063_vm2, %v6329_v32, %v5624_v49 }
 0x67b   : > { %v5626_v21 = vpop.permute.xlu0 %5625 }
 0x67c   : > { %v6362_v42 = vsel %vm2063_vm2, %v6330_v39, %v5626_v21  ;;  %v12865_v21 = vld [vmem:[%s13011_s6] ss:$0 sm:$0xff] }
 0x67d   : > { %v6004_v43 = vpop.permute.xlu1 %6003 }
 0x67e   : > { %v6487_v22 = vsel %vm2195_vm6, %v6455_v2, %v6004_v43 }
 0x67f   : > { %v6006_v14 = vpop.permute.xlu0 %6005 }
 0x680   : > { %v6488_v28 = vsel %vm2195_vm6, %v6456_v33, %v6006_v14 }
 0x681   : > { %v5752_v56 = vpop.permute.xlu1 %5751 }
 0x682   : > { %v6393_v46 = vsel %vm2096_vm3, %v6361_v25, %v5752_v56 }
 0x683   : > { %v5754_v37 = vpop.permute.xlu0 %5753  ;;  %v6425_v27 = vsel %vm2129_vm4, %v6393_v46, %v13630_v26 }
 0x684   : > { %v6394_v57 = vsel %vm2096_vm3, %v6362_v42, %v5754_v37 }
 0x685   : > { %v6132_v13 = vpop.permute.xlu1 %6131  ;;  %v6426_v48 = vsel %vm2129_vm4, %v6394_v57, %v13633_v63 }
 0x686   : > { %v8030_v38 = vpop.f32.mrb[74].mxu0  ;;  %v6519_v53 = vsel %vm2228_vm7, %v6487_v22, %v6132_v13 }
 0x687   : > { %v6796_v60 = vadd.f32 %v8030_v38, %v12566_v6  ;;  %v6790_v19 = vpop.f32.mrb[75].mxu0  ;;  %v6260_v17 = vpop.permute.xlu0 %6259 }
 0x688   : > { %v6791_v10 = vadd.f32 %v12566_v6, %v6790_v19  ;;  %v6551_v1 = vsel %vm2261_vm8, %v6519_v53, %v6260_v17 }
 0x689   : > { %v6134_v34 = vpop.permute.xlu1 %6133  ;;  %v6902_v50 = vmax.f32 %v6796_v60, 0.0  ;;  %8052 = vmatprep.mubr.msk.f32.mxu0 %vm2304_vm9, %v6551_v1 }
 0x68a   : > { %v6901_v12 = vmax.f32 %v6791_v10, 0.0  ;;  %v6520_v44 = vsel %vm2228_vm7, %v6488_v28, %v6134_v34 }
 0x68b   : > { %v6262_v54 = vpop.permute.xlu0 %6261 }
 0x68c   : > { %8078 = vmatprep.mubr.msk.f32.mxu1 %vm2063_vm2, %v6901_v12  ;;  %v6552_v35 = vsel %vm2261_vm8, %v6520_v44, %v6262_v54 }
 0x68d   : > { %v5880_v29 = vpop.permute.xlu1 %5879  ;;  %8079 = vmatmul.mubr.msk.f32.gmra.mrb[12].mxu1 %vm2063_vm2, %v6902_v50  ;;  %8053 = vmatmul.mubr.msk.f32.gmra.mrb[90].mxu0 %vm2304_vm9, %v6552_v35 }
 0x68e   : > { %v6457_v41 = vsel %vm2162_vm5, %v6425_v27, %v5880_v29 }
 0x68f   : > { %v6008_v20 = vpop.permute.xlu0 %6007 }
 0x690   : > { %v6489_v24 = vsel %vm2195_vm6, %v6457_v41, %v6008_v20 }
 0x691   : > { %v5882_v45 = vpop.permute.xlu1 %5881 }
 0x692   : > { %v6458_v62 = vsel %vm2162_vm5, %v6426_v48, %v5882_v45 }
 0x693   : > { %v6136_v40 = vpop.permute.xlu0 %6135 }
 0x694   : > { %v6521_v31 = vsel %vm2228_vm7, %v6489_v24, %v6136_v40 }
 0x695   : > { %v6010_v15 = vpop.permute.xlu1 %6009 }
 0x696   : > { %v6490_v4 = vsel %vm2195_vm6, %v6458_v62, %v6010_v15 }
 0x697   : > { %v6264_v9 = vpop.permute.xlu0 %6263 }
 0x698   : > { %v6553_v51 = vsel %vm2261_vm8, %v6521_v31, %v6264_v9 }
 0x699   : > { %v6138_v52 = vpop.permute.xlu1 %6137  ;;  %8055 = vmatprep.mubr.msk.f32.mxu0 %vm2304_vm9, %v6553_v51 }
 0x69a   : > { %v6522_v55 = vsel %vm2228_vm7, %v6490_v4, %v6138_v52 }
 0x69d   : > { %v6266_v18 = vpop.permute.xlu1 %6265 }
 0x69e   : > { %v6554_v63 = vsel %vm2261_vm8, %v6522_v55, %v6266_v18 }
 0x69f   : > { %8056 = vmatmul.mubr.msk.f32.gmra.mrb[92].mxu0 %vm2304_vm9, %v6554_v63 }
 0x6a2   : > { %v8033_v26 = vpop.f32.mrb[76].mxu0 }
 0x6a3   : > { %v6806_v49 = vadd.f32 %v8033_v26, %v12566_v6  ;;  %v6800_v47 = vpop.f32.mrb[77].mxu0 }
 0x6a4   : > { %v6801_v43 = vadd.f32 %v12566_v6, %v6800_v47 }
 0x6a5   : > { %v6904_v56 = vmax.f32 %v6806_v49, 0.0 }
 0x6a6   : > { %v6903_v8 = vmax.f32 %v6801_v43, 0.0 }
 0x6a8   : > { %8081 = vmatprep.mubr.msk.f32.mxu1 %vm2063_vm2, %v6903_v8 }
 0x6a9   : > { %8082 = vmatmul.mubr.msk.f32.gmra.mrb[14].mxu1 %vm2063_vm2, %v6904_v56 }
 0x6b8   : > { %v8062_v11 = vpop.f32.mrb[0].mxu1 }
 0x6b9   : > { %v8138_v13 = vadd.f32 %v8062_v11, %v12865_v21  ;;  %v7084_v30 = vpop.f32.mrb[1].mxu1 }
 0x6ba   : > { %v8139_v14 = vadd.f32 %v12865_v21, %v7084_v30 }
 0x6bb   : > { %7276 = vst.msk [vmem:[%s12872_s13 + $0x8] sm:$0xff] %vm2063_vm2, %v8138_v13 }
 0x6bc   : > { %7275 = vst.msk [vmem:[%s12872_s13] sm:$0xff] %vm2063_vm2, %v8139_v14 }
 0x6be   : > { %v8036_v38 = vpop.f32.mrb[78].mxu0 }
 0x6bf   : > { %v6816_v59 = vadd.f32 %v8036_v38, %v12566_v6  ;;  %v6810_v36 = vpop.f32.mrb[79].mxu0 }
 0x6c0   : > { %v6811_v60 = vadd.f32 %v12566_v6, %v6810_v36 }
 0x6c1   : > { %v6906_v16 = vmax.f32 %v6816_v59, 0.0 }
 0x6c2   : > { %v6905_v19 = vmax.f32 %v6811_v60, 0.0 }
 0x6c4   : > { %8084 = vmatprep.mubr.msk.f32.mxu1 %vm2063_vm2, %v6905_v19 }
 0x6c5   : > { %8085 = vmatmul.mubr.msk.f32.gmra.mrb[16].mxu1 %vm2063_vm2, %v6906_v16 }
 0x6d4   : > { %v8065_v10 = vpop.f32.mrb[2].mxu1 }
 0x6d5   : > { %v8140_v34 = vadd.f32 %v8065_v10, %v12865_v21  ;;  %v7094_v3 = vpop.f32.mrb[3].mxu1 }
 0x6d6   : > { %v8141_v12 = vadd.f32 %v12865_v21, %v7094_v3 }
 0x6d7   : > { %7278 = vst.msk [vmem:[%s12872_s13 + $0x18] sm:$0xff] %vm2063_vm2, %v8140_v34 }
 0x6d8   : > { %7277 = vst.msk [vmem:[%s12872_s13 + $0x10] sm:$0xff] %vm2063_vm2, %v8141_v12 }
 0x6da   : > { %v8039_v37 = vpop.f32.mrb[80].mxu0 }
 0x6db   : > { %v6826_v58 = vadd.f32 %v8039_v37, %v12566_v6  ;;  %v6820_v7 = vpop.f32.mrb[81].mxu0 }
 0x6dc   : > { %v6821_v50 = vadd.f32 %v12566_v6, %v6820_v7 }
 0x6dd   : > { %v6908_v2 = vmax.f32 %v6826_v58, 0.0 }
 0x6de   : > { %v6907_v5 = vmax.f32 %v6821_v50, 0.0 }
 0x6e0   : > { %8087 = vmatprep.mubr.msk.f32.mxu1 %vm2063_vm2, %v6907_v5 }
 0x6e1   : > { %8088 = vmatmul.mubr.msk.f32.gmra.mrb[18].mxu1 %vm2063_vm2, %v6908_v2 }
 0x6f0   : > { %v8068_v22 = vpop.f32.mrb[4].mxu1 }
 0x6f1   : > { %v8142_v29 = vadd.f32 %v8068_v22, %v12865_v21  ;;  %v7104_v53 = vpop.f32.mrb[5].mxu1 }
 0x6f2   : > { %v8143_v17 = vadd.f32 %v12865_v21, %v7104_v53 }
 0x6f3   : > { %7280 = vst.msk [vmem:[%s12872_s13 + $0x28] sm:$0xff] %vm2063_vm2, %v8142_v29 }
 0x6f4   : > { %7279 = vst.msk [vmem:[%s12872_s13 + $0x20] sm:$0xff] %vm2063_vm2, %v8143_v17 }
 0x6f6   : > { %v8042_v0 = vpop.f32.mrb[82].mxu0 }
 0x6f7   : > { %v6836_v1 = vadd.f32 %v8042_v0, %v12566_v6  ;;  %v6830_v33 = vpop.f32.mrb[83].mxu0 }
 0x6f8   : > { %v6831_v28 = vadd.f32 %v12566_v6, %v6830_v33 }
 0x6f9   : > { %v6910_v61 = vmax.f32 %v6836_v1, 0.0 }
 0x6fa   : > { %v6909_v45 = vmax.f32 %v6831_v28, 0.0 }
 0x6fc   : > { %8090 = vmatprep.mubr.msk.f32.mxu1 %vm2063_vm2, %v6909_v45 }
 0x6fd   : > { %8091 = vmatmul.mubr.msk.f32.gmra.mrb[20].mxu1 %vm2063_vm2, %v6910_v61 }
 0x70c   : > { %v8071_v44 = vpop.f32.mrb[6].mxu1 }
 0x70d   : > { %v8144_v54 = vadd.f32 %v8071_v44, %v12865_v21  ;;  %v7114_v23 = vpop.f32.mrb[7].mxu1 }
 0x70e   : > { %v8145_v35 = vadd.f32 %v12865_v21, %v7114_v23 }
 0x70f   : > { %7282 = vst.msk [vmem:[%s12872_s13 + $0x38] sm:$0xff] %vm2063_vm2, %v8144_v54 }
 0x710   : > { %7281 = vst.msk [vmem:[%s12872_s13 + $0x30] sm:$0xff] %vm2063_vm2, %v8145_v35 }
 0x712   : > { %v8045_v39 = vpop.f32.mrb[84].mxu0 }
 0x713   : > { %v6846_v15 = vadd.f32 %v8045_v39, %v12566_v6  ;;  %v6840_v32 = vpop.f32.mrb[85].mxu0 }
 0x714   : > { %v6841_v42 = vadd.f32 %v12566_v6, %v6840_v32 }
 0x715   : > { %v6912_v25 = vmax.f32 %v6846_v15, 0.0 }
 0x716   : > { %v6911_v20 = vmax.f32 %v6841_v42, 0.0 }
 0x718   : > { %8093 = vmatprep.mubr.msk.f32.mxu1 %vm2063_vm2, %v6911_v20 }
 0x719   : > { %8094 = vmatmul.mubr.msk.f32.gmra.mrb[22].mxu1 %vm2063_vm2, %v6912_v25 }
 0x728   : > { %v8074_v57 = vpop.f32.mrb[8].mxu1 }
 0x729   : > { %v8146_v46 = vadd.f32 %v8074_v57, %v12865_v21  ;;  %v7124_v52 = vpop.f32.mrb[9].mxu1 }
 0x72a   : > { %v8147_v48 = vadd.f32 %v12865_v21, %v7124_v52 }
 0x72b   : > { %7284 = vst.msk [vmem:[%s12872_s13 + $0x48] sm:$0xff] %vm2063_vm2, %v8146_v46 }
 0x72c   : > { %7283 = vst.msk [vmem:[%s12872_s13 + $0x40] sm:$0xff] %vm2063_vm2, %v8147_v48 }
 0x72e   : > { %v8048_v40 = vpop.f32.mrb[86].mxu0 }
 0x72f   : > { %v6856_v27 = vadd.f32 %v8048_v40, %v12566_v6  ;;  %v6850_v62 = vpop.f32.mrb[87].mxu0 }
 0x730   : > { %v6851_v41 = vadd.f32 %v12566_v6, %v6850_v62 }
 0x731   : > { %v6914_v24 = vmax.f32 %v6856_v27, 0.0 }
 0x732   : > { %v6913_v4 = vmax.f32 %v6851_v41, 0.0 }
 0x734   : > { %8096 = vmatprep.mubr.msk.f32.mxu1 %vm2063_vm2, %v6913_v4 }
 0x735   : > { %8097 = vmatmul.mubr.msk.f32.gmra.mrb[24].mxu1 %vm2063_vm2, %v6914_v24 }
 0x744   : > { %v8077_v55 = vpop.f32.mrb[10].mxu1 }
 0x745   : > { %v8148_v18 = vadd.f32 %v8077_v55, %v12865_v21  ;;  %v7134_v31 = vpop.f32.mrb[11].mxu1 }
 0x746   : > { %v8149_v63 = vadd.f32 %v12865_v21, %v7134_v31 }
 0x747   : > { %7286 = vst.msk [vmem:[%s12872_s13 + $0x58] sm:$0xff] %vm2063_vm2, %v8148_v18 }
 0x748   : > { %7285 = vst.msk [vmem:[%s12872_s13 + $0x50] sm:$0xff] %vm2063_vm2, %v8149_v63 }
 0x74a   : > { %v8051_v9 = vpop.f32.mrb[88].mxu0 }
 0x74b   : > { %v6866_v51 = vadd.f32 %v8051_v9, %v12566_v6  ;;  %v6860_v26 = vpop.f32.mrb[89].mxu0 }
 0x74c   : > { %v6861_v49 = vadd.f32 %v12566_v6, %v6860_v26 }
 0x74d   : > { %v6916_v43 = vmax.f32 %v6866_v51, 0.0 }
 0x74e   : > { %v6915_v47 = vmax.f32 %v6861_v49, 0.0 }
 0x750   : > { %8099 = vmatprep.mubr.msk.f32.mxu1 %vm2063_vm2, %v6915_v47 }
 0x751   : > { %8100 = vmatmul.mubr.msk.f32.gmra.mrb[26].mxu1 %vm2063_vm2, %v6916_v43 }
 0x760   : > { %v8080_v8 = vpop.f32.mrb[12].mxu1  ;;  %v8054_v30 = vpop.f32.mrb[90].mxu0 }
 0x761   : > { %v8150_v56 = vadd.f32 %v8080_v8, %v12865_v21  ;;  %v7144_v11 = vpop.f32.mrb[13].mxu1  ;;  %v6876_v14 = vadd.f32 %v8054_v30, %v12566_v6  ;;  %v6870_v38 = vpop.f32.mrb[91].mxu0 }
 0x762   : > { %v8151_v13 = vadd.f32 %v12865_v21, %v7144_v11  ;;  %v6871_v59 = vadd.f32 %v12566_v6, %v6870_v38 }
 0x763   : > { %7288 = vst.msk [vmem:[%s12872_s13 + $0x68] sm:$0xff] %vm2063_vm2, %v8150_v56  ;;  %v6918_v60 = vmax.f32 %v6876_v14, 0.0 }
 0x764   : > { %7287 = vst.msk [vmem:[%s12872_s13 + $0x60] sm:$0xff] %vm2063_vm2, %v8151_v13  ;;  %v6917_v36 = vmax.f32 %v6871_v59, 0.0 }
 0x766   : > { %8102 = vmatprep.mubr.msk.f32.mxu1 %vm2063_vm2, %v6917_v36 }
 0x767   : > { %8103 = vmatmul.mubr.msk.f32.gmra.mrb[28].mxu1 %vm2063_vm2, %v6918_v60 }
 0x772   : > { %v8057_v19 = vpop.f32.mrb[92].mxu0 }
 0x773   : > { %v6886_v16 = vadd.f32 %v8057_v19, %v12566_v6  ;;  %v6880_v10 = vpop.f32.mrb[93].mxu0 }
 0x774   : > { %v6881_v34 = vadd.f32 %v12566_v6, %v6880_v10 }
 0x775   : > { %v6920_v12 = vmax.f32 %v6886_v16, 0.0 }
 0x776   : > { %v6919_v3 = vmax.f32 %v6881_v34, 0.0 }
 0x778   : > { %8105 = vmatprep.mubr.msk.f32.mxu1 %vm2063_vm2, %v6919_v3 }
 0x779   : > { %8106 = vmatmul.mubr.msk.f32.gmra.mrb[30].mxu1 %vm2063_vm2, %v6920_v12 }
 0x77c   : > { %v8083_v37 = vpop.f32.mrb[14].mxu1 }
 0x77d   : > { %v8152_v58 = vadd.f32 %v8083_v37, %v12865_v21  ;;  %v7154_v7 = vpop.f32.mrb[15].mxu1 }
 0x77e   : > { %v8153_v50 = vadd.f32 %v12865_v21, %v7154_v7 }
 0x77f   : > { %7290 = vst.msk [vmem:[%s12872_s13 + $0x78] sm:$0xff] %vm2063_vm2, %v8152_v58 }
 0x780   : > { %7289 = vst.msk [vmem:[%s12872_s13 + $0x70] sm:$0xff] %vm2063_vm2, %v8153_v50 }
 0x798   : > { %v8086_v6 = vpop.f32.mrb[16].mxu1 }
 0x799   : > { %v8154_v5 = vadd.f32 %v8086_v6, %v12865_v21  ;;  %v7164_v2 = vpop.f32.mrb[17].mxu1 }
 0x79a   : > { %v8155_v22 = vadd.f32 %v12865_v21, %v7164_v2 }
 0x79b   : > { %7292 = vst.msk [vmem:[%s12872_s13 + $0x88] sm:$0xff] %vm2063_vm2, %v8154_v5 }
 0x79c   : > { %7291 = vst.msk [vmem:[%s12872_s13 + $0x80] sm:$0xff] %vm2063_vm2, %v8155_v22 }
 0x7b4   : > { %v8089_v29 = vpop.f32.mrb[18].mxu1 }
 0x7b5   : > { %v8156_v53 = vadd.f32 %v8089_v29, %v12865_v21  ;;  %v7174_v17 = vpop.f32.mrb[19].mxu1 }
 0x7b6   : > { %v8157_v0 = vadd.f32 %v12865_v21, %v7174_v17 }
 0x7b7   : > { %7294 = vst.msk [vmem:[%s12872_s13 + $0x98] sm:$0xff] %vm2063_vm2, %v8156_v53 }
 0x7b8   : > { %7293 = vst.msk [vmem:[%s12872_s13 + $0x90] sm:$0xff] %vm2063_vm2, %v8157_v0 }
 0x7d0   : > { %v8092_v1 = vpop.f32.mrb[20].mxu1 }
 0x7d1   : > { %v8158_v33 = vadd.f32 %v8092_v1, %v12865_v21  ;;  %v7184_v28 = vpop.f32.mrb[21].mxu1 }
 0x7d2   : > { %v8159_v45 = vadd.f32 %v12865_v21, %v7184_v28 }
 0x7d3   : > { %7296 = vst.msk [vmem:[%s12872_s13 + $0xa8] sm:$0xff] %vm2063_vm2, %v8158_v33 }
 0x7d4   : > { %7295 = vst.msk [vmem:[%s12872_s13 + $0xa0] sm:$0xff] %vm2063_vm2, %v8159_v45 }
 0x7ec   : > { %v8095_v61 = vpop.f32.mrb[22].mxu1 }
 0x7ed   : > { %v8160_v44 = vadd.f32 %v8095_v61, %v12865_v21  ;;  %v7194_v54 = vpop.f32.mrb[23].mxu1 }
 0x7ee   : > { %v8161_v23 = vadd.f32 %v12865_v21, %v7194_v54 }
 0x7ef   : > { %7298 = vst.msk [vmem:[%s12872_s13 + $0xb8] sm:$0xff] %vm2063_vm2, %v8160_v44 }
 0x7f0   : > { %7297 = vst.msk [vmem:[%s12872_s13 + $0xb0] sm:$0xff] %vm2063_vm2, %v8161_v23 }
 0x808   : > { %v8098_v35 = vpop.f32.mrb[24].mxu1 }
 0x809   : > { %v8162_v39 = vadd.f32 %v8098_v35, %v12865_v21  ;;  %v7204_v15 = vpop.f32.mrb[25].mxu1 }
 0x80a   : > { %v8163_v32 = vadd.f32 %v12865_v21, %v7204_v15 }
 0x80b   : > { %7300 = vst.msk [vmem:[%s12872_s13 + $0xc8] sm:$0xff] %vm2063_vm2, %v8162_v39 }
 0x80c   : > { %7299 = vst.msk [vmem:[%s12872_s13 + $0xc0] sm:$0xff] %vm2063_vm2, %v8163_v32 }
 0x824   : > { %v8101_v42 = vpop.f32.mrb[26].mxu1 }
 0x825   : > { %v8164_v20 = vadd.f32 %v8101_v42, %v12865_v21  ;;  %v7214_v25 = vpop.f32.mrb[27].mxu1 }
 0x826   : > { %v8165_v57 = vadd.f32 %v12865_v21, %v7214_v25 }
 0x827   : > { %7302 = vst.msk [vmem:[%s12872_s13 + $0xd8] sm:$0xff] %vm2063_vm2, %v8164_v20 }
 0x828   : > { %7301 = vst.msk [vmem:[%s12872_s13 + $0xd0] sm:$0xff] %vm2063_vm2, %v8165_v57 }
 0x83a   : > { %v8104_v46 = vpop.f32.mrb[28].mxu1 }
 0x83b   : > { %v8166_v52 = vadd.f32 %v8104_v46, %v12865_v21  ;;  %v7224_v48 = vpop.f32.mrb[29].mxu1 }
 0x83c   : > { %v8167_v40 = vadd.f32 %v12865_v21, %v7224_v48 }
 0x83d   : > { %7304 = vst.msk [vmem:[%s12872_s13 + $0xe8] sm:$0xff] %vm2063_vm2, %v8166_v52 }
 0x83e   : > { %7303 = vst.msk [vmem:[%s12872_s13 + $0xe0] sm:$0xff] %vm2063_vm2, %v8167_v40 }
 0x84c   : > { %v8107_v27 = vpop.f32.mrb[30].mxu1 }
 0x84d   : > { %v8168_v62 = vadd.f32 %v8107_v27, %v12865_v21  ;;  %v7234_v41 = vpop.f32.mrb[31].mxu1 }
 0x84e   : > { %v8169_v4 = vadd.f32 %v12865_v21, %v7234_v41 }
 0x84f   : > { %7306 = vst.msk [vmem:[%s12872_s13 + $0xf8] sm:$0xff] %vm2063_vm2, %v8168_v62 }
 0x850   : > { %7305 = vst.msk [vmem:[%s12872_s13 + $0xf0] sm:$0xff] %vm2063_vm2, %v8169_v4 }
 0x851 PF: > { %s17_s24 = sadd.s32 1, %s8289_s24  }
 0x852   : > { %p14_p4 = scmp.ge.s32.totalorder %s17_s24, 4  }
 0x854   :  { %16 = sbr.rel (!%p14_p4) target bundleno = 1 (0x1), region = 84 }

</bundles_post_ra>
